<compile_context>
chip_gen: v5e
topology: v5e:2x2
jax: 0.10.0
libtpu: 0.0.40
codegen_flags: <defaults>
</compile_context>

<pallas_src>
import functools

import jax
import jax.numpy as jnp
from jax import lax
from jax.experimental import pallas as pl
from jax.experimental.pallas import tpu as pltpu


BN_EPS = 1e-5
LEAKY_SLOPE = 0.2
VMEM_LIMIT = 32 * 1024 * 1024   # explicit scoped-VMEM budget, ok on v5e/v6e/v7x


# ----------------------------------------------------------------------------
# Fused epilogue math (runs on the f32 accumulator inside the kernels)
# ----------------------------------------------------------------------------
def _leaky(y):
    return jnp.where(y > 0, y, LEAKY_SLOPE * y)


def _bn_leaky(y):
    """BatchNorm2d (training-mode batch stats, gamma=1, beta=0, biased var,
    eps=1e-5 -- PyTorch defaults for a fresh module) + LeakyReLU(0.2).

    Requires the full batch*spatial extent resident on axis 0 (tm == M).
    One-pass stats: a single sum and a single sum-of-squares XLU sweep.
    """
    inv_m = 1.0 / y.shape[0]
    s1 = jnp.sum(y, axis=0, keepdims=True)
    s2 = jnp.sum(y * y, axis=0, keepdims=True)
    mean = s1 * inv_m
    var = s2 * inv_m - mean * mean
    yn = (y - mean) * lax.rsqrt(var + BN_EPS)
    return _leaky(yn)


# ----------------------------------------------------------------------------
# Pallas kernels
# ----------------------------------------------------------------------------
def _conv1_kernel(a_ref, b_ref, o_ref):
    """Layer 1: single-K-step GEMM + LeakyReLU.  No accumulator scratch:
    dot -> epilogue -> store."""
    y = jnp.dot(a_ref[...], b_ref[...], preferred_element_type=jnp.float32)
    o_ref[...] = _leaky(y).astype(o_ref.dtype)


def _tap_conv_kernel(*refs, n_ksteps, fuse_head, batch):
    """Implicit-GEMM conv over a group of (kh,kw) taps with fused epilogue.

    refs layout:
      fuse_head=False: (taps, w_taps, out, [acc])
      fuse_head=True : (taps, w_taps, w4, partial_out, [acc])

    taps   : (G, M, Cin)  bf16   -- G taps of the current K step
    w_taps : (G, Cin, tn) bf16
    w4     : (Ho*Wo, tn)  bf16   -- only when the final 8x8 conv is fused
    Epilogue = BatchNorm (batch stats) + LeakyReLU, plus (fuse_head) the
    per-image reduction against w4 producing a partial logit per channel tile.
    """
    nin = 3 if fuse_head else 2
    a_ref, b_ref = refs[0], refs[1]
    w4_ref = refs[2] if fuse_head else None
    out_ref = refs[nin]
    acc_ref = refs[nin + 1] if n_ksteps > 1 else None

    g_taps = a_ref.shape[0]
    partial = jnp.dot(a_ref[0], b_ref[0], preferred_element_type=jnp.float32)
    for g in range(1, g_taps):                      # static unroll over taps
        partial = partial + jnp.dot(a_ref[g], b_ref[g],
                                    preferred_element_type=jnp.float32)

    def epilogue(y):
        y = _bn_leaky(y)                            # (M, tn) f32
        if fuse_head:
            # Fused layer 4: out[b] += sum_{hw,c in tile} y[b,hw,c]*w4[hw,c].
            tn = y.shape[-1]
            hw = y.shape[0] // batch
            yb = y.reshape(batch, hw, tn)
            w4 = w4_ref[...].astype(jnp.float32)    # (hw, tn)
            p = jnp.sum(yb * w4[None, :, :], axis=2, keepdims=True)  # (B,hw,1)
            p = jnp.sum(p, axis=1)                                   # (B,1)
            out_ref[...] = p.reshape(1, batch, 1)
        else:
            out_ref[...] = y.astype(out_ref.dtype)

    if n_ksteps == 1:
        epilogue(partial)
    else:
        t = pl.program_id(1)

        @pl.when(t == 0)
        def _():
            acc_ref[...] = partial                   # init (no zero+RMW)

        @pl.when(jnp.logical_and(t > 0, t < n_ksteps - 1))
        def _():
            acc_ref[...] += partial

        @pl.when(t == n_ksteps - 1)
        def _():
            epilogue(acc_ref[...] + partial)         # no final acc store/reload


# ----------------------------------------------------------------------------
# Pallas wrappers
# ----------------------------------------------------------------------------
def conv1_leaky(patches, w_mat, *, num_m_tiles=2):
    """patches: (M, 16) bf16, w_mat: (16, 128) bf16 -> (M, 128) bf16."""
    M, K = patches.shape
    _, N = w_mat.shape
    if M % num_m_tiles or (M // num_m_tiles) % 8:
        num_m_tiles = 1
    tm = M // num_m_tiles
    return pl.pallas_call(
        _conv1_kernel,
        out_shape=jax.ShapeDtypeStruct((M, N), jnp.bfloat16),
        grid_spec=pltpu.PrefetchScalarGridSpec(
            num_scalar_prefetch=0,
            grid=(num_m_tiles,),
            in_specs=[pl.BlockSpec((tm, K), lambda i: (i, 0)),
                      pl.BlockSpec((K, N), lambda i: (0, 0))],
            out_specs=pl.BlockSpec((tm, N), lambda i: (i, 0)),
        ),
        compiler_params=pltpu.CompilerParams(
            dimension_semantics=("parallel",),
            vmem_limit_bytes=VMEM_LIMIT),
    )(patches, w_mat)


def conv_bn_leaky(taps, w_taps, *, tap_group=4, num_n_tiles=2,
                  w4=None, batch=None, out_dtype=jnp.bfloat16):
    """Implicit-GEMM conv + BatchNorm + LeakyReLU (+ optional fused head).

    taps   : (T, M, Cin)  bf16 tap slabs (T = kh*kw), M = B*Ho*Wo
    w_taps : (T, Cin, Cout) bf16
    w4     : optional (Ho*Wo, Cout) bf16 -- fuse the final 8x8 conv; then the
             result is (num_n_tiles, batch, 1) f32 partial logits.
    Grid = (N tiles ["parallel" -> megacore], T//tap_group K steps ["arbitrary"]).
    BN batch stats need the full M extent resident (tm == M).
    """
    T, M, Cin = taps.shape
    _, _, Cout = w_taps.shape
    assert T % tap_group == 0 and Cout % num_n_tiles == 0 and M % 8 == 0
    n_ksteps = T // tap_group
    tn = Cout // num_n_tiles
    fuse_head = w4 is not None
    grid = (num_n_tiles, n_ksteps)

    in_specs = [
        pl.BlockSpec((tap_group, M, Cin), lambda j, t: (t, 0, 0)),
        pl.BlockSpec((tap_group, Cin, tn), lambda j, t: (t, 0, j)),
    ]
    inputs = [taps, w_taps]
    if fuse_head:
        in_specs.append(pl.BlockSpec((w4.shape[0], tn), lambda j, t: (0, j)))
        inputs.append(w4)
        out_shape = jax.ShapeDtypeStruct((num_n_tiles, batch, 1), jnp.float32)
        out_spec = pl.BlockSpec((1, batch, 1), lambda j, t: (j, 0, 0))
    else:
        out_shape = jax.ShapeDtypeStruct((M, Cout), out_dtype)
        out_spec = pl.BlockSpec((M, tn), lambda j, t: (0, j))

    scratch = [pltpu.VMEM((M, tn), jnp.float32)] if n_ksteps > 1 else []

    return pl.pallas_call(
        functools.partial(_tap_conv_kernel, n_ksteps=n_ksteps,
                          fuse_head=fuse_head, batch=batch),
        out_shape=out_shape,
        grid_spec=pltpu.PrefetchScalarGridSpec(
            num_scalar_prefetch=0,
            grid=grid,
            in_specs=in_specs,
            out_specs=out_spec,
            scratch_shapes=scratch),
        compiler_params=pltpu.CompilerParams(
            dimension_semantics=("parallel", "arbitrary"),
            vmem_limit_bytes=VMEM_LIMIT),
    )(*inputs)


# ----------------------------------------------------------------------------
# Glue: tap-slab / im2col builders + weight packing (cheap XLA layout work)
# ----------------------------------------------------------------------------
def tap_slabs_nhwc(x, kh, kw, stride, pad):
    """x: (N,H,W,C) -> (kh*kw, N*Ho*Wo, C).  Channels stay lane-dense; the tap
    axis becomes the implicit-GEMM K grid axis.  Only strided slices + stack,
    no (n,h,w)<->(kh,kw) transpose."""
    n, h, w, c = x.shape
    xp = jnp.pad(x, ((0, 0), (pad, pad), (pad, pad), (0, 0)))
    ho = (h + 2 * pad - kh) // stride + 1
    wo = (w + 2 * pad - kw) // stride + 1
    slabs = []
    for i in range(kh):
        for j in range(kw):
            s = xp[:, i:i + stride * ho:stride, j:j + stride * wo:stride, :]
            slabs.append(s.reshape(n * ho * wo, c))
    return jnp.stack(slabs, axis=0), ho, wo


def im2col_small(x, kh, kw, stride, pad):
    """Tiny-C im2col for layer 1: (N,H,W,C) -> (N*Ho*Wo, kh*kw*C)."""
    n, h, w, c = x.shape
    xp = jnp.pad(x, ((0, 0), (pad, pad), (pad, pad), (0, 0)))
    ho = (h + 2 * pad - kh) // stride + 1
    wo = (w + 2 * pad - kw) // stride + 1
    cols = [xp[:, i:i + stride * ho:stride, j:j + stride * wo:stride, :]
            .reshape(n * ho * wo, c)
            for i in range(kh) for j in range(kw)]
    return jnp.concatenate(cols, axis=1), ho, wo


def conv_w_mat(w):
    """(Cout, Cin, kh, kw) -> (kh*kw*Cin, Cout) bf16, tap-major K order."""
    co, ci, kh, kw = w.shape
    return w.transpose(2, 3, 1, 0).reshape(kh * kw * ci, co).astype(jnp.bfloat16)


def conv_w_taps(w):
    """(Cout, Cin, kh, kw) -> (kh*kw, Cin, Cout) bf16, tap-major."""
    co, ci, kh, kw = w.shape
    return w.transpose(2, 3, 1, 0).reshape(kh * kw, ci, co).astype(jnp.bfloat16)


def init_params(key):
    keys = jax.random.split(key, 4)
    std = 0.02  # DCGAN-style deterministic init
    w1 = std * jax.random.normal(keys[0], (128, 1, 4, 4), jnp.float32)
    w2 = std * jax.random.normal(keys[1], (256, 128, 4, 4), jnp.float32)
    w3 = std * jax.random.normal(keys[2], (512, 256, 4, 4), jnp.float32)
    w4 = std * jax.random.normal(keys[3], (1, 512, 8, 8), jnp.float32)
    return dict(w1=w1, w2=w2, w3=w3, w4=w4)


def discriminator_forward(x, params):
    b = x.shape[0]
    # NCHW -> NHWC once; cast to bf16 *before* padding / slicing so the
    # layer-1 patch traffic (and everything downstream) is already half-width.
    x = x.transpose(0, 2, 3, 1).astype(jnp.bfloat16)

    # Layer 1: Conv(1->128, 4, s2, p1) + LeakyReLU.  K = 16 (single K step, no
    # scratch); M split in two so both v7x TensorCores always get work.
    p1, ho, wo = im2col_small(x, 4, 4, 2, 1)                 # (B*1024, 16)
    y1 = conv1_leaky(p1, conv_w_mat(params["w1"]))           # (B*1024, 128)
    x1 = y1.reshape(b, ho, wo, 128)

    # Layer 2: Conv(128->256) + BatchNorm + LeakyReLU.  Implicit GEMM over 16
    # taps (4 K steps of 4 taps, tk = 512), 2 "parallel" channel tiles.
    # BN needs the full B*Ho*Wo extent resident -> holds for B up to ~40 under
    # the 32 MiB VMEM limit.
    # TODO(synk): cross-grid-step BN (sum/sumsq scratch + second pass) to lift
    # the full-M-resident restriction for large batches.
    t2, ho, wo = tap_slabs_nhwc(x1, 4, 4, 2, 1)              # (16, B*256, 128)
    y2 = conv_bn_leaky(t2, conv_w_taps(params["w2"]))        # (B*256, 256)
    x2 = y2.reshape(b, ho, wo, 256)

    # Layer 3 + Layer 4 fused: Conv(256->512)+BN+LeakyReLU, then the 8x8 valid
    # Conv(512->1) is a per-image reduce against w4 inside the same epilogue.
    # Layer-3 activations never touch HBM; each channel tile emits a partial
    # logit and one trivial XLA op finishes sum + sigmoid.
    t3, ho, wo = tap_slabs_nhwc(x2, 4, 4, 2, 1)              # (16, B*64, 256)
    w4 = (params["w4"].transpose(0, 2, 3, 1)                 # (1, 8, 8, 512)
          .reshape(ho * wo, 512).astype(jnp.bfloat16))       # (64, 512)
    partial = conv_bn_leaky(t3, conv_w_taps(params["w3"]),
                            w4=w4, batch=b)                  # (2, B, 1) f32
    logits = jnp.sum(partial[:, :, 0], axis=0)               # (B,)
    return jax.nn.sigmoid(logits)                            # == .view(-1)


if __name__ == "__main__":
    key = jax.random.PRNGKey(0)
    pkey, xkey = jax.random.split(key)
    params = init_params(pkey)
    # Input implied by the architecture: 1-channel 64x64 images, batch 2.
    x = jax.random.normal(xkey, (2, 1, 64, 64), jnp.float32)

    out = jax.jit(discriminator_forward)(x, params)
    out = jax.block_until_ready(out)

    assert out.shape == (2,), out.shape
    assert bool(jnp.all(jnp.isfinite(out)))
    assert bool(jnp.all((out >= 0.0) & (out <= 1.0)))
    print("KERNEL_OK")
</pallas_src>

<mosaic_0001>
module attributes {stable_mosaic.version = 11 : i64} {
  func.func @_conv1_kernel(%arg0: i32, %arg1: memref<1024x16xbf16, #tpu.memory_space<vmem>>, %arg2: memref<16x128xbf16, #tpu.memory_space<vmem>>, %arg3: memref<1024x128xbf16, #tpu.memory_space<vmem>>) attributes {dimension_semantics = [#tpu.dimension_semantics<parallel>], iteration_bounds = array<i64: 2>, scalar_prefetch = 0 : i64, scratch_operands = 0 : i64, tpu.core_type = #tpu.core_type<tc>, window_params = [{transform_indices = @transform_0, window_bounds = array<i64: 1024, 16>}, {pipeline_mode = #tpu.pipeline_mode<synchronous>, transform_indices = @transform_1, window_bounds = array<i64: 16, 128>}, {transform_indices = @transform_2, window_bounds = array<i64: 1024, 128>}]} {
    %c0 = arith.constant 0 : index
    %c0_0 = arith.constant 0 : index
    %0 = vector.load %arg1[%c0, %c0_0] : memref<1024x16xbf16, #tpu.memory_space<vmem>>, vector<1024x16xbf16>
    %c0_1 = arith.constant 0 : index
    %c0_2 = arith.constant 0 : index
    %1 = vector.load %arg2[%c0_1, %c0_2] : memref<16x128xbf16, #tpu.memory_space<vmem>>, vector<16x128xbf16>
    %cst = arith.constant dense<0.000000e+00> : vector<1024x128xf32>
    %2 = tpu.matmul %0, %1, %cst {dimension_numbers = #tpu.dot_dimension_numbers<[1], [0], [0], [1], [0, 0, 1, 1], [], []>} : vector<1024x16xbf16>, vector<16x128xbf16>, vector<1024x128xf32> -> vector<1024x128xf32>
    %cst_3 = arith.constant 0.000000e+00 : f32
    %3 = vector.broadcast %cst_3 : f32 to vector<1024x128xf32>
    %4 = arith.cmpf ogt, %2, %3 : vector<1024x128xf32>
    %cst_4 = arith.constant 2.000000e-01 : f32
    %5 = vector.broadcast %cst_4 : f32 to vector<1024x128xf32>
    %6 = arith.mulf %5, %2 : vector<1024x128xf32>
    %7 = arith.select %4, %2, %6 : vector<1024x128xi1>, vector<1024x128xf32>
    %8 = arith.truncf %7 : vector<1024x128xf32> to vector<1024x128xbf16>
    %c0_5 = arith.constant 0 : index
    %c0_6 = arith.constant 0 : index
    %9 = vector.load %arg3[%c0_5, %c0_6] : memref<1024x128xbf16, #tpu.memory_space<vmem>>, vector<1024x128xbf16>
    tpu.vector_store %arg3[%c0_5, %c0_6], %8 {strides = array<i32>} : memref<1024x128xbf16, #tpu.memory_space<vmem>>, vector<1024x128xbf16>,
    return
  }
  func.func @transform_0(%arg0: i32) -> (i32, i32) {
    %c0_i32 = arith.constant 0 : i32
    %c0_i32_0 = arith.constant 0 : i32
    return %arg0, %c0_i32 : i32, i32
  }
  func.func @transform_1(%arg0: i32) -> (i32, i32) {
    %c0_i32 = arith.constant 0 : i32
    %c0_i32_0 = arith.constant 0 : i32
    %c0_i32_1 = arith.constant 0 : i32
    return %c0_i32, %c0_i32_0 : i32, i32
  }
  func.func @transform_2(%arg0: i32) -> (i32, i32) {
    %c0_i32 = arith.constant 0 : i32
    %c0_i32_0 = arith.constant 0 : i32
    return %arg0, %c0_i32 : i32, i32
  }
}

module attributes {stable_mosaic.version = 11 : i64} {
  func.func @_tap_conv_kernel(%arg0: i32, %arg1: i32, %arg2: memref<4x512x128xbf16, #tpu.memory_space<vmem>>, %arg3: memref<4x128x128xbf16, #tpu.memory_space<vmem>>, %arg4: memref<512x128xbf16, #tpu.memory_space<vmem>>, %arg5: memref<512x128xf32, #tpu.memory_space<vmem>>) attributes {dimension_semantics = [#tpu.dimension_semantics<parallel>, #tpu.dimension_semantics<arbitrary>], iteration_bounds = array<i64: 2, 4>, scalar_prefetch = 0 : i64, scratch_operands = 1 : i64, tpu.core_type = #tpu.core_type<tc>, window_params = [{transform_indices = @transform_0, window_bounds = array<i64: 4, 512, 128>}, {transform_indices = @transform_1, window_bounds = array<i64: 4, 128, 128>}, {transform_indices = @transform_2, window_bounds = array<i64: 512, 128>}]} {
    %c0 = arith.constant 0 : index
    %c0_0 = arith.constant 0 : index
    %c0_1 = arith.constant 0 : index
    %0 = vector.load %arg2[%c0, %c0_0, %c0_1] : memref<4x512x128xbf16, #tpu.memory_space<vmem>>, vector<1x512x128xbf16>
    %1 = vector.shape_cast %0 : vector<1x512x128xbf16> to vector<512x128xbf16>
    %c0_2 = arith.constant 0 : index
    %c0_3 = arith.constant 0 : index
    %c0_4 = arith.constant 0 : index
    %2 = vector.load %arg3[%c0_2, %c0_3, %c0_4] : memref<4x128x128xbf16, #tpu.memory_space<vmem>>, vector<1x128x128xbf16>
    %3 = vector.shape_cast %2 : vector<1x128x128xbf16> to vector<128x128xbf16>
    %cst = arith.constant dense<0.000000e+00> : vector<512x128xf32>
    %4 = tpu.matmul %1, %3, %cst {dimension_numbers = #tpu.dot_dimension_numbers<[1], [0], [0], [1], [0, 0, 1, 1], [], []>} : vector<512x128xbf16>, vector<128x128xbf16>, vector<512x128xf32> -> vector<512x128xf32>
    %c1 = arith.constant 1 : index
    %c0_5 = arith.constant 0 : index
    %c0_6 = arith.constant 0 : index
    %5 = vector.load %arg2[%c1, %c0_5, %c0_6] : memref<4x512x128xbf16, #tpu.memory_space<vmem>>, vector<1x512x128xbf16>
    %6 = vector.shape_cast %5 : vector<1x512x128xbf16> to vector<512x128xbf16>
    %c1_7 = arith.constant 1 : index
    %c0_8 = arith.constant 0 : index
    %c0_9 = arith.constant 0 : index
    %7 = vector.load %arg3[%c1_7, %c0_8, %c0_9] : memref<4x128x128xbf16, #tpu.memory_space<vmem>>, vector<1x128x128xbf16>
    %8 = vector.shape_cast %7 : vector<1x128x128xbf16> to vector<128x128xbf16>
    %cst_10 = arith.constant dense<0.000000e+00> : vector<512x128xf32>
    %9 = tpu.matmul %6, %8, %cst_10 {dimension_numbers = #tpu.dot_dimension_numbers<[1], [0], [0], [1], [0, 0, 1, 1], [], []>} : vector<512x128xbf16>, vector<128x128xbf16>, vector<512x128xf32> -> vector<512x128xf32>
    %10 = arith.addf %4, %9 : vector<512x128xf32>
    %c2 = arith.constant 2 : index
    %c0_11 = arith.constant 0 : index
    %c0_12 = arith.constant 0 : index
    %11 = vector.load %arg2[%c2, %c0_11, %c0_12] : memref<4x512x128xbf16, #tpu.memory_space<vmem>>, vector<1x512x128xbf16>
    %12 = vector.shape_cast %11 : vector<1x512x128xbf16> to vector<512x128xbf16>
    %c2_13 = arith.constant 2 : index
    %c0_14 = arith.constant 0 : index
    %c0_15 = arith.constant 0 : index
    %13 = vector.load %arg3[%c2_13, %c0_14, %c0_15] : memref<4x128x128xbf16, #tpu.memory_space<vmem>>, vector<1x128x128xbf16>
    %14 = vector.shape_cast %13 : vector<1x128x128xbf16> to vector<128x128xbf16>
    %cst_16 = arith.constant dense<0.000000e+00> : vector<512x128xf32>
    %15 = tpu.matmul %12, %14, %cst_16 {dimension_numbers = #tpu.dot_dimension_numbers<[1], [0], [0], [1], [0, 0, 1, 1], [], []>} : vector<512x128xbf16>, vector<128x128xbf16>, vector<512x128xf32> -> vector<512x128xf32>
    %16 = arith.addf %10, %15 : vector<512x128xf32>
    %c3 = arith.constant 3 : index
    %c0_17 = arith.constant 0 : index
    %c0_18 = arith.constant 0 : index
    %17 = vector.load %arg2[%c3, %c0_17, %c0_18] : memref<4x512x128xbf16, #tpu.memory_space<vmem>>, vector<1x512x128xbf16>
    %18 = vector.shape_cast %17 : vector<1x512x128xbf16> to vector<512x128xbf16>
    %c3_19 = arith.constant 3 : index
    %c0_20 = arith.constant 0 : index
    %c0_21 = arith.constant 0 : index
    %19 = vector.load %arg3[%c3_19, %c0_20, %c0_21] : memref<4x128x128xbf16, #tpu.memory_space<vmem>>, vector<1x128x128xbf16>
    %20 = vector.shape_cast %19 : vector<1x128x128xbf16> to vector<128x128xbf16>
    %cst_22 = arith.constant dense<0.000000e+00> : vector<512x128xf32>
    %21 = tpu.matmul %18, %20, %cst_22 {dimension_numbers = #tpu.dot_dimension_numbers<[1], [0], [0], [1], [0, 0, 1, 1], [], []>} : vector<512x128xbf16>, vector<128x128xbf16>, vector<512x128xf32> -> vector<512x128xf32>
    %22 = arith.addf %16, %21 : vector<512x128xf32>
    %c0_i32 = arith.constant 0 : i32
    %23 = arith.cmpi eq, %arg1, %c0_i32 : i32
    %24 = arith.extui %23 : i1 to i32
    %c0_i32_23 = arith.constant 0 : i32
    %25 = arith.cmpi ne, %24, %c0_i32_23 : i32
    scf.if %25 {
      %c0_28 = arith.constant 0 : index
      %c0_29 = arith.constant 0 : index
      %34 = vector.load %arg5[%c0_28, %c0_29] : memref<512x128xf32, #tpu.memory_space<vmem>>, vector<512x128xf32>
      tpu.vector_store %arg5[%c0_28, %c0_29], %22 {strides = array<i32>} : memref<512x128xf32, #tpu.memory_space<vmem>>, vector<512x128xf32>,
    } else {
    }
    %c0_i32_24 = arith.constant 0 : i32
    %26 = arith.cmpi sgt, %arg1, %c0_i32_24 : i32
    %c3_i32 = arith.constant 3 : i32
    %27 = arith.cmpi slt, %arg1, %c3_i32 : i32
    %28 = arith.andi %26, %27 : i1
    %29 = arith.extui %28 : i1 to i32
    %c0_i32_25 = arith.constant 0 : i32
    %30 = arith.cmpi ne, %29, %c0_i32_25 : i32
    scf.if %30 {
      %c0_28 = arith.constant 0 : index
      %c0_29 = arith.constant 0 : index
      %34 = vector.load %arg5[%c0_28, %c0_29] : memref<512x128xf32, #tpu.memory_space<vmem>>, vector<512x128xf32>
      %35 = arith.addf %34, %22 : vector<512x128xf32>
      %c0_30 = arith.constant 0 : index
      %c0_31 = arith.constant 0 : index
      %36 = vector.load %arg5[%c0_30, %c0_31] : memref<512x128xf32, #tpu.memory_space<vmem>>, vector<512x128xf32>
      tpu.vector_store %arg5[%c0_30, %c0_31], %35 {strides = array<i32>} : memref<512x128xf32, #tpu.memory_space<vmem>>, vector<512x128xf32>,
    } else {
    }
    %c3_i32_26 = arith.constant 3 : i32
    %31 = arith.cmpi eq, %arg1, %c3_i32_26 : i32
    %32 = arith.extui %31 : i1 to i32
    %c0_i32_27 = arith.constant 0 : i32
    %33 = arith.cmpi ne, %32, %c0_i32_27 : i32
    scf.if %33 {
      %c0_28 = arith.constant 0 : index
      %c0_29 = arith.constant 0 : index
      %34 = vector.load %arg5[%c0_28, %c0_29] : memref<512x128xf32, #tpu.memory_space<vmem>>, vector<512x128xf32>
      %35 = arith.addf %34, %22 : vector<512x128xf32>
      %cst_30 = arith.constant dense<0.000000e+00> : vector<128xf32>
      %36 = vector.multi_reduction <add>, %35, %cst_30 [0] : vector<512x128xf32> to vector<128xf32>
      %37 = vector.shape_cast %36 : vector<128xf32> to vector<1x128xf32>
      %38 = arith.mulf %35, %35 : vector<512x128xf32>
      %cst_31 = arith.constant dense<0.000000e+00> : vector<128xf32>
      %39 = vector.multi_reduction <add>, %38, %cst_31 [0] : vector<512x128xf32> to vector<128xf32>
      %40 = vector.shape_cast %39 : vector<128xf32> to vector<1x128xf32>
      %cst_32 = arith.constant 0.001953125 : f32
      %41 = vector.broadcast %cst_32 : f32 to vector<1x128xf32>
      %42 = arith.mulf %37, %41 : vector<1x128xf32>
      %cst_33 = arith.constant 0.001953125 : f32
      %43 = vector.broadcast %cst_33 : f32 to vector<1x128xf32>
      %44 = arith.mulf %40, %43 : vector<1x128xf32>
      %45 = arith.mulf %42, %42 : vector<1x128xf32>
      %46 = arith.subf %44, %45 : vector<1x128xf32>
      %47 = vector.broadcast %42 : vector<1x128xf32> to vector<512x128xf32>
      %48 = arith.subf %35, %47 : vector<512x128xf32>
      %cst_34 = arith.constant 9.99999974E-6 : f32
      %49 = vector.broadcast %cst_34 : f32 to vector<1x128xf32>
      %50 = arith.addf %46, %49 : vector<1x128xf32>
      %51 = math.rsqrt %50 : vector<1x128xf32>
      %52 = vector.broadcast %51 : vector<1x128xf32> to vector<512x128xf32>
      %53 = arith.mulf %48, %52 : vector<512x128xf32>
      %cst_35 = arith.constant 0.000000e+00 : f32
      %54 = vector.broadcast %cst_35 : f32 to vector<512x128xf32>
      %55 = arith.cmpf ogt, %53, %54 : vector<512x128xf32>
      %cst_36 = arith.constant 2.000000e-01 : f32
      %56 = vector.broadcast %cst_36 : f32 to vector<512x128xf32>
      %57 = arith.mulf %56, %53 : vector<512x128xf32>
      %58 = arith.select %55, %53, %57 : vector<512x128xi1>, vector<512x128xf32>
      %59 = arith.truncf %58 : vector<512x128xf32> to vector<512x128xbf16>
      %c0_37 = arith.constant 0 : index
      %c0_38 = arith.constant 0 : index
      %60 = vector.load %arg4[%c0_37, %c0_38] : memref<512x128xbf16, #tpu.memory_space<vmem>>, vector<512x128xbf16>
      tpu.vector_store %arg4[%c0_37, %c0_38], %59 {strides = array<i32>} : memref<512x128xbf16, #tpu.memory_space<vmem>>, vector<512x128xbf16>,
    } else {
    }
    return
  }
  func.func @transform_0(%arg0: i32, %arg1: i32) -> (i32, i32, i32) {
    %c0_i32 = arith.constant 0 : i32
    %c0_i32_0 = arith.constant 0 : i32
    %c0_i32_1 = arith.constant 0 : i32
    return %arg1, %c0_i32, %c0_i32_0 : i32, i32, i32
  }
  func.func @transform_1(%arg0: i32, %arg1: i32) -> (i32, i32, i32) {
    %c0_i32 = arith.constant 0 : i32
    %c0_i32_0 = arith.constant 0 : i32
    return %arg1, %c0_i32, %arg0 : i32, i32, i32
  }
  func.func @transform_2(%arg0: i32, %arg1: i32) -> (i32, i32) {
    %c0_i32 = arith.constant 0 : i32
    %c0_i32_0 = arith.constant 0 : i32
    return %c0_i32, %arg0 : i32, i32
  }
}

module attributes {stable_mosaic.version = 11 : i64} {
  func.func @_tap_conv_kernel(%arg0: i32, %arg1: i32, %arg2: memref<4x128x256xbf16, #tpu.memory_space<vmem>>, %arg3: memref<4x256x256xbf16, #tpu.memory_space<vmem>>, %arg4: memref<64x256xbf16, #tpu.memory_space<vmem>>, %arg5: memref<1x2x1xf32, #tpu.memory_space<vmem>>, %arg6: memref<128x256xf32, #tpu.memory_space<vmem>>) attributes {dimension_semantics = [#tpu.dimension_semantics<parallel>, #tpu.dimension_semantics<arbitrary>], iteration_bounds = array<i64: 2, 4>, scalar_prefetch = 0 : i64, scratch_operands = 1 : i64, tpu.core_type = #tpu.core_type<tc>, window_params = [{transform_indices = @transform_0, window_bounds = array<i64: 4, 128, 256>}, {transform_indices = @transform_1, window_bounds = array<i64: 4, 256, 256>}, {transform_indices = @transform_2, window_bounds = array<i64: 64, 256>}, {transform_indices = @transform_3, window_bounds = array<i64: 1, 2, 1>}]} {
    %c0 = arith.constant 0 : index
    %c0_0 = arith.constant 0 : index
    %c0_1 = arith.constant 0 : index
    %0 = vector.load %arg2[%c0, %c0_0, %c0_1] : memref<4x128x256xbf16, #tpu.memory_space<vmem>>, vector<1x128x256xbf16>
    %1 = vector.shape_cast %0 : vector<1x128x256xbf16> to vector<128x256xbf16>
    %c0_2 = arith.constant 0 : index
    %c0_3 = arith.constant 0 : index
    %c0_4 = arith.constant 0 : index
    %2 = vector.load %arg3[%c0_2, %c0_3, %c0_4] : memref<4x256x256xbf16, #tpu.memory_space<vmem>>, vector<1x256x256xbf16>
    %3 = vector.shape_cast %2 : vector<1x256x256xbf16> to vector<256x256xbf16>
    %cst = arith.constant dense<0.000000e+00> : vector<128x256xf32>
    %4 = tpu.matmul %1, %3, %cst {dimension_numbers = #tpu.dot_dimension_numbers<[1], [0], [0], [1], [0, 0, 1, 1], [], []>} : vector<128x256xbf16>, vector<256x256xbf16>, vector<128x256xf32> -> vector<128x256xf32>
    %c1 = arith.constant 1 : index
    %c0_5 = arith.constant 0 : index
    %c0_6 = arith.constant 0 : index
    %5 = vector.load %arg2[%c1, %c0_5, %c0_6] : memref<4x128x256xbf16, #tpu.memory_space<vmem>>, vector<1x128x256xbf16>
    %6 = vector.shape_cast %5 : vector<1x128x256xbf16> to vector<128x256xbf16>
    %c1_7 = arith.constant 1 : index
    %c0_8 = arith.constant 0 : index
    %c0_9 = arith.constant 0 : index
    %7 = vector.load %arg3[%c1_7, %c0_8, %c0_9] : memref<4x256x256xbf16, #tpu.memory_space<vmem>>, vector<1x256x256xbf16>
    %8 = vector.shape_cast %7 : vector<1x256x256xbf16> to vector<256x256xbf16>
    %cst_10 = arith.constant dense<0.000000e+00> : vector<128x256xf32>
    %9 = tpu.matmul %6, %8, %cst_10 {dimension_numbers = #tpu.dot_dimension_numbers<[1], [0], [0], [1], [0, 0, 1, 1], [], []>} : vector<128x256xbf16>, vector<256x256xbf16>, vector<128x256xf32> -> vector<128x256xf32>
    %10 = arith.addf %4, %9 : vector<128x256xf32>
    %c2 = arith.constant 2 : index
    %c0_11 = arith.constant 0 : index
    %c0_12 = arith.constant 0 : index
    %11 = vector.load %arg2[%c2, %c0_11, %c0_12] : memref<4x128x256xbf16, #tpu.memory_space<vmem>>, vector<1x128x256xbf16>
    %12 = vector.shape_cast %11 : vector<1x128x256xbf16> to vector<128x256xbf16>
    %c2_13 = arith.constant 2 : index
    %c0_14 = arith.constant 0 : index
    %c0_15 = arith.constant 0 : index
    %13 = vector.load %arg3[%c2_13, %c0_14, %c0_15] : memref<4x256x256xbf16, #tpu.memory_space<vmem>>, vector<1x256x256xbf16>
    %14 = vector.shape_cast %13 : vector<1x256x256xbf16> to vector<256x256xbf16>
    %cst_16 = arith.constant dense<0.000000e+00> : vector<128x256xf32>
    %15 = tpu.matmul %12, %14, %cst_16 {dimension_numbers = #tpu.dot_dimension_numbers<[1], [0], [0], [1], [0, 0, 1, 1], [], []>} : vector<128x256xbf16>, vector<256x256xbf16>, vector<128x256xf32> -> vector<128x256xf32>
    %16 = arith.addf %10, %15 : vector<128x256xf32>
    %c3 = arith.constant 3 : index
    %c0_17 = arith.constant 0 : index
    %c0_18 = arith.constant 0 : index
    %17 = vector.load %arg2[%c3, %c0_17, %c0_18] : memref<4x128x256xbf16, #tpu.memory_space<vmem>>, vector<1x128x256xbf16>
    %18 = vector.shape_cast %17 : vector<1x128x256xbf16> to vector<128x256xbf16>
    %c3_19 = arith.constant 3 : index
    %c0_20 = arith.constant 0 : index
    %c0_21 = arith.constant 0 : index
    %19 = vector.load %arg3[%c3_19, %c0_20, %c0_21] : memref<4x256x256xbf16, #tpu.memory_space<vmem>>, vector<1x256x256xbf16>
    %20 = vector.shape_cast %19 : vector<1x256x256xbf16> to vector<256x256xbf16>
    %cst_22 = arith.constant dense<0.000000e+00> : vector<128x256xf32>
    %21 = tpu.matmul %18, %20, %cst_22 {dimension_numbers = #tpu.dot_dimension_numbers<[1], [0], [0], [1], [0, 0, 1, 1], [], []>} : vector<128x256xbf16>, vector<256x256xbf16>, vector<128x256xf32> -> vector<128x256xf32>
    %22 = arith.addf %16, %21 : vector<128x256xf32>
    %c0_i32 = arith.constant 0 : i32
    %23 = arith.cmpi eq, %arg1, %c0_i32 : i32
    %24 = arith.extui %23 : i1 to i32
    %c0_i32_23 = arith.constant 0 : i32
    %25 = arith.cmpi ne, %24, %c0_i32_23 : i32
    scf.if %25 {
      %c0_28 = arith.constant 0 : index
      %c0_29 = arith.constant 0 : index
      %34 = vector.load %arg6[%c0_28, %c0_29] : memref<128x256xf32, #tpu.memory_space<vmem>>, vector<128x256xf32>
      tpu.vector_store %arg6[%c0_28, %c0_29], %22 {strides = array<i32>} : memref<128x256xf32, #tpu.memory_space<vmem>>, vector<128x256xf32>,
    } else {
    }
    %c0_i32_24 = arith.constant 0 : i32
    %26 = arith.cmpi sgt, %arg1, %c0_i32_24 : i32
    %c3_i32 = arith.constant 3 : i32
    %27 = arith.cmpi slt, %arg1, %c3_i32 : i32
    %28 = arith.andi %26, %27 : i1
    %29 = arith.extui %28 : i1 to i32
    %c0_i32_25 = arith.constant 0 : i32
    %30 = arith.cmpi ne, %29, %c0_i32_25 : i32
    scf.if %30 {
      %c0_28 = arith.constant 0 : index
      %c0_29 = arith.constant 0 : index
      %34 = vector.load %arg6[%c0_28, %c0_29] : memref<128x256xf32, #tpu.memory_space<vmem>>, vector<128x256xf32>
      %35 = arith.addf %34, %22 : vector<128x256xf32>
      %c0_30 = arith.constant 0 : index
      %c0_31 = arith.constant 0 : index
      %36 = vector.load %arg6[%c0_30, %c0_31] : memref<128x256xf32, #tpu.memory_space<vmem>>, vector<128x256xf32>
      tpu.vector_store %arg6[%c0_30, %c0_31], %35 {strides = array<i32>} : memref<128x256xf32, #tpu.memory_space<vmem>>, vector<128x256xf32>,
    } else {
    }
    %c3_i32_26 = arith.constant 3 : i32
    %31 = arith.cmpi eq, %arg1, %c3_i32_26 : i32
    %32 = arith.extui %31 : i1 to i32
    %c0_i32_27 = arith.constant 0 : i32
    %33 = arith.cmpi ne, %32, %c0_i32_27 : i32
    scf.if %33 {
      %c0_28 = arith.constant 0 : index
      %c0_29 = arith.constant 0 : index
      %34 = vector.load %arg6[%c0_28, %c0_29] : memref<128x256xf32, #tpu.memory_space<vmem>>, vector<128x256xf32>
      %35 = arith.addf %34, %22 : vector<128x256xf32>
      %cst_30 = arith.constant dense<0.000000e+00> : vector<256xf32>
      %36 = vector.multi_reduction <add>, %35, %cst_30 [0] : vector<128x256xf32> to vector<256xf32>
      %37 = vector.shape_cast %36 : vector<256xf32> to vector<1x256xf32>
      %38 = arith.mulf %35, %35 : vector<128x256xf32>
      %cst_31 = arith.constant dense<0.000000e+00> : vector<256xf32>
      %39 = vector.multi_reduction <add>, %38, %cst_31 [0] : vector<128x256xf32> to vector<256xf32>
      %40 = vector.shape_cast %39 : vector<256xf32> to vector<1x256xf32>
      %cst_32 = arith.constant 7.812500e-03 : f32
      %41 = vector.broadcast %cst_32 : f32 to vector<1x256xf32>
      %42 = arith.mulf %37, %41 : vector<1x256xf32>
      %cst_33 = arith.constant 7.812500e-03 : f32
      %43 = vector.broadcast %cst_33 : f32 to vector<1x256xf32>
      %44 = arith.mulf %40, %43 : vector<1x256xf32>
      %45 = arith.mulf %42, %42 : vector<1x256xf32>
      %46 = arith.subf %44, %45 : vector<1x256xf32>
      %47 = vector.broadcast %42 : vector<1x256xf32> to vector<128x256xf32>
      %48 = arith.subf %35, %47 : vector<128x256xf32>
      %cst_34 = arith.constant 9.99999974E-6 : f32
      %49 = vector.broadcast %cst_34 : f32 to vector<1x256xf32>
      %50 = arith.addf %46, %49 : vector<1x256xf32>
      %51 = math.rsqrt %50 : vector<1x256xf32>
      %52 = vector.broadcast %51 : vector<1x256xf32> to vector<128x256xf32>
      %53 = arith.mulf %48, %52 : vector<128x256xf32>
      %cst_35 = arith.constant 0.000000e+00 : f32
      %54 = vector.broadcast %cst_35 : f32 to vector<128x256xf32>
      %55 = arith.cmpf ogt, %53, %54 : vector<128x256xf32>
      %cst_36 = arith.constant 2.000000e-01 : f32
      %56 = vector.broadcast %cst_36 : f32 to vector<128x256xf32>
      %57 = arith.mulf %56, %53 : vector<128x256xf32>
      %58 = arith.select %55, %53, %57 : vector<128x256xi1>, vector<128x256xf32>
      %59 = vector.shape_cast %58 : vector<128x256xf32> to vector<2x64x256xf32>
      %c0_37 = arith.constant 0 : index
      %c0_38 = arith.constant 0 : index
      %60 = vector.load %arg4[%c0_37, %c0_38] : memref<64x256xbf16, #tpu.memory_space<vmem>>, vector<64x256xbf16>
      %61 = arith.extf %60 : vector<64x256xbf16> to vector<64x256xf32>
      %62 = vector.shape_cast %61 : vector<64x256xf32> to vector<1x64x256xf32>
      %63 = vector.broadcast %62 : vector<1x64x256xf32> to vector<2x64x256xf32>
      %64 = arith.mulf %59, %63 : vector<2x64x256xf32>
      %cst_39 = arith.constant dense<0.000000e+00> : vector<2x64xf32>
      %65 = vector.multi_reduction <add>, %64, %cst_39 [2] : vector<2x64x256xf32> to vector<2x64xf32>
      %66 = vector.shape_cast %65 : vector<2x64xf32> to vector<2x64x1xf32>
      %cst_40 = arith.constant dense<0.000000e+00> : vector<2x1xf32>
      %67 = vector.multi_reduction <add>, %66, %cst_40 [1] : vector<2x64x1xf32> to vector<2x1xf32>
      %68 = vector.shape_cast %67 : vector<2x1xf32> to vector<1x2x1xf32>
      %c0_41 = arith.constant 0 : index
      %c0_42 = arith.constant 0 : index
      %c0_43 = arith.constant 0 : index
      %69 = vector.load %arg5[%c0_41, %c0_42, %c0_43] : memref<1x2x1xf32, #tpu.memory_space<vmem>>, vector<1x2x1xf32>
      tpu.vector_store %arg5[%c0_41, %c0_42, %c0_43], %68 {strides = array<i32>} : memref<1x2x1xf32, #tpu.memory_space<vmem>>, vector<1x2x1xf32>,
    } else {
    }
    return
  }
  func.func @transform_0(%arg0: i32, %arg1: i32) -> (i32, i32, i32) {
    %c0_i32 = arith.constant 0 : i32
    %c0_i32_0 = arith.constant 0 : i32
    %c0_i32_1 = arith.constant 0 : i32
    return %arg1, %c0_i32, %c0_i32_0 : i32, i32, i32
  }
  func.func @transform_1(%arg0: i32, %arg1: i32) -> (i32, i32, i32) {
    %c0_i32 = arith.constant 0 : i32
    %c0_i32_0 = arith.constant 0 : i32
    return %arg1, %c0_i32, %arg0 : i32, i32, i32
  }
  func.func @transform_2(%arg0: i32, %arg1: i32) -> (i32, i32) {
    %c0_i32 = arith.constant 0 : i32
    %c0_i32_0 = arith.constant 0 : i32
    return %c0_i32, %arg0 : i32, i32
  }
  func.func @transform_3(%arg0: i32, %arg1: i32) -> (i32, i32, i32) {
    %c0_i32 = arith.constant 0 : i32
    %c0_i32_0 = arith.constant 0 : i32
    %c0_i32_1 = arith.constant 0 : i32
    return %arg0, %c0_i32, %c0_i32_0 : i32, i32, i32
  }
}

</mosaic_0001>

<bundles_post_ra>
// kernel: discriminator_forward.3
= control target key start
LH: loop header
LB: loop body
LE: loop exit
PB: predicated region body
PF: predicated region fallthrough
CT: control target
= control target key end

     0   :  { %s2639_s9 = smov 0   ;;  %s2862_s0 = inlined_call_operand.vmem [shape: bf16[2048,16], index: 0, kind: input, shape index: {}]   ;;  %s2863_s1 = inlined_call_operand.vmem [shape: bf16[16,128], index: 1, kind: input, shape index: {}]   ;;  %s2864_s2 = inlined_call_operand.vmem [shape: bf16[2048,128], index: 2, kind: output, shape index: {}]  }
   0x1 LB: > { %s1822_s10 = sadd.s32 4294967295, %s2622_s9   ;;  %p1826_p0 = scmp.ge.s32.totalorder %s2622_s9, 1  ;;  %s2622_s9 = sphi %s2639_s9, %s12_s9  }
   0x2   : > { %p113_p1 = scmp.lt.s32.totalorder %s2622_s9, 3 }
   0x4   : > { %p114_p2 = pnand %p1826_p0, %p113_p1 }
   0x5   : > { %s1827_s13 = sshll.u32 (!%p114_p2), %s1822_s10, 7 }
   0x6   : > { %117 = sbr.rel (%p114_p2) target bundleno = 404 (0x194), region = 28  ;;  %p136_p3 = scmp.lt.s32.totalorder (!%p114_p2), %s1827_s13, 255 }
   0xb   : > { %v2221_v0 = vld [vmem:[%s2863_s1] sm:$0xff]  ;;  %s2866_s13 = smov (!%p136_p3, %s1827_s13), 255  ;;  %vm604_vm0 = vcmask 130048  }
   0xc   : > { %804 = vmatpush.bf16.msra.mxu0 %v2221_v0  ;;  %2605 = vmatpush.bf16.msra.mxu1 %v2221_v0  ;;  %s1828_s14 = sshll.u32 %s2866_s13, 2 }
   0xd   : > { %2606 = vmatpush.bf16.msra.mxu2 %v2221_v0  ;;  %2607 = vmatpush.bf16.msra.mxu3 %v2221_v0  ;;  %s2658_s17 = scalar_lea.vmem %s2862_s0, %s1828_s14  ;;  %s2737_s20 = scalar_lea.vmem %s2864_s2, %s1828_s14 }
   0xe   : > { %v2157_v1 = vld [vmem:[%s2658_s17] sm:$0xff]  ;;  %v2158_v5 = vld [vmem:[%s2658_s17 + $0x8] sm:$0xff]  ;;  %v2159_v9 = vld [vmem:[%s2658_s17 + $0x10] sm:$0xff] }
   0xf   : > { %v2173_v2 = vld [vmem:[%s2658_s17 + $0x80] sm:$0xff]  ;;  %2091 = vmatmul.msk.bf16.vlgmr.msra.gmra.mxu0 %vm604_vm0, %v2157_v1  ;;  %v2174_v6 = vld [vmem:[%s2658_s17 + $0x88] sm:$0xff]  ;;  %v2175_v10 = vld [vmem:[%s2658_s17 + $0x90] sm:$0xff] }
  0x10   : > { %v2189_v3 = vld [vmem:[%s2658_s17 + $0x100] sm:$0xff]  ;;  %2107 = vmatmul.msk.bf16.vlgmr.msra.gmra.mxu1 %vm604_vm0, %v2173_v2  ;;  %v2190_v7 = vld [vmem:[%s2658_s17 + $0x108] sm:$0xff]  ;;  %v2191_v11 = vld [vmem:[%s2658_s17 + $0x110] sm:$0xff] }
  0x11   : > { %v2205_v4 = vld [vmem:[%s2658_s17 + $0x180] sm:$0xff]  ;;  %2123 = vmatmul.msk.bf16.vlgmr.msra.gmra.mxu2 %vm604_vm0, %v2189_v3  ;;  %v2206_v8 = vld [vmem:[%s2658_s17 + $0x188] sm:$0xff]  ;;  %v2207_v12 = vld [vmem:[%s2658_s17 + $0x190] sm:$0xff] }
  0x12   : > { %2139 = vmatmul.msk.bf16.vlgmr.msra.gmra.mxu3 %vm604_vm0, %v2205_v4  ;;  %v2160_v13 = vld [vmem:[%s2658_s17 + $0x18] sm:$0xff]  ;;  %v2161_v17 = vld [vmem:[%s2658_s17 + $0x20] sm:$0xff]  ;;  %v2162_v21 = vld [vmem:[%s2658_s17 + $0x28] sm:$0xff] }
  0x13   : > { %v2176_v14 = vld [vmem:[%s2658_s17 + $0x98] sm:$0xff]  ;;  %v2177_v18 = vld [vmem:[%s2658_s17 + $0xa0] sm:$0xff]  ;;  %v2178_v22 = vld [vmem:[%s2658_s17 + $0xa8] sm:$0xff] }
  0x14   : > { %v2192_v15 = vld [vmem:[%s2658_s17 + $0x118] sm:$0xff]  ;;  %v2193_v19 = vld [vmem:[%s2658_s17 + $0x120] sm:$0xff]  ;;  %v2194_v23 = vld [vmem:[%s2658_s17 + $0x128] sm:$0xff] }
  0x15   : > { %v2208_v16 = vld [vmem:[%s2658_s17 + $0x198] sm:$0xff]  ;;  %v2209_v20 = vld [vmem:[%s2658_s17 + $0x1a0] sm:$0xff]  ;;  %v2210_v24 = vld [vmem:[%s2658_s17 + $0x1a8] sm:$0xff] }
  0x16   : > { %v2163_v25 = vld [vmem:[%s2658_s17 + $0x30] sm:$0xff]  ;;  %v2164_v29 = vld [vmem:[%s2658_s17 + $0x38] sm:$0xff]  ;;  %v2165_v33 = vld [vmem:[%s2658_s17 + $0x40] sm:$0xff] }
  0x17   : > { %v2179_v26 = vld [vmem:[%s2658_s17 + $0xb0] sm:$0xff]  ;;  %v2180_v30 = vld [vmem:[%s2658_s17 + $0xb8] sm:$0xff]  ;;  %v2181_v34 = vld [vmem:[%s2658_s17 + $0xc0] sm:$0xff] }
  0x18   : > { %v2195_v27 = vld [vmem:[%s2658_s17 + $0x130] sm:$0xff]  ;;  %v2196_v31 = vld [vmem:[%s2658_s17 + $0x138] sm:$0xff]  ;;  %v2197_v37 = vld [vmem:[%s2658_s17 + $0x140] sm:$0xff] }
  0x19   : > { %v2211_v28 = vld [vmem:[%s2658_s17 + $0x1b0] sm:$0xff]  ;;  %v2212_v32 = vld [vmem:[%s2658_s17 + $0x1b8] sm:$0xff]  ;;  %v2213_v38 = vld [vmem:[%s2658_s17 + $0x1c0] sm:$0xff] }
  0x1a   : > { %v2166_v57 = vld [vmem:[%s2658_s17 + $0x48] sm:$0xff] }
  0x1b   : > { %v2182_v58 = vld [vmem:[%s2658_s17 + $0xc8] sm:$0xff] }
  0x1c   : > { %v2198_v59 = vld [vmem:[%s2658_s17 + $0x148] sm:$0xff] }
  0x1d   : > { %v2214_v0 = vld [vmem:[%s2658_s17 + $0x1c8] sm:$0xff] }
  0x1f   : > { %2092 = vmatmul.msk.bf16.gmra.mxu0 %vm604_vm0, %v2158_v5 }
  0x20   : > { %2108 = vmatmul.msk.bf16.gmra.mxu1 %vm604_vm0, %v2174_v6 }
  0x21   : > { %2124 = vmatmul.msk.bf16.gmra.mxu2 %vm604_vm0, %v2190_v7 }
  0x22   : > { %2140 = vmatmul.msk.bf16.gmra.mxu3 %vm604_vm0, %v2206_v8 }
  0x2f   : > { %2093 = vmatmul.msk.bf16.gmra.mxu0 %vm604_vm0, %v2159_v9 }
  0x30   : > { %2109 = vmatmul.msk.bf16.gmra.mxu1 %vm604_vm0, %v2175_v10 }
  0x31   : > { %2125 = vmatmul.msk.bf16.gmra.mxu2 %vm604_vm0, %v2191_v11 }
  0x32   : > { %2141 = vmatmul.msk.bf16.gmra.mxu3 %vm604_vm0, %v2207_v12 }
  0x3f   : > { %2094 = vmatmul.msk.bf16.gmra.mxu0 %vm604_vm0, %v2160_v13 }
  0x40   : > { %2110 = vmatmul.msk.bf16.gmra.mxu1 %vm604_vm0, %v2176_v14 }
  0x41   : > { %2126 = vmatmul.msk.bf16.gmra.mxu2 %vm604_vm0, %v2192_v15 }
  0x42   : > { %2142 = vmatmul.msk.bf16.gmra.mxu3 %vm604_vm0, %v2208_v16 }
  0x4f   : > { %2095 = vmatmul.msk.bf16.gmra.mxu0 %vm604_vm0, %v2161_v17 }
  0x50   : > { %2111 = vmatmul.msk.bf16.gmra.mxu1 %vm604_vm0, %v2177_v18 }
  0x51   : > { %2127 = vmatmul.msk.bf16.gmra.mxu2 %vm604_vm0, %v2193_v19 }
  0x52   : > { %2143 = vmatmul.msk.bf16.gmra.mxu3 %vm604_vm0, %v2209_v20 }
  0x5f   : > { %2096 = vmatmul.msk.bf16.gmra.mxu0 %vm604_vm0, %v2162_v21 }
  0x60   : > { %2112 = vmatmul.msk.bf16.gmra.mxu1 %vm604_vm0, %v2178_v22 }
  0x61   : > { %2128 = vmatmul.msk.bf16.gmra.mxu2 %vm604_vm0, %v2194_v23 }
  0x62   : > { %2144 = vmatmul.msk.bf16.gmra.mxu3 %vm604_vm0, %v2210_v24 }
  0x6f   : > { %2097 = vmatmul.msk.bf16.gmra.mxu0 %vm604_vm0, %v2163_v25  ;;  %v2167_v25 = vld [vmem:[%s2658_s17 + $0x50] sm:$0xff] }
  0x70   : > { %2113 = vmatmul.msk.bf16.gmra.mxu1 %vm604_vm0, %v2179_v26  ;;  %v2183_v26 = vld [vmem:[%s2658_s17 + $0xd0] sm:$0xff] }
  0x71   : > { %2129 = vmatmul.msk.bf16.gmra.mxu2 %vm604_vm0, %v2195_v27  ;;  %v2199_v27 = vld [vmem:[%s2658_s17 + $0x150] sm:$0xff] }
  0x72   : > { %2145 = vmatmul.msk.bf16.gmra.mxu3 %vm604_vm0, %v2211_v28 }
  0x7f   : > { %2098 = vmatmul.msk.bf16.gmra.mxu0 %vm604_vm0, %v2164_v29 }
  0x80   : > { %2114 = vmatmul.msk.bf16.gmra.mxu1 %vm604_vm0, %v2180_v30 }
  0x81   : > { %2130 = vmatmul.msk.bf16.gmra.mxu2 %vm604_vm0, %v2196_v31 }
  0x82   : > { %2146 = vmatmul.msk.bf16.gmra.mxu3 %vm604_vm0, %v2212_v32  ;;  %v2215_v32 = vld [vmem:[%s2658_s17 + $0x1d0] sm:$0xff] }
  0x8c   : > { %v806_v35 = vpop.f32.mrf.mxu0 }
  0x8d   : > { %v886_v36 = vpop.f32.mrf.mxu1  ;;  %v1254_v39 = vmul.f32 0.2, %v806_v35  ;;  %vm1126_vm1 = vcmp.gt.f32.partialorder %v806_v35, 0.0 }
  0x8e   : > { %v1286_v40 = vmul.f32 0.2, %v886_v36  ;;  %vm1158_vm2 = vcmp.gt.f32.partialorder %v886_v36, 0.0 }
  0x8f   : > { %2099 = vmatmul.msk.bf16.gmra.mxu0 %vm604_vm0, %v2165_v33  ;;  %v1382_v47 = vsel %vm1126_vm1, %v806_v35, %v1254_v39 }
  0x90   : > { %2115 = vmatmul.msk.bf16.gmra.mxu1 %vm604_vm0, %v2181_v34  ;;  %v1414_v48 = vsel %vm1158_vm2, %v886_v36, %v1286_v40 }
  0x91   : > { %2131 = vmatmul.msk.bf16.gmra.mxu2 %vm604_vm0, %v2197_v37 }
  0x92   : > { %2147 = vmatmul.msk.bf16.gmra.mxu3 %vm604_vm0, %v2213_v38 }
  0x94   : > { %v966_v41 = vpop.f32.mrf.mxu2  ;;  %v808_v43 = vpop.f32.mrf.mxu0 }
  0x95   : > { %v1046_v42 = vpop.f32.mrf.mxu3  ;;  %v888_v44 = vpop.f32.mrf.mxu1  ;;  %vm1127_vm3 = vcmp.gt.f32.partialorder %v808_v43, 0.0  ;;  %v1255_v45 = vmul.f32 0.2, %v808_v43  ;;  %v1318_v53 = vmul.f32 0.2, %v966_v41  ;;  %vm1190_vm5 = vcmp.gt.f32.partialorder %v966_v41, 0.0 }
  0x96   : > { %vm1159_vm4 = vcmp.gt.f32.partialorder %v888_v44, 0.0  ;;  %v1287_v46 = vmul.f32 0.2, %v888_v44  ;;  %v1350_v54 = vmul.f32 0.2, %v1046_v42  ;;  %vm1222_vm6 = vcmp.gt.f32.partialorder %v1046_v42, 0.0 }
  0x97   : > { %v1383_v49 = vsel %vm1127_vm3, %v808_v43, %v1255_v45  ;;  %v1446_v1 = vsel %vm1190_vm5, %v966_v41, %v1318_v53 }
  0x98   : > { %v1415_v50 = vsel %vm1159_vm4, %v888_v44, %v1287_v46  ;;  %v2225_v51 = vpack.c.bf16 %v1383_v49, %v1382_v47  ;;  %v1478_v2 = vsel %vm1222_vm6, %v1046_v42, %v1350_v54 }
  0x99   : > { %v2305_v52 = vpack.c.bf16 %v1415_v50, %v1414_v48 }
  0x9a   : > { %2226 = vst [vmem:[%s2737_s20] sm:$0xff] %v2225_v51  }
  0x9b   : > { %2557 = vst [vmem:[%s2737_s20 + $0x80] sm:$0xff] %v2305_v52  }
  0x9c   : > { %v968_v55 = vpop.f32.mrf.mxu2  ;;  %v811_v62 = vpop.f32.mrf.mxu0 }
  0x9d   : > { %v1048_v56 = vpop.f32.mrf.mxu3  ;;  %vm1191_vm7 = vcmp.gt.f32.partialorder %v968_v55, 0.0  ;;  %v1319_v60 = vmul.f32 0.2, %v968_v55  ;;  %v891_v63 = vpop.f32.mrf.mxu1  ;;  %v1256_v7 = vmul.f32 0.2, %v811_v62  ;;  %vm1128_vm9 = vcmp.gt.f32.partialorder %v811_v62, 0.0 }
  0x9e   : > { %vm1223_vm8 = vcmp.gt.f32.partialorder %v1048_v56, 0.0  ;;  %v1351_v61 = vmul.f32 0.2, %v1048_v56  ;;  %v1288_v8 = vmul.f32 0.2, %v891_v63  ;;  %vm1160_vm10 = vcmp.gt.f32.partialorder %v891_v63, 0.0 }
  0x9f   : > { %v1447_v3 = vsel %vm1191_vm7, %v968_v55, %v1319_v60  ;;  %2100 = vmatmul.msk.bf16.gmra.mxu0 %vm604_vm0, %v2166_v57  ;;  %v1384_v15 = vsel %vm1128_vm9, %v811_v62, %v1256_v7  ;;  %v2168_v57 = vld [vmem:[%s2658_s17 + $0x58] sm:$0xff] }
  0xa0   : > { %v1479_v4 = vsel %vm1223_vm8, %v1048_v56, %v1351_v61  ;;  %v2385_v5 = vpack.c.bf16 %v1447_v3, %v1446_v1  ;;  %2116 = vmatmul.msk.bf16.gmra.mxu1 %vm604_vm0, %v2182_v58  ;;  %v1416_v16 = vsel %vm1160_vm10, %v891_v63, %v1288_v8  ;;  %v2184_v58 = vld [vmem:[%s2658_s17 + $0xd8] sm:$0xff] }
  0xa1   : > { %v2465_v6 = vpack.c.bf16 %v1479_v4, %v1478_v2  ;;  %2132 = vmatmul.msk.bf16.gmra.mxu2 %vm604_vm0, %v2198_v59  ;;  %v2200_v59 = vld [vmem:[%s2658_s17 + $0x158] sm:$0xff] }
  0xa2   : > { %2573 = vst [vmem:[%s2737_s20 + $0x100] sm:$0xff] %v2385_v5   ;;  %2148 = vmatmul.msk.bf16.gmra.mxu3 %vm604_vm0, %v2214_v0  ;;  %v2216_v0 = vld [vmem:[%s2658_s17 + $0x1d8] sm:$0xff] }
  0xa3   : > { %2589 = vst [vmem:[%s2737_s20 + $0x180] sm:$0xff] %v2465_v6  }
  0xa4   : > { %v971_v9 = vpop.f32.mrf.mxu2  ;;  %v813_v11 = vpop.f32.mrf.mxu0 }
  0xa5   : > { %v1051_v10 = vpop.f32.mrf.mxu3  ;;  %v893_v12 = vpop.f32.mrf.mxu1  ;;  %vm1129_vm11 = vcmp.gt.f32.partialorder %v813_v11, 0.0  ;;  %v1257_v13 = vmul.f32 0.2, %v813_v11  ;;  %v1320_v21 = vmul.f32 0.2, %v971_v9  ;;  %vm1192_vm13 = vcmp.gt.f32.partialorder %v971_v9, 0.0 }
  0xa6   : > { %vm1161_vm12 = vcmp.gt.f32.partialorder %v893_v12, 0.0  ;;  %v1289_v14 = vmul.f32 0.2, %v893_v12  ;;  %v1352_v22 = vmul.f32 0.2, %v1051_v10  ;;  %vm1224_vm14 = vcmp.gt.f32.partialorder %v1051_v10, 0.0 }
  0xa7   : > { %v1385_v17 = vsel %vm1129_vm11, %v813_v11, %v1257_v13  ;;  %v1448_v33 = vsel %vm1192_vm13, %v971_v9, %v1320_v21 }
  0xa8   : > { %v1417_v18 = vsel %vm1161_vm12, %v893_v12, %v1289_v14  ;;  %v2230_v19 = vpack.c.bf16 %v1385_v17, %v1384_v15  ;;  %v1480_v34 = vsel %vm1224_vm14, %v1051_v10, %v1352_v22 }
  0xa9   : > { %v2310_v20 = vpack.c.bf16 %v1417_v18, %v1416_v16 }
  0xaa   : > { %2542 = vst [vmem:[%s2737_s20 + $0x8] sm:$0xff] %v2230_v19  }
  0xab   : > { %2558 = vst [vmem:[%s2737_s20 + $0x88] sm:$0xff] %v2310_v20  }
  0xac   : > { %v973_v23 = vpop.f32.mrf.mxu2  ;;  %v816_v30 = vpop.f32.mrf.mxu0 }
  0xad   : > { %v1053_v24 = vpop.f32.mrf.mxu3  ;;  %vm1193_vm15 = vcmp.gt.f32.partialorder %v973_v23, 0.0  ;;  %v1321_v28 = vmul.f32 0.2, %v973_v23  ;;  %v896_v31 = vpop.f32.mrf.mxu1  ;;  %v1258_v39 = vmul.f32 0.2, %v816_v30  ;;  %vm1130_vm2 = vcmp.gt.f32.partialorder %v816_v30, 0.0 }
  0xae   : > { %vm1225_vm1 = vcmp.gt.f32.partialorder %v1053_v24, 0.0  ;;  %v1353_v29 = vmul.f32 0.2, %v1053_v24  ;;  %v1290_v40 = vmul.f32 0.2, %v896_v31  ;;  %vm1162_vm3 = vcmp.gt.f32.partialorder %v896_v31, 0.0 }
  0xaf   : > { %v1449_v35 = vsel %vm1193_vm15, %v973_v23, %v1321_v28  ;;  %2101 = vmatmul.msk.bf16.gmra.mxu0 %vm604_vm0, %v2167_v25  ;;  %v1386_v47 = vsel %vm1130_vm2, %v816_v30, %v1258_v39  ;;  %v2169_v25 = vld [vmem:[%s2658_s17 + $0x60] sm:$0xff] }
  0xb0   : > { %v1481_v36 = vsel %vm1225_vm1, %v1053_v24, %v1353_v29  ;;  %v2390_v37 = vpack.c.bf16 %v1449_v35, %v1448_v33  ;;  %2117 = vmatmul.msk.bf16.gmra.mxu1 %vm604_vm0, %v2183_v26  ;;  %v1418_v48 = vsel %vm1162_vm3, %v896_v31, %v1290_v40  ;;  %v2185_v26 = vld [vmem:[%s2658_s17 + $0xe0] sm:$0xff] }
  0xb1   : > { %v2470_v38 = vpack.c.bf16 %v1481_v36, %v1480_v34  ;;  %2133 = vmatmul.msk.bf16.gmra.mxu2 %vm604_vm0, %v2199_v27  ;;  %v2201_v27 = vld [vmem:[%s2658_s17 + $0x160] sm:$0xff] }
  0xb2   : > { %2574 = vst [vmem:[%s2737_s20 + $0x108] sm:$0xff] %v2390_v37   ;;  %2149 = vmatmul.msk.bf16.gmra.mxu3 %vm604_vm0, %v2215_v32  ;;  %v2217_v32 = vld [vmem:[%s2658_s17 + $0x1e0] sm:$0xff] }
  0xb3   : > { %2590 = vst [vmem:[%s2737_s20 + $0x188] sm:$0xff] %v2470_v38  }
  0xb4   : > { %v976_v41 = vpop.f32.mrf.mxu2  ;;  %v818_v43 = vpop.f32.mrf.mxu0 }
  0xb5   : > { %v1056_v42 = vpop.f32.mrf.mxu3  ;;  %v898_v44 = vpop.f32.mrf.mxu1  ;;  %vm1131_vm4 = vcmp.gt.f32.partialorder %v818_v43, 0.0  ;;  %v1259_v45 = vmul.f32 0.2, %v818_v43  ;;  %v1322_v53 = vmul.f32 0.2, %v976_v41  ;;  %vm1194_vm6 = vcmp.gt.f32.partialorder %v976_v41, 0.0 }
  0xb6   : > { %vm1163_vm5 = vcmp.gt.f32.partialorder %v898_v44, 0.0  ;;  %v1291_v46 = vmul.f32 0.2, %v898_v44  ;;  %v1354_v54 = vmul.f32 0.2, %v1056_v42  ;;  %vm1226_vm7 = vcmp.gt.f32.partialorder %v1056_v42, 0.0 }
  0xb7   : > { %v1387_v49 = vsel %vm1131_vm4, %v818_v43, %v1259_v45  ;;  %v1450_v1 = vsel %vm1194_vm6, %v976_v41, %v1322_v53 }
  0xb8   : > { %v1419_v50 = vsel %vm1163_vm5, %v898_v44, %v1291_v46  ;;  %v2235_v51 = vpack.c.bf16 %v1387_v49, %v1386_v47  ;;  %v1482_v2 = vsel %vm1226_vm7, %v1056_v42, %v1354_v54 }
  0xb9   : > { %v2315_v52 = vpack.c.bf16 %v1419_v50, %v1418_v48 }
  0xba   : > { %2543 = vst [vmem:[%s2737_s20 + $0x10] sm:$0xff] %v2235_v51  }
  0xbb   : > { %2559 = vst [vmem:[%s2737_s20 + $0x90] sm:$0xff] %v2315_v52  }
  0xbc   : > { %v978_v55 = vpop.f32.mrf.mxu2  ;;  %v821_v62 = vpop.f32.mrf.mxu0 }
  0xbd   : > { %v1058_v56 = vpop.f32.mrf.mxu3  ;;  %vm1195_vm8 = vcmp.gt.f32.partialorder %v978_v55, 0.0  ;;  %v1323_v60 = vmul.f32 0.2, %v978_v55  ;;  %v901_v63 = vpop.f32.mrf.mxu1  ;;  %v1260_v7 = vmul.f32 0.2, %v821_v62  ;;  %vm1132_vm10 = vcmp.gt.f32.partialorder %v821_v62, 0.0 }
  0xbe   : > { %vm1227_vm9 = vcmp.gt.f32.partialorder %v1058_v56, 0.0  ;;  %v1355_v61 = vmul.f32 0.2, %v1058_v56  ;;  %v1292_v8 = vmul.f32 0.2, %v901_v63  ;;  %vm1164_vm11 = vcmp.gt.f32.partialorder %v901_v63, 0.0 }
  0xbf   : > { %v1451_v3 = vsel %vm1195_vm8, %v978_v55, %v1323_v60  ;;  %2102 = vmatmul.msk.bf16.gmra.mxu0 %vm604_vm0, %v2168_v57  ;;  %v1388_v15 = vsel %vm1132_vm10, %v821_v62, %v1260_v7  ;;  %v2170_v57 = vld [vmem:[%s2658_s17 + $0x68] sm:$0xff] }
  0xc0   : > { %v1483_v4 = vsel %vm1227_vm9, %v1058_v56, %v1355_v61  ;;  %v2395_v5 = vpack.c.bf16 %v1451_v3, %v1450_v1  ;;  %2118 = vmatmul.msk.bf16.gmra.mxu1 %vm604_vm0, %v2184_v58  ;;  %v1420_v16 = vsel %vm1164_vm11, %v901_v63, %v1292_v8  ;;  %v2186_v58 = vld [vmem:[%s2658_s17 + $0xe8] sm:$0xff] }
  0xc1   : > { %v2475_v6 = vpack.c.bf16 %v1483_v4, %v1482_v2  ;;  %2134 = vmatmul.msk.bf16.gmra.mxu2 %vm604_vm0, %v2200_v59  ;;  %v2202_v59 = vld [vmem:[%s2658_s17 + $0x168] sm:$0xff] }
  0xc2   : > { %2575 = vst [vmem:[%s2737_s20 + $0x110] sm:$0xff] %v2395_v5   ;;  %2150 = vmatmul.msk.bf16.gmra.mxu3 %vm604_vm0, %v2216_v0  ;;  %v2218_v0 = vld [vmem:[%s2658_s17 + $0x1e8] sm:$0xff] }
  0xc3   : > { %2591 = vst [vmem:[%s2737_s20 + $0x190] sm:$0xff] %v2475_v6  }
  0xc4   : > { %v981_v9 = vpop.f32.mrf.mxu2  ;;  %v823_v11 = vpop.f32.mrf.mxu0 }
  0xc5   : > { %v1061_v10 = vpop.f32.mrf.mxu3  ;;  %v903_v12 = vpop.f32.mrf.mxu1  ;;  %vm1133_vm12 = vcmp.gt.f32.partialorder %v823_v11, 0.0  ;;  %v1261_v13 = vmul.f32 0.2, %v823_v11  ;;  %v1324_v21 = vmul.f32 0.2, %v981_v9  ;;  %vm1196_vm14 = vcmp.gt.f32.partialorder %v981_v9, 0.0 }
  0xc6   : > { %vm1165_vm13 = vcmp.gt.f32.partialorder %v903_v12, 0.0  ;;  %v1293_v14 = vmul.f32 0.2, %v903_v12  ;;  %v1356_v22 = vmul.f32 0.2, %v1061_v10  ;;  %vm1228_vm15 = vcmp.gt.f32.partialorder %v1061_v10, 0.0 }
  0xc7   : > { %v1389_v17 = vsel %vm1133_vm12, %v823_v11, %v1261_v13  ;;  %v1452_v33 = vsel %vm1196_vm14, %v981_v9, %v1324_v21 }
  0xc8   : > { %v1421_v18 = vsel %vm1165_vm13, %v903_v12, %v1293_v14  ;;  %v2240_v19 = vpack.c.bf16 %v1389_v17, %v1388_v15  ;;  %v1484_v34 = vsel %vm1228_vm15, %v1061_v10, %v1356_v22 }
  0xc9   : > { %v2320_v20 = vpack.c.bf16 %v1421_v18, %v1420_v16 }
  0xca   : > { %2544 = vst [vmem:[%s2737_s20 + $0x18] sm:$0xff] %v2240_v19  }
  0xcb   : > { %2560 = vst [vmem:[%s2737_s20 + $0x98] sm:$0xff] %v2320_v20  }
  0xcc   : > { %v983_v23 = vpop.f32.mrf.mxu2  ;;  %v826_v30 = vpop.f32.mrf.mxu0 }
  0xcd   : > { %v1063_v24 = vpop.f32.mrf.mxu3  ;;  %vm1197_vm1 = vcmp.gt.f32.partialorder %v983_v23, 0.0  ;;  %v1325_v28 = vmul.f32 0.2, %v983_v23  ;;  %v906_v31 = vpop.f32.mrf.mxu1  ;;  %v1262_v39 = vmul.f32 0.2, %v826_v30  ;;  %vm1134_vm3 = vcmp.gt.f32.partialorder %v826_v30, 0.0 }
  0xce   : > { %vm1229_vm2 = vcmp.gt.f32.partialorder %v1063_v24, 0.0  ;;  %v1357_v29 = vmul.f32 0.2, %v1063_v24  ;;  %v1294_v40 = vmul.f32 0.2, %v906_v31  ;;  %vm1166_vm4 = vcmp.gt.f32.partialorder %v906_v31, 0.0 }
  0xcf   : > { %v1453_v35 = vsel %vm1197_vm1, %v983_v23, %v1325_v28  ;;  %2103 = vmatmul.msk.bf16.gmra.mxu0 %vm604_vm0, %v2169_v25  ;;  %v1390_v47 = vsel %vm1134_vm3, %v826_v30, %v1262_v39  ;;  %v2171_v25 = vld [vmem:[%s2658_s17 + $0x70] sm:$0xff] }
  0xd0   : > { %v1485_v36 = vsel %vm1229_vm2, %v1063_v24, %v1357_v29  ;;  %v2400_v37 = vpack.c.bf16 %v1453_v35, %v1452_v33  ;;  %2119 = vmatmul.msk.bf16.gmra.mxu1 %vm604_vm0, %v2185_v26  ;;  %v1422_v48 = vsel %vm1166_vm4, %v906_v31, %v1294_v40  ;;  %v2187_v26 = vld [vmem:[%s2658_s17 + $0xf0] sm:$0xff] }
  0xd1   : > { %v2480_v38 = vpack.c.bf16 %v1485_v36, %v1484_v34  ;;  %2135 = vmatmul.msk.bf16.gmra.mxu2 %vm604_vm0, %v2201_v27  ;;  %v2203_v27 = vld [vmem:[%s2658_s17 + $0x170] sm:$0xff] }
  0xd2   : > { %2576 = vst [vmem:[%s2737_s20 + $0x118] sm:$0xff] %v2400_v37   ;;  %2151 = vmatmul.msk.bf16.gmra.mxu3 %vm604_vm0, %v2217_v32  ;;  %v2219_v32 = vld [vmem:[%s2658_s17 + $0x1f0] sm:$0xff] }
  0xd3   : > { %2592 = vst [vmem:[%s2737_s20 + $0x198] sm:$0xff] %v2480_v38  }
  0xd4   : > { %v986_v41 = vpop.f32.mrf.mxu2  ;;  %v828_v43 = vpop.f32.mrf.mxu0 }
  0xd5   : > { %v1066_v42 = vpop.f32.mrf.mxu3  ;;  %v908_v44 = vpop.f32.mrf.mxu1  ;;  %vm1135_vm5 = vcmp.gt.f32.partialorder %v828_v43, 0.0  ;;  %v1263_v45 = vmul.f32 0.2, %v828_v43  ;;  %v1326_v53 = vmul.f32 0.2, %v986_v41  ;;  %vm1198_vm7 = vcmp.gt.f32.partialorder %v986_v41, 0.0 }
  0xd6   : > { %vm1167_vm6 = vcmp.gt.f32.partialorder %v908_v44, 0.0  ;;  %v1295_v46 = vmul.f32 0.2, %v908_v44  ;;  %v1358_v54 = vmul.f32 0.2, %v1066_v42  ;;  %vm1230_vm8 = vcmp.gt.f32.partialorder %v1066_v42, 0.0 }
  0xd7   : > { %v1391_v49 = vsel %vm1135_vm5, %v828_v43, %v1263_v45  ;;  %v1454_v1 = vsel %vm1198_vm7, %v986_v41, %v1326_v53 }
  0xd8   : > { %v1423_v50 = vsel %vm1167_vm6, %v908_v44, %v1295_v46  ;;  %v2245_v51 = vpack.c.bf16 %v1391_v49, %v1390_v47  ;;  %v1486_v2 = vsel %vm1230_vm8, %v1066_v42, %v1358_v54 }
  0xd9   : > { %v2325_v52 = vpack.c.bf16 %v1423_v50, %v1422_v48 }
  0xda   : > { %2545 = vst [vmem:[%s2737_s20 + $0x20] sm:$0xff] %v2245_v51  }
  0xdb   : > { %2561 = vst [vmem:[%s2737_s20 + $0xa0] sm:$0xff] %v2325_v52  }
  0xdc   : > { %v988_v55 = vpop.f32.mrf.mxu2  ;;  %v831_v62 = vpop.f32.mrf.mxu0 }
  0xdd   : > { %v1068_v56 = vpop.f32.mrf.mxu3  ;;  %vm1199_vm9 = vcmp.gt.f32.partialorder %v988_v55, 0.0  ;;  %v1327_v60 = vmul.f32 0.2, %v988_v55  ;;  %v911_v63 = vpop.f32.mrf.mxu1  ;;  %v1264_v7 = vmul.f32 0.2, %v831_v62  ;;  %vm1136_vm11 = vcmp.gt.f32.partialorder %v831_v62, 0.0 }
  0xde   : > { %vm1231_vm10 = vcmp.gt.f32.partialorder %v1068_v56, 0.0  ;;  %v1359_v61 = vmul.f32 0.2, %v1068_v56  ;;  %v1296_v8 = vmul.f32 0.2, %v911_v63  ;;  %vm1168_vm12 = vcmp.gt.f32.partialorder %v911_v63, 0.0 }
  0xdf   : > { %v1455_v3 = vsel %vm1199_vm9, %v988_v55, %v1327_v60  ;;  %2104 = vmatmul.msk.bf16.gmra.mxu0 %vm604_vm0, %v2170_v57  ;;  %v1392_v15 = vsel %vm1136_vm11, %v831_v62, %v1264_v7  ;;  %v2172_v57 = vld [vmem:[%s2658_s17 + $0x78] sm:$0xff] }
  0xe0   : > { %v1487_v4 = vsel %vm1231_vm10, %v1068_v56, %v1359_v61  ;;  %v2405_v5 = vpack.c.bf16 %v1455_v3, %v1454_v1  ;;  %2120 = vmatmul.msk.bf16.gmra.mxu1 %vm604_vm0, %v2186_v58  ;;  %v1424_v16 = vsel %vm1168_vm12, %v911_v63, %v1296_v8  ;;  %v2188_v58 = vld [vmem:[%s2658_s17 + $0xf8] sm:$0xff] }
  0xe1   : > { %v2485_v6 = vpack.c.bf16 %v1487_v4, %v1486_v2  ;;  %2136 = vmatmul.msk.bf16.gmra.mxu2 %vm604_vm0, %v2202_v59  ;;  %v2204_v59 = vld [vmem:[%s2658_s17 + $0x178] sm:$0xff] }
  0xe2   : > { %2577 = vst [vmem:[%s2737_s20 + $0x120] sm:$0xff] %v2405_v5   ;;  %2152 = vmatmul.msk.bf16.gmra.mxu3 %vm604_vm0, %v2218_v0  ;;  %v2220_v0 = vld [vmem:[%s2658_s17 + $0x1f8] sm:$0xff] }
  0xe3   : > { %2593 = vst [vmem:[%s2737_s20 + $0x1a0] sm:$0xff] %v2485_v6  }
  0xe4   : > { %v991_v9 = vpop.f32.mrf.mxu2  ;;  %v833_v11 = vpop.f32.mrf.mxu0 }
  0xe5   : > { %v1071_v10 = vpop.f32.mrf.mxu3  ;;  %v913_v12 = vpop.f32.mrf.mxu1  ;;  %vm1137_vm13 = vcmp.gt.f32.partialorder %v833_v11, 0.0  ;;  %v1265_v13 = vmul.f32 0.2, %v833_v11  ;;  %v1328_v21 = vmul.f32 0.2, %v991_v9  ;;  %vm1200_vm15 = vcmp.gt.f32.partialorder %v991_v9, 0.0 }
  0xe6   : > { %vm1169_vm14 = vcmp.gt.f32.partialorder %v913_v12, 0.0  ;;  %v1297_v14 = vmul.f32 0.2, %v913_v12  ;;  %v1360_v22 = vmul.f32 0.2, %v1071_v10  ;;  %vm1232_vm1 = vcmp.gt.f32.partialorder %v1071_v10, 0.0 }
  0xe7   : > { %v1393_v17 = vsel %vm1137_vm13, %v833_v11, %v1265_v13  ;;  %v1456_v33 = vsel %vm1200_vm15, %v991_v9, %v1328_v21 }
  0xe8   : > { %v1425_v18 = vsel %vm1169_vm14, %v913_v12, %v1297_v14  ;;  %v2250_v19 = vpack.c.bf16 %v1393_v17, %v1392_v15  ;;  %v1488_v34 = vsel %vm1232_vm1, %v1071_v10, %v1360_v22 }
  0xe9   : > { %v2330_v20 = vpack.c.bf16 %v1425_v18, %v1424_v16 }
  0xea   : > { %2546 = vst [vmem:[%s2737_s20 + $0x28] sm:$0xff] %v2250_v19  }
  0xeb   : > { %2562 = vst [vmem:[%s2737_s20 + $0xa8] sm:$0xff] %v2330_v20  }
  0xec   : > { %v993_v23 = vpop.f32.mrf.mxu2  ;;  %v836_v30 = vpop.f32.mrf.mxu0 }
  0xed   : > { %v1073_v24 = vpop.f32.mrf.mxu3  ;;  %vm1201_vm2 = vcmp.gt.f32.partialorder %v993_v23, 0.0  ;;  %v1329_v28 = vmul.f32 0.2, %v993_v23  ;;  %v916_v31 = vpop.f32.mrf.mxu1  ;;  %v1266_v39 = vmul.f32 0.2, %v836_v30  ;;  %vm1138_vm4 = vcmp.gt.f32.partialorder %v836_v30, 0.0 }
  0xee   : > { %vm1233_vm3 = vcmp.gt.f32.partialorder %v1073_v24, 0.0  ;;  %v1361_v29 = vmul.f32 0.2, %v1073_v24  ;;  %v1298_v40 = vmul.f32 0.2, %v916_v31  ;;  %vm1170_vm5 = vcmp.gt.f32.partialorder %v916_v31, 0.0 }
  0xef   : > { %v1457_v35 = vsel %vm1201_vm2, %v993_v23, %v1329_v28  ;;  %2105 = vmatmul.msk.bf16.gmra.mxu0 %vm604_vm0, %v2171_v25  ;;  %v1394_v47 = vsel %vm1138_vm4, %v836_v30, %v1266_v39 }
  0xf0   : > { %v1489_v36 = vsel %vm1233_vm3, %v1073_v24, %v1361_v29  ;;  %v2410_v37 = vpack.c.bf16 %v1457_v35, %v1456_v33  ;;  %2121 = vmatmul.msk.bf16.gmra.mxu1 %vm604_vm0, %v2187_v26  ;;  %v1426_v48 = vsel %vm1170_vm5, %v916_v31, %v1298_v40 }
  0xf1   : > { %v2490_v38 = vpack.c.bf16 %v1489_v36, %v1488_v34  ;;  %2137 = vmatmul.msk.bf16.gmra.mxu2 %vm604_vm0, %v2203_v27 }
  0xf2   : > { %2578 = vst [vmem:[%s2737_s20 + $0x128] sm:$0xff] %v2410_v37   ;;  %2153 = vmatmul.msk.bf16.gmra.mxu3 %vm604_vm0, %v2219_v32 }
  0xf3   : > { %2594 = vst [vmem:[%s2737_s20 + $0x1a8] sm:$0xff] %v2490_v38  }
  0xf4   : > { %v996_v41 = vpop.f32.mrf.mxu2  ;;  %v838_v43 = vpop.f32.mrf.mxu0 }
  0xf5   : > { %v1076_v42 = vpop.f32.mrf.mxu3  ;;  %v918_v44 = vpop.f32.mrf.mxu1  ;;  %vm1139_vm6 = vcmp.gt.f32.partialorder %v838_v43, 0.0  ;;  %v1267_v45 = vmul.f32 0.2, %v838_v43  ;;  %v1330_v53 = vmul.f32 0.2, %v996_v41  ;;  %vm1202_vm8 = vcmp.gt.f32.partialorder %v996_v41, 0.0 }
  0xf6   : > { %vm1171_vm7 = vcmp.gt.f32.partialorder %v918_v44, 0.0  ;;  %v1299_v46 = vmul.f32 0.2, %v918_v44  ;;  %v1362_v54 = vmul.f32 0.2, %v1076_v42  ;;  %vm1234_vm9 = vcmp.gt.f32.partialorder %v1076_v42, 0.0 }
  0xf7   : > { %v1395_v49 = vsel %vm1139_vm6, %v838_v43, %v1267_v45  ;;  %v1458_v1 = vsel %vm1202_vm8, %v996_v41, %v1330_v53 }
  0xf8   : > { %v1427_v50 = vsel %vm1171_vm7, %v918_v44, %v1299_v46  ;;  %v2255_v51 = vpack.c.bf16 %v1395_v49, %v1394_v47  ;;  %v1490_v2 = vsel %vm1234_vm9, %v1076_v42, %v1362_v54 }
  0xf9   : > { %v2335_v52 = vpack.c.bf16 %v1427_v50, %v1426_v48 }
  0xfa   : > { %2547 = vst [vmem:[%s2737_s20 + $0x30] sm:$0xff] %v2255_v51  }
  0xfb   : > { %2563 = vst [vmem:[%s2737_s20 + $0xb0] sm:$0xff] %v2335_v52  }
  0xfc   : > { %v998_v55 = vpop.f32.mrf.mxu2  ;;  %v841_v62 = vpop.f32.mrf.mxu0 }
  0xfd   : > { %v1078_v56 = vpop.f32.mrf.mxu3  ;;  %vm1203_vm10 = vcmp.gt.f32.partialorder %v998_v55, 0.0  ;;  %v1331_v60 = vmul.f32 0.2, %v998_v55  ;;  %v921_v63 = vpop.f32.mrf.mxu1  ;;  %v1268_v7 = vmul.f32 0.2, %v841_v62  ;;  %vm1140_vm12 = vcmp.gt.f32.partialorder %v841_v62, 0.0 }
  0xfe   : > { %vm1235_vm11 = vcmp.gt.f32.partialorder %v1078_v56, 0.0  ;;  %v1363_v61 = vmul.f32 0.2, %v1078_v56  ;;  %v1300_v8 = vmul.f32 0.2, %v921_v63  ;;  %vm1172_vm13 = vcmp.gt.f32.partialorder %v921_v63, 0.0 }
  0xff   : > { %v1459_v3 = vsel %vm1203_vm10, %v998_v55, %v1331_v60  ;;  %2106 = vmatmul.msk.bf16.gmra.mxu0 %vm604_vm0, %v2172_v57  ;;  %v1396_v15 = vsel %vm1140_vm12, %v841_v62, %v1268_v7 }
 0x100   : > { %v1491_v4 = vsel %vm1235_vm11, %v1078_v56, %v1363_v61  ;;  %v2415_v5 = vpack.c.bf16 %v1459_v3, %v1458_v1  ;;  %2122 = vmatmul.msk.bf16.gmra.mxu1 %vm604_vm0, %v2188_v58  ;;  %v1428_v16 = vsel %vm1172_vm13, %v921_v63, %v1300_v8 }
 0x101   : > { %v2495_v6 = vpack.c.bf16 %v1491_v4, %v1490_v2  ;;  %2138 = vmatmul.msk.bf16.gmra.mxu2 %vm604_vm0, %v2204_v59 }
 0x102   : > { %2579 = vst [vmem:[%s2737_s20 + $0x130] sm:$0xff] %v2415_v5   ;;  %2154 = vmatmul.msk.bf16.gmra.mxu3 %vm604_vm0, %v2220_v0 }
 0x103   : > { %2595 = vst [vmem:[%s2737_s20 + $0x1b0] sm:$0xff] %v2495_v6  }
 0x104   : > { %v1001_v9 = vpop.f32.mrf.mxu2  ;;  %v843_v11 = vpop.f32.mrf.mxu0 }
 0x105   : > { %v1081_v10 = vpop.f32.mrf.mxu3  ;;  %v923_v12 = vpop.f32.mrf.mxu1  ;;  %vm1141_vm14 = vcmp.gt.f32.partialorder %v843_v11, 0.0  ;;  %v1269_v13 = vmul.f32 0.2, %v843_v11  ;;  %v1332_v21 = vmul.f32 0.2, %v1001_v9  ;;  %vm1204_vm0 = vcmp.gt.f32.partialorder %v1001_v9, 0.0 }
 0x106   : > { %vm1173_vm15 = vcmp.gt.f32.partialorder %v923_v12, 0.0  ;;  %v1301_v14 = vmul.f32 0.2, %v923_v12  ;;  %v1364_v22 = vmul.f32 0.2, %v1081_v10  ;;  %vm1236_vm1 = vcmp.gt.f32.partialorder %v1081_v10, 0.0 }
 0x107   : > { %v1397_v17 = vsel %vm1141_vm14, %v843_v11, %v1269_v13  ;;  %v1460_v29 = vsel %vm1204_vm0, %v1001_v9, %v1332_v21 }
 0x108   : > { %v1429_v18 = vsel %vm1173_vm15, %v923_v12, %v1301_v14  ;;  %v2260_v19 = vpack.c.bf16 %v1397_v17, %v1396_v15  ;;  %v1492_v30 = vsel %vm1236_vm1, %v1081_v10, %v1364_v22 }
 0x109   : > { %v2340_v20 = vpack.c.bf16 %v1429_v18, %v1428_v16 }
 0x10a   : > { %2548 = vst [vmem:[%s2737_s20 + $0x38] sm:$0xff] %v2260_v19  }
 0x10b   : > { %2564 = vst [vmem:[%s2737_s20 + $0xb8] sm:$0xff] %v2340_v20  }
 0x10c   : > { %v1003_v23 = vpop.f32.mrf.mxu2  ;;  %v846_v27 = vpop.f32.mrf.mxu0 }
 0x10d   : > { %v1083_v24 = vpop.f32.mrf.mxu3  ;;  %vm1205_vm2 = vcmp.gt.f32.partialorder %v1003_v23, 0.0  ;;  %v1333_v25 = vmul.f32 0.2, %v1003_v23  ;;  %v926_v28 = vpop.f32.mrf.mxu1  ;;  %v1270_v35 = vmul.f32 0.2, %v846_v27  ;;  %vm1142_vm4 = vcmp.gt.f32.partialorder %v846_v27, 0.0 }
 0x10e   : > { %vm1237_vm3 = vcmp.gt.f32.partialorder %v1083_v24, 0.0  ;;  %v1365_v26 = vmul.f32 0.2, %v1083_v24  ;;  %v1302_v36 = vmul.f32 0.2, %v926_v28  ;;  %vm1174_vm5 = vcmp.gt.f32.partialorder %v926_v28, 0.0 }
 0x10f   : > { %v1461_v31 = vsel %vm1205_vm2, %v1003_v23, %v1333_v25  ;;  %v1398_v43 = vsel %vm1142_vm4, %v846_v27, %v1270_v35 }
 0x110   : > { %v1493_v32 = vsel %vm1237_vm3, %v1083_v24, %v1365_v26  ;;  %v2420_v33 = vpack.c.bf16 %v1461_v31, %v1460_v29  ;;  %v1430_v44 = vsel %vm1174_vm5, %v926_v28, %v1302_v36 }
 0x111   : > { %v2500_v34 = vpack.c.bf16 %v1493_v32, %v1492_v30 }
 0x112   : > { %2580 = vst [vmem:[%s2737_s20 + $0x138] sm:$0xff] %v2420_v33  }
 0x113   : > { %2596 = vst [vmem:[%s2737_s20 + $0x1b8] sm:$0xff] %v2500_v34  }
 0x114   : > { %v1006_v37 = vpop.f32.mrf.mxu2  ;;  %v848_v39 = vpop.f32.mrf.mxu0 }
 0x115   : > { %v1086_v38 = vpop.f32.mrf.mxu3  ;;  %v928_v40 = vpop.f32.mrf.mxu1  ;;  %vm1143_vm6 = vcmp.gt.f32.partialorder %v848_v39, 0.0  ;;  %v1271_v41 = vmul.f32 0.2, %v848_v39  ;;  %v1334_v49 = vmul.f32 0.2, %v1006_v37  ;;  %vm1206_vm8 = vcmp.gt.f32.partialorder %v1006_v37, 0.0 }
 0x116   : > { %vm1175_vm7 = vcmp.gt.f32.partialorder %v928_v40, 0.0  ;;  %v1303_v42 = vmul.f32 0.2, %v928_v40  ;;  %v1366_v50 = vmul.f32 0.2, %v1086_v38  ;;  %vm1238_vm9 = vcmp.gt.f32.partialorder %v1086_v38, 0.0 }
 0x117   : > { %v1399_v45 = vsel %vm1143_vm6, %v848_v39, %v1271_v41  ;;  %v1462_v57 = vsel %vm1206_vm8, %v1006_v37, %v1334_v49 }
 0x118   : > { %v1431_v46 = vsel %vm1175_vm7, %v928_v40, %v1303_v42  ;;  %v2265_v47 = vpack.c.bf16 %v1399_v45, %v1398_v43  ;;  %v1494_v58 = vsel %vm1238_vm9, %v1086_v38, %v1366_v50 }
 0x119   : > { %v2345_v48 = vpack.c.bf16 %v1431_v46, %v1430_v44 }
 0x11a   : > { %2549 = vst [vmem:[%s2737_s20 + $0x40] sm:$0xff] %v2265_v47  }
 0x11b   : > { %2565 = vst [vmem:[%s2737_s20 + $0xc0] sm:$0xff] %v2345_v48  }
 0x11c   : > { %v1008_v51 = vpop.f32.mrf.mxu2  ;;  %v851_v55 = vpop.f32.mrf.mxu0 }
 0x11d   : > { %v1088_v52 = vpop.f32.mrf.mxu3  ;;  %vm1207_vm10 = vcmp.gt.f32.partialorder %v1008_v51, 0.0  ;;  %v1335_v53 = vmul.f32 0.2, %v1008_v51  ;;  %v931_v56 = vpop.f32.mrf.mxu1  ;;  %v1272_v63 = vmul.f32 0.2, %v851_v55  ;;  %vm1144_vm12 = vcmp.gt.f32.partialorder %v851_v55, 0.0 }
 0x11e   : > { %vm1239_vm11 = vcmp.gt.f32.partialorder %v1088_v52, 0.0  ;;  %v1367_v54 = vmul.f32 0.2, %v1088_v52  ;;  %v1304_v1 = vmul.f32 0.2, %v931_v56  ;;  %vm1176_vm13 = vcmp.gt.f32.partialorder %v931_v56, 0.0 }
 0x11f   : > { %v1463_v59 = vsel %vm1207_vm10, %v1008_v51, %v1335_v53  ;;  %v1400_v7 = vsel %vm1144_vm12, %v851_v55, %v1272_v63 }
 0x120   : > { %v1495_v60 = vsel %vm1239_vm11, %v1088_v52, %v1367_v54  ;;  %v2425_v61 = vpack.c.bf16 %v1463_v59, %v1462_v57  ;;  %v1432_v9 = vsel %vm1176_vm13, %v931_v56, %v1304_v1 }
 0x121   : > { %v2505_v62 = vpack.c.bf16 %v1495_v60, %v1494_v58 }
 0x122   : > { %2581 = vst [vmem:[%s2737_s20 + $0x140] sm:$0xff] %v2425_v61  }
 0x123   : > { %2597 = vst [vmem:[%s2737_s20 + $0x1c0] sm:$0xff] %v2505_v62  }
 0x124   : > { %v1011_v0 = vpop.f32.mrf.mxu2  ;;  %v853_v3 = vpop.f32.mrf.mxu0 }
 0x125   : > { %v1091_v2 = vpop.f32.mrf.mxu3  ;;  %vm1145_vm14 = vcmp.gt.f32.partialorder %v853_v3, 0.0  ;;  %v1273_v4 = vmul.f32 0.2, %v853_v3  ;;  %v933_v5 = vpop.f32.mrf.mxu1  ;;  %v1336_v13 = vmul.f32 0.2, %v1011_v0  ;;  %vm1208_vm0 = vcmp.gt.f32.partialorder %v1011_v0, 0.0 }
 0x126   : > { %vm1177_vm15 = vcmp.gt.f32.partialorder %v933_v5, 0.0  ;;  %v1305_v6 = vmul.f32 0.2, %v933_v5  ;;  %v1368_v14 = vmul.f32 0.2, %v1091_v2  ;;  %vm1240_vm1 = vcmp.gt.f32.partialorder %v1091_v2, 0.0 }
 0x127   : > { %v1401_v8 = vsel %vm1145_vm14, %v853_v3, %v1273_v4  ;;  %v1464_v21 = vsel %vm1208_vm0, %v1011_v0, %v1336_v13 }
 0x128   : > { %v2270_v10 = vpack.c.bf16 %v1401_v8, %v1400_v7  ;;  %v1433_v11 = vsel %vm1177_vm15, %v933_v5, %v1305_v6  ;;  %v1496_v23 = vsel %vm1240_vm1, %v1091_v2, %v1368_v14 }
 0x129   : > { %v2350_v12 = vpack.c.bf16 %v1433_v11, %v1432_v9 }
 0x12a   : > { %2550 = vst [vmem:[%s2737_s20 + $0x48] sm:$0xff] %v2270_v10  }
 0x12b   : > { %2566 = vst [vmem:[%s2737_s20 + $0xc8] sm:$0xff] %v2350_v12  }
 0x12c   : > { %v1013_v15 = vpop.f32.mrf.mxu2  ;;  %v856_v18 = vpop.f32.mrf.mxu0 }
 0x12d   : > { %vm1209_vm2 = vcmp.gt.f32.partialorder %v1013_v15, 0.0  ;;  %v1337_v16 = vmul.f32 0.2, %v1013_v15  ;;  %v1093_v17 = vpop.f32.mrf.mxu3  ;;  %v936_v20 = vpop.f32.mrf.mxu1  ;;  %v1274_v27 = vmul.f32 0.2, %v856_v18  ;;  %vm1146_vm4 = vcmp.gt.f32.partialorder %v856_v18, 0.0 }
 0x12e   : > { %vm1241_vm3 = vcmp.gt.f32.partialorder %v1093_v17, 0.0  ;;  %v1369_v19 = vmul.f32 0.2, %v1093_v17  ;;  %v1306_v29 = vmul.f32 0.2, %v936_v20  ;;  %vm1178_vm5 = vcmp.gt.f32.partialorder %v936_v20, 0.0 }
 0x12f   : > { %v1465_v22 = vsel %vm1209_vm2, %v1013_v15, %v1337_v16  ;;  %v1402_v35 = vsel %vm1146_vm4, %v856_v18, %v1274_v27 }
 0x130   : > { %v2430_v24 = vpack.c.bf16 %v1465_v22, %v1464_v21  ;;  %v1497_v25 = vsel %vm1241_vm3, %v1093_v17, %v1369_v19  ;;  %v1434_v37 = vsel %vm1178_vm5, %v936_v20, %v1306_v29 }
 0x131   : > { %v2510_v26 = vpack.c.bf16 %v1497_v25, %v1496_v23 }
 0x132   : > { %2582 = vst [vmem:[%s2737_s20 + $0x148] sm:$0xff] %v2430_v24  }
 0x133   : > { %2598 = vst [vmem:[%s2737_s20 + $0x1c8] sm:$0xff] %v2510_v26  }
 0x134   : > { %v1016_v28 = vpop.f32.mrf.mxu2  ;;  %v858_v31 = vpop.f32.mrf.mxu0 }
 0x135   : > { %v1096_v30 = vpop.f32.mrf.mxu3  ;;  %vm1147_vm6 = vcmp.gt.f32.partialorder %v858_v31, 0.0  ;;  %v1275_v32 = vmul.f32 0.2, %v858_v31  ;;  %v938_v33 = vpop.f32.mrf.mxu1  ;;  %v1338_v41 = vmul.f32 0.2, %v1016_v28  ;;  %vm1210_vm8 = vcmp.gt.f32.partialorder %v1016_v28, 0.0 }
 0x136   : > { %vm1179_vm7 = vcmp.gt.f32.partialorder %v938_v33, 0.0  ;;  %v1307_v34 = vmul.f32 0.2, %v938_v33  ;;  %v1370_v42 = vmul.f32 0.2, %v1096_v30  ;;  %vm1242_vm9 = vcmp.gt.f32.partialorder %v1096_v30, 0.0 }
 0x137   : > { %v1403_v36 = vsel %vm1147_vm6, %v858_v31, %v1275_v32  ;;  %v1466_v49 = vsel %vm1210_vm8, %v1016_v28, %v1338_v41 }
 0x138   : > { %v2275_v38 = vpack.c.bf16 %v1403_v36, %v1402_v35  ;;  %v1435_v39 = vsel %vm1179_vm7, %v938_v33, %v1307_v34  ;;  %v1498_v51 = vsel %vm1242_vm9, %v1096_v30, %v1370_v42 }
 0x139   : > { %v2355_v40 = vpack.c.bf16 %v1435_v39, %v1434_v37 }
 0x13a   : > { %2551 = vst [vmem:[%s2737_s20 + $0x50] sm:$0xff] %v2275_v38  }
 0x13b   : > { %2567 = vst [vmem:[%s2737_s20 + $0xd0] sm:$0xff] %v2355_v40  }
 0x13c   : > { %v1018_v43 = vpop.f32.mrf.mxu2  ;;  %v861_v46 = vpop.f32.mrf.mxu0 }
 0x13d   : > { %vm1211_vm10 = vcmp.gt.f32.partialorder %v1018_v43, 0.0  ;;  %v1339_v44 = vmul.f32 0.2, %v1018_v43  ;;  %v1098_v45 = vpop.f32.mrf.mxu3  ;;  %v941_v48 = vpop.f32.mrf.mxu1  ;;  %v1276_v55 = vmul.f32 0.2, %v861_v46  ;;  %vm1148_vm12 = vcmp.gt.f32.partialorder %v861_v46, 0.0 }
 0x13e   : > { %vm1243_vm11 = vcmp.gt.f32.partialorder %v1098_v45, 0.0  ;;  %v1371_v47 = vmul.f32 0.2, %v1098_v45  ;;  %v1308_v57 = vmul.f32 0.2, %v941_v48  ;;  %vm1180_vm13 = vcmp.gt.f32.partialorder %v941_v48, 0.0 }
 0x13f   : > { %v1467_v50 = vsel %vm1211_vm10, %v1018_v43, %v1339_v44  ;;  %v1404_v63 = vsel %vm1148_vm12, %v861_v46, %v1276_v55 }
 0x140   : > { %v2435_v52 = vpack.c.bf16 %v1467_v50, %v1466_v49  ;;  %v1499_v53 = vsel %vm1243_vm11, %v1098_v45, %v1371_v47  ;;  %v1436_v1 = vsel %vm1180_vm13, %v941_v48, %v1308_v57 }
 0x141   : > { %v2515_v54 = vpack.c.bf16 %v1499_v53, %v1498_v51 }
 0x142   : > { %2583 = vst [vmem:[%s2737_s20 + $0x150] sm:$0xff] %v2435_v52  }
 0x143   : > { %2599 = vst [vmem:[%s2737_s20 + $0x1d0] sm:$0xff] %v2515_v54  }
 0x144   : > { %v1021_v56 = vpop.f32.mrf.mxu2  ;;  %v863_v59 = vpop.f32.mrf.mxu0 }
 0x145   : > { %v1101_v58 = vpop.f32.mrf.mxu3  ;;  %vm1149_vm14 = vcmp.gt.f32.partialorder %v863_v59, 0.0  ;;  %v1277_v60 = vmul.f32 0.2, %v863_v59  ;;  %v943_v61 = vpop.f32.mrf.mxu1  ;;  %v1340_v5 = vmul.f32 0.2, %v1021_v56  ;;  %vm1212_vm0 = vcmp.gt.f32.partialorder %v1021_v56, 0.0 }
 0x146   : > { %vm1181_vm15 = vcmp.gt.f32.partialorder %v943_v61, 0.0  ;;  %v1309_v62 = vmul.f32 0.2, %v943_v61  ;;  %v1372_v6 = vmul.f32 0.2, %v1101_v58  ;;  %vm1244_vm1 = vcmp.gt.f32.partialorder %v1101_v58, 0.0 }
 0x147   : > { %v1405_v0 = vsel %vm1149_vm14, %v863_v59, %v1277_v60  ;;  %v1468_v13 = vsel %vm1212_vm0, %v1021_v56, %v1340_v5 }
 0x148   : > { %v2280_v2 = vpack.c.bf16 %v1405_v0, %v1404_v63  ;;  %v1437_v3 = vsel %vm1181_vm15, %v943_v61, %v1309_v62  ;;  %v1500_v15 = vsel %vm1244_vm1, %v1101_v58, %v1372_v6 }
 0x149   : > { %v2360_v4 = vpack.c.bf16 %v1437_v3, %v1436_v1 }
 0x14a   : > { %2552 = vst [vmem:[%s2737_s20 + $0x58] sm:$0xff] %v2280_v2  }
 0x14b   : > { %2568 = vst [vmem:[%s2737_s20 + $0xd8] sm:$0xff] %v2360_v4  }
 0x14c   : > { %v1023_v7 = vpop.f32.mrf.mxu2  ;;  %v866_v10 = vpop.f32.mrf.mxu0 }
 0x14d   : > { %vm1213_vm2 = vcmp.gt.f32.partialorder %v1023_v7, 0.0  ;;  %v1341_v8 = vmul.f32 0.2, %v1023_v7  ;;  %v1103_v9 = vpop.f32.mrf.mxu3  ;;  %v946_v12 = vpop.f32.mrf.mxu1  ;;  %v1278_v19 = vmul.f32 0.2, %v866_v10  ;;  %vm1150_vm4 = vcmp.gt.f32.partialorder %v866_v10, 0.0 }
 0x14e   : > { %vm1245_vm3 = vcmp.gt.f32.partialorder %v1103_v9, 0.0  ;;  %v1373_v11 = vmul.f32 0.2, %v1103_v9  ;;  %v1310_v21 = vmul.f32 0.2, %v946_v12  ;;  %vm1182_vm5 = vcmp.gt.f32.partialorder %v946_v12, 0.0 }
 0x14f   : > { %v1469_v14 = vsel %vm1213_vm2, %v1023_v7, %v1341_v8  ;;  %v1406_v27 = vsel %vm1150_vm4, %v866_v10, %v1278_v19 }
 0x150   : > { %v2440_v16 = vpack.c.bf16 %v1469_v14, %v1468_v13  ;;  %v1501_v17 = vsel %vm1245_vm3, %v1103_v9, %v1373_v11  ;;  %v1438_v29 = vsel %vm1182_vm5, %v946_v12, %v1310_v21 }
 0x151   : > { %v2520_v18 = vpack.c.bf16 %v1501_v17, %v1500_v15 }
 0x152   : > { %2584 = vst [vmem:[%s2737_s20 + $0x158] sm:$0xff] %v2440_v16  }
 0x153   : > { %2600 = vst [vmem:[%s2737_s20 + $0x1d8] sm:$0xff] %v2520_v18  }
 0x154   : > { %v1026_v20 = vpop.f32.mrf.mxu2  ;;  %v868_v23 = vpop.f32.mrf.mxu0 }
 0x155   : > { %v1106_v22 = vpop.f32.mrf.mxu3  ;;  %vm1151_vm6 = vcmp.gt.f32.partialorder %v868_v23, 0.0  ;;  %v1279_v24 = vmul.f32 0.2, %v868_v23  ;;  %v948_v25 = vpop.f32.mrf.mxu1  ;;  %v1342_v33 = vmul.f32 0.2, %v1026_v20  ;;  %vm1214_vm8 = vcmp.gt.f32.partialorder %v1026_v20, 0.0 }
 0x156   : > { %vm1183_vm7 = vcmp.gt.f32.partialorder %v948_v25, 0.0  ;;  %v1311_v26 = vmul.f32 0.2, %v948_v25  ;;  %v1374_v34 = vmul.f32 0.2, %v1106_v22  ;;  %vm1246_vm9 = vcmp.gt.f32.partialorder %v1106_v22, 0.0 }
 0x157   : > { %v1407_v28 = vsel %vm1151_vm6, %v868_v23, %v1279_v24  ;;  %v1470_v41 = vsel %vm1214_vm8, %v1026_v20, %v1342_v33 }
 0x158   : > { %v2285_v30 = vpack.c.bf16 %v1407_v28, %v1406_v27  ;;  %v1439_v31 = vsel %vm1183_vm7, %v948_v25, %v1311_v26  ;;  %v1502_v43 = vsel %vm1246_vm9, %v1106_v22, %v1374_v34 }
 0x159   : > { %v2365_v32 = vpack.c.bf16 %v1439_v31, %v1438_v29 }
 0x15a   : > { %2553 = vst [vmem:[%s2737_s20 + $0x60] sm:$0xff] %v2285_v30  }
 0x15b   : > { %2569 = vst [vmem:[%s2737_s20 + $0xe0] sm:$0xff] %v2365_v32  }
 0x15c   : > { %v1028_v35 = vpop.f32.mrf.mxu2  ;;  %v871_v38 = vpop.f32.mrf.mxu0 }
 0x15d   : > { %vm1215_vm10 = vcmp.gt.f32.partialorder %v1028_v35, 0.0  ;;  %v1343_v36 = vmul.f32 0.2, %v1028_v35  ;;  %v1108_v37 = vpop.f32.mrf.mxu3  ;;  %v951_v40 = vpop.f32.mrf.mxu1  ;;  %v1280_v47 = vmul.f32 0.2, %v871_v38  ;;  %vm1152_vm12 = vcmp.gt.f32.partialorder %v871_v38, 0.0 }
 0x15e   : > { %vm1247_vm11 = vcmp.gt.f32.partialorder %v1108_v37, 0.0  ;;  %v1375_v39 = vmul.f32 0.2, %v1108_v37  ;;  %v1312_v49 = vmul.f32 0.2, %v951_v40  ;;  %vm1184_vm13 = vcmp.gt.f32.partialorder %v951_v40, 0.0 }
 0x15f   : > { %v1471_v42 = vsel %vm1215_vm10, %v1028_v35, %v1343_v36  ;;  %v1408_v55 = vsel %vm1152_vm12, %v871_v38, %v1280_v47 }
 0x160   : > { %v2445_v44 = vpack.c.bf16 %v1471_v42, %v1470_v41  ;;  %v1503_v45 = vsel %vm1247_vm11, %v1108_v37, %v1375_v39  ;;  %v1440_v57 = vsel %vm1184_vm13, %v951_v40, %v1312_v49 }
 0x161   : > { %v2525_v46 = vpack.c.bf16 %v1503_v45, %v1502_v43 }
 0x162   : > { %2585 = vst [vmem:[%s2737_s20 + $0x160] sm:$0xff] %v2445_v44  }
 0x163   : > { %2601 = vst [vmem:[%s2737_s20 + $0x1e0] sm:$0xff] %v2525_v46  }
 0x164   : > { %v1031_v48 = vpop.f32.mrf.mxu2  ;;  %v873_v51 = vpop.f32.mrf.mxu0 }
 0x165   : > { %v1111_v50 = vpop.f32.mrf.mxu3  ;;  %vm1153_vm14 = vcmp.gt.f32.partialorder %v873_v51, 0.0  ;;  %v1281_v52 = vmul.f32 0.2, %v873_v51  ;;  %v953_v53 = vpop.f32.mrf.mxu1  ;;  %v1344_v61 = vmul.f32 0.2, %v1031_v48  ;;  %vm1216_vm0 = vcmp.gt.f32.partialorder %v1031_v48, 0.0 }
 0x166   : > { %vm1185_vm15 = vcmp.gt.f32.partialorder %v953_v53, 0.0  ;;  %v1313_v54 = vmul.f32 0.2, %v953_v53  ;;  %v1376_v62 = vmul.f32 0.2, %v1111_v50  ;;  %vm1248_vm1 = vcmp.gt.f32.partialorder %v1111_v50, 0.0 }
 0x167   : > { %v1409_v56 = vsel %vm1153_vm14, %v873_v51, %v1281_v52  ;;  %v1472_v5 = vsel %vm1216_vm0, %v1031_v48, %v1344_v61 }
 0x168   : > { %v2290_v58 = vpack.c.bf16 %v1409_v56, %v1408_v55  ;;  %v1441_v59 = vsel %vm1185_vm15, %v953_v53, %v1313_v54  ;;  %v1504_v7 = vsel %vm1248_vm1, %v1111_v50, %v1376_v62 }
 0x169   : > { %v2370_v60 = vpack.c.bf16 %v1441_v59, %v1440_v57 }
 0x16a   : > { %2554 = vst [vmem:[%s2737_s20 + $0x68] sm:$0xff] %v2290_v58  }
 0x16b   : > { %2570 = vst [vmem:[%s2737_s20 + $0xe8] sm:$0xff] %v2370_v60  }
 0x16c   : > { %v1033_v63 = vpop.f32.mrf.mxu2  ;;  %v876_v2 = vpop.f32.mrf.mxu0 }
 0x16d   : > { %vm1217_vm2 = vcmp.gt.f32.partialorder %v1033_v63, 0.0  ;;  %v1345_v0 = vmul.f32 0.2, %v1033_v63  ;;  %v1113_v1 = vpop.f32.mrf.mxu3  ;;  %v956_v4 = vpop.f32.mrf.mxu1  ;;  %v1282_v11 = vmul.f32 0.2, %v876_v2  ;;  %vm1154_vm4 = vcmp.gt.f32.partialorder %v876_v2, 0.0 }
 0x16e   : > { %vm1249_vm3 = vcmp.gt.f32.partialorder %v1113_v1, 0.0  ;;  %v1377_v3 = vmul.f32 0.2, %v1113_v1  ;;  %v1314_v13 = vmul.f32 0.2, %v956_v4  ;;  %vm1186_vm5 = vcmp.gt.f32.partialorder %v956_v4, 0.0 }
 0x16f   : > { %v1473_v6 = vsel %vm1217_vm2, %v1033_v63, %v1345_v0  ;;  %v1410_v19 = vsel %vm1154_vm4, %v876_v2, %v1282_v11 }
 0x170   : > { %v2450_v8 = vpack.c.bf16 %v1473_v6, %v1472_v5  ;;  %v1505_v9 = vsel %vm1249_vm3, %v1113_v1, %v1377_v3  ;;  %v1442_v21 = vsel %vm1186_vm5, %v956_v4, %v1314_v13 }
 0x171   : > { %v2530_v10 = vpack.c.bf16 %v1505_v9, %v1504_v7 }
 0x172   : > { %2586 = vst [vmem:[%s2737_s20 + $0x168] sm:$0xff] %v2450_v8  }
 0x173   : > { %2602 = vst [vmem:[%s2737_s20 + $0x1e8] sm:$0xff] %v2530_v10  }
 0x174   : > { %v1036_v12 = vpop.f32.mrf.mxu2  ;;  %v878_v15 = vpop.f32.mrf.mxu0 }
 0x175   : > { %v1116_v14 = vpop.f32.mrf.mxu3  ;;  %vm1155_vm6 = vcmp.gt.f32.partialorder %v878_v15, 0.0  ;;  %v1283_v16 = vmul.f32 0.2, %v878_v15  ;;  %v958_v17 = vpop.f32.mrf.mxu1  ;;  %v1346_v25 = vmul.f32 0.2, %v1036_v12  ;;  %vm1218_vm8 = vcmp.gt.f32.partialorder %v1036_v12, 0.0 }
 0x176   : > { %vm1187_vm7 = vcmp.gt.f32.partialorder %v958_v17, 0.0  ;;  %v1315_v18 = vmul.f32 0.2, %v958_v17  ;;  %v1378_v26 = vmul.f32 0.2, %v1116_v14  ;;  %vm1250_vm9 = vcmp.gt.f32.partialorder %v1116_v14, 0.0 }
 0x177   : > { %v1411_v20 = vsel %vm1155_vm6, %v878_v15, %v1283_v16  ;;  %v1474_v33 = vsel %vm1218_vm8, %v1036_v12, %v1346_v25 }
 0x178   : > { %v2295_v22 = vpack.c.bf16 %v1411_v20, %v1410_v19  ;;  %v1443_v23 = vsel %vm1187_vm7, %v958_v17, %v1315_v18  ;;  %v1506_v35 = vsel %vm1250_vm9, %v1116_v14, %v1378_v26 }
 0x179   : > { %v2375_v24 = vpack.c.bf16 %v1443_v23, %v1442_v21 }
 0x17a   : > { %2555 = vst [vmem:[%s2737_s20 + $0x70] sm:$0xff] %v2295_v22  }
 0x17b   : > { %2571 = vst [vmem:[%s2737_s20 + $0xf0] sm:$0xff] %v2375_v24  }
 0x17c   : > { %v1038_v27 = vpop.f32.mrf.mxu2  ;;  %v881_v30 = vpop.f32.mrf.mxu0 }
 0x17d   : > { %vm1219_vm10 = vcmp.gt.f32.partialorder %v1038_v27, 0.0  ;;  %v1347_v28 = vmul.f32 0.2, %v1038_v27  ;;  %v1118_v29 = vpop.f32.mrf.mxu3  ;;  %v961_v32 = vpop.f32.mrf.mxu1  ;;  %v1284_v39 = vmul.f32 0.2, %v881_v30  ;;  %vm1156_vm12 = vcmp.gt.f32.partialorder %v881_v30, 0.0 }
 0x17e   : > { %vm1251_vm11 = vcmp.gt.f32.partialorder %v1118_v29, 0.0  ;;  %v1379_v31 = vmul.f32 0.2, %v1118_v29  ;;  %v1316_v41 = vmul.f32 0.2, %v961_v32  ;;  %vm1188_vm13 = vcmp.gt.f32.partialorder %v961_v32, 0.0 }
 0x17f   : > { %v1475_v34 = vsel %vm1219_vm10, %v1038_v27, %v1347_v28  ;;  %v1412_v47 = vsel %vm1156_vm12, %v881_v30, %v1284_v39 }
 0x180   : > { %v2455_v36 = vpack.c.bf16 %v1475_v34, %v1474_v33  ;;  %v1507_v37 = vsel %vm1251_vm11, %v1118_v29, %v1379_v31  ;;  %v1444_v49 = vsel %vm1188_vm13, %v961_v32, %v1316_v41 }
 0x181   : > { %v2535_v38 = vpack.c.bf16 %v1507_v37, %v1506_v35 }
 0x182   : > { %2587 = vst [vmem:[%s2737_s20 + $0x170] sm:$0xff] %v2455_v36  }
 0x183   : > { %2603 = vst [vmem:[%s2737_s20 + $0x1f0] sm:$0xff] %v2535_v38  }
 0x184   : > { %v1041_v40 = vpop.f32.mrf.mxu2  ;;  %v883_v43 = vpop.f32.mrf.mxu0 }
 0x185   : > { %v1121_v42 = vpop.f32.mrf.mxu3  ;;  %vm1157_vm14 = vcmp.gt.f32.partialorder %v883_v43, 0.0  ;;  %v1285_v44 = vmul.f32 0.2, %v883_v43  ;;  %v963_v45 = vpop.f32.mrf.mxu1  ;;  %v1348_v53 = vmul.f32 0.2, %v1041_v40  ;;  %vm1220_vm0 = vcmp.gt.f32.partialorder %v1041_v40, 0.0 }
 0x186   : > { %vm1189_vm15 = vcmp.gt.f32.partialorder %v963_v45, 0.0  ;;  %v1317_v46 = vmul.f32 0.2, %v963_v45  ;;  %v1380_v54 = vmul.f32 0.2, %v1121_v42  ;;  %vm1252_vm1 = vcmp.gt.f32.partialorder %v1121_v42, 0.0 }
 0x187   : > { %v1413_v48 = vsel %vm1157_vm14, %v883_v43, %v1285_v44  ;;  %v1476_v59 = vsel %vm1220_vm0, %v1041_v40, %v1348_v53 }
 0x188   : > { %v2300_v50 = vpack.c.bf16 %v1413_v48, %v1412_v47  ;;  %v1445_v51 = vsel %vm1189_vm15, %v963_v45, %v1317_v46  ;;  %v1508_v61 = vsel %vm1252_vm1, %v1121_v42, %v1380_v54 }
 0x189   : > { %v2380_v52 = vpack.c.bf16 %v1445_v51, %v1444_v49 }
 0x18a   : > { %2556 = vst [vmem:[%s2737_s20 + $0x78] sm:$0xff] %v2300_v50  }
 0x18b   : > { %2572 = vst [vmem:[%s2737_s20 + $0xf8] sm:$0xff] %v2380_v52  }
 0x18c   : > { %v1043_v55 = vpop.f32.mrf.mxu2 }
 0x18d   : > { %vm1221_vm2 = vcmp.gt.f32.partialorder %v1043_v55, 0.0  ;;  %v1349_v56 = vmul.f32 0.2, %v1043_v55  ;;  %v1123_v57 = vpop.f32.mrf.mxu3 }
 0x18e   : > { %vm1253_vm3 = vcmp.gt.f32.partialorder %v1123_v57, 0.0  ;;  %v1381_v58 = vmul.f32 0.2, %v1123_v57 }
 0x18f   : > { %v1477_v60 = vsel %vm1221_vm2, %v1043_v55, %v1349_v56 }
 0x190   : > { %v2460_v62 = vpack.c.bf16 %v1477_v60, %v1476_v59  ;;  %v1509_v63 = vsel %vm1253_vm3, %v1123_v57, %v1381_v58 }
 0x191   : > { %v2540_v0 = vpack.c.bf16 %v1509_v63, %v1508_v61 }
 0x192   : > { %2588 = vst [vmem:[%s2737_s20 + $0x178] sm:$0xff] %v2460_v62  }
 0x193   : > { %2604 = vst [vmem:[%s2737_s20 + $0x1f8] sm:$0xff] %v2540_v0  }
 0x194 PF: > { %s12_s9 = sadd.s32 1, %s2622_s9  }
 0x195   : > { %p9_p4 = scmp.ge.s32.totalorder %s12_s9, 4  }
 0x197   :  { %11 = sbr.rel (!%p9_p4) target bundleno = 1 (0x1), region = 58 }

// kernel: discriminator_forward.4
= control target key start
LH: loop header
LB: loop body
LE: loop exit
PB: predicated region body
PF: predicated region fallthrough
CT: control target
= control target key end

     0   :  { %s5427_s9 = smov 0   ;;  %s5429_s10 = smov 0   ;;  %s6938_s0 = inlined_call_operand.vmem [shape: bf16[16,512,128], index: 0, kind: input, shape index: {}]   ;;  %s6939_s1 = inlined_call_operand.vmem [shape: bf16[16,128,256], index: 1, kind: input, shape index: {}]   ;;  %s6940_s2 = inlined_call_operand.vmem [shape: bf16[512,256], index: 2, kind: output, shape index: {}]  }
   0x1   :  { %s5431_s11 = smov 0   ;;  %s5433_s12 = smov 0  }
   0x2   :  { %s5435_s13 = smov 0   ;;  %s5437_s14 = smov 0  }
   0x3   :  { %s5439_s15 = smov 0   ;;  %s5441_s16 = smov 0  }
   0x4   :  { %s5443_s17 = smov 0  }
   0x5 LB: > { %s21_s18 = sadd.s32 1, %s5402_s15  ;;  %s24_s19 = sadd.s32 1, %s5406_s16  ;;  %s5410_s17 = sphi %s5443_s17, %s12_s17   ;;  %s5406_s16 = sphi %s5441_s16, %s7133_s16   ;;  %s5402_s15 = sphi %s5439_s15, %s7132_s15   ;;  %s5398_s14 = sphi %s5437_s14, %s7131_s14   ;;  %s5394_s13 = sphi %s5435_s13, %s7130_s13   ;;  %s5390_s12 = sphi %s5433_s12, %s7129_s12   ;;  %s5386_s11 = sphi %s5431_s11, %s7128_s11   ;;  %s5382_s10 = sphi %s5429_s10, %s7127_s10   ;;  %s5378_s9 = sphi %s5427_s9, %s7126_s9  }
   0x6   : > { %p22_p0 = scmp.ge.s32.totalorder %s21_s18, 4  ;;  %p66_p1 = scmp.ne.s32.totalorder %s5390_s12, %s5386_s11 }
   0x7   : > { %s4013_s20 = sadd.s32 4294967295, %s5410_s17   ;;  %p67_p2 = scmp.eq.s32.totalorder %s5410_s17, 0 }
   0x8   : > { %s7135_s18 = smov (%p22_p0, %s21_s18), 0  ;;  %s7137_s19 = smov (!%p22_p0, %s24_s19), %s5406_s16 }
   0x9   : > { %p26_p3 = scmp.ge.s32.totalorder %s7137_s19, 2  ;;  %s54_s21 = ssub.s32 %s5402_s15, %s7135_s18 }
   0xa   : > { %p5483_p4 = por %p67_p2, %p66_p1  ;;  %p95_p5 = scmp.ne.s32.totalorder %s5382_s10, %s5378_s9 }
   0xb   : > { %s7139_s19 = smov (%p26_p3, %s7137_s19), 0  ;;  %s59_s23 = sadd.s32 1, %s5390_s12 }
   0xc   : > { %p96_p6 = scmp.eq.s32.totalorder %s4013_s20, 7  ;;  %s55_s24 = ssub.s32 %s5406_s16, %s7139_s19 }
   0xd   : > { %s85_s25 = sadd.s32 1, %s5382_s10  ;;  %s56_s26 = sor.u32 %s55_s24, %s54_s21 }
   0xe   : > { %p83_p7 = scmp.eq.s32.totalorder %s55_s24, 0  ;;  %p57_p8 = scmp.eq.s32.totalorder %s56_s26, 0 }
   0xf   : > { %p5495_p9 = por %p96_p6, %p95_p5  ;;  %p4016_p10 = scmp.ge.s32.totalorder %s5410_s17, 8 }
  0x10   : > { %s5500_s28 = scalar_select %p83_p7, %s5382_s10, %s85_s25  }
  0x11   : > { %s5503_s29 = scalar_select %p57_p8, %s5390_s12, %s59_s23  }
  0x12   : > { %118 = sbr.rel (%p4016_p10) target bundleno = 93 (0x5d), region = 16 }
  0x17   : > { %131 = sbr.rel (!%p5483_p4) target bundleno = 93 (0x5d), region = 24  ;;  %s133_s30 = sand.u32 (%p5483_p4), 1, %s5390_s12  }
  0x18   : > { %s4913_s3 = sshll.u32 (%p5483_p4), %s5402_s15, 7  ;;  %s4017_s4 = sshll.u32 (%p5483_p4), %s133_s30, 8 }
  0x19   : > { %s138_s5 = sadd.s32 (%p5483_p4), %s5406_s16, %s4913_s3  ;;  %s5519_s21 = scalar_lea.vmem (%p5483_p4), [#allocation3], %s4017_s4 }
  0x1a   : > { %s4020_s6 = sshll.u32 (%p5483_p4), %s138_s5, 2 }
  0x1b   : > { %s5514_s20 = scalar_lea.vmem (%p5483_p4), %s6939_s1, %s4020_s6 }
  0x1c   : > { %v157_v0 = vld [vmem:[%s5514_s20] sm:$0xf]  ;;  %v159_v1 = vld [vmem:[%s5514_s20 + $0x8] sm:$0xf]  ;;  %v161_v2 = vld [vmem:[%s5514_s20 + $0x10] sm:$0xf] }
  0x1d   : > { %158 = vst [vmem:[%s5519_s21] sm:$0xf] %v157_v0  ;;  %v163_v3 = vld [vmem:[%s5514_s20 + $0x18] sm:$0xf]  ;;  %v165_v4 = vld [vmem:[%s5514_s20 + $0x20] sm:$0xf] }
  0x1e   : > { %160 = vst [vmem:[%s5519_s21 + $0x4] sm:$0xf] %v159_v1  ;;  %v167_v5 = vld [vmem:[%s5514_s20 + $0x28] sm:$0xf]  ;;  %v169_v6 = vld [vmem:[%s5514_s20 + $0x30] sm:$0xf] }
  0x1f   : > { %162 = vst [vmem:[%s5519_s21 + $0x8] sm:$0xf] %v161_v2  ;;  %v171_v7 = vld [vmem:[%s5514_s20 + $0x38] sm:$0xf]  ;;  %v173_v8 = vld [vmem:[%s5514_s20 + $0x40] sm:$0xf] }
  0x20   : > { %164 = vst [vmem:[%s5519_s21 + $0xc] sm:$0xf] %v163_v3  ;;  %v175_v9 = vld [vmem:[%s5514_s20 + $0x48] sm:$0xf]  ;;  %v177_v10 = vld [vmem:[%s5514_s20 + $0x50] sm:$0xf] }
  0x21   : > { %166 = vst [vmem:[%s5519_s21 + $0x10] sm:$0xf] %v165_v4  ;;  %v179_v11 = vld [vmem:[%s5514_s20 + $0x58] sm:$0xf]  ;;  %v181_v12 = vld [vmem:[%s5514_s20 + $0x60] sm:$0xf] }
  0x22   : > { %168 = vst [vmem:[%s5519_s21 + $0x14] sm:$0xf] %v167_v5  ;;  %v183_v13 = vld [vmem:[%s5514_s20 + $0x68] sm:$0xf]  ;;  %v185_v14 = vld [vmem:[%s5514_s20 + $0x70] sm:$0xf] }
  0x23   : > { %170 = vst [vmem:[%s5519_s21 + $0x18] sm:$0xf] %v169_v6  ;;  %v187_v15 = vld [vmem:[%s5514_s20 + $0x78] sm:$0xf]  ;;  %v189_v16 = vld [vmem:[%s5514_s20 + $0x80] sm:$0xf] }
  0x24   : > { %172 = vst [vmem:[%s5519_s21 + $0x1c] sm:$0xf] %v171_v7  ;;  %v191_v17 = vld [vmem:[%s5514_s20 + $0x88] sm:$0xf]  ;;  %v193_v18 = vld [vmem:[%s5514_s20 + $0x90] sm:$0xf] }
  0x25   : > { %174 = vst [vmem:[%s5519_s21 + $0x20] sm:$0xf] %v173_v8  ;;  %v195_v19 = vld [vmem:[%s5514_s20 + $0x98] sm:$0xf]  ;;  %v197_v20 = vld [vmem:[%s5514_s20 + $0xa0] sm:$0xf] }
  0x26   : > { %176 = vst [vmem:[%s5519_s21 + $0x24] sm:$0xf] %v175_v9  ;;  %v199_v21 = vld [vmem:[%s5514_s20 + $0xa8] sm:$0xf]  ;;  %v201_v22 = vld [vmem:[%s5514_s20 + $0xb0] sm:$0xf] }
  0x27   : > { %178 = vst [vmem:[%s5519_s21 + $0x28] sm:$0xf] %v177_v10  ;;  %v203_v23 = vld [vmem:[%s5514_s20 + $0xb8] sm:$0xf]  ;;  %v205_v24 = vld [vmem:[%s5514_s20 + $0xc0] sm:$0xf] }
  0x28   : > { %180 = vst [vmem:[%s5519_s21 + $0x2c] sm:$0xf] %v179_v11  ;;  %v207_v25 = vld [vmem:[%s5514_s20 + $0xc8] sm:$0xf]  ;;  %v209_v26 = vld [vmem:[%s5514_s20 + $0xd0] sm:$0xf] }
  0x29   : > { %182 = vst [vmem:[%s5519_s21 + $0x30] sm:$0xf] %v181_v12  ;;  %v211_v27 = vld [vmem:[%s5514_s20 + $0xd8] sm:$0xf]  ;;  %v213_v28 = vld [vmem:[%s5514_s20 + $0xe0] sm:$0xf] }
  0x2a   : > { %184 = vst [vmem:[%s5519_s21 + $0x34] sm:$0xf] %v183_v13  ;;  %v215_v29 = vld [vmem:[%s5514_s20 + $0xe8] sm:$0xf]  ;;  %v217_v30 = vld [vmem:[%s5514_s20 + $0xf0] sm:$0xf] }
  0x2b   : > { %186 = vst [vmem:[%s5519_s21 + $0x38] sm:$0xf] %v185_v14  ;;  %v219_v31 = vld [vmem:[%s5514_s20 + $0xf8] sm:$0xf]  ;;  %v221_v32 = vld [vmem:[%s5514_s20 + $0x100] sm:$0xf] }
  0x2c   : > { %188 = vst [vmem:[%s5519_s21 + $0x3c] sm:$0xf] %v187_v15  ;;  %v223_v33 = vld [vmem:[%s5514_s20 + $0x108] sm:$0xf]  ;;  %v225_v34 = vld [vmem:[%s5514_s20 + $0x110] sm:$0xf] }
  0x2d   : > { %190 = vst [vmem:[%s5519_s21 + $0x40] sm:$0xf] %v189_v16  ;;  %v227_v35 = vld [vmem:[%s5514_s20 + $0x118] sm:$0xf]  ;;  %v229_v36 = vld [vmem:[%s5514_s20 + $0x120] sm:$0xf] }
  0x2e   : > { %192 = vst [vmem:[%s5519_s21 + $0x44] sm:$0xf] %v191_v17  ;;  %v231_v37 = vld [vmem:[%s5514_s20 + $0x128] sm:$0xf]  ;;  %v233_v38 = vld [vmem:[%s5514_s20 + $0x130] sm:$0xf] }
  0x2f   : > { %194 = vst [vmem:[%s5519_s21 + $0x48] sm:$0xf] %v193_v18  ;;  %v235_v39 = vld [vmem:[%s5514_s20 + $0x138] sm:$0xf]  ;;  %v237_v40 = vld [vmem:[%s5514_s20 + $0x140] sm:$0xf] }
  0x30   : > { %196 = vst [vmem:[%s5519_s21 + $0x4c] sm:$0xf] %v195_v19  ;;  %v239_v41 = vld [vmem:[%s5514_s20 + $0x148] sm:$0xf]  ;;  %v241_v42 = vld [vmem:[%s5514_s20 + $0x150] sm:$0xf] }
  0x31   : > { %198 = vst [vmem:[%s5519_s21 + $0x50] sm:$0xf] %v197_v20  ;;  %v243_v43 = vld [vmem:[%s5514_s20 + $0x158] sm:$0xf]  ;;  %v245_v44 = vld [vmem:[%s5514_s20 + $0x160] sm:$0xf] }
  0x32   : > { %200 = vst [vmem:[%s5519_s21 + $0x54] sm:$0xf] %v199_v21  ;;  %v247_v45 = vld [vmem:[%s5514_s20 + $0x168] sm:$0xf]  ;;  %v249_v46 = vld [vmem:[%s5514_s20 + $0x170] sm:$0xf] }
  0x33   : > { %202 = vst [vmem:[%s5519_s21 + $0x58] sm:$0xf] %v201_v22  ;;  %v251_v47 = vld [vmem:[%s5514_s20 + $0x178] sm:$0xf]  ;;  %v253_v48 = vld [vmem:[%s5514_s20 + $0x180] sm:$0xf] }
  0x34   : > { %204 = vst [vmem:[%s5519_s21 + $0x5c] sm:$0xf] %v203_v23  ;;  %v255_v49 = vld [vmem:[%s5514_s20 + $0x188] sm:$0xf]  ;;  %v257_v50 = vld [vmem:[%s5514_s20 + $0x190] sm:$0xf] }
  0x35   : > { %206 = vst [vmem:[%s5519_s21 + $0x60] sm:$0xf] %v205_v24  ;;  %v259_v51 = vld [vmem:[%s5514_s20 + $0x198] sm:$0xf]  ;;  %v261_v52 = vld [vmem:[%s5514_s20 + $0x1a0] sm:$0xf] }
  0x36   : > { %208 = vst [vmem:[%s5519_s21 + $0x64] sm:$0xf] %v207_v25  ;;  %v263_v53 = vld [vmem:[%s5514_s20 + $0x1a8] sm:$0xf]  ;;  %v265_v54 = vld [vmem:[%s5514_s20 + $0x1b0] sm:$0xf] }
  0x37   : > { %210 = vst [vmem:[%s5519_s21 + $0x68] sm:$0xf] %v209_v26  ;;  %v267_v55 = vld [vmem:[%s5514_s20 + $0x1b8] sm:$0xf]  ;;  %v269_v56 = vld [vmem:[%s5514_s20 + $0x1c0] sm:$0xf] }
  0x38   : > { %212 = vst [vmem:[%s5519_s21 + $0x6c] sm:$0xf] %v211_v27  ;;  %v271_v57 = vld [vmem:[%s5514_s20 + $0x1c8] sm:$0xf]  ;;  %v273_v58 = vld [vmem:[%s5514_s20 + $0x1d0] sm:$0xf] }
  0x39   : > { %214 = vst [vmem:[%s5519_s21 + $0x70] sm:$0xf] %v213_v28  ;;  %v275_v59 = vld [vmem:[%s5514_s20 + $0x1d8] sm:$0xf]  ;;  %v277_v60 = vld [vmem:[%s5514_s20 + $0x1e0] sm:$0xf] }
  0x3a   : > { %216 = vst [vmem:[%s5519_s21 + $0x74] sm:$0xf] %v215_v29  ;;  %v279_v61 = vld [vmem:[%s5514_s20 + $0x1e8] sm:$0xf]  ;;  %v281_v62 = vld [vmem:[%s5514_s20 + $0x1f0] sm:$0xf] }
  0x3b   : > { %218 = vst [vmem:[%s5519_s21 + $0x78] sm:$0xf] %v217_v30  ;;  %v283_v63 = vld [vmem:[%s5514_s20 + $0x1f8] sm:$0xf] }
  0x3c   : > { %220 = vst [vmem:[%s5519_s21 + $0x7c] sm:$0xf] %v219_v31 }
  0x3d   : > { %222 = vst [vmem:[%s5519_s21 + $0x80] sm:$0xf] %v221_v32 }
  0x3e   : > { %224 = vst [vmem:[%s5519_s21 + $0x84] sm:$0xf] %v223_v33 }
  0x3f   : > { %226 = vst [vmem:[%s5519_s21 + $0x88] sm:$0xf] %v225_v34 }
  0x40   : > { %228 = vst [vmem:[%s5519_s21 + $0x8c] sm:$0xf] %v227_v35 }
  0x41   : > { %230 = vst [vmem:[%s5519_s21 + $0x90] sm:$0xf] %v229_v36 }
  0x42   : > { %232 = vst [vmem:[%s5519_s21 + $0x94] sm:$0xf] %v231_v37 }
  0x43   : > { %234 = vst [vmem:[%s5519_s21 + $0x98] sm:$0xf] %v233_v38 }
  0x44   : > { %236 = vst [vmem:[%s5519_s21 + $0x9c] sm:$0xf] %v235_v39 }
  0x45   : > { %238 = vst [vmem:[%s5519_s21 + $0xa0] sm:$0xf] %v237_v40 }
  0x46   : > { %240 = vst [vmem:[%s5519_s21 + $0xa4] sm:$0xf] %v239_v41 }
  0x47   : > { %242 = vst [vmem:[%s5519_s21 + $0xa8] sm:$0xf] %v241_v42 }
  0x48   : > { %244 = vst [vmem:[%s5519_s21 + $0xac] sm:$0xf] %v243_v43 }
  0x49   : > { %246 = vst [vmem:[%s5519_s21 + $0xb0] sm:$0xf] %v245_v44 }
  0x4a   : > { %248 = vst [vmem:[%s5519_s21 + $0xb4] sm:$0xf] %v247_v45 }
  0x4b   : > { %250 = vst [vmem:[%s5519_s21 + $0xb8] sm:$0xf] %v249_v46 }
  0x4c   : > { %252 = vst [vmem:[%s5519_s21 + $0xbc] sm:$0xf] %v251_v47 }
  0x4d   : > { %254 = vst [vmem:[%s5519_s21 + $0xc0] sm:$0xf] %v253_v48 }
  0x4e   : > { %256 = vst [vmem:[%s5519_s21 + $0xc4] sm:$0xf] %v255_v49 }
  0x4f   : > { %258 = vst [vmem:[%s5519_s21 + $0xc8] sm:$0xf] %v257_v50 }
  0x50   : > { %260 = vst [vmem:[%s5519_s21 + $0xcc] sm:$0xf] %v259_v51 }
  0x51   : > { %262 = vst [vmem:[%s5519_s21 + $0xd0] sm:$0xf] %v261_v52 }
  0x52   : > { %264 = vst [vmem:[%s5519_s21 + $0xd4] sm:$0xf] %v263_v53 }
  0x53   : > { %266 = vst [vmem:[%s5519_s21 + $0xd8] sm:$0xf] %v265_v54 }
  0x54   : > { %268 = vst [vmem:[%s5519_s21 + $0xdc] sm:$0xf] %v267_v55 }
  0x55   : > { %270 = vst [vmem:[%s5519_s21 + $0xe0] sm:$0xf] %v269_v56 }
  0x56   : > { %272 = vst [vmem:[%s5519_s21 + $0xe4] sm:$0xf] %v271_v57 }
  0x57   : > { %274 = vst [vmem:[%s5519_s21 + $0xe8] sm:$0xf] %v273_v58 }
  0x58   : > { %276 = vst [vmem:[%s5519_s21 + $0xec] sm:$0xf] %v275_v59 }
  0x59   : > { %278 = vst [vmem:[%s5519_s21 + $0xf0] sm:$0xf] %v277_v60 }
  0x5a   : > { %280 = vst [vmem:[%s5519_s21 + $0xf4] sm:$0xf] %v279_v61 }
  0x5b   : > { %282 = vst [vmem:[%s5519_s21 + $0xf8] sm:$0xf] %v281_v62 }
  0x5c   : > { %284 = vst [vmem:[%s5519_s21 + $0xfc] sm:$0xf] %v283_v63 }
  0x5d PF: > { %p4021_p11 = scmp.ge.s32.totalorder %s5410_s17, 1  ;;  %p435_p12 = scmp.lt.s32.totalorder %s5410_s17, 9 }
  0x5f   : > { %p436_p13 = pnand %p4021_p11, %p435_p12 }
  0x61   : > { %439 = sbr.rel (%p436_p13) target bundleno = 1267 (0x4f3), region = 65 }
  0x66   : > { %s442_s22 = sand.u32 1, %s5386_s11   ;;  %s465_s23 = sand.u32 1, %s5378_s9  }
  0x67   : > { %s4022_s24 = sshll.u32 %s442_s22, 8  ;;  %s5650_s25 = sshll.u32 %s465_s23, 8 }
  0x68   : > { %s5652_s26 = scalar_lea.vmem [#allocation3], %s4022_s24  ;;  %s4024_s9 = sshll.u32 %s5394_s13, 2 }
  0x69   : > { %v4994_v0 = vld [vmem:[%s5652_s26 + $0x78] sm:$0xff]  ;;  %v4993_v4 = vld [vmem:[%s5652_s26 + $0x70] sm:$0xff]  ;;  %v4992_v8 = vld [vmem:[%s5652_s26 + $0x68] sm:$0xff]  ;;  %p469_p0 = scmp.lt.s32.totalorder %s4024_s9, 15  ;;  %s5949_s5 = scalar_lea.vmem [#allocation4], %s5650_s25 }
  0x6a   : > { %v4954_v1 = vld [vmem:[%s5652_s26 + $0x38] sm:$0xff]  ;;  %878 = vmatpush.bf16.msra.mxu0 %v4994_v0  ;;  %v4953_v5 = vld [vmem:[%s5652_s26 + $0x30] sm:$0xff]  ;;  %v4952_v9 = vld [vmem:[%s5652_s26 + $0x28] sm:$0xff]  ;;  %p4907_p1 = scmp.ne.s32.totalorder %s5394_s13, 0 }
  0x6b   : > { %v5034_v2 = vld [vmem:[%s5652_s26 + $0xb8] sm:$0xff]  ;;  %1287 = vmatpush.bf16.msra.mxu1 %v4954_v1  ;;  %v5033_v6 = vld [vmem:[%s5652_s26 + $0xb0] sm:$0xff]  ;;  %v5032_v10 = vld [vmem:[%s5652_s26 + $0xa8] sm:$0xff]  ;;  %s7141_s9 = smov (!%p469_p0, %s4024_s9), 15 }
  0x6c   : > { %v5074_v3 = vld [vmem:[%s5652_s26 + $0xf8] sm:$0xff]  ;;  %1778 = vmatpush.bf16.msra.mxu2 %v5034_v2  ;;  %v5073_v7 = vld [vmem:[%s5652_s26 + $0xf0] sm:$0xff]  ;;  %v5072_v11 = vld [vmem:[%s5652_s26 + $0xe8] sm:$0xff]  ;;  %s4914_s11 = sshll.u32 %s7141_s9, 8 }
  0x6d   : > { %2333 = vmatpush.bf16.msra.mxu3 %v5074_v3  ;;  %v4991_v12 = vld [vmem:[%s5652_s26 + $0x60] sm:$0xff]  ;;  %v4990_v16 = vld [vmem:[%s5652_s26 + $0x58] sm:$0xff]  ;;  %v4989_v20 = vld [vmem:[%s5652_s26 + $0x50] sm:$0xff]  ;;  %s5688_s4 = scalar_lea.vmem %s6938_s0, %s4914_s11 }
  0x6e   : > { %879 = vmatpush.bf16.msra.mxu0 %v4993_v4  ;;  %v4951_v13 = vld [vmem:[%s5652_s26 + $0x20] sm:$0xff]  ;;  %v4950_v17 = vld [vmem:[%s5652_s26 + $0x18] sm:$0xff]  ;;  %v4949_v21 = vld [vmem:[%s5652_s26 + $0x10] sm:$0xff] }
  0x6f   : > { %1288 = vmatpush.bf16.msra.mxu1 %v4953_v5  ;;  %v5031_v14 = vld [vmem:[%s5652_s26 + $0xa0] sm:$0xff]  ;;  %v5030_v18 = vld [vmem:[%s5652_s26 + $0x98] sm:$0xff]  ;;  %v5029_v22 = vld [vmem:[%s5652_s26 + $0x90] sm:$0xff] }
  0x70   : > { %1779 = vmatpush.bf16.msra.mxu2 %v5033_v6  ;;  %v5071_v15 = vld [vmem:[%s5652_s26 + $0xe0] sm:$0xff]  ;;  %v5070_v19 = vld [vmem:[%s5652_s26 + $0xd8] sm:$0xff]  ;;  %v5069_v23 = vld [vmem:[%s5652_s26 + $0xd0] sm:$0xff] }
  0x71   : > { %2334 = vmatpush.bf16.msra.mxu3 %v5073_v7  ;;  %v4988_v24 = vld [vmem:[%s5652_s26 + $0x48] sm:$0xff]  ;;  %v4987_v28 = vld [vmem:[%s5652_s26 + $0x40] sm:$0xff]  ;;  %v4957_v40 = vld [vmem:[%s5688_s4 + $0x110] sm:$0xff] }
  0x72   : > { %880 = vmatpush.bf16.msra.mxu0 %v4992_v8  ;;  %v4948_v25 = vld [vmem:[%s5652_s26 + $0x8] sm:$0xff]  ;;  %v4947_v29 = vld [vmem:[%s5652_s26] sm:$0xff]  ;;  %v4917_v41 = vld [vmem:[%s5688_s4 + $0x10] sm:$0xff] }
  0x73   : > { %1289 = vmatpush.bf16.msra.mxu1 %v4952_v9  ;;  %v5028_v26 = vld [vmem:[%s5652_s26 + $0x88] sm:$0xff]  ;;  %v5027_v30 = vld [vmem:[%s5652_s26 + $0x80] sm:$0xff]  ;;  %v4997_v42 = vld [vmem:[%s5688_s4 + $0x210] sm:$0xff] }
  0x74   : > { %1780 = vmatpush.bf16.msra.mxu2 %v5032_v10  ;;  %v5068_v27 = vld [vmem:[%s5652_s26 + $0xc8] sm:$0xff]  ;;  %v5067_v31 = vld [vmem:[%s5652_s26 + $0xc0] sm:$0xff]  ;;  %v5037_v43 = vld [vmem:[%s5688_s4 + $0x310] sm:$0xff] }
  0x75   : > { %2335 = vmatpush.bf16.msra.mxu3 %v5072_v11  ;;  %v4955_v32 = vld [vmem:[%s5688_s4 + $0x100] sm:$0xff]  ;;  %v4956_v36 = vld [vmem:[%s5688_s4 + $0x108] sm:$0xff]  ;;  %v4958_v44 = vld [vmem:[%s5688_s4 + $0x118] sm:$0xff] }
  0x76   : > { %881 = vmatpush.bf16.msra.mxu0 %v4991_v12  ;;  %v4915_v33 = vld [vmem:[%s5688_s4] sm:$0xff]  ;;  %v4916_v37 = vld [vmem:[%s5688_s4 + $0x8] sm:$0xff]  ;;  %v4918_v45 = vld [vmem:[%s5688_s4 + $0x18] sm:$0xff] }
  0x77   : > { %1290 = vmatpush.bf16.msra.mxu1 %v4951_v13  ;;  %v4995_v34 = vld [vmem:[%s5688_s4 + $0x200] sm:$0xff]  ;;  %v4996_v38 = vld [vmem:[%s5688_s4 + $0x208] sm:$0xff]  ;;  %v4998_v46 = vld [vmem:[%s5688_s4 + $0x218] sm:$0xff] }
  0x78   : > { %1781 = vmatpush.bf16.msra.mxu2 %v5031_v14  ;;  %v5035_v35 = vld [vmem:[%s5688_s4 + $0x300] sm:$0xff]  ;;  %v5036_v39 = vld [vmem:[%s5688_s4 + $0x308] sm:$0xff]  ;;  %v5038_v47 = vld [vmem:[%s5688_s4 + $0x318] sm:$0xff] }
  0x79   : > { %2336 = vmatpush.bf16.msra.mxu3 %v5071_v15  ;;  %v4959_v48 = vld [vmem:[%s5688_s4 + $0x120] sm:$0xff]  ;;  %v4960_v52 = vld [vmem:[%s5688_s4 + $0x128] sm:$0xff]  ;;  %v4961_v56 = vld [vmem:[%s5688_s4 + $0x130] sm:$0xff] }
  0x7a   : > { %882 = vmatpush.bf16.msra.mxu0 %v4990_v16  ;;  %v4919_v49 = vld [vmem:[%s5688_s4 + $0x20] sm:$0xff]  ;;  %v4920_v53 = vld [vmem:[%s5688_s4 + $0x28] sm:$0xff]  ;;  %v4921_v57 = vld [vmem:[%s5688_s4 + $0x30] sm:$0xff] }
  0x7b   : > { %1291 = vmatpush.bf16.msra.mxu1 %v4950_v17  ;;  %v4999_v50 = vld [vmem:[%s5688_s4 + $0x220] sm:$0xff]  ;;  %v5000_v54 = vld [vmem:[%s5688_s4 + $0x228] sm:$0xff]  ;;  %v5001_v58 = vld [vmem:[%s5688_s4 + $0x230] sm:$0xff] }
  0x7c   : > { %1782 = vmatpush.bf16.msra.mxu2 %v5030_v18  ;;  %v5039_v51 = vld [vmem:[%s5688_s4 + $0x320] sm:$0xff]  ;;  %v5040_v55 = vld [vmem:[%s5688_s4 + $0x328] sm:$0xff]  ;;  %v5041_v59 = vld [vmem:[%s5688_s4 + $0x330] sm:$0xff] }
  0x7d   : > { %2337 = vmatpush.bf16.msra.mxu3 %v5070_v19  ;;  %v4962_v60 = vld [vmem:[%s5688_s4 + $0x138] sm:$0xff]  ;;  %v4963_v0 = vld [vmem:[%s5688_s4 + $0x140] sm:$0xff]  ;;  %v4964_v16 = vld [vmem:[%s5688_s4 + $0x148] sm:$0xff] }
  0x7e   : > { %883 = vmatpush.bf16.msra.mxu0 %v4989_v20  ;;  %v4922_v61 = vld [vmem:[%s5688_s4 + $0x38] sm:$0xff]  ;;  %v4923_v1 = vld [vmem:[%s5688_s4 + $0x40] sm:$0xff]  ;;  %v4924_v17 = vld [vmem:[%s5688_s4 + $0x48] sm:$0xff] }
  0x7f   : > { %1292 = vmatpush.bf16.msra.mxu1 %v4949_v21  ;;  %v5002_v62 = vld [vmem:[%s5688_s4 + $0x238] sm:$0xff]  ;;  %v5003_v4 = vld [vmem:[%s5688_s4 + $0x240] sm:$0xff]  ;;  %v5004_v21 = vld [vmem:[%s5688_s4 + $0x248] sm:$0xff] }
  0x80   : > { %1783 = vmatpush.bf16.msra.mxu2 %v5029_v22  ;;  %v5042_v63 = vld [vmem:[%s5688_s4 + $0x338] sm:$0xff]  ;;  %v5043_v5 = vld [vmem:[%s5688_s4 + $0x340] sm:$0xff]  ;;  %v5044_v22 = vld [vmem:[%s5688_s4 + $0x348] sm:$0xff] }
  0x81   : > { %2338 = vmatpush.bf16.msra.mxu3 %v5069_v23 }
  0x82   : > { %884 = vmatpush.bf16.msra.mxu0 %v4988_v24 }
  0x83   : > { %1293 = vmatpush.bf16.msra.mxu1 %v4948_v25 }
  0x84   : > { %1784 = vmatpush.bf16.msra.mxu2 %v5028_v26 }
  0x85   : > { %2339 = vmatpush.bf16.msra.mxu3 %v5068_v27 }
  0x86   : > { %885 = vmatpush.bf16.msra.mxu0 %v4987_v28 }
  0x87   : > { %1294 = vmatpush.bf16.msra.mxu1 %v4947_v29 }
  0x88   : > { %1785 = vmatpush.bf16.msra.mxu2 %v5027_v30 }
  0x89   : > { %2340 = vmatpush.bf16.msra.mxu3 %v5067_v31  ;;  %886 = vmatmul.bf16.vlgmr.msra.gmra.mxu0 %v4955_v32 }
  0x8a   : > { %1295 = vmatmul.bf16.vlgmr.msra.gmra.mxu1 %v4915_v33 }
  0x8b   : > { %1786 = vmatmul.bf16.vlgmr.msra.gmra.mxu2 %v4995_v34  ;;  %v4965_v34 = vld [vmem:[%s5688_s4 + $0x150] sm:$0xff] }
  0x8c   : > { %2341 = vmatmul.bf16.vlgmr.msra.gmra.mxu3 %v5035_v35  ;;  %v4925_v35 = vld [vmem:[%s5688_s4 + $0x50] sm:$0xff] }
  0x99   : > { %891 = vmatmul.bf16.gmra.mxu0 %v4956_v36 }
  0x9a   : > { %1300 = vmatmul.bf16.gmra.mxu1 %v4916_v37 }
  0x9b   : > { %1791 = vmatmul.bf16.gmra.mxu2 %v4996_v38 }
  0x9c   : > { %2346 = vmatmul.bf16.gmra.mxu3 %v5036_v39  ;;  %v5005_v39 = vld [vmem:[%s5688_s4 + $0x250] sm:$0xff] }
  0xa9   : > { %896 = vmatmul.bf16.gmra.mxu0 %v4957_v40  ;;  %v5045_v40 = vld [vmem:[%s5688_s4 + $0x350] sm:$0xff] }
  0xaa   : > { %1305 = vmatmul.bf16.gmra.mxu1 %v4917_v41 }
  0xab   : > { %1796 = vmatmul.bf16.gmra.mxu2 %v4997_v42 }
  0xac   : > { %2351 = vmatmul.bf16.gmra.mxu3 %v5037_v43 }
  0xb9   : > { %901 = vmatmul.bf16.gmra.mxu0 %v4958_v44 }
  0xba   : > { %1310 = vmatmul.bf16.gmra.mxu1 %v4918_v45 }
  0xbb   : > { %1801 = vmatmul.bf16.gmra.mxu2 %v4998_v46 }
  0xbc   : > { %2356 = vmatmul.bf16.gmra.mxu3 %v5038_v47 }
  0xc9   : > { %906 = vmatmul.bf16.gmra.mxu0 %v4959_v48 }
  0xca   : > { %1315 = vmatmul.bf16.gmra.mxu1 %v4919_v49 }
  0xcb   : > { %1806 = vmatmul.bf16.gmra.mxu2 %v4999_v50 }
  0xcc   : > { %2361 = vmatmul.bf16.gmra.mxu3 %v5039_v51 }
  0xd9   : > { %911 = vmatmul.bf16.gmra.mxu0 %v4960_v52  ;;  %v4966_v52 = vld [vmem:[%s5688_s4 + $0x158] sm:$0xff] }
  0xda   : > { %1320 = vmatmul.bf16.gmra.mxu1 %v4920_v53  ;;  %v4926_v53 = vld [vmem:[%s5688_s4 + $0x58] sm:$0xff] }
  0xdb   : > { %1811 = vmatmul.bf16.gmra.mxu2 %v5000_v54 }
  0xdc   : > { %2366 = vmatmul.bf16.gmra.mxu3 %v5040_v55 }
  0xe9   : > { %916 = vmatmul.bf16.gmra.mxu0 %v4961_v56 }
  0xea   : > { %1325 = vmatmul.bf16.gmra.mxu1 %v4921_v57  ;;  %v5006_v57 = vld [vmem:[%s5688_s4 + $0x258] sm:$0xff] }
  0xeb   : > { %1816 = vmatmul.bf16.gmra.mxu2 %v5001_v58  ;;  %v5046_v58 = vld [vmem:[%s5688_s4 + $0x358] sm:$0xff] }
  0xec   : > { %2371 = vmatmul.bf16.gmra.mxu3 %v5041_v59 }
  0xf9   : > { %921 = vmatmul.bf16.gmra.mxu0 %v4962_v60 }
  0xfa   : > { %1330 = vmatmul.bf16.gmra.mxu1 %v4922_v61 }
  0xfb   : > { %1821 = vmatmul.bf16.gmra.mxu2 %v5002_v62 }
  0xfc   : > { %2376 = vmatmul.bf16.gmra.mxu3 %v5042_v63 }
 0x106   : > { %v887_v2 = vpop.f32.mrf.mxu0 }
 0x107   : > { %v1296_v3 = vpop.f32.mrf.mxu1 }
 0x108   : > { %v1297_v6 = vadd.f32 %v1296_v3, %v887_v2 }
 0x109   : > { %926 = vmatmul.bf16.gmra.mxu0 %v4963_v0 }
 0x10a   : > { %1335 = vmatmul.bf16.gmra.mxu1 %v4923_v1 }
 0x10b   : > { %1826 = vmatmul.bf16.gmra.mxu2 %v5003_v4 }
 0x10c   : > { %2381 = vmatmul.bf16.gmra.mxu3 %v5043_v5 }
 0x10e   : > { %v1787_v7 = vpop.f32.mrf.mxu2  ;;  %v889_v10 = vpop.f32.mrf.mxu0 }
 0x10f   : > { %v2342_v8 = vpop.f32.mrf.mxu3  ;;  %v1947_v9 = vadd.f32 %v1787_v7, %v1297_v6  ;;  %v1298_v11 = vpop.f32.mrf.mxu1  ;;  %v4967_v6 = vld [vmem:[%s5688_s4 + $0x160] sm:$0xff] }
 0x110   : > { %v1299_v12 = vadd.f32 %v1298_v11, %v889_v10  ;;  %v4927_v7 = vld [vmem:[%s5688_s4 + $0x60] sm:$0xff] }
 0x111   : > { %v5728_v13 = vadd.f32 %v2342_v8, %v1947_v9  ;;  %v5007_v11 = vld [vmem:[%s5688_s4 + $0x260] sm:$0xff] }
 0x116   : > { %v1789_v14 = vpop.f32.mrf.mxu2  ;;  %v892_v19 = vpop.f32.mrf.mxu0 }
 0x117   : > { %v2344_v15 = vpop.f32.mrf.mxu3  ;;  %v1948_v18 = vadd.f32 %v1789_v14, %v1299_v12  ;;  %v1301_v20 = vpop.f32.mrf.mxu1  ;;  %v5047_v12 = vld [vmem:[%s5688_s4 + $0x360] sm:$0xff] }
 0x118   : > { %v1302_v23 = vadd.f32 %v1301_v20, %v892_v19 }
 0x119   : > { %v5734_v24 = vadd.f32 %v2344_v15, %v1948_v18  ;;  %931 = vmatmul.bf16.gmra.mxu0 %v4964_v16 }
 0x11a   : > { %1340 = vmatmul.bf16.gmra.mxu1 %v4924_v17 }
 0x11b   : > { %1831 = vmatmul.bf16.gmra.mxu2 %v5004_v21 }
 0x11c   : > { %2386 = vmatmul.bf16.gmra.mxu3 %v5044_v22 }
 0x11e   : > { %v1792_v25 = vpop.f32.mrf.mxu2  ;;  %v894_v28 = vpop.f32.mrf.mxu0 }
 0x11f   : > { %v2347_v26 = vpop.f32.mrf.mxu3  ;;  %v1949_v27 = vadd.f32 %v1792_v25, %v1302_v23  ;;  %v1303_v29 = vpop.f32.mrf.mxu1 }
 0x120   : > { %v1304_v30 = vadd.f32 %v1303_v29, %v894_v28 }
 0x121   : > { %v5736_v31 = vadd.f32 %v2347_v26, %v1949_v27  ;;  %v4968_v26 = vld [vmem:[%s5688_s4 + $0x168] sm:$0xff] }
 0x122   : > { %v4928_v27 = vld [vmem:[%s5688_s4 + $0x68] sm:$0xff] }
 0x126   : > { %v1794_v32 = vpop.f32.mrf.mxu2  ;;  %v897_v37 = vpop.f32.mrf.mxu0 }
 0x127   : > { %v2349_v33 = vpop.f32.mrf.mxu3  ;;  %v1950_v36 = vadd.f32 %v1794_v32, %v1304_v30  ;;  %v1306_v38 = vpop.f32.mrf.mxu1  ;;  %v5008_v32 = vld [vmem:[%s5688_s4 + $0x268] sm:$0xff] }
 0x128   : > { %v1307_v41 = vadd.f32 %v1306_v38, %v897_v37 }
 0x129   : > { %v5742_v42 = vadd.f32 %v2349_v33, %v1950_v36  ;;  %936 = vmatmul.bf16.gmra.mxu0 %v4965_v34  ;;  %v5048_v33 = vld [vmem:[%s5688_s4 + $0x368] sm:$0xff] }
 0x12a   : > { %1345 = vmatmul.bf16.gmra.mxu1 %v4925_v35 }
 0x12b   : > { %6978 = vst [vmem:[#allocation5_spill] sm:$0xff] %v5742_v42  ;;  %1836 = vmatmul.bf16.gmra.mxu2 %v5005_v39 }
 0x12c   : > { %2391 = vmatmul.bf16.gmra.mxu3 %v5045_v40 }
 0x12e   : > { %v1797_v43 = vpop.f32.mrf.mxu2  ;;  %v899_v46 = vpop.f32.mrf.mxu0 }
 0x12f   : > { %v2352_v44 = vpop.f32.mrf.mxu3  ;;  %v1951_v45 = vadd.f32 %v1797_v43, %v1307_v41  ;;  %v1308_v47 = vpop.f32.mrf.mxu1 }
 0x130   : > { %v1309_v48 = vadd.f32 %v1308_v47, %v899_v46  ;;  %v4969_v46 = vld [vmem:[%s5688_s4 + $0x170] sm:$0xff] }
 0x131   : > { %v5744_v49 = vadd.f32 %v2352_v44, %v1951_v45  ;;  %v4929_v47 = vld [vmem:[%s5688_s4 + $0x70] sm:$0xff] }
 0x136   : > { %v1799_v50 = vpop.f32.mrf.mxu2  ;;  %v902_v55 = vpop.f32.mrf.mxu0 }
 0x137   : > { %v2354_v51 = vpop.f32.mrf.mxu3  ;;  %v1952_v54 = vadd.f32 %v1799_v50, %v1309_v48  ;;  %v1311_v56 = vpop.f32.mrf.mxu1 }
 0x138   : > { %v1312_v59 = vadd.f32 %v1311_v56, %v902_v55 }
 0x139   : > { %v5750_v60 = vadd.f32 %v2354_v51, %v1952_v54  ;;  %941 = vmatmul.bf16.gmra.mxu0 %v4966_v52  ;;  %v5009_v52 = vld [vmem:[%s5688_s4 + $0x270] sm:$0xff] }
 0x13a   : > { %1350 = vmatmul.bf16.gmra.mxu1 %v4926_v53  ;;  %v5049_v53 = vld [vmem:[%s5688_s4 + $0x370] sm:$0xff] }
 0x13b   : > { %1841 = vmatmul.bf16.gmra.mxu2 %v5006_v57 }
 0x13c   : > { %2396 = vmatmul.bf16.gmra.mxu3 %v5046_v58 }
 0x13e   : > { %v1802_v61 = vpop.f32.mrf.mxu2  ;;  %v904_v0 = vpop.f32.mrf.mxu0 }
 0x13f   : > { %v2357_v62 = vpop.f32.mrf.mxu3  ;;  %v1953_v63 = vadd.f32 %v1802_v61, %v1312_v59  ;;  %v1313_v1 = vpop.f32.mrf.mxu1 }
 0x140   : > { %v1314_v2 = vadd.f32 %v1313_v1, %v904_v0 }
 0x141   : > { %v5752_v3 = vadd.f32 %v2357_v62, %v1953_v63 }
 0x146   : > { %v1804_v4 = vpop.f32.mrf.mxu2  ;;  %v907_v9 = vpop.f32.mrf.mxu0 }
 0x147   : > { %v2359_v5 = vpop.f32.mrf.mxu3  ;;  %v1954_v8 = vadd.f32 %v1804_v4, %v1314_v2  ;;  %v1316_v10 = vpop.f32.mrf.mxu1  ;;  %v4970_v2 = vld [vmem:[%s5688_s4 + $0x178] sm:$0xff] }
 0x148   : > { %v1317_v14 = vadd.f32 %v1316_v10, %v907_v9  ;;  %v4930_v4 = vld [vmem:[%s5688_s4 + $0x78] sm:$0xff] }
 0x149   : > { %v5758_v15 = vadd.f32 %v2359_v5, %v1954_v8  ;;  %946 = vmatmul.bf16.gmra.mxu0 %v4967_v6  ;;  %v5010_v8 = vld [vmem:[%s5688_s4 + $0x278] sm:$0xff] }
 0x14a   : > { %1355 = vmatmul.bf16.gmra.mxu1 %v4927_v7  ;;  %v5050_v9 = vld [vmem:[%s5688_s4 + $0x378] sm:$0xff] }
 0x14b   : > { %1846 = vmatmul.bf16.gmra.mxu2 %v5007_v11 }
 0x14c   : > { %2401 = vmatmul.bf16.gmra.mxu3 %v5047_v12 }
 0x14e   : > { %v1807_v16 = vpop.f32.mrf.mxu2  ;;  %v909_v19 = vpop.f32.mrf.mxu0 }
 0x14f   : > { %v2362_v17 = vpop.f32.mrf.mxu3  ;;  %v1955_v18 = vadd.f32 %v1807_v16, %v1317_v14  ;;  %v1318_v20 = vpop.f32.mrf.mxu1 }
 0x150   : > { %v1319_v21 = vadd.f32 %v1318_v20, %v909_v19 }
 0x151   : > { %v5760_v22 = vadd.f32 %v2362_v17, %v1955_v18 }
 0x156   : > { %v1809_v23 = vpop.f32.mrf.mxu2  ;;  %v912_v29 = vpop.f32.mrf.mxu0 }
 0x157   : > { %v2364_v25 = vpop.f32.mrf.mxu3  ;;  %v1956_v28 = vadd.f32 %v1809_v23, %v1319_v21  ;;  %v1321_v30 = vpop.f32.mrf.mxu1 }
 0x158   : > { %v1322_v34 = vadd.f32 %v1321_v30, %v912_v29  ;;  %v5011_v30 = vld [vmem:[%s5688_s4 + $0x280] sm:$0xff] }
 0x159   : > { %v5766_v35 = vadd.f32 %v2364_v25, %v1956_v28  ;;  %951 = vmatmul.bf16.gmra.mxu0 %v4968_v26  ;;  %v4971_v25 = vld [vmem:[%s5688_s4 + $0x180] sm:$0xff] }
 0x15a   : > { %1360 = vmatmul.bf16.gmra.mxu1 %v4928_v27  ;;  %v4931_v26 = vld [vmem:[%s5688_s4 + $0x80] sm:$0xff] }
 0x15b   : > { %1851 = vmatmul.bf16.gmra.mxu2 %v5008_v32  ;;  %v5051_v32 = vld [vmem:[%s5688_s4 + $0x380] sm:$0xff] }
 0x15c   : > { %2406 = vmatmul.bf16.gmra.mxu3 %v5048_v33 }
 0x15e   : > { %v1812_v36 = vpop.f32.mrf.mxu2  ;;  %v914_v39 = vpop.f32.mrf.mxu0 }
 0x15f   : > { %v2367_v37 = vpop.f32.mrf.mxu3  ;;  %v1957_v38 = vadd.f32 %v1812_v36, %v1322_v34  ;;  %v1323_v40 = vpop.f32.mrf.mxu1 }
 0x160   : > { %v1324_v41 = vadd.f32 %v1323_v40, %v914_v39 }
 0x161   : > { %v5768_v43 = vadd.f32 %v2367_v37, %v1957_v38 }
 0x166   : > { %v1814_v44 = vpop.f32.mrf.mxu2  ;;  %v917_v50 = vpop.f32.mrf.mxu0 }
 0x167   : > { %v2369_v45 = vpop.f32.mrf.mxu3  ;;  %v1958_v48 = vadd.f32 %v1814_v44, %v1324_v41  ;;  %v1326_v51 = vpop.f32.mrf.mxu1 }
 0x168   : > { %v1327_v54 = vadd.f32 %v1326_v51, %v917_v50 }
 0x169   : > { %v5774_v55 = vadd.f32 %v2369_v45, %v1958_v48  ;;  %956 = vmatmul.bf16.gmra.mxu0 %v4969_v46  ;;  %v4932_v48 = vld [vmem:[%s5688_s4 + $0x88] sm:$0xff] }
 0x16a   : > { %1365 = vmatmul.bf16.gmra.mxu1 %v4929_v47  ;;  %v4972_v47 = vld [vmem:[%s5688_s4 + $0x188] sm:$0xff] }
 0x16b   : > { %1856 = vmatmul.bf16.gmra.mxu2 %v5009_v52 }
 0x16c   : > { %2411 = vmatmul.bf16.gmra.mxu3 %v5049_v53  ;;  %v5012_v53 = vld [vmem:[%s5688_s4 + $0x288] sm:$0xff] }
 0x16e   : > { %v1817_v56 = vpop.f32.mrf.mxu2  ;;  %v919_v59 = vpop.f32.mrf.mxu0 }
 0x16f   : > { %v2372_v57 = vpop.f32.mrf.mxu3  ;;  %v1959_v58 = vadd.f32 %v1817_v56, %v1327_v54  ;;  %v1328_v61 = vpop.f32.mrf.mxu1  ;;  %v5052_v54 = vld [vmem:[%s5688_s4 + $0x388] sm:$0xff] }
 0x170   : > { %v1329_v62 = vadd.f32 %v1328_v61, %v919_v59 }
 0x171   : > { %v5776_v63 = vadd.f32 %v2372_v57, %v1959_v58 }
 0x176   : > { %v1819_v0 = vpop.f32.mrf.mxu2  ;;  %v922_v6 = vpop.f32.mrf.mxu0 }
 0x177   : > { %v2374_v1 = vpop.f32.mrf.mxu3  ;;  %v1960_v5 = vadd.f32 %v1819_v0, %v1329_v62  ;;  %v1331_v7 = vpop.f32.mrf.mxu1 }
 0x178   : > { %v1332_v10 = vadd.f32 %v1331_v7, %v922_v6  ;;  %v4973_v6 = vld [vmem:[%s5688_s4 + $0x190] sm:$0xff] }
 0x179   : > { %v5782_v11 = vadd.f32 %v2374_v1, %v1960_v5  ;;  %961 = vmatmul.bf16.gmra.mxu0 %v4970_v2  ;;  %v4933_v7 = vld [vmem:[%s5688_s4 + $0x90] sm:$0xff] }
 0x17a   : > { %1370 = vmatmul.bf16.gmra.mxu1 %v4930_v4 }
 0x17b   : > { %1861 = vmatmul.bf16.gmra.mxu2 %v5010_v8 }
 0x17c   : > { %2416 = vmatmul.bf16.gmra.mxu3 %v5050_v9 }
 0x17e   : > { %v1822_v12 = vpop.f32.mrf.mxu2  ;;  %v924_v17 = vpop.f32.mrf.mxu0 }
 0x17f   : > { %v2377_v14 = vpop.f32.mrf.mxu3  ;;  %v1961_v16 = vadd.f32 %v1822_v12, %v1332_v10  ;;  %v1333_v18 = vpop.f32.mrf.mxu1  ;;  %v5013_v12 = vld [vmem:[%s5688_s4 + $0x290] sm:$0xff] }
 0x180   : > { %v1334_v19 = vadd.f32 %v1333_v18, %v924_v17 }
 0x181   : > { %v5784_v20 = vadd.f32 %v2377_v14, %v1961_v16  ;;  %v5053_v14 = vld [vmem:[%s5688_s4 + $0x390] sm:$0xff] }
 0x186   : > { %v1824_v21 = vpop.f32.mrf.mxu2  ;;  %v927_v28 = vpop.f32.mrf.mxu0 }
 0x187   : > { %v2379_v23 = vpop.f32.mrf.mxu3  ;;  %v1962_v27 = vadd.f32 %v1824_v21, %v1334_v19  ;;  %v1336_v29 = vpop.f32.mrf.mxu1 }
 0x188   : > { %v1337_v33 = vadd.f32 %v1336_v29, %v927_v28 }
 0x189   : > { %v5790_v34 = vadd.f32 %v2379_v23, %v1962_v27  ;;  %966 = vmatmul.bf16.gmra.mxu0 %v4971_v25 }
 0x18a   : > { %1375 = vmatmul.bf16.gmra.mxu1 %v4931_v26 }
 0x18b   : > { %1866 = vmatmul.bf16.gmra.mxu2 %v5011_v30  ;;  %v4974_v30 = vld [vmem:[%s5688_s4 + $0x198] sm:$0xff] }
 0x18c   : > { %2421 = vmatmul.bf16.gmra.mxu3 %v5051_v32  ;;  %v4934_v32 = vld [vmem:[%s5688_s4 + $0x98] sm:$0xff] }
 0x18e   : > { %v1827_v36 = vpop.f32.mrf.mxu2  ;;  %v929_v39 = vpop.f32.mrf.mxu0 }
 0x18f   : > { %v2382_v37 = vpop.f32.mrf.mxu3  ;;  %v1963_v38 = vadd.f32 %v1827_v36, %v1337_v33  ;;  %v1338_v40 = vpop.f32.mrf.mxu1 }
 0x190   : > { %v1339_v41 = vadd.f32 %v1338_v40, %v929_v39  ;;  %v5054_v39 = vld [vmem:[%s5688_s4 + $0x398] sm:$0xff] }
 0x191   : > { %v5792_v44 = vadd.f32 %v2382_v37, %v1963_v38  ;;  %v5014_v38 = vld [vmem:[%s5688_s4 + $0x298] sm:$0xff] }
 0x196   : > { %v1829_v45 = vpop.f32.mrf.mxu2  ;;  %v932_v51 = vpop.f32.mrf.mxu0 }
 0x197   : > { %v2384_v46 = vpop.f32.mrf.mxu3  ;;  %v1964_v50 = vadd.f32 %v1829_v45, %v1339_v41  ;;  %v1341_v52 = vpop.f32.mrf.mxu1 }
 0x198   : > { %v1342_v56 = vadd.f32 %v1341_v52, %v932_v51 }
 0x199   : > { %v5798_v57 = vadd.f32 %v2384_v46, %v1964_v50  ;;  %971 = vmatmul.bf16.gmra.mxu0 %v4972_v47 }
 0x19a   : > { %1380 = vmatmul.bf16.gmra.mxu1 %v4932_v48 }
 0x19b   : > { %1871 = vmatmul.bf16.gmra.mxu2 %v5012_v53 }
 0x19c   : > { %2426 = vmatmul.bf16.gmra.mxu3 %v5052_v54 }
 0x19e   : > { %v1832_v58 = vpop.f32.mrf.mxu2  ;;  %v934_v62 = vpop.f32.mrf.mxu0 }
 0x19f   : > { %v2387_v59 = vpop.f32.mrf.mxu3  ;;  %v1965_v61 = vadd.f32 %v1832_v58, %v1342_v56  ;;  %v1343_v0 = vpop.f32.mrf.mxu1  ;;  %v4975_v56 = vld [vmem:[%s5688_s4 + $0x1a0] sm:$0xff] }
 0x1a0   : > { %v1344_v1 = vadd.f32 %v1343_v0, %v934_v62  ;;  %v4935_v58 = vld [vmem:[%s5688_s4 + $0xa0] sm:$0xff] }
 0x1a1   : > { %v5800_v2 = vadd.f32 %v2387_v59, %v1965_v61  ;;  %v5015_v0 = vld [vmem:[%s5688_s4 + $0x2a0] sm:$0xff] }
 0x1a6   : > { %v1834_v4 = vpop.f32.mrf.mxu2  ;;  %v937_v9 = vpop.f32.mrf.mxu0 }
 0x1a7   : > { %v2389_v5 = vpop.f32.mrf.mxu3  ;;  %v1966_v8 = vadd.f32 %v1834_v4, %v1344_v1  ;;  %v1346_v10 = vpop.f32.mrf.mxu1  ;;  %v5055_v1 = vld [vmem:[%s5688_s4 + $0x3a0] sm:$0xff] }
 0x1a8   : > { %v1347_v16 = vadd.f32 %v1346_v10, %v937_v9 }
 0x1a9   : > { %v5806_v17 = vadd.f32 %v2389_v5, %v1966_v8  ;;  %976 = vmatmul.bf16.gmra.mxu0 %v4973_v6 }
 0x1aa   : > { %1385 = vmatmul.bf16.gmra.mxu1 %v4933_v7 }
 0x1ab   : > { %1876 = vmatmul.bf16.gmra.mxu2 %v5013_v12 }
 0x1ac   : > { %2431 = vmatmul.bf16.gmra.mxu3 %v5053_v14 }
 0x1ae   : > { %v1837_v18 = vpop.f32.mrf.mxu2  ;;  %v939_v23 = vpop.f32.mrf.mxu0 }
 0x1af   : > { %v2392_v19 = vpop.f32.mrf.mxu3  ;;  %v1967_v21 = vadd.f32 %v1837_v18, %v1347_v16  ;;  %v1348_v25 = vpop.f32.mrf.mxu1 }
 0x1b0   : > { %v1349_v26 = vadd.f32 %v1348_v25, %v939_v23 }
 0x1b1   : > { %v5808_v27 = vadd.f32 %v2392_v19, %v1967_v21  ;;  %v4976_v19 = vld [vmem:[%s5688_s4 + $0x1a8] sm:$0xff] }
 0x1b2   : > { %v4936_v21 = vld [vmem:[%s5688_s4 + $0xa8] sm:$0xff] }
 0x1b6   : > { %v1839_v28 = vpop.f32.mrf.mxu2  ;;  %v942_v36 = vpop.f32.mrf.mxu0 }
 0x1b7   : > { %v2394_v29 = vpop.f32.mrf.mxu3  ;;  %v1968_v33 = vadd.f32 %v1839_v28, %v1349_v26  ;;  %v1351_v37 = vpop.f32.mrf.mxu1  ;;  %v5016_v28 = vld [vmem:[%s5688_s4 + $0x2a8] sm:$0xff] }
 0x1b8   : > { %v1352_v40 = vadd.f32 %v1351_v37, %v942_v36 }
 0x1b9   : > { %v5814_v41 = vadd.f32 %v2394_v29, %v1968_v33  ;;  %981 = vmatmul.bf16.gmra.mxu0 %v4974_v30  ;;  %v5056_v29 = vld [vmem:[%s5688_s4 + $0x3a8] sm:$0xff] }
 0x1ba   : > { %1390 = vmatmul.bf16.gmra.mxu1 %v4934_v32 }
 0x1bb   : > { %1881 = vmatmul.bf16.gmra.mxu2 %v5014_v38 }
 0x1bc   : > { %2436 = vmatmul.bf16.gmra.mxu3 %v5054_v39 }
 0x1be   : > { %v1842_v45 = vpop.f32.mrf.mxu2  ;;  %v944_v48 = vpop.f32.mrf.mxu0 }
 0x1bf   : > { %v2397_v46 = vpop.f32.mrf.mxu3  ;;  %v1969_v47 = vadd.f32 %v1842_v45, %v1352_v40  ;;  %v1353_v50 = vpop.f32.mrf.mxu1 }
 0x1c0   : > { %v1354_v51 = vadd.f32 %v1353_v50, %v944_v48  ;;  %v4977_v48 = vld [vmem:[%s5688_s4 + $0x1b0] sm:$0xff] }
 0x1c1   : > { %v5816_v52 = vadd.f32 %v2397_v46, %v1969_v47  ;;  %v4937_v50 = vld [vmem:[%s5688_s4 + $0xb0] sm:$0xff] }
 0x1c6   : > { %v1844_v53 = vpop.f32.mrf.mxu2  ;;  %v947_v61 = vpop.f32.mrf.mxu0 }
 0x1c7   : > { %v2399_v54 = vpop.f32.mrf.mxu3  ;;  %v1970_v59 = vadd.f32 %v1844_v53, %v1354_v51  ;;  %v1356_v62 = vpop.f32.mrf.mxu1 }
 0x1c8   : > { %v1357_v4 = vadd.f32 %v1356_v62, %v947_v61 }
 0x1c9   : > { %v5822_v5 = vadd.f32 %v2399_v54, %v1970_v59  ;;  %986 = vmatmul.bf16.gmra.mxu0 %v4975_v56  ;;  %v5017_v56 = vld [vmem:[%s5688_s4 + $0x2b0] sm:$0xff] }
 0x1ca   : > { %1395 = vmatmul.bf16.gmra.mxu1 %v4935_v58  ;;  %v5057_v58 = vld [vmem:[%s5688_s4 + $0x3b0] sm:$0xff] }
 0x1cb   : > { %1886 = vmatmul.bf16.gmra.mxu2 %v5015_v0 }
 0x1cc   : > { %2441 = vmatmul.bf16.gmra.mxu3 %v5055_v1 }
 0x1ce   : > { %v1847_v6 = vpop.f32.mrf.mxu2  ;;  %v949_v9 = vpop.f32.mrf.mxu0 }
 0x1cf   : > { %v2402_v7 = vpop.f32.mrf.mxu3  ;;  %v1971_v8 = vadd.f32 %v1847_v6, %v1357_v4  ;;  %v1358_v10 = vpop.f32.mrf.mxu1 }
 0x1d0   : > { %v1359_v12 = vadd.f32 %v1358_v10, %v949_v9 }
 0x1d1   : > { %v5824_v14 = vadd.f32 %v2402_v7, %v1971_v8 }
 0x1d6   : > { %v1849_v16 = vpop.f32.mrf.mxu2  ;;  %v952_v25 = vpop.f32.mrf.mxu0 }
 0x1d7   : > { %v2404_v18 = vpop.f32.mrf.mxu3  ;;  %v1972_v23 = vadd.f32 %v1849_v16, %v1359_v12  ;;  %v1361_v26 = vpop.f32.mrf.mxu1  ;;  %v4978_v12 = vld [vmem:[%s5688_s4 + $0x1b8] sm:$0xff] }
 0x1d8   : > { %v1362_v30 = vadd.f32 %v1361_v26, %v952_v25  ;;  %v4938_v16 = vld [vmem:[%s5688_s4 + $0xb8] sm:$0xff] }
 0x1d9   : > { %v5830_v32 = vadd.f32 %v2404_v18, %v1972_v23  ;;  %991 = vmatmul.bf16.gmra.mxu0 %v4976_v19  ;;  %v5018_v23 = vld [vmem:[%s5688_s4 + $0x2b8] sm:$0xff] }
 0x1da   : > { %1400 = vmatmul.bf16.gmra.mxu1 %v4936_v21  ;;  %v5058_v25 = vld [vmem:[%s5688_s4 + $0x3b8] sm:$0xff] }
 0x1db   : > { %1891 = vmatmul.bf16.gmra.mxu2 %v5016_v28 }
 0x1dc   : > { %2446 = vmatmul.bf16.gmra.mxu3 %v5056_v29 }
 0x1de   : > { %v1852_v33 = vpop.f32.mrf.mxu2  ;;  %v954_v38 = vpop.f32.mrf.mxu0 }
 0x1df   : > { %v2407_v36 = vpop.f32.mrf.mxu3  ;;  %v1973_v37 = vadd.f32 %v1852_v33, %v1362_v30  ;;  %v1363_v39 = vpop.f32.mrf.mxu1 }
 0x1e0   : > { %v1364_v40 = vadd.f32 %v1363_v39, %v954_v38 }
 0x1e1   : > { %v5832_v45 = vadd.f32 %v2407_v36, %v1973_v37 }
 0x1e6   : > { %v1854_v46 = vpop.f32.mrf.mxu2  ;;  %v957_v53 = vpop.f32.mrf.mxu0 }
 0x1e7   : > { %v2409_v47 = vpop.f32.mrf.mxu3  ;;  %v1974_v51 = vadd.f32 %v1854_v46, %v1364_v40  ;;  %v1366_v54 = vpop.f32.mrf.mxu1 }
 0x1e8   : > { %v1367_v59 = vadd.f32 %v1366_v54, %v957_v53  ;;  %v5019_v54 = vld [vmem:[%s5688_s4 + $0x2c0] sm:$0xff] }
 0x1e9   : > { %v5838_v61 = vadd.f32 %v2409_v47, %v1974_v51  ;;  %996 = vmatmul.bf16.gmra.mxu0 %v4977_v48  ;;  %v4979_v47 = vld [vmem:[%s5688_s4 + $0x1c0] sm:$0xff] }
 0x1ea   : > { %1405 = vmatmul.bf16.gmra.mxu1 %v4937_v50  ;;  %v4939_v48 = vld [vmem:[%s5688_s4 + $0xc0] sm:$0xff] }
 0x1eb   : > { %1896 = vmatmul.bf16.gmra.mxu2 %v5017_v56  ;;  %v5059_v56 = vld [vmem:[%s5688_s4 + $0x3c0] sm:$0xff] }
 0x1ec   : > { %2451 = vmatmul.bf16.gmra.mxu3 %v5057_v58 }
 0x1ee   : > { %v1857_v62 = vpop.f32.mrf.mxu2  ;;  %v959_v4 = vpop.f32.mrf.mxu0 }
 0x1ef   : > { %v2412_v0 = vpop.f32.mrf.mxu3  ;;  %v1975_v1 = vadd.f32 %v1857_v62, %v1367_v59  ;;  %v1368_v6 = vpop.f32.mrf.mxu1 }
 0x1f0   : > { %v1369_v7 = vadd.f32 %v1368_v6, %v959_v4 }
 0x1f1   : > { %v5840_v8 = vadd.f32 %v2412_v0, %v1975_v1 }
 0x1f6   : > { %v1859_v9 = vpop.f32.mrf.mxu2  ;;  %v962_v19 = vpop.f32.mrf.mxu0 }
 0x1f7   : > { %v2414_v10 = vpop.f32.mrf.mxu3  ;;  %v1976_v18 = vadd.f32 %v1859_v9, %v1369_v7  ;;  %v1371_v21 = vpop.f32.mrf.mxu1 }
 0x1f8   : > { %v1372_v26 = vadd.f32 %v1371_v21, %v962_v19 }
 0x1f9   : > { %v5846_v28 = vadd.f32 %v2414_v10, %v1976_v18  ;;  %1001 = vmatmul.bf16.gmra.mxu0 %v4978_v12  ;;  %v4940_v18 = vld [vmem:[%s5688_s4 + $0xc8] sm:$0xff] }
 0x1fa   : > { %1410 = vmatmul.bf16.gmra.mxu1 %v4938_v16  ;;  %v4980_v16 = vld [vmem:[%s5688_s4 + $0x1c8] sm:$0xff] }
 0x1fb   : > { %1901 = vmatmul.bf16.gmra.mxu2 %v5018_v23 }
 0x1fc   : > { %2456 = vmatmul.bf16.gmra.mxu3 %v5058_v25  ;;  %v5020_v25 = vld [vmem:[%s5688_s4 + $0x2c8] sm:$0xff] }
 0x1fe   : > { %v1862_v29 = vpop.f32.mrf.mxu2  ;;  %v964_v36 = vpop.f32.mrf.mxu0 }
 0x1ff   : > { %v2417_v30 = vpop.f32.mrf.mxu3  ;;  %v1977_v33 = vadd.f32 %v1862_v29, %v1372_v26  ;;  %v1373_v37 = vpop.f32.mrf.mxu1  ;;  %v5060_v26 = vld [vmem:[%s5688_s4 + $0x3c8] sm:$0xff] }
 0x200   : > { %v1374_v38 = vadd.f32 %v1373_v37, %v964_v36 }
 0x201   : > { %v5848_v39 = vadd.f32 %v2417_v30, %v1977_v33 }
 0x206   : > { %v1864_v40 = vpop.f32.mrf.mxu2  ;;  %v967_v51 = vpop.f32.mrf.mxu0 }
 0x207   : > { %v2419_v46 = vpop.f32.mrf.mxu3  ;;  %v1978_v50 = vadd.f32 %v1864_v40, %v1374_v38  ;;  %v1376_v53 = vpop.f32.mrf.mxu1 }
 0x208   : > { %v1377_v58 = vadd.f32 %v1376_v53, %v967_v51  ;;  %v4981_v51 = vld [vmem:[%s5688_s4 + $0x1d0] sm:$0xff] }
 0x209   : > { %v5854_v59 = vadd.f32 %v2419_v46, %v1978_v50  ;;  %1006 = vmatmul.bf16.gmra.mxu0 %v4979_v47  ;;  %v4941_v53 = vld [vmem:[%s5688_s4 + $0xd0] sm:$0xff] }
 0x20a   : > { %1415 = vmatmul.bf16.gmra.mxu1 %v4939_v48 }
 0x20b   : > { %1906 = vmatmul.bf16.gmra.mxu2 %v5019_v54 }
 0x20c   : > { %2461 = vmatmul.bf16.gmra.mxu3 %v5059_v56 }
 0x20e   : > { %v1867_v62 = vpop.f32.mrf.mxu2  ;;  %v969_v4 = vpop.f32.mrf.mxu0 }
 0x20f   : > { %v2422_v0 = vpop.f32.mrf.mxu3  ;;  %v1979_v1 = vadd.f32 %v1867_v62, %v1377_v58  ;;  %v1378_v6 = vpop.f32.mrf.mxu1  ;;  %v5021_v62 = vld [vmem:[%s5688_s4 + $0x2d0] sm:$0xff] }
 0x210   : > { %v1379_v7 = vadd.f32 %v1378_v6, %v969_v4 }
 0x211   : > { %v5856_v9 = vadd.f32 %v2422_v0, %v1979_v1  ;;  %v5061_v0 = vld [vmem:[%s5688_s4 + $0x3d0] sm:$0xff] }
 0x216   : > { %v1869_v10 = vpop.f32.mrf.mxu2  ;;  %v972_v21 = vpop.f32.mrf.mxu0 }
 0x217   : > { %v2424_v12 = vpop.f32.mrf.mxu3  ;;  %v1980_v19 = vadd.f32 %v1869_v10, %v1379_v7  ;;  %v1381_v23 = vpop.f32.mrf.mxu1 }
 0x218   : > { %v1382_v29 = vadd.f32 %v1381_v23, %v972_v21 }
 0x219   : > { %v5862_v30 = vadd.f32 %v2424_v12, %v1980_v19  ;;  %1011 = vmatmul.bf16.gmra.mxu0 %v4980_v16 }
 0x21a   : > { %1420 = vmatmul.bf16.gmra.mxu1 %v4940_v18 }
 0x21b   : > { %1911 = vmatmul.bf16.gmra.mxu2 %v5020_v25  ;;  %v4982_v25 = vld [vmem:[%s5688_s4 + $0x1d8] sm:$0xff] }
 0x21c   : > { %2466 = vmatmul.bf16.gmra.mxu3 %v5060_v26  ;;  %v4942_v26 = vld [vmem:[%s5688_s4 + $0xd8] sm:$0xff] }
 0x21e   : > { %v1872_v33 = vpop.f32.mrf.mxu2  ;;  %v974_v38 = vpop.f32.mrf.mxu0 }
 0x21f   : > { %v2427_v36 = vpop.f32.mrf.mxu3  ;;  %v1981_v37 = vadd.f32 %v1872_v33, %v1382_v29  ;;  %v1383_v40 = vpop.f32.mrf.mxu1 }
 0x220   : > { %v1384_v46 = vadd.f32 %v1383_v40, %v974_v38  ;;  %v5062_v38 = vld [vmem:[%s5688_s4 + $0x3d8] sm:$0xff] }
 0x221   : > { %v5864_v47 = vadd.f32 %v2427_v36, %v1981_v37  ;;  %v5022_v37 = vld [vmem:[%s5688_s4 + $0x2d8] sm:$0xff] }
 0x226   : > { %v1874_v48 = vpop.f32.mrf.mxu2  ;;  %v977_v56 = vpop.f32.mrf.mxu0 }
 0x227   : > { %v2429_v50 = vpop.f32.mrf.mxu3  ;;  %v1982_v54 = vadd.f32 %v1874_v48, %v1384_v46  ;;  %v1386_v58 = vpop.f32.mrf.mxu1 }
 0x228   : > { %v1387_v1 = vadd.f32 %v1386_v58, %v977_v56 }
 0x229   : > { %v5870_v4 = vadd.f32 %v2429_v50, %v1982_v54  ;;  %1016 = vmatmul.bf16.gmra.mxu0 %v4981_v51 }
 0x22a   : > { %1425 = vmatmul.bf16.gmra.mxu1 %v4941_v53 }
 0x22b   : > { %1916 = vmatmul.bf16.gmra.mxu2 %v5021_v62 }
 0x22c   : > { %2471 = vmatmul.bf16.gmra.mxu3 %v5061_v0 }
 0x22e   : > { %v1877_v6 = vpop.f32.mrf.mxu2  ;;  %v979_v12 = vpop.f32.mrf.mxu0 }
 0x22f   : > { %v2432_v7 = vpop.f32.mrf.mxu3  ;;  %v1983_v10 = vadd.f32 %v1877_v6, %v1387_v1  ;;  %v1388_v16 = vpop.f32.mrf.mxu1  ;;  %v4983_v1 = vld [vmem:[%s5688_s4 + $0x1e0] sm:$0xff] }
 0x230   : > { %v1389_v18 = vadd.f32 %v1388_v16, %v979_v12  ;;  %v4943_v6 = vld [vmem:[%s5688_s4 + $0xe0] sm:$0xff] }
 0x231   : > { %v5872_v19 = vadd.f32 %v2432_v7, %v1983_v10  ;;  %v5023_v16 = vld [vmem:[%s5688_s4 + $0x2e0] sm:$0xff] }
 0x236   : > { %v1879_v21 = vpop.f32.mrf.mxu2  ;;  %v982_v33 = vpop.f32.mrf.mxu0 }
 0x237   : > { %v2434_v23 = vpop.f32.mrf.mxu3  ;;  %v1984_v29 = vadd.f32 %v1879_v21, %v1389_v18  ;;  %v1391_v36 = vpop.f32.mrf.mxu1  ;;  %v5063_v18 = vld [vmem:[%s5688_s4 + $0x3e0] sm:$0xff] }
 0x238   : > { %v1392_v40 = vadd.f32 %v1391_v36, %v982_v33 }
 0x239   : > { %v5878_v46 = vadd.f32 %v2434_v23, %v1984_v29  ;;  %1021 = vmatmul.bf16.gmra.mxu0 %v4982_v25 }
 0x23a   : > { %1430 = vmatmul.bf16.gmra.mxu1 %v4942_v26 }
 0x23b   : > { %6979 = vst [vmem:[#allocation6_spill] sm:$0xff] %v5878_v46  ;;  %1921 = vmatmul.bf16.gmra.mxu2 %v5022_v37 }
 0x23c   : > { %2476 = vmatmul.bf16.gmra.mxu3 %v5062_v38 }
 0x23e   : > { %v1882_v48 = vpop.f32.mrf.mxu2  ;;  %v984_v53 = vpop.f32.mrf.mxu0 }
 0x23f   : > { %v2437_v50 = vpop.f32.mrf.mxu3  ;;  %v1985_v51 = vadd.f32 %v1882_v48, %v1392_v40  ;;  %v1393_v54 = vpop.f32.mrf.mxu1 }
 0x240   : > { %v1394_v56 = vadd.f32 %v1393_v54, %v984_v53 }
 0x241   : > { %v5880_v58 = vadd.f32 %v2437_v50, %v1985_v51  ;;  %v4984_v50 = vld [vmem:[%s5688_s4 + $0x1e8] sm:$0xff] }
 0x242   : > { %v4944_v51 = vld [vmem:[%s5688_s4 + $0xe8] sm:$0xff] }
 0x243   : > { %6980 = vst [vmem:[#allocation7_spill] sm:$0xff] %v5880_v58 }
 0x246   : > { %v1884_v62 = vpop.f32.mrf.mxu2  ;;  %v987_v10 = vpop.f32.mrf.mxu0 }
 0x247   : > { %v2439_v0 = vpop.f32.mrf.mxu3  ;;  %v1986_v7 = vadd.f32 %v1884_v62, %v1394_v56  ;;  %v1396_v12 = vpop.f32.mrf.mxu1  ;;  %v5024_v62 = vld [vmem:[%s5688_s4 + $0x2e8] sm:$0xff] }
 0x248   : > { %v1397_v21 = vadd.f32 %v1396_v12, %v987_v10 }
 0x249   : > { %v5886_v23 = vadd.f32 %v2439_v0, %v1986_v7  ;;  %1026 = vmatmul.bf16.gmra.mxu0 %v4983_v1  ;;  %v5064_v0 = vld [vmem:[%s5688_s4 + $0x3e8] sm:$0xff] }
 0x24a   : > { %1435 = vmatmul.bf16.gmra.mxu1 %v4943_v6 }
 0x24b   : > { %6981 = vst [vmem:[#allocation8_spill] sm:$0xff] %v5886_v23  ;;  %1926 = vmatmul.bf16.gmra.mxu2 %v5023_v16 }
 0x24c   : > { %2481 = vmatmul.bf16.gmra.mxu3 %v5063_v18 }
 0x24e   : > { %v1887_v25 = vpop.f32.mrf.mxu2  ;;  %v989_v33 = vpop.f32.mrf.mxu0 }
 0x24f   : > { %v2442_v26 = vpop.f32.mrf.mxu3  ;;  %v1987_v29 = vadd.f32 %v1887_v25, %v1397_v21  ;;  %v1398_v36 = vpop.f32.mrf.mxu1 }
 0x250   : > { %v1399_v37 = vadd.f32 %v1398_v36, %v989_v33  ;;  %v4985_v33 = vld [vmem:[%s5688_s4 + $0x1f0] sm:$0xff] }
 0x251   : > { %v5888_v38 = vadd.f32 %v2442_v26, %v1987_v29  ;;  %v4945_v36 = vld [vmem:[%s5688_s4 + $0xf0] sm:$0xff] }
 0x256   : > { %v1889_v40 = vpop.f32.mrf.mxu2  ;;  %v992_v54 = vpop.f32.mrf.mxu0 }
 0x257   : > { %v2444_v48 = vpop.f32.mrf.mxu3  ;;  %v1988_v53 = vadd.f32 %v1889_v40, %v1399_v37  ;;  %v1401_v56 = vpop.f32.mrf.mxu1 }
 0x258   : > { %v1402_v1 = vadd.f32 %v1401_v56, %v992_v54 }
 0x259   : > { %v5894_v6 = vadd.f32 %v2444_v48, %v1988_v53  ;;  %1031 = vmatmul.bf16.gmra.mxu0 %v4984_v50  ;;  %v5025_v50 = vld [vmem:[%s5688_s4 + $0x2f0] sm:$0xff] }
 0x25a   : > { %1440 = vmatmul.bf16.gmra.mxu1 %v4944_v51  ;;  %v5065_v51 = vld [vmem:[%s5688_s4 + $0x3f0] sm:$0xff] }
 0x25b   : > { %6982 = vst [vmem:[#allocation9_spill] sm:$0xff] %v5894_v6  ;;  %1931 = vmatmul.bf16.gmra.mxu2 %v5024_v62 }
 0x25c   : > { %2486 = vmatmul.bf16.gmra.mxu3 %v5064_v0 }
 0x25e   : > { %v1892_v7 = vpop.f32.mrf.mxu2  ;;  %v994_v16 = vpop.f32.mrf.mxu0 }
 0x25f   : > { %v2447_v10 = vpop.f32.mrf.mxu3  ;;  %v1989_v12 = vadd.f32 %v1892_v7, %v1402_v1  ;;  %v1403_v18 = vpop.f32.mrf.mxu1 }
 0x260   : > { %v1404_v21 = vadd.f32 %v1403_v18, %v994_v16 }
 0x261   : > { %v5896_v25 = vadd.f32 %v2447_v10, %v1989_v12 }
 0x263   : > { %6983 = vst [vmem:[#allocation10_spill] sm:$0xff] %v5896_v25 }
 0x266   : > { %v1894_v26 = vpop.f32.mrf.mxu2  ;;  %v997_v40 = vpop.f32.mrf.mxu0 }
 0x267   : > { %v2449_v29 = vpop.f32.mrf.mxu3  ;;  %v1990_v37 = vadd.f32 %v1894_v26, %v1404_v21  ;;  %v1406_v48 = vpop.f32.mrf.mxu1  ;;  %v4986_v21 = vld [vmem:[%s5688_s4 + $0x1f8] sm:$0xff] }
 0x268   : > { %v1407_v53 = vadd.f32 %v1406_v48, %v997_v40  ;;  %v4946_v26 = vld [vmem:[%s5688_s4 + $0xf8] sm:$0xff] }
 0x269   : > { %v5902_v54 = vadd.f32 %v2449_v29, %v1990_v37  ;;  %1036 = vmatmul.bf16.gmra.mxu0 %v4985_v33  ;;  %v5066_v40 = vld [vmem:[%s5688_s4 + $0x3f8] sm:$0xff] }
 0x26a   : > { %1445 = vmatmul.bf16.gmra.mxu1 %v4945_v36  ;;  %v5026_v36 = vld [vmem:[%s5688_s4 + $0x2f8] sm:$0xff] }
 0x26b   : > { %6984 = vst [vmem:[#allocation11_spill] sm:$0xff] %v5902_v54  ;;  %1936 = vmatmul.bf16.gmra.mxu2 %v5025_v50 }
 0x26c   : > { %2491 = vmatmul.bf16.gmra.mxu3 %v5065_v51 }
 0x26e   : > { %v1897_v56 = vpop.f32.mrf.mxu2  ;;  %v999_v1 = vpop.f32.mrf.mxu0 }
 0x26f   : > { %v2452_v62 = vpop.f32.mrf.mxu3  ;;  %v1991_v0 = vadd.f32 %v1897_v56, %v1407_v53  ;;  %v1408_v7 = vpop.f32.mrf.mxu1 }
 0x270   : > { %v1409_v10 = vadd.f32 %v1408_v7, %v999_v1 }
 0x271   : > { %v5904_v12 = vadd.f32 %v2452_v62, %v1991_v0 }
 0x273   : > { %6985 = vst [vmem:[#allocation12_spill] sm:$0xff] %v5904_v12 }
 0x276   : > { %v1899_v16 = vpop.f32.mrf.mxu2  ;;  %v1002_v37 = vpop.f32.mrf.mxu0 }
 0x277   : > { %v2454_v18 = vpop.f32.mrf.mxu3  ;;  %v1992_v29 = vadd.f32 %v1899_v16, %v1409_v10  ;;  %v1411_v33 = vpop.f32.mrf.mxu1 }
 0x278   : > { %v1412_v48 = vadd.f32 %v1411_v33, %v1002_v37 }
 0x279   : > { %v5910_v50 = vadd.f32 %v2454_v18, %v1992_v29  ;;  %1041 = vmatmul.bf16.gmra.mxu0 %v4986_v21 }
 0x27a   : > { %1450 = vmatmul.bf16.gmra.mxu1 %v4946_v26 }
 0x27b   : > { %6986 = vst [vmem:[#allocation13_spill] sm:$0xff] %v5910_v50  ;;  %1941 = vmatmul.bf16.gmra.mxu2 %v5026_v36 }
 0x27c   : > { %2496 = vmatmul.bf16.gmra.mxu3 %v5066_v40 }
 0x27e   : > { %v1902_v51 = vpop.f32.mrf.mxu2  ;;  %v1004_v62 = vpop.f32.mrf.mxu0 }
 0x27f   : > { %v2457_v53 = vpop.f32.mrf.mxu3  ;;  %v1993_v56 = vadd.f32 %v1902_v51, %v1412_v48  ;;  %v1413_v0 = vpop.f32.mrf.mxu1 }
 0x280   : > { %v1414_v1 = vadd.f32 %v1413_v0, %v1004_v62 }
 0x281   : > { %v5912_v7 = vadd.f32 %v2457_v53, %v1993_v56 }
 0x283   : > { %6987 = vst [vmem:[#allocation14_spill] sm:$0xff] %v5912_v7 }
 0x286   : > { %v1904_v10 = vpop.f32.mrf.mxu2  ;;  %v1007_v54 = vpop.f32.mrf.mxu0 }
 0x287   : > { %v2459_v16 = vpop.f32.mrf.mxu3  ;;  %v1994_v12 = vadd.f32 %v1904_v10, %v1414_v1  ;;  %v1416_v25 = vpop.f32.mrf.mxu1 }
 0x288   : > { %v1417_v37 = vadd.f32 %v1416_v25, %v1007_v54 }
 0x289   : > { %v5914_v18 = vadd.f32 %v2459_v16, %v1994_v12 }
 0x28b   : > { %6988 = vst [vmem:[#allocation15_spill] sm:$0xff] %v5914_v18 }
 0x28e   : > { %v1907_v21 = vpop.f32.mrf.mxu2  ;;  %v1009_v33 = vpop.f32.mrf.mxu0 }
 0x28f   : > { %v2462_v26 = vpop.f32.mrf.mxu3  ;;  %v1995_v29 = vadd.f32 %v1907_v21, %v1417_v37  ;;  %v1418_v36 = vpop.f32.mrf.mxu1 }
 0x290   : > { %v1419_v40 = vadd.f32 %v1418_v36, %v1009_v33 }
 0x291   : > { %v5916_v48 = vadd.f32 %v2462_v26, %v1995_v29 }
 0x293   : > { %6989 = vst [vmem:[#allocation16_spill] sm:$0xff] %v5916_v48 }
 0x296   : > { %v1909_v51 = vpop.f32.mrf.mxu2  ;;  %v1012_v56 = vpop.f32.mrf.mxu0 }
 0x297   : > { %v2464_v62 = vpop.f32.mrf.mxu3  ;;  %v1996_v53 = vadd.f32 %v1909_v51, %v1419_v40  ;;  %v1421_v0 = vpop.f32.mrf.mxu1 }
 0x298   : > { %v1422_v7 = vadd.f32 %v1421_v0, %v1012_v56 }
 0x299   : > { %v5918_v1 = vadd.f32 %v2464_v62, %v1996_v53 }
 0x29b   : > { %6990 = vst [vmem:[#allocation17_spill] sm:$0xff] %v5918_v1 }
 0x29e   : > { %v1912_v10 = vpop.f32.mrf.mxu2  ;;  %v1014_v12 = vpop.f32.mrf.mxu0 }
 0x29f   : > { %v2467_v25 = vpop.f32.mrf.mxu3  ;;  %v1997_v54 = vadd.f32 %v1912_v10, %v1422_v7  ;;  %v1423_v16 = vpop.f32.mrf.mxu1 }
 0x2a0   : > { %v1424_v18 = vadd.f32 %v1423_v16, %v1014_v12 }
 0x2a1   : > { %v5920_v37 = vadd.f32 %v2467_v25, %v1997_v54 }
 0x2a3   : > { %6991 = vst [vmem:[#allocation18_spill] sm:$0xff] %v5920_v37 }
 0x2a6   : > { %v1914_v21 = vpop.f32.mrf.mxu2  ;;  %v1017_v29 = vpop.f32.mrf.mxu0 }
 0x2a7   : > { %v2469_v33 = vpop.f32.mrf.mxu3  ;;  %v1998_v26 = vadd.f32 %v1914_v21, %v1424_v18  ;;  %v1426_v36 = vpop.f32.mrf.mxu1 }
 0x2a8   : > { %v1427_v48 = vadd.f32 %v1426_v36, %v1017_v29 }
 0x2a9   : > { %v5922_v40 = vadd.f32 %v2469_v33, %v1998_v26 }
 0x2ab   : > { %6992 = vst [vmem:[#allocation19_spill] sm:$0xff] %v5922_v40 }
 0x2ae   : > { %v1917_v51 = vpop.f32.mrf.mxu2  ;;  %v1019_v53 = vpop.f32.mrf.mxu0 }
 0x2af   : > { %v2472_v56 = vpop.f32.mrf.mxu3  ;;  %v1999_v62 = vadd.f32 %v1917_v51, %v1427_v48  ;;  %v1428_v0 = vpop.f32.mrf.mxu1 }
 0x2b0   : > { %v1429_v1 = vadd.f32 %v1428_v0, %v1019_v53 }
 0x2b1   : > { %v5924_v7 = vadd.f32 %v2472_v56, %v1999_v62 }
 0x2b3   : > { %6993 = vst [vmem:[#allocation20_spill] sm:$0xff] %v5924_v7 }
 0x2b6   : > { %v1919_v10 = vpop.f32.mrf.mxu2  ;;  %v1022_v54 = vpop.f32.mrf.mxu0 }
 0x2b7   : > { %v2474_v12 = vpop.f32.mrf.mxu3  ;;  %v2000_v25 = vadd.f32 %v1919_v10, %v1429_v1  ;;  %v1431_v16 = vpop.f32.mrf.mxu1 }
 0x2b8   : > { %v1432_v37 = vadd.f32 %v1431_v16, %v1022_v54 }
 0x2b9   : > { %v5926_v18 = vadd.f32 %v2474_v12, %v2000_v25 }
 0x2bb   : > { %6994 = vst [vmem:[#allocation21_spill] sm:$0xff] %v5926_v18 }
 0x2be   : > { %v1922_v21 = vpop.f32.mrf.mxu2  ;;  %v1024_v26 = vpop.f32.mrf.mxu0 }
 0x2bf   : > { %v2477_v29 = vpop.f32.mrf.mxu3  ;;  %v2001_v33 = vadd.f32 %v1922_v21, %v1432_v37  ;;  %v1433_v36 = vpop.f32.mrf.mxu1 }
 0x2c0   : > { %v1434_v40 = vadd.f32 %v1433_v36, %v1024_v26 }
 0x2c1   : > { %v5928_v48 = vadd.f32 %v2477_v29, %v2001_v33 }
 0x2c3   : > { %6995 = vst [vmem:[#allocation22_spill] sm:$0xff] %v5928_v48 }
 0x2c6   : > { %v1924_v51 = vpop.f32.mrf.mxu2  ;;  %v1027_v62 = vpop.f32.mrf.mxu0 }
 0x2c7   : > { %v2479_v53 = vpop.f32.mrf.mxu3  ;;  %v2002_v56 = vadd.f32 %v1924_v51, %v1434_v40  ;;  %v1436_v0 = vpop.f32.mrf.mxu1 }
 0x2c8   : > { %v1437_v1 = vadd.f32 %v1436_v0, %v1027_v62 }
 0x2c9   : > { %v5930_v7 = vadd.f32 %v2479_v53, %v2002_v56 }
 0x2cb   : > { %6996 = vst [vmem:[#allocation23_spill] sm:$0xff] %v5930_v7 }
 0x2ce   : > { %v1927_v10 = vpop.f32.mrf.mxu2  ;;  %v1029_v25 = vpop.f32.mrf.mxu0 }
 0x2cf   : > { %v2482_v54 = vpop.f32.mrf.mxu3  ;;  %v2003_v12 = vadd.f32 %v1927_v10, %v1437_v1  ;;  %v1438_v16 = vpop.f32.mrf.mxu1 }
 0x2d0   : > { %v1439_v37 = vadd.f32 %v1438_v16, %v1029_v25 }
 0x2d1   : > { %v5932_v18 = vadd.f32 %v2482_v54, %v2003_v12 }
 0x2d3   : > { %6997 = vst [vmem:[#allocation24_spill] sm:$0xff] %v5932_v18 }
 0x2d6   : > { %v1929_v21 = vpop.f32.mrf.mxu2  ;;  %v1032_v33 = vpop.f32.mrf.mxu0 }
 0x2d7   : > { %v2484_v26 = vpop.f32.mrf.mxu3  ;;  %v2004_v29 = vadd.f32 %v1929_v21, %v1439_v37  ;;  %v1441_v36 = vpop.f32.mrf.mxu1 }
 0x2d8   : > { %v1442_v40 = vadd.f32 %v1441_v36, %v1032_v33 }
 0x2d9   : > { %v5934_v48 = vadd.f32 %v2484_v26, %v2004_v29 }
 0x2db   : > { %6998 = vst [vmem:[#allocation25_spill] sm:$0xff] %v5934_v48 }
 0x2de   : > { %v1932_v51 = vpop.f32.mrf.mxu2  ;;  %v1034_v62 = vpop.f32.mrf.mxu0 }
 0x2df   : > { %v2487_v53 = vpop.f32.mrf.mxu3  ;;  %v2005_v56 = vadd.f32 %v1932_v51, %v1442_v40  ;;  %v1443_v0 = vpop.f32.mrf.mxu1 }
 0x2e0   : > { %v1444_v1 = vadd.f32 %v1443_v0, %v1034_v62 }
 0x2e1   : > { %v5936_v7 = vadd.f32 %v2487_v53, %v2005_v56 }
 0x2e6   : > { %v1934_v10 = vpop.f32.mrf.mxu2  ;;  %v1037_v25 = vpop.f32.mrf.mxu0 }
 0x2e7   : > { %v2489_v54 = vpop.f32.mrf.mxu3  ;;  %v2006_v12 = vadd.f32 %v1934_v10, %v1444_v1  ;;  %v1446_v16 = vpop.f32.mrf.mxu1 }
 0x2e8   : > { %v1447_v37 = vadd.f32 %v1446_v16, %v1037_v25 }
 0x2e9   : > { %v5938_v18 = vadd.f32 %v2489_v54, %v2006_v12 }
 0x2eb   : > { %6999 = vst [vmem:[#allocation26_spill] sm:$0xff] %v5938_v18 }
 0x2ee   : > { %v1937_v21 = vpop.f32.mrf.mxu2  ;;  %v1039_v33 = vpop.f32.mrf.mxu0 }
 0x2ef   : > { %v2492_v26 = vpop.f32.mrf.mxu3  ;;  %v2007_v29 = vadd.f32 %v1937_v21, %v1447_v37  ;;  %v1448_v36 = vpop.f32.mrf.mxu1 }
 0x2f0   : > { %v1449_v40 = vadd.f32 %v1448_v36, %v1039_v33 }
 0x2f1   : > { %v5940_v48 = vadd.f32 %v2492_v26, %v2007_v29 }
 0x2f6   : > { %v1939_v51 = vpop.f32.mrf.mxu2  ;;  %v1042_v62 = vpop.f32.mrf.mxu0 }
 0x2f7   : > { %v2494_v53 = vpop.f32.mrf.mxu3  ;;  %v2008_v56 = vadd.f32 %v1939_v51, %v1449_v40  ;;  %v1451_v0 = vpop.f32.mrf.mxu1 }
 0x2f8   : > { %v1452_v10 = vadd.f32 %v1451_v0, %v1042_v62 }
 0x2f9   : > { %v5942_v1 = vadd.f32 %v2494_v53, %v2008_v56 }
 0x2fe   : > { %v1942_v54 = vpop.f32.mrf.mxu2  ;;  %v1044_v37 = vpop.f32.mrf.mxu0 }
 0x2ff   : > { %v2497_v12 = vpop.f32.mrf.mxu3  ;;  %v2009_v25 = vadd.f32 %v1942_v54, %v1452_v10  ;;  %v1453_v21 = vpop.f32.mrf.mxu1 }
 0x300   : > { %v1454_v18 = vadd.f32 %v1453_v21, %v1044_v37 }
 0x301   : > { %v5944_v16 = vadd.f32 %v2497_v12, %v2009_v25 }
 0x305   : > { %2569 = sbr.rel (%p4907_p1) target bundleno = 842 (0x34a), region = 73 }
 0x306   : > { %v1944_v26 = vpop.f32.mrf.mxu2 }
 0x307   : > { %v2010_v29 = vadd.f32 %v1944_v26, %v1454_v18  ;;  %v2499_v33 = vpop.f32.mrf.mxu3 }
 0x309   : > { %v5946_v36 = vadd.f32 %v2499_v33, %v2010_v29 }
 0x30a   : > { %2570 = vst [vmem:[#allocation2 + $0xb0] sm:$0xff] %v5728_v13  ;;  %v7000_v18 = vld [vmem:[#allocation10_spill] sm:$0xff]  ;;  %v7001_v40 = vld [vmem:[#allocation11_spill] sm:$0xff]  ;;  %v7002_v51 = vld [vmem:[#allocation12_spill] sm:$0xff] }
 0x30b   : > { %2571 = vst [vmem:[#allocation2 + $0x1b0] sm:$0xff] %v5734_v24  ;;  %v7003_v53 = vld [vmem:[#allocation14_spill] sm:$0xff]  ;;  %v7004_v56 = vld [vmem:[#allocation15_spill] sm:$0xff]  ;;  %v7005_v62 = vld [vmem:[#allocation16_spill] sm:$0xff] }
 0x30c   : > { %2572 = vst [vmem:[#allocation2 + $0xd8] sm:$0xff] %v5736_v31  ;;  %v7006_v0 = vld [vmem:[#allocation17_spill] sm:$0xff]  ;;  %v7007_v10 = vld [vmem:[#allocation18_spill] sm:$0xff]  ;;  %v7008_v54 = vld [vmem:[#allocation19_spill] sm:$0xff] }
 0x30d   : > { %2573 = vst [vmem:[#allocation2 + $0x18] sm:$0xff] %v5742_v42  ;;  %v7009_v12 = vld [vmem:[#allocation20_spill] sm:$0xff]  ;;  %v7010_v25 = vld [vmem:[#allocation21_spill] sm:$0xff]  ;;  %v7011_v37 = vld [vmem:[#allocation22_spill] sm:$0xff] }
 0x30e   : > { %2574 = vst [vmem:[#allocation2 + $0x50] sm:$0xff] %v5744_v49  ;;  %v7012_v21 = vld [vmem:[#allocation23_spill] sm:$0xff]  ;;  %v7013_v26 = vld [vmem:[#allocation24_spill] sm:$0xff]  ;;  %v7014_v29 = vld [vmem:[#allocation25_spill] sm:$0xff] }
 0x30f   : > { %2575 = vst [vmem:[#allocation2 + $0x168] sm:$0xff] %v5750_v60  ;;  %v7015_v33 = vld [vmem:[#allocation26_spill] sm:$0xff] }
 0x310   : > { %2576 = vst [vmem:[#allocation2 + $0x130] sm:$0xff] %v5752_v3 }
 0x311   : > { %2577 = vst [vmem:[#allocation2 + $0x48] sm:$0xff] %v5758_v15 }
 0x312   : > { %2578 = vst [vmem:[#allocation2 + $0x180] sm:$0xff] %v5760_v22 }
 0x313   : > { %2579 = vst [vmem:[#allocation2 + $0x110] sm:$0xff] %v5766_v35 }
 0x314   : > { %2580 = vst [vmem:[#allocation2 + $0x118] sm:$0xff] %v5768_v43 }
 0x315   : > { %2581 = vst [vmem:[#allocation2 + $0x98] sm:$0xff] %v5774_v55 }
 0x316   : > { %2582 = vst [vmem:[#allocation2 + $0x120] sm:$0xff] %v5776_v63 }
 0x317   : > { %2583 = vst [vmem:[#allocation2 + $0x150] sm:$0xff] %v5782_v11 }
 0x318   : > { %2584 = vst [vmem:[#allocation2 + $0x108] sm:$0xff] %v5784_v20 }
 0x319   : > { %2585 = vst [vmem:[#allocation2 + $0x60] sm:$0xff] %v5790_v34 }
 0x31a   : > { %2586 = vst [vmem:[#allocation2 + $0xe0] sm:$0xff] %v5792_v44 }
 0x31b   : > { %2587 = vst [vmem:[#allocation2 + $0x188] sm:$0xff] %v5798_v57 }
 0x31c   : > { %2588 = vst [vmem:[#allocation2 + $0x138] sm:$0xff] %v5800_v2 }
 0x31d   : > { %2589 = vst [vmem:[#allocation2 + $0x140] sm:$0xff] %v5806_v17 }
 0x31e   : > { %2590 = vst [vmem:[#allocation2 + $0x80] sm:$0xff] %v5808_v27 }
 0x31f   : > { %2591 = vst [vmem:[#allocation2 + $0x1a8] sm:$0xff] %v5814_v41 }
 0x320   : > { %2592 = vst [vmem:[#allocation2 + $0x1b8] sm:$0xff] %v5816_v52 }
 0x321   : > { %2593 = vst [vmem:[#allocation2 + $0x28] sm:$0xff] %v5822_v5 }
 0x322   : > { %2594 = vst [vmem:[#allocation2 + $0x1e8] sm:$0xff] %v5824_v14 }
 0x323   : > { %2595 = vst [vmem:[#allocation2 + $0xf8] sm:$0xff] %v5830_v32 }
 0x324   : > { %2596 = vst [vmem:[#allocation2 + $0x160] sm:$0xff] %v5832_v45 }
 0x325   : > { %2597 = vst [vmem:[#allocation2 + $0x30] sm:$0xff] %v5838_v61 }
 0x326   : > { %2598 = vst [vmem:[#allocation2 + $0x1e0] sm:$0xff] %v5840_v8 }
 0x327   : > { %2599 = vst [vmem:[#allocation2] sm:$0xff] %v5846_v28 }
 0x328   : > { %2600 = vst [vmem:[#allocation2 + $0xf0] sm:$0xff] %v5848_v39 }
 0x329   : > { %2601 = vst [vmem:[#allocation2 + $0x8] sm:$0xff] %v5854_v59 }
 0x32a   : > { %2602 = vst [vmem:[#allocation2 + $0x148] sm:$0xff] %v5856_v9 }
 0x32b   : > { %2603 = vst [vmem:[#allocation2 + $0x1d0] sm:$0xff] %v5862_v30 }
 0x32c   : > { %2604 = vst [vmem:[#allocation2 + $0x100] sm:$0xff] %v5864_v47 }
 0x32d   : > { %2605 = vst [vmem:[#allocation2 + $0xc8] sm:$0xff] %v5870_v4 }
 0x32e   : > { %2606 = vst [vmem:[#allocation2 + $0x40] sm:$0xff] %v5872_v19 }
 0x32f   : > { %2607 = vst [vmem:[#allocation2 + $0x1f8] sm:$0xff] %v5878_v46 }
 0x330   : > { %2608 = vst [vmem:[#allocation2 + $0x20] sm:$0xff] %v5880_v58 }
 0x331   : > { %2609 = vst [vmem:[#allocation2 + $0x128] sm:$0xff] %v5886_v23 }
 0x332   : > { %2610 = vst [vmem:[#allocation2 + $0x1a0] sm:$0xff] %v5888_v38 }
 0x333   : > { %2611 = vst [vmem:[#allocation2 + $0x1f0] sm:$0xff] %v5894_v6 }
 0x334   : > { %2612 = vst [vmem:[#allocation2 + $0xe8] sm:$0xff] %v7000_v18 }
 0x335   : > { %2613 = vst [vmem:[#allocation2 + $0x78] sm:$0xff] %v7001_v40 }
 0x336   : > { %2614 = vst [vmem:[#allocation2 + $0x70] sm:$0xff] %v7002_v51 }
 0x337   : > { %2615 = vst [vmem:[#allocation2 + $0x90] sm:$0xff] %v5910_v50 }
 0x338   : > { %2616 = vst [vmem:[#allocation2 + $0x1d8] sm:$0xff] %v7003_v53 }
 0x339   : > { %2617 = vst [vmem:[#allocation2 + $0xd0] sm:$0xff] %v7004_v56 }
 0x33a   : > { %2618 = vst [vmem:[#allocation2 + $0xb8] sm:$0xff] %v7005_v62 }
 0x33b   : > { %2619 = vst [vmem:[#allocation2 + $0x88] sm:$0xff] %v7006_v0 }
 0x33c   : > { %2620 = vst [vmem:[#allocation2 + $0xa8] sm:$0xff] %v7007_v10 }
 0x33d   : > { %2621 = vst [vmem:[#allocation2 + $0x1c8] sm:$0xff] %v7008_v54 }
 0x33e   : > { %2622 = vst [vmem:[#allocation2 + $0x170] sm:$0xff] %v7009_v12 }
 0x33f   : > { %2623 = vst [vmem:[#allocation2 + $0x178] sm:$0xff] %v7010_v25 }
 0x340   : > { %2624 = vst [vmem:[#allocation2 + $0x68] sm:$0xff] %v7011_v37 }
 0x341   : > { %2625 = vst [vmem:[#allocation2 + $0x190] sm:$0xff] %v7012_v21 }
 0x342   : > { %2626 = vst [vmem:[#allocation2 + $0x198] sm:$0xff] %v7013_v26 }
 0x343   : > { %2627 = vst [vmem:[#allocation2 + $0x38] sm:$0xff] %v7014_v29 }
 0x344   : > { %2628 = vst [vmem:[#allocation2 + $0xc0] sm:$0xff] %v5936_v7 }
 0x345   : > { %2629 = vst [vmem:[#allocation2 + $0x1c0] sm:$0xff] %v7015_v33 }
 0x346   : > { %2630 = vst [vmem:[#allocation2 + $0x158] sm:$0xff] %v5940_v48 }
 0x347   : > { %2631 = vst [vmem:[#allocation2 + $0x10] sm:$0xff] %v5942_v1 }
 0x348   : > { %2632 = vst [vmem:[#allocation2 + $0x58] sm:$0xff] %v5944_v16 }
 0x349   : > { %2633 = vst [vmem:[#allocation2 + $0xa0] sm:$0xff] %v5946_v36 }
 0x34a PF: > { %p2634_p2 = scmp.gt.s32.totalorder %s5394_s13, 0  ;;  %p2635_p3 = scmp.lt.s32.totalorder %s5394_s13, 3 }
 0x34c   : > { %p2636_p4 = pnand %p2635_p3, %p2634_p2 }
 0x34e   : > { %2639 = sbr.rel (%p2636_p4) target bundleno = 918 (0x396), region = 77 }
 0x353   : > { %v2640_v18 = vld [vmem:[#allocation2 + $0xb0] sm:$0xff]  ;;  %v2642_v51 = vld [vmem:[#allocation2 + $0xd8] sm:$0xff]  ;;  %v2645_v54 = vld [vmem:[#allocation2 + $0x168] sm:$0xff] }
 0x354   : > { %v2641_v40 = vld [vmem:[#allocation2 + $0x1b0] sm:$0xff]  ;;  %v2704_v53 = vadd.f32 %v2640_v18, %v5728_v13  ;;  %v2706_v62 = vadd.f32 %v2642_v51, %v5736_v31  ;;  %v2643_v0 = vld [vmem:[#allocation2 + $0x18] sm:$0xff]  ;;  %v2647_v21 = vld [vmem:[#allocation2 + $0x48] sm:$0xff]  ;;  %v2709_v26 = vadd.f32 %v2645_v54, %v5750_v60 }
 0x355   : > { %v2705_v56 = vadd.f32 %v2641_v40, %v5734_v24  ;;  %v2644_v10 = vld [vmem:[#allocation2 + $0x50] sm:$0xff]  ;;  %v2707_v12 = vadd.f32 %v2643_v0, %v5742_v42  ;;  %v2648_v29 = vld [vmem:[#allocation2 + $0x180] sm:$0xff]  ;;  %v2711_v40 = vadd.f32 %v2647_v21, %v5758_v15  ;;  %v2650_v51 = vld [vmem:[#allocation2 + $0x118] sm:$0xff] }
 0x356   : > { %v2646_v25 = vld [vmem:[#allocation2 + $0x130] sm:$0xff]  ;;  %2768 = vst [vmem:[#allocation2 + $0xb0] sm:$0xff] %v2704_v53  ;;  %v2708_v37 = vadd.f32 %v2644_v10, %v5744_v49  ;;  %v2712_v0 = vadd.f32 %v2648_v29, %v5760_v22  ;;  %v2651_v42 = vld [vmem:[#allocation2 + $0x98] sm:$0xff]  ;;  %v2652_v10 = vld [vmem:[#allocation2 + $0x120] sm:$0xff] }
 0x357   : > { %2769 = vst [vmem:[#allocation2 + $0x1b0] sm:$0xff] %v2705_v56  ;;  %v2710_v33 = vadd.f32 %v2646_v25, %v5752_v3  ;;  %v2649_v18 = vld [vmem:[#allocation2 + $0x110] sm:$0xff]  ;;  %v2714_v56 = vadd.f32 %v2650_v51, %v5768_v43  ;;  %v2654_v25 = vld [vmem:[#allocation2 + $0x108] sm:$0xff]  ;;  %v2655_v21 = vld [vmem:[#allocation2 + $0x60] sm:$0xff] }
 0x358   : > { %2770 = vst [vmem:[#allocation2 + $0xd8] sm:$0xff] %v2706_v62  ;;  %v2713_v53 = vadd.f32 %v2649_v18, %v5766_v35  ;;  %v2653_v54 = vld [vmem:[#allocation2 + $0x150] sm:$0xff]  ;;  %v2715_v62 = vadd.f32 %v2651_v42, %v5774_v55  ;;  %v2656_v29 = vld [vmem:[#allocation2 + $0xe0] sm:$0xff]  ;;  %v2657_v18 = vld [vmem:[#allocation2 + $0x188] sm:$0xff] }
 0x359   : > { %2771 = vst [vmem:[#allocation2 + $0x18] sm:$0xff] %v2707_v12  ;;  %v2716_v12 = vadd.f32 %v2652_v10, %v5776_v63  ;;  %v2658_v51 = vld [vmem:[#allocation2 + $0x138] sm:$0xff]  ;;  %v2720_v42 = vadd.f32 %v2656_v29, %v5792_v44  ;;  %v2660_v10 = vld [vmem:[#allocation2 + $0x80] sm:$0xff]  ;;  %v2664_v29 = vld [vmem:[#allocation2 + $0x1e8] sm:$0xff] }
 0x35a   : > { %2772 = vst [vmem:[#allocation2 + $0x50] sm:$0xff] %v2708_v37  ;;  %v2717_v37 = vadd.f32 %v2653_v54, %v5782_v11  ;;  %v2661_v54 = vld [vmem:[#allocation2 + $0x1a8] sm:$0xff] }
 0x35b   : > { %2773 = vst [vmem:[#allocation2 + $0x168] sm:$0xff] %v2709_v26  ;;  %v2718_v26 = vadd.f32 %v2654_v25, %v5784_v20  ;;  %v2662_v25 = vld [vmem:[#allocation2 + $0x1b8] sm:$0xff] }
 0x35c   : > { %2774 = vst [vmem:[#allocation2 + $0x130] sm:$0xff] %v2710_v33  ;;  %v2719_v33 = vadd.f32 %v2655_v21, %v5790_v34  ;;  %v2663_v21 = vld [vmem:[#allocation2 + $0x28] sm:$0xff] }
 0x35d   : > { %2775 = vst [vmem:[#allocation2 + $0x48] sm:$0xff] %v2711_v40  ;;  %v2659_v40 = vld [vmem:[#allocation2 + $0x140] sm:$0xff] }
 0x35e   : > { %2776 = vst [vmem:[#allocation2 + $0x180] sm:$0xff] %v2712_v0  ;;  %v2721_v0 = vadd.f32 %v2657_v18, %v5798_v57  ;;  %v2665_v18 = vld [vmem:[#allocation2 + $0xf8] sm:$0xff] }
 0x35f   : > { %2777 = vst [vmem:[#allocation2 + $0x110] sm:$0xff] %v2713_v53  ;;  %v2722_v53 = vadd.f32 %v2658_v51, %v5800_v2  ;;  %v2666_v51 = vld [vmem:[#allocation2 + $0x160] sm:$0xff] }
 0x360   : > { %2778 = vst [vmem:[#allocation2 + $0x118] sm:$0xff] %v2714_v56  ;;  %v2723_v56 = vadd.f32 %v2659_v40, %v5806_v17  ;;  %v2667_v40 = vld [vmem:[#allocation2 + $0x30] sm:$0xff] }
 0x361   : > { %2779 = vst [vmem:[#allocation2 + $0x98] sm:$0xff] %v2715_v62  ;;  %v2724_v62 = vadd.f32 %v2660_v10, %v5808_v27  ;;  %v2668_v10 = vld [vmem:[#allocation2 + $0x1e0] sm:$0xff] }
 0x362   : > { %2780 = vst [vmem:[#allocation2 + $0x120] sm:$0xff] %v2716_v12  ;;  %v2725_v12 = vadd.f32 %v2661_v54, %v5814_v41  ;;  %v2669_v54 = vld [vmem:[#allocation2] sm:$0xff] }
 0x363   : > { %2781 = vst [vmem:[#allocation2 + $0x150] sm:$0xff] %v2717_v37  ;;  %v2726_v37 = vadd.f32 %v2662_v25, %v5816_v52  ;;  %v2670_v25 = vld [vmem:[#allocation2 + $0xf0] sm:$0xff] }
 0x364   : > { %2782 = vst [vmem:[#allocation2 + $0x108] sm:$0xff] %v2718_v26  ;;  %v2727_v26 = vadd.f32 %v2663_v21, %v5822_v5  ;;  %v2671_v21 = vld [vmem:[#allocation2 + $0x8] sm:$0xff] }
 0x365   : > { %2783 = vst [vmem:[#allocation2 + $0x60] sm:$0xff] %v2719_v33  ;;  %v2728_v33 = vadd.f32 %v2664_v29, %v5824_v14  ;;  %v2672_v29 = vld [vmem:[#allocation2 + $0x148] sm:$0xff] }
 0x366   : > { %2784 = vst [vmem:[#allocation2 + $0xe0] sm:$0xff] %v2720_v42  ;;  %v2729_v42 = vadd.f32 %v2665_v18, %v5830_v32  ;;  %v2673_v18 = vld [vmem:[#allocation2 + $0x1d0] sm:$0xff] }
 0x367   : > { %2785 = vst [vmem:[#allocation2 + $0x188] sm:$0xff] %v2721_v0  ;;  %v2730_v0 = vadd.f32 %v2666_v51, %v5832_v45  ;;  %v2674_v51 = vld [vmem:[#allocation2 + $0x100] sm:$0xff] }
 0x368   : > { %2786 = vst [vmem:[#allocation2 + $0x138] sm:$0xff] %v2722_v53  ;;  %v2731_v53 = vadd.f32 %v2667_v40, %v5838_v61  ;;  %v2675_v40 = vld [vmem:[#allocation2 + $0xc8] sm:$0xff] }
 0x369   : > { %2787 = vst [vmem:[#allocation2 + $0x140] sm:$0xff] %v2723_v56  ;;  %v2732_v56 = vadd.f32 %v2668_v10, %v5840_v8  ;;  %v2676_v10 = vld [vmem:[#allocation2 + $0x40] sm:$0xff] }
 0x36a   : > { %2788 = vst [vmem:[#allocation2 + $0x80] sm:$0xff] %v2724_v62  ;;  %v2733_v62 = vadd.f32 %v2669_v54, %v5846_v28  ;;  %v2677_v54 = vld [vmem:[#allocation2 + $0x1f8] sm:$0xff] }
 0x36b   : > { %2789 = vst [vmem:[#allocation2 + $0x1a8] sm:$0xff] %v2725_v12  ;;  %v2734_v12 = vadd.f32 %v2670_v25, %v5848_v39  ;;  %v2678_v25 = vld [vmem:[#allocation2 + $0x20] sm:$0xff] }
 0x36c   : > { %2790 = vst [vmem:[#allocation2 + $0x1b8] sm:$0xff] %v2726_v37  ;;  %v2735_v37 = vadd.f32 %v2671_v21, %v5854_v59  ;;  %v2679_v21 = vld [vmem:[#allocation2 + $0x128] sm:$0xff] }
 0x36d   : > { %2791 = vst [vmem:[#allocation2 + $0x28] sm:$0xff] %v2727_v26  ;;  %v2736_v26 = vadd.f32 %v2672_v29, %v5856_v9  ;;  %v2680_v29 = vld [vmem:[#allocation2 + $0x1a0] sm:$0xff] }
 0x36e   : > { %2792 = vst [vmem:[#allocation2 + $0x1e8] sm:$0xff] %v2728_v33  ;;  %v2737_v33 = vadd.f32 %v2673_v18, %v5862_v30  ;;  %v2681_v18 = vld [vmem:[#allocation2 + $0x1f0] sm:$0xff] }
 0x36f   : > { %2793 = vst [vmem:[#allocation2 + $0xf8] sm:$0xff] %v2729_v42  ;;  %v2738_v42 = vadd.f32 %v2674_v51, %v5864_v47  ;;  %v2682_v51 = vld [vmem:[#allocation2 + $0xe8] sm:$0xff] }
 0x370   : > { %2794 = vst [vmem:[#allocation2 + $0x160] sm:$0xff] %v2730_v0  ;;  %v2739_v0 = vadd.f32 %v2675_v40, %v5870_v4  ;;  %v2683_v40 = vld [vmem:[#allocation2 + $0x78] sm:$0xff] }
 0x371   : > { %2795 = vst [vmem:[#allocation2 + $0x30] sm:$0xff] %v2731_v53  ;;  %v2740_v53 = vadd.f32 %v2676_v10, %v5872_v19  ;;  %v2684_v10 = vld [vmem:[#allocation2 + $0x70] sm:$0xff] }
 0x372   : > { %2796 = vst [vmem:[#allocation2 + $0x1e0] sm:$0xff] %v2732_v56  ;;  %v2741_v56 = vadd.f32 %v2677_v54, %v5878_v46  ;;  %v2685_v46 = vld [vmem:[#allocation2 + $0x90] sm:$0xff] }
 0x373   : > { %2797 = vst [vmem:[#allocation2] sm:$0xff] %v2733_v62  ;;  %v2742_v62 = vadd.f32 %v2678_v25, %v5880_v58  ;;  %v2686_v58 = vld [vmem:[#allocation2 + $0x1d8] sm:$0xff] }
 0x374   : > { %2798 = vst [vmem:[#allocation2 + $0xf0] sm:$0xff] %v2734_v12  ;;  %v2743_v12 = vadd.f32 %v2679_v21, %v5886_v23  ;;  %v2687_v23 = vld [vmem:[#allocation2 + $0xd0] sm:$0xff] }
 0x375   : > { %2799 = vst [vmem:[#allocation2 + $0x8] sm:$0xff] %v2735_v37  ;;  %v2744_v37 = vadd.f32 %v2680_v29, %v5888_v38  ;;  %v2688_v29 = vld [vmem:[#allocation2 + $0xb8] sm:$0xff] }
 0x376   : > { %2800 = vst [vmem:[#allocation2 + $0x148] sm:$0xff] %v2736_v26  ;;  %v2745_v26 = vadd.f32 %v2681_v18, %v5894_v6  ;;  %v2689_v6 = vld [vmem:[#allocation2 + $0x88] sm:$0xff] }
 0x377   : > { %2801 = vst [vmem:[#allocation2 + $0x1d0] sm:$0xff] %v2737_v33  ;;  %v7016_v33 = vld [vmem:[#allocation10_spill] sm:$0xff] }
 0x378   : > { %2802 = vst [vmem:[#allocation2 + $0x100] sm:$0xff] %v2738_v42  ;;  %v2746_v54 = vadd.f32 %v2682_v51, %v7016_v33  ;;  %v7017_v42 = vld [vmem:[#allocation11_spill] sm:$0xff]  ;;  %v2690_v33 = vld [vmem:[#allocation2 + $0xa8] sm:$0xff] }
 0x379   : > { %2803 = vst [vmem:[#allocation2 + $0xc8] sm:$0xff] %v2739_v0  ;;  %v2747_v25 = vadd.f32 %v2683_v40, %v7017_v42  ;;  %v7018_v0 = vld [vmem:[#allocation12_spill] sm:$0xff]  ;;  %v2691_v42 = vld [vmem:[#allocation2 + $0x1c8] sm:$0xff] }
 0x37a   : > { %2804 = vst [vmem:[#allocation2 + $0x40] sm:$0xff] %v2740_v53  ;;  %v2748_v21 = vadd.f32 %v2684_v10, %v7018_v0  ;;  %v2749_v53 = vadd.f32 %v2685_v46, %v5910_v50  ;;  %v2692_v0 = vld [vmem:[#allocation2 + $0x170] sm:$0xff]  ;;  %v2693_v50 = vld [vmem:[#allocation2 + $0x178] sm:$0xff] }
 0x37b   : > { %2805 = vst [vmem:[#allocation2 + $0x1f8] sm:$0xff] %v2741_v56  ;;  %v7019_v56 = vld [vmem:[#allocation14_spill] sm:$0xff] }
 0x37c   : > { %2806 = vst [vmem:[#allocation2 + $0x20] sm:$0xff] %v2742_v62  ;;  %v2750_v18 = vadd.f32 %v2686_v58, %v7019_v56  ;;  %v7020_v62 = vld [vmem:[#allocation15_spill] sm:$0xff]  ;;  %v2694_v56 = vld [vmem:[#allocation2 + $0x68] sm:$0xff] }
 0x37d   : > { %2807 = vst [vmem:[#allocation2 + $0x128] sm:$0xff] %v2743_v12  ;;  %v2751_v51 = vadd.f32 %v2687_v23, %v7020_v62  ;;  %v7021_v12 = vld [vmem:[#allocation16_spill] sm:$0xff]  ;;  %v2695_v62 = vld [vmem:[#allocation2 + $0x190] sm:$0xff] }
 0x37e   : > { %2808 = vst [vmem:[#allocation2 + $0x1a0] sm:$0xff] %v2744_v37  ;;  %v2752_v40 = vadd.f32 %v2688_v29, %v7021_v12  ;;  %v7022_v37 = vld [vmem:[#allocation17_spill] sm:$0xff]  ;;  %v2696_v12 = vld [vmem:[#allocation2 + $0x198] sm:$0xff] }
 0x37f   : > { %2809 = vst [vmem:[#allocation2 + $0x1f0] sm:$0xff] %v2745_v26  ;;  %v2753_v10 = vadd.f32 %v2689_v6, %v7022_v37  ;;  %v7023_v26 = vld [vmem:[#allocation18_spill] sm:$0xff]  ;;  %v2697_v37 = vld [vmem:[#allocation2 + $0x38] sm:$0xff] }
 0x380   : > { %2810 = vst [vmem:[#allocation2 + $0xe8] sm:$0xff] %v2746_v54  ;;  %v2754_v46 = vadd.f32 %v2690_v33, %v7023_v26  ;;  %v7024_v54 = vld [vmem:[#allocation19_spill] sm:$0xff]  ;;  %v2698_v26 = vld [vmem:[#allocation2 + $0xc0] sm:$0xff] }
 0x381   : > { %2811 = vst [vmem:[#allocation2 + $0x78] sm:$0xff] %v2747_v25  ;;  %v2755_v58 = vadd.f32 %v2691_v42, %v7024_v54  ;;  %v7025_v25 = vld [vmem:[#allocation20_spill] sm:$0xff]  ;;  %v2699_v54 = vld [vmem:[#allocation2 + $0x1c0] sm:$0xff] }
 0x382   : > { %2812 = vst [vmem:[#allocation2 + $0x70] sm:$0xff] %v2748_v21  ;;  %v2756_v23 = vadd.f32 %v2692_v0, %v7025_v25  ;;  %v7026_v21 = vld [vmem:[#allocation21_spill] sm:$0xff]  ;;  %v2700_v25 = vld [vmem:[#allocation2 + $0x158] sm:$0xff] }
 0x383   : > { %2813 = vst [vmem:[#allocation2 + $0x90] sm:$0xff] %v2749_v53  ;;  %v2757_v29 = vadd.f32 %v2693_v50, %v7026_v21  ;;  %v7027_v53 = vld [vmem:[#allocation22_spill] sm:$0xff]  ;;  %v2762_v50 = vadd.f32 %v2698_v26, %v5936_v7  ;;  %v2702_v21 = vld [vmem:[#allocation2 + $0x58] sm:$0xff] }
 0x384   : > { %2814 = vst [vmem:[#allocation2 + $0x1d8] sm:$0xff] %v2750_v18  ;;  %v2758_v6 = vadd.f32 %v2694_v56, %v7027_v53  ;;  %v7028_v18 = vld [vmem:[#allocation23_spill] sm:$0xff] }
 0x385   : > { %2815 = vst [vmem:[#allocation2 + $0xd0] sm:$0xff] %v2751_v51  ;;  %v2759_v33 = vadd.f32 %v2695_v62, %v7028_v18  ;;  %v7029_v51 = vld [vmem:[#allocation24_spill] sm:$0xff]  ;;  %v2703_v62 = vld [vmem:[#allocation2 + $0xa0] sm:$0xff] }
 0x386   : > { %2816 = vst [vmem:[#allocation2 + $0xb8] sm:$0xff] %v2752_v40  ;;  %v2760_v42 = vadd.f32 %v2696_v12, %v7029_v51  ;;  %v7030_v40 = vld [vmem:[#allocation25_spill] sm:$0xff]  ;;  %v2767_v12 = vadd.f32 %v2703_v62, %v5946_v36 }
 0x387   : > { %2817 = vst [vmem:[#allocation2 + $0x88] sm:$0xff] %v2753_v10  ;;  %v2761_v0 = vadd.f32 %v2697_v37, %v7030_v40  ;;  %v2701_v10 = vld [vmem:[#allocation2 + $0x10] sm:$0xff] }
 0x388   : > { %2818 = vst [vmem:[#allocation2 + $0xa8] sm:$0xff] %v2754_v46  ;;  %v7031_v46 = vld [vmem:[#allocation26_spill] sm:$0xff] }
 0x389   : > { %2819 = vst [vmem:[#allocation2 + $0x1c8] sm:$0xff] %v2755_v58  ;;  %v2763_v56 = vadd.f32 %v2699_v54, %v7031_v46  ;;  %v2764_v58 = vadd.f32 %v2700_v25, %v5940_v48 }
 0x38a   : > { %2820 = vst [vmem:[#allocation2 + $0x170] sm:$0xff] %v2756_v23  ;;  %v2765_v23 = vadd.f32 %v2701_v10, %v5942_v1 }
 0x38b   : > { %2821 = vst [vmem:[#allocation2 + $0x178] sm:$0xff] %v2757_v29  ;;  %v2766_v29 = vadd.f32 %v2702_v21, %v5944_v16 }
 0x38c   : > { %2822 = vst [vmem:[#allocation2 + $0x68] sm:$0xff] %v2758_v6 }
 0x38d   : > { %2823 = vst [vmem:[#allocation2 + $0x190] sm:$0xff] %v2759_v33 }
 0x38e   : > { %2824 = vst [vmem:[#allocation2 + $0x198] sm:$0xff] %v2760_v42 }
 0x38f   : > { %2825 = vst [vmem:[#allocation2 + $0x38] sm:$0xff] %v2761_v0 }
 0x390   : > { %2826 = vst [vmem:[#allocation2 + $0xc0] sm:$0xff] %v2762_v50 }
 0x391   : > { %2827 = vst [vmem:[#allocation2 + $0x1c0] sm:$0xff] %v2763_v56 }
 0x392   : > { %2828 = vst [vmem:[#allocation2 + $0x158] sm:$0xff] %v2764_v58 }
 0x393   : > { %2829 = vst [vmem:[#allocation2 + $0x10] sm:$0xff] %v2765_v23 }
 0x394   : > { %2830 = vst [vmem:[#allocation2 + $0x58] sm:$0xff] %v2766_v29 }
 0x395   : > { %2831 = vst [vmem:[#allocation2 + $0xa0] sm:$0xff] %v2767_v12 }
 0x396 PF: > { %p4908_p5 = scmp.ne.s32.totalorder %s5394_s13, 3 }
 0x398   : > { %2835 = sbr.rel (%p4908_p5) target bundleno = 1201 (0x4b1), region = 81 }
 0x39d   : > { %v2836_v53 = vld [vmem:[#allocation2 + $0xb0] sm:$0xff]  ;;  %v2838_v37 = vld [vmem:[#allocation2 + $0xd8] sm:$0xff]  ;;  %v7032_v54 = vld [vmem:[#allocation5_spill] sm:$0xff] }
 0x39e   : > { %v2837_v6 = vld [vmem:[#allocation2 + $0x1b0] sm:$0xff]  ;;  %v2839_v18 = vld [vmem:[#allocation2 + $0x18] sm:$0xff]  ;;  %v6084_v33 = vadd.f32 %v2836_v53, %v5728_v13  ;;  %v6090_v51 = vadd.f32 %v2838_v37, %v5736_v31  ;;  %v2841_v25 = vld [vmem:[#allocation2 + $0x168] sm:$0xff] }
 0x39f   : > { %v6087_v26 = vadd.f32 %v2837_v6, %v5734_v24  ;;  %v2840_v42 = vld [vmem:[#allocation2 + $0x50] sm:$0xff]  ;;  %v6093_v40 = vadd.f32 %v2839_v18, %v7032_v54  ;;  %v6102_v24 = vadd.f32 %v2841_v25, %v5750_v60  ;;  %v2843_v46 = vld [vmem:[#allocation2 + $0x48] sm:$0xff]  ;;  %v2844_v58 = vld [vmem:[#allocation2 + $0x180] sm:$0xff] }
 0x3a0   : > { %v6098_v50 = vadd.f32 %v2840_v42, %v5744_v49  ;;  %v2842_v10 = vld [vmem:[#allocation2 + $0x130] sm:$0xff]  ;;  %v6110_v62 = vadd.f32 %v2843_v46, %v5758_v15  ;;  %v6114_v29 = vadd.f32 %v2844_v58, %v5760_v22  ;;  %v2846_v12 = vld [vmem:[#allocation2 + $0x118] sm:$0xff]  ;;  %v2848_v18 = vld [vmem:[#allocation2 + $0x120] sm:$0xff] }
 0x3a1   : > { %v2964_v0 = vadd.f32 %v6087_v26, %v6084_v33  ;;  %v6106_v56 = vadd.f32 %v2842_v10, %v5752_v3  ;;  %v2845_v23 = vld [vmem:[#allocation2 + $0x110] sm:$0xff]  ;;  %v2847_v6 = vld [vmem:[#allocation2 + $0x98] sm:$0xff]  ;;  %v6122_v37 = vadd.f32 %v2846_v12, %v5768_v43  ;;  %v2850_v25 = vld [vmem:[#allocation2 + $0x108] sm:$0xff]  ;;  %v3033_v10 = vmul.f32 %v6084_v33, %v6084_v33 }
 0x3a2   : > { %v6118_v53 = vadd.f32 %v2845_v23, %v5766_v35  ;;  %v6126_v42 = vadd.f32 %v2847_v6, %v5774_v55  ;;  %v2849_v54 = vld [vmem:[#allocation2 + $0x150] sm:$0xff]  ;;  %v3034_v55 = vmul.f32 %v6087_v26, %v6087_v26  ;;  %v6142_v46 = vadd.f32 %v2850_v25, %v5784_v20  ;;  %v2852_v58 = vld [vmem:[#allocation2 + $0xe0] sm:$0xff]  ;;  %v2853_v12 = vld [vmem:[#allocation2 + $0x188] sm:$0xff] }
 0x3a3   : > { %v2965_v13 = vadd.f32 %v2964_v0, %v6090_v51  ;;  %v6130_v0 = vadd.f32 %v2848_v18, %v5776_v63  ;;  %v3036_v23 = vmul.f32 %v6093_v40, %v6093_v40  ;;  %v3037_v6 = vmul.f32 %v6098_v50, %v6098_v50  ;;  %v2854_v18 = vld [vmem:[#allocation2 + $0x138] sm:$0xff]  ;;  %v2855_v25 = vld [vmem:[#allocation2 + $0x140] sm:$0xff] }
 0x3a5   : > { %v2966_v31 = vadd.f32 %v2965_v13, %v6093_v40  ;;  %v6134_v13 = vadd.f32 %v2849_v54, %v5782_v11  ;;  %v3038_v54 = vmul.f32 %v6102_v24, %v6102_v24 }
 0x3a7   : > { %v2967_v21 = vadd.f32 %v2966_v31, %v6098_v50  ;;  %v2851_v31 = vld [vmem:[#allocation2 + $0x60] sm:$0xff] }
 0x3a8   : > { %v6148_v11 = vadd.f32 %v2851_v31, %v5790_v34  ;;  %v6160_v34 = vadd.f32 %v2853_v12, %v5798_v57  ;;  %v2856_v31 = vld [vmem:[#allocation2 + $0x80] sm:$0xff]  ;;  %v6172_v57 = vadd.f32 %v2855_v25, %v5806_v17 }
 0x3a9   : > { %v2968_v49 = vadd.f32 %v2967_v21, %v6102_v24  ;;  %v3035_v21 = vmul.f32 %v6090_v51, %v6090_v51 }
 0x3ab   : > { %v2969_v60 = vadd.f32 %v2968_v49, %v6106_v56 }
 0x3ad   : > { %v2970_v3 = vadd.f32 %v2969_v60, %v6110_v62  ;;  %v3097_v60 = vadd.f32 %v3034_v55, %v3033_v10  ;;  %v3039_v10 = vmul.f32 %v6106_v56, %v6106_v56 }
 0x3af   : > { %v2971_v15 = vadd.f32 %v2970_v3, %v6114_v29  ;;  %v6154_v3 = vadd.f32 %v2852_v58, %v5792_v44  ;;  %v6166_v44 = vadd.f32 %v2854_v18, %v5800_v2  ;;  %v6178_v2 = vadd.f32 %v2856_v31, %v5808_v27 }
 0x3b1   : > { %v2972_v22 = vadd.f32 %v2971_v15, %v6118_v53  ;;  %v3098_v15 = vadd.f32 %v3097_v60, %v3035_v21  ;;  %v3040_v21 = vmul.f32 %v6110_v62, %v6110_v62  ;;  %v3041_v60 = vmul.f32 %v6114_v29, %v6114_v29 }
 0x3b3   : > { %v2973_v35 = vadd.f32 %v2972_v22, %v6122_v37 }
 0x3b5   : > { %v2974_v43 = vadd.f32 %v2973_v35, %v6126_v42  ;;  %v3099_v35 = vadd.f32 %v3098_v15, %v3036_v23  ;;  %v3042_v15 = vmul.f32 %v6118_v53, %v6118_v53 }
 0x3b7   : > { %v2975_v63 = vadd.f32 %v2974_v43, %v6130_v0  ;;  %v3100_v55 = vadd.f32 %v3099_v35, %v3037_v6  ;;  %v3043_v35 = vmul.f32 %v6122_v37, %v6122_v37 }
 0x3b9   : > { %v2976_v49 = vadd.f32 %v2975_v63, %v6134_v13  ;;  %v3101_v58 = vadd.f32 %v3100_v55, %v3038_v54  ;;  %v3044_v55 = vmul.f32 %v6126_v42, %v6126_v42 }
 0x3bb   : > { %v2977_v20 = vadd.f32 %v2976_v49, %v6142_v46  ;;  %v2857_v49 = vld [vmem:[#allocation2 + $0x1a8] sm:$0xff]  ;;  %v3102_v12 = vadd.f32 %v3101_v58, %v3039_v10  ;;  %v3045_v58 = vmul.f32 %v6130_v0, %v6130_v0 }
 0x3bc   : > { %v6184_v17 = vadd.f32 %v2857_v49, %v5814_v41 }
 0x3bd   : > { %v2978_v22 = vadd.f32 %v2977_v20, %v6148_v11  ;;  %v2858_v20 = vld [vmem:[#allocation2 + $0x1b8] sm:$0xff]  ;;  %v3103_v18 = vadd.f32 %v3102_v12, %v3040_v21  ;;  %v3046_v12 = vmul.f32 %v6134_v13, %v6134_v13 }
 0x3be   : > { %v6190_v27 = vadd.f32 %v2858_v20, %v5816_v52 }
 0x3bf   : > { %v2979_v43 = vadd.f32 %v2978_v22, %v6154_v3  ;;  %v2859_v22 = vld [vmem:[#allocation2 + $0x28] sm:$0xff]  ;;  %v3104_v25 = vadd.f32 %v3103_v18, %v3041_v60  ;;  %v3047_v18 = vmul.f32 %v6142_v46, %v6142_v46 }
 0x3c0   : > { %v6196_v41 = vadd.f32 %v2859_v22, %v5822_v5 }
 0x3c1   : > { %v2980_v63 = vadd.f32 %v2979_v43, %v6160_v34  ;;  %v2860_v43 = vld [vmem:[#allocation2 + $0x1e8] sm:$0xff]  ;;  %v3105_v31 = vadd.f32 %v3104_v25, %v3042_v15  ;;  %v3048_v25 = vmul.f32 %v6148_v11, %v6148_v11 }
 0x3c2   : > { %v6202_v52 = vadd.f32 %v2860_v43, %v5824_v14 }
 0x3c3   : > { %v2981_v23 = vadd.f32 %v2980_v63, %v6166_v44  ;;  %v2861_v63 = vld [vmem:[#allocation2 + $0xf8] sm:$0xff]  ;;  %v3106_v49 = vadd.f32 %v3105_v31, %v3043_v35  ;;  %v3049_v31 = vmul.f32 %v6154_v3, %v6154_v3 }
 0x3c4   : > { %v6208_v5 = vadd.f32 %v2861_v63, %v5830_v32 }
 0x3c5   : > { %v2982_v6 = vadd.f32 %v2981_v23, %v6172_v57  ;;  %v2862_v23 = vld [vmem:[#allocation2 + $0x160] sm:$0xff]  ;;  %v3107_v20 = vadd.f32 %v3106_v49, %v3044_v55  ;;  %v3050_v49 = vmul.f32 %v6160_v34, %v6160_v34 }
 0x3c6   : > { %v6214_v14 = vadd.f32 %v2862_v23, %v5832_v45 }
 0x3c7   : > { %v2983_v54 = vadd.f32 %v2982_v6, %v6178_v2  ;;  %v2863_v6 = vld [vmem:[#allocation2 + $0x30] sm:$0xff]  ;;  %v3108_v22 = vadd.f32 %v3107_v20, %v3045_v58  ;;  %v3051_v20 = vmul.f32 %v6166_v44, %v6166_v44 }
 0x3c8   : > { %v6220_v32 = vadd.f32 %v2863_v6, %v5838_v61 }
 0x3c9   : > { %v2984_v10 = vadd.f32 %v2983_v54, %v6184_v17  ;;  %v2864_v54 = vld [vmem:[#allocation2 + $0x1e0] sm:$0xff]  ;;  %v3109_v43 = vadd.f32 %v3108_v22, %v3046_v12  ;;  %v3052_v22 = vmul.f32 %v6172_v57, %v6172_v57 }
 0x3ca   : > { %v6226_v45 = vadd.f32 %v2864_v54, %v5840_v8 }
 0x3cb   : > { %v2985_v21 = vadd.f32 %v2984_v10, %v6190_v27  ;;  %v2865_v10 = vld [vmem:[#allocation2] sm:$0xff]  ;;  %v3110_v63 = vadd.f32 %v3109_v43, %v3047_v18  ;;  %v3053_v43 = vmul.f32 %v6178_v2, %v6178_v2 }
 0x3cc   : > { %7033 = vst [vmem:[#allocation27_spill] sm:$0xff] %v6226_v45  ;;  %v6232_v61 = vadd.f32 %v2865_v10, %v5846_v28 }
 0x3cd   : > { %v2986_v60 = vadd.f32 %v2985_v21, %v6196_v41  ;;  %v2866_v21 = vld [vmem:[#allocation2 + $0xf0] sm:$0xff]  ;;  %v3111_v23 = vadd.f32 %v3110_v63, %v3048_v25  ;;  %v3054_v63 = vmul.f32 %v6184_v17, %v6184_v17 }
 0x3ce   : > { %7034 = vst [vmem:[#allocation28_spill] sm:$0xff] %v6232_v61  ;;  %v6238_v8 = vadd.f32 %v2866_v21, %v5848_v39 }
 0x3cf   : > { %v2987_v15 = vadd.f32 %v2986_v60, %v6202_v52  ;;  %v2867_v60 = vld [vmem:[#allocation2 + $0x8] sm:$0xff]  ;;  %v3112_v6 = vadd.f32 %v3111_v23, %v3049_v31  ;;  %v3055_v23 = vmul.f32 %v6190_v27, %v6190_v27 }
 0x3d0   : > { %7035 = vst [vmem:[#allocation29_spill] sm:$0xff] %v6238_v8  ;;  %v6244_v28 = vadd.f32 %v2867_v60, %v5854_v59 }
 0x3d1   : > { %v2988_v35 = vadd.f32 %v2987_v15, %v6208_v5  ;;  %v2868_v15 = vld [vmem:[#allocation2 + $0x148] sm:$0xff]  ;;  %v3113_v54 = vadd.f32 %v3112_v6, %v3050_v49  ;;  %v3056_v6 = vmul.f32 %v6196_v41, %v6196_v41 }
 0x3d2   : > { %7036 = vst [vmem:[#allocation30_spill] sm:$0xff] %v6244_v28  ;;  %v6250_v39 = vadd.f32 %v2868_v15, %v5856_v9 }
 0x3d3   : > { %v2989_v55 = vadd.f32 %v2988_v35, %v6214_v14  ;;  %v2869_v35 = vld [vmem:[#allocation2 + $0x1d0] sm:$0xff]  ;;  %v3114_v10 = vadd.f32 %v3113_v54, %v3051_v20  ;;  %v3057_v54 = vmul.f32 %v6202_v52, %v6202_v52 }
 0x3d4   : > { %7037 = vst [vmem:[#allocation31_spill] sm:$0xff] %v6250_v39  ;;  %v6256_v59 = vadd.f32 %v2869_v35, %v5862_v30 }
 0x3d5   : > { %v2990_v58 = vadd.f32 %v2989_v55, %v6220_v32  ;;  %v2870_v55 = vld [vmem:[#allocation2 + $0x100] sm:$0xff]  ;;  %v3115_v21 = vadd.f32 %v3114_v10, %v3052_v22 }
 0x3d6   : > { %7038 = vst [vmem:[#allocation32_spill] sm:$0xff] %v6256_v59  ;;  %v6262_v9 = vadd.f32 %v2870_v55, %v5864_v47  ;;  %v3058_v55 = vmul.f32 %v6208_v5, %v6208_v5 }
 0x3d7   : > { %v2991_v12 = vadd.f32 %v2990_v58, %v6226_v45  ;;  %v2871_v58 = vld [vmem:[#allocation2 + $0xc8] sm:$0xff]  ;;  %v3116_v60 = vadd.f32 %v3115_v21, %v3053_v43  ;;  %v7044_v21 = vld [vmem:[#allocation7_spill] sm:$0xff] }
 0x3d8   : > { %7039 = vst [vmem:[#allocation33_spill] sm:$0xff] %v6262_v9  ;;  %v6268_v30 = vadd.f32 %v2871_v58, %v5870_v4  ;;  %v7042_v43 = vld [vmem:[#allocation6_spill] sm:$0xff] }
 0x3d9   : > { %v2992_v18 = vadd.f32 %v2991_v12, %v6232_v61  ;;  %v2872_v12 = vld [vmem:[#allocation2 + $0x40] sm:$0xff]  ;;  %v3117_v15 = vadd.f32 %v3116_v60, %v3054_v63  ;;  %v2875_v63 = vld [vmem:[#allocation2 + $0x128] sm:$0xff] }
 0x3da   : > { %7040 = vst [vmem:[#allocation34_spill] sm:$0xff] %v6268_v30  ;;  %v6274_v47 = vadd.f32 %v2872_v12, %v5872_v19  ;;  %v2876_v60 = vld [vmem:[#allocation2 + $0x1a0] sm:$0xff]  ;;  %v7046_v12 = vld [vmem:[#allocation8_spill] sm:$0xff] }
 0x3db   : > { %v2993_v25 = vadd.f32 %v2992_v18, %v6238_v8  ;;  %v2873_v18 = vld [vmem:[#allocation2 + $0x1f8] sm:$0xff]  ;;  %v3118_v35 = vadd.f32 %v3117_v15, %v3055_v23 }
 0x3dc   : > { %7041 = vst [vmem:[#allocation35_spill] sm:$0xff] %v6274_v47  ;;  %v6280_v4 = vadd.f32 %v2873_v18, %v7042_v43  ;;  %v3060_v18 = vmul.f32 %v6220_v32, %v6220_v32  ;;  %v3061_v43 = vmul.f32 %v6226_v45, %v6226_v45  ;;  %v7053_v45 = vld [vmem:[#allocation11_spill] sm:$0xff] }
 0x3dd   : > { %v2994_v31 = vadd.f32 %v2993_v25, %v6244_v28  ;;  %v2874_v25 = vld [vmem:[#allocation2 + $0x20] sm:$0xff] }
 0x3de   : > { %7043 = vst [vmem:[#allocation36_spill] sm:$0xff] %v6280_v4  ;;  %v6286_v19 = vadd.f32 %v2874_v25, %v7044_v21 }
 0x3df   : > { %v2995_v49 = vadd.f32 %v2994_v31, %v6250_v39  ;;  %v3119_v31 = vadd.f32 %v3118_v35, %v3056_v6  ;;  %v6298_v35 = vadd.f32 %v2876_v60, %v5888_v38 }
 0x3e0   : > { %7045 = vst [vmem:[#allocation37_spill] sm:$0xff] %v6286_v19 }
 0x3e1   : > { %v2996_v20 = vadd.f32 %v2995_v49, %v6256_v59  ;;  %v3059_v49 = vmul.f32 %v6214_v14, %v6214_v14  ;;  %v3120_v23 = vadd.f32 %v3119_v31, %v3057_v54  ;;  %7048 = vst [vmem:[#allocation39_spill] sm:$0xff] %v6298_v35  ;;  %v7049_v31 = vld [vmem:[#allocation9_spill] sm:$0xff] }
 0x3e3   : > { %v2997_v22 = vadd.f32 %v2996_v20, %v6262_v9  ;;  %v6292_v20 = vadd.f32 %v2875_v63, %v7046_v12  ;;  %v3121_v6 = vadd.f32 %v3120_v23, %v3058_v55  ;;  %v2879_v23 = vld [vmem:[#allocation2 + $0x78] sm:$0xff]  ;;  %v7051_v12 = vld [vmem:[#allocation10_spill] sm:$0xff] }
 0x3e5   : > { %v2998_v10 = vadd.f32 %v2997_v22, %v6268_v30  ;;  %7047 = vst [vmem:[#allocation38_spill] sm:$0xff] %v6292_v20  ;;  %v2877_v22 = vld [vmem:[#allocation2 + $0x1f0] sm:$0xff]  ;;  %v3122_v54 = vadd.f32 %v3121_v6, %v3059_v49 }
 0x3e6   : > { %v6304_v63 = vadd.f32 %v2877_v22, %v7049_v31  ;;  %v2880_v6 = vld [vmem:[#allocation2 + $0x70] sm:$0xff]  ;;  %v6316_v22 = vadd.f32 %v2879_v23, %v7053_v45  ;;  %v3064_v31 = vmul.f32 %v6244_v28, %v6244_v28  ;;  %v7057_v28 = vld [vmem:[#allocation14_spill] sm:$0xff] }
 0x3e7   : > { %v2999_v58 = vadd.f32 %v2998_v10, %v6274_v47  ;;  %v2878_v10 = vld [vmem:[#allocation2 + $0xe8] sm:$0xff]  ;;  %v3123_v55 = vadd.f32 %v3122_v54, %v3060_v18  ;;  %v2881_v54 = vld [vmem:[#allocation2 + $0x90] sm:$0xff] }
 0x3e8   : > { %7050 = vst [vmem:[#allocation40_spill] sm:$0xff] %v6304_v63  ;;  %v6310_v38 = vadd.f32 %v2878_v10, %v7051_v12  ;;  %v3065_v12 = vmul.f32 %v6250_v39, %v6250_v39  ;;  %v7058_v39 = vld [vmem:[#allocation15_spill] sm:$0xff] }
 0x3e9   : > { %v3000_v15 = vadd.f32 %v2999_v58, %v6280_v4  ;;  %v3062_v58 = vmul.f32 %v6232_v61, %v6232_v61  ;;  %v3124_v49 = vadd.f32 %v3123_v55, %v3061_v43  ;;  %v7054_v61 = vld [vmem:[#allocation12_spill] sm:$0xff] }
 0x3ea   : > { %7052 = vst [vmem:[#allocation41_spill] sm:$0xff] %v6310_v38  ;;  %v6322_v10 = vadd.f32 %v2880_v6, %v7054_v61  ;;  %v2882_v55 = vld [vmem:[#allocation2 + $0x1d8] sm:$0xff] }
 0x3eb   : > { %v3001_v25 = vadd.f32 %v3000_v15, %v6286_v19  ;;  %v3063_v15 = vmul.f32 %v6238_v8, %v6238_v8  ;;  %v3125_v18 = vadd.f32 %v3124_v49, %v3062_v58  ;;  %v7056_v8 = vld [vmem:[#allocation13_spill] sm:$0xff]  ;;  %v2883_v49 = vld [vmem:[#allocation2 + $0xd0] sm:$0xff]  ;;  %v6334_v61 = vadd.f32 %v2882_v55, %v7057_v28 }
 0x3ec   : > { %7055 = vst [vmem:[#allocation42_spill] sm:$0xff] %v6322_v10  ;;  %v6328_v45 = vadd.f32 %v2881_v54, %v7056_v8  ;;  %v6340_v8 = vadd.f32 %v2883_v49, %v7058_v39 }
 0x3ed   : > { %v3002_v21 = vadd.f32 %v3001_v25, %v6292_v20  ;;  %v3126_v43 = vadd.f32 %v3125_v18, %v3063_v15  ;;  %v2884_v18 = vld [vmem:[#allocation2 + $0xb8] sm:$0xff] }
 0x3ef   : > { %v3003_v60 = vadd.f32 %v3002_v21, %v6298_v35  ;;  %v3127_v58 = vadd.f32 %v3126_v43, %v3064_v31  ;;  %v2885_v43 = vld [vmem:[#allocation2 + $0x88] sm:$0xff] }
 0x3f1   : > { %v3004_v25 = vadd.f32 %v3003_v60, %v6304_v63  ;;  %v3066_v60 = vmul.f32 %v6256_v59, %v6256_v59  ;;  %v3128_v15 = vadd.f32 %v3127_v58, %v3065_v12  ;;  %v7059_v59 = vld [vmem:[#allocation16_spill] sm:$0xff]  ;;  %v2886_v58 = vld [vmem:[#allocation2 + $0xa8] sm:$0xff] }
 0x3f2   : > { %v6346_v28 = vadd.f32 %v2884_v18, %v7059_v59 }
 0x3f3   : > { %v3005_v21 = vadd.f32 %v3004_v25, %v6310_v38  ;;  %v3067_v25 = vmul.f32 %v6262_v9, %v6262_v9  ;;  %v3129_v31 = vadd.f32 %v3128_v15, %v3066_v60  ;;  %v7060_v9 = vld [vmem:[#allocation17_spill] sm:$0xff]  ;;  %v2887_v15 = vld [vmem:[#allocation2 + $0x1c8] sm:$0xff] }
 0x3f4   : > { %v6352_v39 = vadd.f32 %v2885_v43, %v7060_v9 }
 0x3f5   : > { %v3006_v23 = vadd.f32 %v3005_v21, %v6316_v22  ;;  %v3068_v21 = vmul.f32 %v6268_v30, %v6268_v30  ;;  %v3130_v12 = vadd.f32 %v3129_v31, %v3067_v25  ;;  %v7061_v30 = vld [vmem:[#allocation18_spill] sm:$0xff]  ;;  %v2888_v31 = vld [vmem:[#allocation2 + $0x170] sm:$0xff] }
 0x3f6   : > { %v6358_v59 = vadd.f32 %v2886_v58, %v7061_v30 }
 0x3f7   : > { %v3007_v6 = vadd.f32 %v3006_v23, %v6322_v10  ;;  %v3069_v23 = vmul.f32 %v6274_v47, %v6274_v47  ;;  %v3131_v60 = vadd.f32 %v3130_v12, %v3068_v21  ;;  %v7062_v47 = vld [vmem:[#allocation19_spill] sm:$0xff]  ;;  %v2889_v12 = vld [vmem:[#allocation2 + $0x178] sm:$0xff] }
 0x3f8   : > { %v6364_v9 = vadd.f32 %v2887_v15, %v7062_v47 }
 0x3f9   : > { %v3008_v54 = vadd.f32 %v3007_v6, %v6328_v45  ;;  %v3070_v6 = vmul.f32 %v6280_v4, %v6280_v4  ;;  %v3132_v25 = vadd.f32 %v3131_v60, %v3069_v23  ;;  %v7063_v4 = vld [vmem:[#allocation20_spill] sm:$0xff]  ;;  %v2890_v60 = vld [vmem:[#allocation2 + $0x68] sm:$0xff] }
 0x3fa   : > { %v6370_v30 = vadd.f32 %v2888_v31, %v7063_v4 }
 0x3fb   : > { %v3009_v55 = vadd.f32 %v3008_v54, %v6334_v61  ;;  %v3071_v54 = vmul.f32 %v6286_v19, %v6286_v19  ;;  %v3133_v21 = vadd.f32 %v3132_v25, %v3070_v6  ;;  %v7064_v19 = vld [vmem:[#allocation21_spill] sm:$0xff]  ;;  %v2891_v25 = vld [vmem:[#allocation2 + $0x190] sm:$0xff] }
 0x3fc   : > { %v6376_v47 = vadd.f32 %v2889_v12, %v7064_v19 }
 0x3fd   : > { %v3010_v49 = vadd.f32 %v3009_v55, %v6340_v8  ;;  %v3072_v55 = vmul.f32 %v6292_v20, %v6292_v20  ;;  %v3134_v23 = vadd.f32 %v3133_v21, %v3071_v54  ;;  %v7065_v20 = vld [vmem:[#allocation22_spill] sm:$0xff]  ;;  %v2892_v21 = vld [vmem:[#allocation2 + $0x198] sm:$0xff] }
 0x3fe   : > { %v6382_v4 = vadd.f32 %v2890_v60, %v7065_v20 }
 0x3ff   : > { %v3011_v18 = vadd.f32 %v3010_v49, %v6346_v28  ;;  %v3073_v49 = vmul.f32 %v6298_v35, %v6298_v35  ;;  %v3135_v6 = vadd.f32 %v3134_v23, %v3072_v55  ;;  %v7066_v35 = vld [vmem:[#allocation23_spill] sm:$0xff]  ;;  %v2893_v23 = vld [vmem:[#allocation2 + $0x38] sm:$0xff] }
 0x400   : > { %v6388_v19 = vadd.f32 %v2891_v25, %v7066_v35 }
 0x401   : > { %v3012_v43 = vadd.f32 %v3011_v18, %v6352_v39  ;;  %v3074_v18 = vmul.f32 %v6304_v63, %v6304_v63  ;;  %v3136_v54 = vadd.f32 %v3135_v6, %v3073_v49  ;;  %v7067_v63 = vld [vmem:[#allocation24_spill] sm:$0xff]  ;;  %v2894_v6 = vld [vmem:[#allocation2 + $0xc0] sm:$0xff] }
 0x402   : > { %v6394_v20 = vadd.f32 %v2892_v21, %v7067_v63  ;;  %v6406_v63 = vadd.f32 %v2894_v6, %v5936_v7 }
 0x403   : > { %v3013_v58 = vadd.f32 %v3012_v43, %v6358_v59  ;;  %v3075_v43 = vmul.f32 %v6310_v38, %v6310_v38  ;;  %v3137_v55 = vadd.f32 %v3136_v54, %v3074_v18  ;;  %v7069_v38 = vld [vmem:[#allocation25_spill] sm:$0xff] }
 0x404   : > { %7068 = vst [vmem:[#allocation43_spill] sm:$0xff] %v6394_v20  ;;  %v6400_v35 = vadd.f32 %v2893_v23, %v7069_v38  ;;  %v2895_v54 = vld [vmem:[#allocation2 + $0x1c0] sm:$0xff] }
 0x405   : > { %v3014_v15 = vadd.f32 %v3013_v58, %v6364_v9  ;;  %v3076_v58 = vmul.f32 %v6316_v22, %v6316_v22  ;;  %v3138_v49 = vadd.f32 %v3137_v55, %v3075_v43  ;;  %7071 = vst [vmem:[#allocation45_spill] sm:$0xff] %v6406_v63  ;;  %v2896_v55 = vld [vmem:[#allocation2 + $0x158] sm:$0xff] }
 0x406   : > { %7070 = vst [vmem:[#allocation44_spill] sm:$0xff] %v6400_v35  ;;  %v6418_v7 = vadd.f32 %v2896_v55, %v5940_v48  ;;  %v3083_v48 = vmul.f32 %v6358_v59, %v6358_v59 }
 0x407   : > { %v3015_v31 = vadd.f32 %v3014_v15, %v6370_v30  ;;  %v3077_v15 = vmul.f32 %v6322_v10, %v6322_v10  ;;  %v3139_v18 = vadd.f32 %v3138_v49, %v3076_v58  ;;  %v7072_v10 = vld [vmem:[#allocation26_spill] sm:$0xff]  ;;  %v2897_v49 = vld [vmem:[#allocation2 + $0x10] sm:$0xff] }
 0x408   : > { %v6412_v38 = vadd.f32 %v2895_v54, %v7072_v10  ;;  %7074 = vst [vmem:[#allocation47_spill] sm:$0xff] %v6418_v7  ;;  %v3082_v54 = vmul.f32 %v6352_v39, %v6352_v39 }
 0x409   : > { %v3016_v12 = vadd.f32 %v3015_v31, %v6376_v47  ;;  %v3078_v31 = vmul.f32 %v6328_v45, %v6328_v45  ;;  %v3140_v43 = vadd.f32 %v3139_v18, %v3077_v15  ;;  %v6424_v18 = vadd.f32 %v2897_v49, %v5942_v1  ;;  %v2899_v49 = vld [vmem:[#allocation2 + $0xa0] sm:$0xff] }
 0x40a   : > { %7073 = vst [vmem:[#allocation46_spill] sm:$0xff] %v6412_v38  ;;  %v3084_v1 = vmul.f32 %v6364_v9, %v6364_v9 }
 0x40b   : > { %v3017_v60 = vadd.f32 %v3016_v12, %v6382_v4  ;;  %v3079_v12 = vmul.f32 %v6334_v61, %v6334_v61  ;;  %v3141_v58 = vadd.f32 %v3140_v43, %v3078_v31  ;;  %v2898_v31 = vld [vmem:[#allocation2 + $0x58] sm:$0xff] }
 0x40d   : > { %v3018_v25 = vadd.f32 %v3017_v60, %v6388_v19  ;;  %v3080_v60 = vmul.f32 %v6340_v8, %v6340_v8  ;;  %v3142_v15 = vadd.f32 %v3141_v58, %v3079_v12 }
 0x40f   : > { %v3019_v21 = vadd.f32 %v3018_v25, %v6394_v20  ;;  %v3081_v25 = vmul.f32 %v6346_v28, %v6346_v28 }
 0x411   : > { %v3020_v23 = vadd.f32 %v3019_v21, %v6400_v35  ;;  %v3143_v21 = vadd.f32 %v3142_v15, %v3080_v60  ;;  %v3085_v60 = vmul.f32 %v6370_v30, %v6370_v30  ;;  %v6441_v15 = vadd.f32 %v2899_v49, %v5946_v36 }
 0x412   : > { %v3089_v36 = vmul.f32 %v6394_v20, %v6394_v20 }
 0x413   : > { %v3021_v6 = vadd.f32 %v3020_v23, %v6406_v63  ;;  %v3144_v55 = vadd.f32 %v3143_v21, %v3081_v25  ;;  %v6433_v23 = vadd.f32 %v2898_v31, %v5944_v16  ;;  %7076 = vst [vmem:[#allocation49_spill] sm:$0xff] %v6441_v15  ;;  %v3086_v16 = vmul.f32 %v6376_v47, %v6376_v47 }
 0x414   : > { %v3087_v21 = vmul.f32 %v6382_v4, %v6382_v4 }
 0x415   : > { %v3022_v10 = vadd.f32 %v3021_v6, %v6412_v38  ;;  %7075 = vst [vmem:[#allocation48_spill] sm:$0xff] %v6433_v23  ;;  %v3145_v58 = vadd.f32 %v3144_v55, %v3082_v54 }
 0x417   : > { %v3023_v43 = vadd.f32 %v3022_v10, %v6418_v7  ;;  %v3146_v6 = vadd.f32 %v3145_v58, %v3083_v48 }
 0x419   : > { %v3024_v12 = vadd.f32 %v3023_v43, %v6424_v18  ;;  %v3147_v25 = vadd.f32 %v3146_v6, %v3084_v1  ;;  %v3088_v43 = vmul.f32 %v6388_v19, %v6388_v19  ;;  %v3091_v1 = vmul.f32 %v6406_v63, %v6406_v63 }
 0x41b   : > { %v3025_v10 = vadd.f32 %v3024_v12, %v6433_v23  ;;  %v3148_v31 = vadd.f32 %v3147_v25, %v3085_v60  ;;  %v3090_v12 = vmul.f32 %v6400_v35, %v6400_v35 }
 0x41d   : > { %v3026_v54 = vadd.f32 %v3025_v10, %v6441_v15  ;;  %v3149_v55 = vadd.f32 %v3148_v31, %v3086_v16  ;;  %v3092_v10 = vmul.f32 %v6412_v38, %v6412_v38  ;;  %v3093_v16 = vmul.f32 %v6418_v7, %v6418_v7 }
 0x41f   : > { %v3150_v48 = vadd.f32 %v3149_v55, %v3087_v21  ;;  %v3027_v58 = vrot.slane %v3026_v54, 4  ;;  %v3094_v21 = vmul.f32 %v6424_v18, %v6424_v18 }
 0x421   : > { %v3151_v49 = vadd.f32 %v3150_v48, %v3088_v43  ;;  %v3028_v60 = vadd.f32 %v3027_v58, %v3026_v54  ;;  %v3095_v43 = vmul.f32 %v6433_v23, %v6433_v23  ;;  %v3096_v54 = vmul.f32 %v6441_v15, %v6441_v15 }
 0x423   : > { %v3152_v6 = vadd.f32 %v3151_v49, %v3089_v36  ;;  %v3029_v20 = vrot.slane %v3028_v60, 2 }
 0x425   : > { %v3153_v25 = vadd.f32 %v3152_v6, %v3090_v12  ;;  %v3030_v63 = vadd.f32 %v3029_v20, %v3028_v60 }
 0x427   : > { %v3154_v31 = vadd.f32 %v3153_v25, %v3091_v1  ;;  %v3031_v12 = vrot.slane %v3030_v63, 1 }
 0x429   : > { %v3155_v55 = vadd.f32 %v3154_v31, %v3092_v10  ;;  %v3032_v7 = vadd.f32 %v3031_v12, %v3030_v63 }
 0x42b   : > { %v3156_v48 = vadd.f32 %v3155_v55, %v3093_v16  ;;  %v6467_v35 = vmul.f32 0.001953125, %v3032_v7 }
 0x42d   : > { %v3157_v36 = vadd.f32 %v3156_v48, %v3094_v21  ;;  %v3168_v16 = vmul.f32 %v6467_v35, %v6467_v35  ;;  %v3171_v63 = vsub.f32 %v6087_v26, %v6467_v35  ;;  %v3172_v7 = vsub.f32 %v6090_v51, %v6467_v35 }
 0x42e   : > { %v3177_v12 = vsub.f32 %v6110_v62, %v6467_v35  ;;  %v7081_v62 = vld [vmem:[#allocation31_spill] sm:$0xff] }
 0x42f   : > { %v3158_v58 = vadd.f32 %v3157_v36, %v3095_v43  ;;  %v3170_v43 = vsub.f32 %v6084_v33, %v6467_v35  ;;  %v3176_v33 = vsub.f32 %v6106_v56, %v6467_v35  ;;  %v7082_v56 = vld [vmem:[#allocation32_spill] sm:$0xff] }
 0x431   : > { %v3159_v49 = vadd.f32 %v3158_v58, %v3096_v54  ;;  %v3174_v54 = vsub.f32 %v6098_v50, %v6467_v35  ;;  %v3175_v58 = vsub.f32 %v6102_v24, %v6467_v35 }
 0x433   : > { %v3160_v6 = vrot.slane %v3159_v49, 4 }
 0x435   : > { %v3161_v1 = vadd.f32 %v3160_v6, %v3159_v49 }
 0x437   : > { %v3162_v25 = vrot.slane %v3161_v1, 2 }
 0x439   : > { %v3163_v38 = vadd.f32 %v3162_v25, %v3161_v1 }
 0x43b   : > { %v3164_v10 = vrot.slane %v3163_v38, 1 }
 0x43d   : > { %v3165_v31 = vadd.f32 %v3164_v10, %v3163_v38  ;;  %v3173_v38 = vsub.f32 %v6093_v40, %v6467_v35 }
 0x43f   : > { %v3167_v20 = vmul.f32 0.001953125, %v3165_v31 }
 0x441   : > { %v3169_v60 = vsub.f32 %v3167_v20, %v3168_v16 }
 0x443   : > { %v3234_v55 = vadd.f32 1e-05, %v3169_v60  ;;  %v7077_v60 = vld [vmem:[#allocation27_spill] sm:$0xff] }
 0x445   : > { %5338 = vrsqrt.f32 %v3234_v55  ;;  %vm3241_vm0 = vweird.f32 %v3234_v55 }
 0x44b   : > { %v5339_v21 = vpop.eup %5338 }
 0x44c   : > { %v3236_v48 = vmul.f32 %v5339_v21, %v3234_v55  ;;  %vm3242_vm1 = vweird.f32 %v5339_v21  ;;  %v7078_v55 = vld [vmem:[#allocation28_spill] sm:$0xff] }
 0x44d   : > { %vm3243_vm2 = vmor %vm3241_vm0, %vm3242_vm1 }
 0x44e   : > { %v3237_v36 = vmul.f32 %v5339_v21, %v3236_v48 }
 0x450   : > { %v3238_v49 = vmul.f32 0.5, %v3237_v36 }
 0x452   : > { %v3239_v25 = vsub.f32 1.5, %v3238_v49  ;;  %v7080_v49 = vld [vmem:[#allocation30_spill] sm:$0xff] }
 0x454   : > { %v3240_v36 = vmul.f32 %v5339_v21, %v3239_v25  ;;  %v7079_v25 = vld [vmem:[#allocation29_spill] sm:$0xff] }
 0x456   : > { %v6533_v6 = vsel %vm3243_vm2, %v5339_v21, %v3240_v36 }
 0x457   : > { %v3245_v24 = vmul.f32 %v6533_v6, %v3170_v43  ;;  %v3246_v10 = vmul.f32 %v6533_v6, %v3171_v63  ;;  %v3247_v1 = vmul.f32 %v6533_v6, %v3172_v7  ;;  %v3248_v50 = vmul.f32 %v6533_v6, %v3173_v38 }
 0x458   : > { %v3249_v21 = vmul.f32 %v6533_v6, %v3174_v54  ;;  %v3250_v36 = vmul.f32 %v6533_v6, %v3175_v58  ;;  %v3251_v16 = vmul.f32 %v6533_v6, %v3176_v33  ;;  %v3252_v48 = vmul.f32 %v6533_v6, %v3177_v12 }
 0x459   : > { %vm3309_vm3 = vcmp.gt.f32.partialorder %v3245_v24, 0.0  ;;  %vm3310_vm4 = vcmp.gt.f32.partialorder %v3246_v10, 0.0  ;;  %v3373_v31 = vmul.f32 0.2, %v3245_v24  ;;  %v3374_v20 = vmul.f32 0.2, %v3246_v10 }
 0x45a   : > { %vm3311_vm5 = vcmp.gt.f32.partialorder %v3247_v1, 0.0  ;;  %vm3312_vm6 = vcmp.gt.f32.partialorder %v3248_v50, 0.0  ;;  %v3375_v43 = vmul.f32 0.2, %v3247_v1  ;;  %v3376_v63 = vmul.f32 0.2, %v3248_v50 }
 0x45b   : > { %v3437_v7 = vsel %vm3309_vm3, %v3245_v24, %v3373_v31  ;;  %v3438_v40 = vsel %vm3310_vm4, %v3246_v10, %v3374_v20  ;;  %vm3313_vm7 = vcmp.gt.f32.partialorder %v3249_v21, 0.0  ;;  %vm3314_vm8 = vcmp.gt.f32.partialorder %v3250_v36, 0.0 }
 0x45c   : > { %v5078_v38 = vpack.c.bf16 %v3438_v40, %v3437_v7  ;;  %v3439_v54 = vsel %vm3311_vm5, %v3247_v1, %v3375_v43  ;;  %v3440_v58 = vsel %vm3312_vm6, %v3248_v50, %v3376_v63  ;;  %v3377_v33 = vmul.f32 0.2, %v3249_v21 }
 0x45d   : > { %v5083_v51 = vpack.c.bf16 %v3440_v58, %v3439_v54  ;;  %v3378_v12 = vmul.f32 0.2, %v3250_v36  ;;  %vm3315_vm9 = vcmp.gt.f32.partialorder %v3251_v16, 0.0  ;;  %vm3316_vm10 = vcmp.gt.f32.partialorder %v3252_v48, 0.0 }
 0x45e   : > { %5079 = vst [vmem:[%s5949_s5] sm:$0xff] %v5078_v38   ;;  %v3441_v26 = vsel %vm3313_vm7, %v3249_v21, %v3377_v33  ;;  %v3379_v15 = vmul.f32 0.2, %v3251_v16  ;;  %v3380_v23 = vmul.f32 0.2, %v3252_v48  ;;  %v7083_v24 = vsub.f32 %v6114_v29, %v6467_v35 }
 0x45f   : > { %5235 = vst [vmem:[%s5949_s5 + $0x8] sm:$0xff] %v5083_v51   ;;  %v3442_v31 = vsel %vm3314_vm8, %v3250_v36, %v3378_v12  ;;  %v7084_v40 = vsub.f32 %v6118_v53, %v6467_v35  ;;  %v7085_v1 = vsub.f32 %v6122_v37, %v6467_v35  ;;  %v7086_v21 = vsub.f32 %v6126_v42, %v6467_v35 }
 0x460   : > { %v3253_v10 = vmul.f32 %v6533_v6, %v7083_v24  ;;  %v5088_v43 = vpack.c.bf16 %v3442_v31, %v3441_v26  ;;  %v3443_v63 = vsel %vm3315_vm9, %v3251_v16, %v3379_v15  ;;  %v3444_v51 = vsel %vm3316_vm10, %v3252_v48, %v3380_v23 }
 0x461   : > { %v3254_v50 = vmul.f32 %v6533_v6, %v7084_v40  ;;  %v3255_v20 = vmul.f32 %v6533_v6, %v7085_v1  ;;  %v3256_v29 = vmul.f32 %v6533_v6, %v7086_v21  ;;  %v5093_v36 = vpack.c.bf16 %v3444_v51, %v3443_v63 }
 0x462   : > { %vm3317_vm11 = vcmp.gt.f32.partialorder %v3253_v10, 0.0  ;;  %v3381_v53 = vmul.f32 0.2, %v3253_v10  ;;  %5236 = vst [vmem:[%s5949_s5 + $0x10] sm:$0xff] %v5088_v43   ;;  %v7087_v38 = vsub.f32 %v6130_v0, %v6467_v35  ;;  %v7088_v23 = vsub.f32 %v6134_v13, %v6467_v35 }
 0x463   : > { %vm3318_vm12 = vcmp.gt.f32.partialorder %v3254_v50, 0.0  ;;  %v3382_v7 = vmul.f32 0.2, %v3254_v50  ;;  %vm3319_vm13 = vcmp.gt.f32.partialorder %v3255_v20, 0.0  ;;  %vm3320_vm14 = vcmp.gt.f32.partialorder %v3256_v29, 0.0  ;;  %5237 = vst [vmem:[%s5949_s5 + $0x18] sm:$0xff] %v5093_v36  }
 0x464   : > { %v3383_v37 = vmul.f32 0.2, %v3255_v20  ;;  %v3257_v42 = vmul.f32 %v6533_v6, %v7087_v38  ;;  %v3445_v54 = vsel %vm3317_vm11, %v3253_v10, %v3381_v53  ;;  %v3384_v15 = vmul.f32 0.2, %v3256_v29 }
 0x465   : > { %v3446_v26 = vsel %vm3318_vm12, %v3254_v50, %v3382_v7  ;;  %v3258_v16 = vmul.f32 %v6533_v6, %v7088_v23  ;;  %v7089_v0 = vsub.f32 %v6142_v46, %v6467_v35  ;;  %v7090_v13 = vsub.f32 %v6148_v11, %v6467_v35 }
 0x466   : > { %v5098_v48 = vpack.c.bf16 %v3446_v26, %v3445_v54  ;;  %v3447_v58 = vsel %vm3319_vm13, %v3255_v20, %v3383_v37  ;;  %vm3321_vm15 = vcmp.gt.f32.partialorder %v3257_v42, 0.0  ;;  %v3385_v33 = vmul.f32 0.2, %v3257_v42 }
 0x467   : > { %v3448_v12 = vsel %vm3320_vm14, %v3256_v29, %v3384_v15  ;;  %vm3322_vm0 = vcmp.gt.f32.partialorder %v3258_v16, 0.0  ;;  %v3386_v24 = vmul.f32 0.2, %v3258_v16  ;;  %v3259_v10 = vmul.f32 %v6533_v6, %v7089_v0 }
 0x468   : > { %5238 = vst [vmem:[%s5949_s5 + $0x20] sm:$0xff] %v5098_v48   ;;  %v5103_v31 = vpack.c.bf16 %v3448_v12, %v3447_v58  ;;  %v3449_v40 = vsel %vm3321_vm15, %v3257_v42, %v3385_v33  ;;  %v3260_v50 = vmul.f32 %v6533_v6, %v7090_v13  ;;  %v7091_v1 = vsub.f32 %v6154_v3, %v6467_v35 }
 0x469   : > { %v3450_v21 = vsel %vm3322_vm0, %v3258_v16, %v3386_v24  ;;  %vm3323_vm1 = vcmp.gt.f32.partialorder %v3259_v10, 0.0  ;;  %v3387_v29 = vmul.f32 0.2, %v3259_v10  ;;  %v7092_v46 = vsub.f32 %v6160_v34, %v6467_v35 }
 0x46a   : > { %v3261_v20 = vmul.f32 %v6533_v6, %v7091_v1  ;;  %5239 = vst [vmem:[%s5949_s5 + $0x28] sm:$0xff] %v5103_v31   ;;  %v5108_v63 = vpack.c.bf16 %v3450_v21, %v3449_v40  ;;  %vm3324_vm2 = vcmp.gt.f32.partialorder %v3260_v50, 0.0  ;;  %v3388_v11 = vmul.f32 0.2, %v3260_v50 }
 0x46b   : > { %v3262_v43 = vmul.f32 %v6533_v6, %v7092_v46  ;;  %v3451_v51 = vsel %vm3323_vm1, %v3259_v10, %v3387_v29  ;;  %v7093_v7 = vsub.f32 %v6166_v44, %v6467_v35  ;;  %v7094_v34 = vsub.f32 %v6172_v57, %v6467_v35 }
 0x46c   : > { %vm3325_vm3 = vcmp.gt.f32.partialorder %v3261_v20, 0.0  ;;  %v3389_v36 = vmul.f32 0.2, %v3261_v20  ;;  %5240 = vst [vmem:[%s5949_s5 + $0x30] sm:$0xff] %v5108_v63   ;;  %v3452_v53 = vsel %vm3324_vm2, %v3260_v50, %v3388_v11  ;;  %v7095_v42 = vsub.f32 %v6178_v2, %v6467_v35 }
 0x46d   : > { %vm3326_vm4 = vcmp.gt.f32.partialorder %v3262_v43, 0.0  ;;  %v3390_v3 = vmul.f32 0.2, %v3262_v43  ;;  %v3263_v37 = vmul.f32 %v6533_v6, %v7093_v7  ;;  %v3264_v38 = vmul.f32 %v6533_v6, %v7094_v34 }
 0x46e   : > { %v3265_v54 = vmul.f32 %v6533_v6, %v7095_v42  ;;  %v5113_v26 = vpack.c.bf16 %v3452_v53, %v3451_v51  ;;  %v3453_v15 = vsel %vm3325_vm3, %v3261_v20, %v3389_v36  ;;  %v7096_v16 = vsub.f32 %v6184_v17, %v6467_v35 }
 0x46f   : > { %v3454_v23 = vsel %vm3326_vm4, %v3262_v43, %v3390_v3  ;;  %vm3327_vm5 = vcmp.gt.f32.partialorder %v3263_v37, 0.0  ;;  %vm3328_vm6 = vcmp.gt.f32.partialorder %v3264_v38, 0.0  ;;  %v3391_v57 = vmul.f32 0.2, %v3263_v37 }
 0x470   : > { %v3266_v44 = vmul.f32 %v6533_v6, %v7096_v16  ;;  %v5118_v48 = vpack.c.bf16 %v3454_v23, %v3453_v15  ;;  %5241 = vst [vmem:[%s5949_s5 + $0x38] sm:$0xff] %v5113_v26   ;;  %v3392_v58 = vmul.f32 0.2, %v3264_v38  ;;  %vm3329_vm7 = vcmp.gt.f32.partialorder %v3265_v54, 0.0 }
 0x471   : > { %v7097_v2 = vsub.f32 %v6190_v27, %v6467_v35  ;;  %v3455_v12 = vsel %vm3327_vm5, %v3263_v37, %v3391_v57  ;;  %v3393_v24 = vmul.f32 0.2, %v3265_v54  ;;  %v7098_v0 = vsub.f32 %v6196_v41, %v6467_v35 }
 0x472   : > { %vm3330_vm8 = vcmp.gt.f32.partialorder %v3266_v44, 0.0  ;;  %5242 = vst [vmem:[%s5949_s5 + $0x40] sm:$0xff] %v5118_v48   ;;  %v3394_v17 = vmul.f32 0.2, %v3266_v44  ;;  %v3456_v31 = vsel %vm3328_vm6, %v3264_v38, %v3392_v58  ;;  %v7099_v13 = vsub.f32 %v6202_v52, %v6467_v35 }
 0x473   : > { %v3267_v33 = vmul.f32 %v6533_v6, %v7097_v2  ;;  %v3268_v10 = vmul.f32 %v6533_v6, %v7098_v0  ;;  %v5123_v50 = vpack.c.bf16 %v3456_v31, %v3455_v12  ;;  %v3457_v1 = vsel %vm3329_vm7, %v3265_v54, %v3393_v24  ;;  %v7109_v31 = vld [vmem:[#allocation33_spill] sm:$0xff] }
 0x474   : > { %v3269_v27 = vmul.f32 %v6533_v6, %v7099_v13  ;;  %v3458_v20 = vsel %vm3330_vm8, %v3266_v44, %v3394_v17  ;;  %v7100_v41 = vsub.f32 %v6208_v5, %v6467_v35  ;;  %v7101_v52 = vsub.f32 %v6214_v14, %v6467_v35 }
 0x475   : > { %vm3331_vm9 = vcmp.gt.f32.partialorder %v3267_v33, 0.0  ;;  %v3395_v40 = vmul.f32 0.2, %v3267_v33  ;;  %vm3332_vm10 = vcmp.gt.f32.partialorder %v3268_v10, 0.0  ;;  %v5128_v21 = vpack.c.bf16 %v3458_v20, %v3457_v1  ;;  %5243 = vst [vmem:[%s5949_s5 + $0x48] sm:$0xff] %v5123_v50   ;;  %v7110_v1 = vld [vmem:[#allocation34_spill] sm:$0xff] }
 0x476   : > { %v3396_v29 = vmul.f32 0.2, %v3268_v10  ;;  %v3270_v43 = vmul.f32 %v6533_v6, %v7100_v41  ;;  %vm3333_vm11 = vcmp.gt.f32.partialorder %v3269_v27, 0.0  ;;  %v3397_v63 = vmul.f32 0.2, %v3269_v27 }
 0x477   : > { %v3459_v46 = vsel %vm3331_vm9, %v3267_v33, %v3395_v40  ;;  %v3271_v11 = vmul.f32 %v6533_v6, %v7101_v52  ;;  %v7102_v51 = vsub.f32 %v6220_v32, %v6467_v35  ;;  %5244 = vst [vmem:[%s5949_s5 + $0x50] sm:$0xff] %v5128_v21   ;;  %v7103_v53 = vsub.f32 %v7077_v60, %v6467_v35 }
 0x478   : > { %v3460_v3 = vsel %vm3332_vm10, %v3268_v10, %v3396_v29  ;;  %vm3334_vm12 = vcmp.gt.f32.partialorder %v3270_v43, 0.0  ;;  %v3398_v5 = vmul.f32 0.2, %v3270_v43  ;;  %v3461_v34 = vsel %vm3333_vm11, %v3269_v27, %v3397_v63 }
 0x479   : > { %v3272_v36 = vmul.f32 %v6533_v6, %v7102_v51  ;;  %v3273_v7 = vmul.f32 %v6533_v6, %v7103_v53  ;;  %v5133_v37 = vpack.c.bf16 %v3460_v3, %v3459_v46  ;;  %vm3335_vm13 = vcmp.gt.f32.partialorder %v3271_v11, 0.0  ;;  %v7111_v46 = vld [vmem:[#allocation35_spill] sm:$0xff]  ;;  %v7113_v53 = vld [vmem:[#allocation37_spill] sm:$0xff] }
 0x47a   : > { %v3462_v14 = vsel %vm3334_vm12, %v3270_v43, %v3398_v5  ;;  %v3399_v38 = vmul.f32 0.2, %v3271_v11  ;;  %v7104_v32 = vsub.f32 %v7078_v55, %v6467_v35  ;;  %v7105_v15 = vsub.f32 %v7079_v25, %v6467_v35  ;;  %v7112_v43 = vld [vmem:[#allocation36_spill] sm:$0xff] }
 0x47b   : > { %vm3336_vm14 = vcmp.gt.f32.partialorder %v3272_v36, 0.0  ;;  %v3400_v42 = vmul.f32 0.2, %v3272_v36  ;;  %5245 = vst [vmem:[%s5949_s5 + $0x58] sm:$0xff] %v5133_v37   ;;  %v5138_v26 = vpack.c.bf16 %v3462_v14, %v3461_v34  ;;  %vm3337_vm15 = vcmp.gt.f32.partialorder %v3273_v7, 0.0  ;;  %v7114_v14 = vld [vmem:[#allocation38_spill] sm:$0xff] }
 0x47c   : > { %v3274_v54 = vmul.f32 %v6533_v6, %v7104_v32  ;;  %v3401_v60 = vmul.f32 0.2, %v3273_v7  ;;  %v3275_v23 = vmul.f32 %v6533_v6, %v7105_v15  ;;  %v3463_v16 = vsel %vm3335_vm13, %v3271_v11, %v3399_v38  ;;  %v7115_v15 = vld [vmem:[#allocation39_spill] sm:$0xff] }
 0x47d   : > { %v3464_v44 = vsel %vm3336_vm14, %v3272_v36, %v3400_v42  ;;  %5246 = vst [vmem:[%s5949_s5 + $0x60] sm:$0xff] %v5138_v26   ;;  %v7106_v55 = vsub.f32 %v7080_v49, %v6467_v35  ;;  %v7107_v25 = vsub.f32 %v7081_v62, %v6467_v35  ;;  %v7108_v17 = vsub.f32 %v7082_v56, %v6467_v35 }
 0x47e   : > { %vm3338_vm0 = vcmp.gt.f32.partialorder %v3274_v54, 0.0  ;;  %v3402_v48 = vmul.f32 0.2, %v3274_v54  ;;  %v5143_v57 = vpack.c.bf16 %v3464_v44, %v3463_v16  ;;  %v3465_v58 = vsel %vm3337_vm15, %v3273_v7, %v3401_v60 }
 0x47f   : > { %v3276_v2 = vmul.f32 %v6533_v6, %v7106_v55  ;;  %vm3339_vm1 = vcmp.gt.f32.partialorder %v3275_v23, 0.0  ;;  %v3403_v12 = vmul.f32 0.2, %v3275_v23  ;;  %v3277_v24 = vmul.f32 %v6533_v6, %v7107_v25  ;;  %v7116_v55 = vld [vmem:[#allocation40_spill] sm:$0xff] }
 0x480   : > { %v3466_v33 = vsel %vm3338_vm0, %v3274_v54, %v3402_v48  ;;  %v3278_v0 = vmul.f32 %v6533_v6, %v7108_v17  ;;  %5247 = vst [vmem:[%s5949_s5 + $0x68] sm:$0xff] %v5143_v57   ;;  %v3204_v40 = vsub.f32 %v7109_v31, %v6467_v35  ;;  %v3205_v56 = vsub.f32 %v7110_v1, %v6467_v35  ;;  %v7118_v31 = vld [vmem:[#allocation42_spill] sm:$0xff] }
 0x481   : > { %v5148_v10 = vpack.c.bf16 %v3466_v33, %v3465_v58  ;;  %vm3340_vm2 = vcmp.gt.f32.partialorder %v3276_v2, 0.0  ;;  %v3404_v49 = vmul.f32 0.2, %v3276_v2  ;;  %v3467_v13 = vsel %vm3339_vm1, %v3275_v23, %v3403_v12 }
 0x482   : > { %vm3341_vm3 = vcmp.gt.f32.partialorder %v3277_v24, 0.0  ;;  %vm3342_vm4 = vcmp.gt.f32.partialorder %v3278_v0, 0.0  ;;  %v3405_v27 = vmul.f32 0.2, %v3277_v24  ;;  %v3406_v50 = vmul.f32 0.2, %v3278_v0 }
 0x483   : > { %5248 = vst [vmem:[%s5949_s5 + $0x70] sm:$0xff] %v5148_v10   ;;  %v3468_v62 = vsel %vm3340_vm2, %v3276_v2, %v3404_v49  ;;  %v3279_v20 = vmul.f32 %v6533_v6, %v3204_v40  ;;  %v3206_v41 = vsub.f32 %v7111_v46, %v6467_v35  ;;  %v3207_v63 = vsub.f32 %v7112_v43, %v6467_v35 }
 0x484   : > { %v5153_v21 = vpack.c.bf16 %v3468_v62, %v3467_v13  ;;  %v3469_v29 = vsel %vm3341_vm3, %v3277_v24, %v3405_v27  ;;  %v3470_v52 = vsel %vm3342_vm4, %v3278_v0, %v3406_v50  ;;  %v3280_v11 = vmul.f32 %v6533_v6, %v3205_v56  ;;  %v7117_v24 = vld [vmem:[#allocation41_spill] sm:$0xff] }
 0x485   : > { %vm3343_vm5 = vcmp.gt.f32.partialorder %v3279_v20, 0.0  ;;  %v3407_v51 = vmul.f32 0.2, %v3279_v20  ;;  %v5158_v36 = vpack.c.bf16 %v3470_v52, %v3469_v29  ;;  %v3281_v3 = vmul.f32 %v6533_v6, %v3206_v41 }
 0x486   : > { %5249 = vst [vmem:[%s5949_s5 + $0x78] sm:$0xff] %v5153_v21   ;;  %v3282_v5 = vmul.f32 %v6533_v6, %v3207_v63  ;;  %v3208_v7 = vsub.f32 %v7113_v53, %v6467_v35  ;;  %vm3344_vm6 = vcmp.gt.f32.partialorder %v3280_v11, 0.0  ;;  %v3408_v37 = vmul.f32 0.2, %v3280_v11 }
 0x487   : > { %v3471_v34 = vsel %vm3343_vm5, %v3279_v20, %v3407_v51  ;;  %v3209_v38 = vsub.f32 %v7114_v14, %v6467_v35  ;;  %5250 = vst [vmem:[%s5949_s5 + $0x80] sm:$0xff] %v5158_v36   ;;  %vm3345_vm7 = vcmp.gt.f32.partialorder %v3281_v3, 0.0  ;;  %v3409_v42 = vmul.f32 0.2, %v3281_v3 }
 0x488   : > { %vm3346_vm8 = vcmp.gt.f32.partialorder %v3282_v5, 0.0  ;;  %v3283_v32 = vmul.f32 %v6533_v6, %v3208_v7  ;;  %v3472_v54 = vsel %vm3344_vm6, %v3280_v11, %v3408_v37  ;;  %v3410_v26 = vmul.f32 0.2, %v3282_v5 }
 0x489   : > { %v3284_v60 = vmul.f32 %v6533_v6, %v3209_v38  ;;  %v3210_v23 = vsub.f32 %v7115_v15, %v6467_v35  ;;  %v5163_v16 = vpack.c.bf16 %v3472_v54, %v3471_v34  ;;  %v3473_v44 = vsel %vm3345_vm7, %v3281_v3, %v3409_v42 }
 0x48a   : > { %vm3347_vm9 = vcmp.gt.f32.partialorder %v3283_v32, 0.0  ;;  %v3411_v48 = vmul.f32 0.2, %v3283_v32  ;;  %v3474_v57 = vsel %vm3346_vm8, %v3282_v5, %v3410_v26  ;;  %v3211_v2 = vsub.f32 %v7116_v55, %v6467_v35 }
 0x48b   : > { %vm3348_vm10 = vcmp.gt.f32.partialorder %v3284_v60, 0.0  ;;  %v3412_v58 = vmul.f32 0.2, %v3284_v60  ;;  %5251 = vst [vmem:[%s5949_s5 + $0x88] sm:$0xff] %v5163_v16   ;;  %v5168_v33 = vpack.c.bf16 %v3474_v57, %v3473_v44  ;;  %v3285_v25 = vmul.f32 %v6533_v6, %v3210_v23 }
 0x48c   : > { %v3475_v12 = vsel %vm3347_vm9, %v3283_v32, %v3411_v48  ;;  %v3212_v17 = vsub.f32 %v7117_v24, %v6467_v35  ;;  %v3286_v10 = vmul.f32 %v6533_v6, %v3211_v2  ;;  %v3213_v49 = vsub.f32 %v6316_v22, %v6467_v35 }
 0x48d   : > { %v3476_v0 = vsel %vm3348_vm10, %v3284_v60, %v3412_v58  ;;  %v3214_v40 = vsub.f32 %v7118_v31, %v6467_v35  ;;  %5252 = vst [vmem:[%s5949_s5 + $0x90] sm:$0xff] %v5168_v33   ;;  %vm3349_vm11 = vcmp.gt.f32.partialorder %v3285_v25, 0.0  ;;  %v3413_v27 = vmul.f32 0.2, %v3285_v25  ;;  %v7120_v31 = vld [vmem:[#allocation44_spill] sm:$0xff] }
 0x48e   : > { %v5173_v13 = vpack.c.bf16 %v3476_v0, %v3475_v12  ;;  %v3287_v62 = vmul.f32 %v6533_v6, %v3212_v17  ;;  %vm3350_vm12 = vcmp.gt.f32.partialorder %v3286_v10, 0.0  ;;  %v3414_v50 = vmul.f32 0.2, %v3286_v10  ;;  %v7119_v17 = vld [vmem:[#allocation43_spill] sm:$0xff] }
 0x48f   : > { %v3288_v1 = vmul.f32 %v6533_v6, %v3213_v49  ;;  %v3215_v56 = vsub.f32 %v6328_v45, %v6467_v35  ;;  %v3477_v20 = vsel %vm3349_vm11, %v3285_v25, %v3413_v27  ;;  %v3289_v21 = vmul.f32 %v6533_v6, %v3214_v40 }
 0x490   : > { %5253 = vst [vmem:[%s5949_s5 + $0x98] sm:$0xff] %v5173_v13   ;;  %vm3351_vm13 = vcmp.gt.f32.partialorder %v3287_v62, 0.0  ;;  %v3415_v22 = vmul.f32 0.2, %v3287_v62  ;;  %v3478_v29 = vsel %vm3350_vm12, %v3286_v10, %v3414_v50  ;;  %v3216_v51 = vsub.f32 %v6334_v61, %v6467_v35 }
 0x491   : > { %vm3352_vm14 = vcmp.gt.f32.partialorder %v3288_v1, 0.0  ;;  %v3416_v46 = vmul.f32 0.2, %v3288_v1  ;;  %v3290_v41 = vmul.f32 %v6533_v6, %v3215_v56  ;;  %v5178_v43 = vpack.c.bf16 %v3478_v29, %v3477_v20 }
 0x492   : > { %v3479_v63 = vsel %vm3351_vm13, %v3287_v62, %v3415_v22  ;;  %vm3353_vm15 = vcmp.gt.f32.partialorder %v3289_v21, 0.0  ;;  %v3417_v52 = vmul.f32 0.2, %v3289_v21  ;;  %v3217_v5 = vsub.f32 %v6340_v8, %v6467_v35 }
 0x493   : > { %v3480_v11 = vsel %vm3352_vm14, %v3288_v1, %v3416_v46  ;;  %vm3354_vm0 = vcmp.gt.f32.partialorder %v3290_v41, 0.0  ;;  %v3418_v45 = vmul.f32 0.2, %v3290_v41  ;;  %5254 = vst [vmem:[%s5949_s5 + $0xa0] sm:$0xff] %v5178_v43   ;;  %v3218_v53 = vsub.f32 %v6346_v28, %v6467_v35 }
 0x494   : > { %v5183_v36 = vpack.c.bf16 %v3480_v11, %v3479_v63  ;;  %v3481_v3 = vsel %vm3353_vm15, %v3289_v21, %v3417_v52  ;;  %v3291_v37 = vmul.f32 %v6533_v6, %v3216_v51  ;;  %v3219_v34 = vsub.f32 %v6352_v39, %v6467_v35  ;;  %v7122_v52 = vld [vmem:[#allocation46_spill] sm:$0xff] }
 0x495   : > { %v3482_v7 = vsel %vm3354_vm0, %v3290_v41, %v3418_v45  ;;  %v3220_v14 = vsub.f32 %v6358_v59, %v6467_v35  ;;  %v3292_v38 = vmul.f32 %v6533_v6, %v3217_v5  ;;  %v3293_v42 = vmul.f32 %v6533_v6, %v3218_v53  ;;  %v7123_v5 = vld [vmem:[#allocation47_spill] sm:$0xff] }
 0x496   : > { %5255 = vst [vmem:[%s5949_s5 + $0xa8] sm:$0xff] %v5183_v36   ;;  %v5188_v61 = vpack.c.bf16 %v3482_v7, %v3481_v3  ;;  %v3221_v8 = vsub.f32 %v6364_v9, %v6467_v35  ;;  %vm3355_vm1 = vcmp.gt.f32.partialorder %v3291_v37, 0.0  ;;  %v3419_v28 = vmul.f32 0.2, %v3291_v37 }
 0x497   : > { %v3294_v32 = vmul.f32 %v6533_v6, %v3219_v34  ;;  %v3295_v54 = vmul.f32 %v6533_v6, %v3220_v14  ;;  %vm3356_vm2 = vcmp.gt.f32.partialorder %v3292_v38, 0.0  ;;  %v3420_v39 = vmul.f32 0.2, %v3292_v38 }
 0x498   : > { %5256 = vst [vmem:[%s5949_s5 + $0xb0] sm:$0xff] %v5188_v61   ;;  %vm3357_vm3 = vcmp.gt.f32.partialorder %v3293_v42, 0.0  ;;  %v3296_v59 = vmul.f32 %v6533_v6, %v3221_v8  ;;  %v3483_v26 = vsel %vm3355_vm1, %v3291_v37, %v3419_v28  ;;  %v3421_v60 = vmul.f32 0.2, %v3293_v42  ;;  %v7125_v8 = vld [vmem:[#allocation49_spill] sm:$0xff] }
 0x499   : > { %vm3358_vm4 = vcmp.gt.f32.partialorder %v3294_v32, 0.0  ;;  %v3422_v15 = vmul.f32 0.2, %v3294_v32  ;;  %v3484_v23 = vsel %vm3356_vm2, %v3292_v38, %v3420_v39  ;;  %vm3359_vm5 = vcmp.gt.f32.partialorder %v3295_v54, 0.0  ;;  %v7124_v38 = vld [vmem:[#allocation48_spill] sm:$0xff] }
 0x49a   : > { %vm3360_vm6 = vcmp.gt.f32.partialorder %v3296_v59, 0.0  ;;  %v3423_v9 = vmul.f32 0.2, %v3295_v54  ;;  %v5193_v16 = vpack.c.bf16 %v3484_v23, %v3483_v26  ;;  %v3485_v44 = vsel %vm3357_vm3, %v3293_v42, %v3421_v60 }
 0x49b   : > { %v3486_v48 = vsel %vm3358_vm4, %v3294_v32, %v3422_v15  ;;  %v3424_v57 = vmul.f32 0.2, %v3296_v59  ;;  %v3222_v2 = vsub.f32 %v6370_v30, %v6467_v35  ;;  %v3223_v33 = vsub.f32 %v6376_v47, %v6467_v35 }
 0x49c   : > { %v5198_v58 = vpack.c.bf16 %v3486_v48, %v3485_v44  ;;  %v3487_v55 = vsel %vm3359_vm5, %v3295_v54, %v3423_v9  ;;  %5257 = vst [vmem:[%s5949_s5 + $0xb8] sm:$0xff] %v5193_v16   ;;  %v3224_v25 = vsub.f32 %v6382_v4, %v6467_v35  ;;  %v3225_v24 = vsub.f32 %v6388_v19, %v6467_v35  ;;  %v7121_v19 = vld [vmem:[#allocation45_spill] sm:$0xff] }
 0x49d   : > { %v3488_v12 = vsel %vm3360_vm6, %v3296_v59, %v3424_v57  ;;  %v3226_v0 = vsub.f32 %v7119_v17, %v6467_v35  ;;  %v3297_v49 = vmul.f32 %v6533_v6, %v3222_v2  ;;  %v3298_v30 = vmul.f32 %v6533_v6, %v3223_v33 }
 0x49e   : > { %5258 = vst [vmem:[%s5949_s5 + $0xc0] sm:$0xff] %v5198_v58   ;;  %v5203_v10 = vpack.c.bf16 %v3488_v12, %v3487_v55  ;;  %v3227_v47 = vsub.f32 %v7120_v31, %v6467_v35  ;;  %v3299_v40 = vmul.f32 %v6533_v6, %v3224_v25  ;;  %v3300_v13 = vmul.f32 %v6533_v6, %v3225_v24 }
 0x49f   : > { %v3301_v4 = vmul.f32 %v6533_v6, %v3226_v0  ;;  %v3228_v27 = vsub.f32 %v7121_v19, %v6467_v35  ;;  %vm3361_vm7 = vcmp.gt.f32.partialorder %v3297_v49, 0.0  ;;  %vm3362_vm8 = vcmp.gt.f32.partialorder %v3298_v30, 0.0 }
 0x4a0   : > { %5259 = vst [vmem:[%s5949_s5 + $0xc8] sm:$0xff] %v5203_v10   ;;  %v3425_v62 = vmul.f32 0.2, %v3297_v49  ;;  %v3302_v50 = vmul.f32 %v6533_v6, %v3227_v47  ;;  %v3426_v1 = vmul.f32 0.2, %v3298_v30  ;;  %vm3363_vm9 = vcmp.gt.f32.partialorder %v3299_v40, 0.0 }
 0x4a1   : > { %vm3364_vm10 = vcmp.gt.f32.partialorder %v3300_v13, 0.0  ;;  %v3427_v56 = vmul.f32 0.2, %v3299_v40  ;;  %v3428_v22 = vmul.f32 0.2, %v3300_v13  ;;  %vm3365_vm11 = vcmp.gt.f32.partialorder %v3301_v4, 0.0 }
 0x4a2   : > { %v3489_v20 = vsel %vm3361_vm7, %v3297_v49, %v3425_v62  ;;  %vm3366_vm12 = vcmp.gt.f32.partialorder %v3302_v50, 0.0  ;;  %v3490_v21 = vsel %vm3362_vm8, %v3298_v30, %v3426_v1  ;;  %v3429_v46 = vmul.f32 0.2, %v3301_v4 }
 0x4a3   : > { %v3491_v29 = vsel %vm3363_vm9, %v3299_v40, %v3427_v56  ;;  %v3430_v41 = vmul.f32 0.2, %v3302_v50  ;;  %v5208_v43 = vpack.c.bf16 %v3490_v21, %v3489_v20  ;;  %v3492_v63 = vsel %vm3364_vm10, %v3300_v13, %v3428_v22 }
 0x4a4   : > { %v3229_v11 = vsub.f32 %v7122_v52, %v6467_v35  ;;  %v3303_v45 = vmul.f32 %v6533_v6, %v3228_v27  ;;  %v5213_v51 = vpack.c.bf16 %v3492_v63, %v3491_v29  ;;  %v3493_v36 = vsel %vm3365_vm11, %v3301_v4, %v3429_v46 }
 0x4a5   : > { %v3494_v3 = vsel %vm3366_vm12, %v3302_v50, %v3430_v41  ;;  %v3230_v53 = vsub.f32 %v7123_v5, %v6467_v35  ;;  %5260 = vst [vmem:[%s5949_s5 + $0xd0] sm:$0xff] %v5208_v43   ;;  %v3231_v14 = vsub.f32 %v6424_v18, %v6467_v35  ;;  %v3232_v42 = vsub.f32 %v7124_v38, %v6467_v35 }
 0x4a6   : > { %v5218_v7 = vpack.c.bf16 %v3494_v3, %v3493_v36  ;;  %v3304_v37 = vmul.f32 %v6533_v6, %v3229_v11  ;;  %vm3367_vm13 = vcmp.gt.f32.partialorder %v3303_v45, 0.0  ;;  %v3431_v34 = vmul.f32 0.2, %v3303_v45  ;;  %5261 = vst [vmem:[%s5949_s5 + $0xd8] sm:$0xff] %v5213_v51  }
 0x4a7   : > { %v3305_v61 = vmul.f32 %v6533_v6, %v3230_v53  ;;  %v3233_v28 = vsub.f32 %v7125_v8, %v6467_v35  ;;  %v3306_v39 = vmul.f32 %v6533_v6, %v3231_v14  ;;  %v3307_v26 = vmul.f32 %v6533_v6, %v3232_v42 }
 0x4a8   : > { %5262 = vst [vmem:[%s5949_s5 + $0xe0] sm:$0xff] %v5218_v7   ;;  %vm3368_vm14 = vcmp.gt.f32.partialorder %v3304_v37, 0.0  ;;  %v3432_v32 = vmul.f32 0.2, %v3304_v37  ;;  %v3495_v54 = vsel %vm3367_vm13, %v3303_v45, %v3431_v34 }
 0x4a9   : > { %vm3369_vm15 = vcmp.gt.f32.partialorder %v3305_v61, 0.0  ;;  %v3433_v59 = vmul.f32 0.2, %v3305_v61  ;;  %v3308_v60 = vmul.f32 %v6533_v6, %v3233_v28  ;;  %vm3370_vm0 = vcmp.gt.f32.partialorder %v3306_v39, 0.0 }
 0x4aa   : > { %v3496_v18 = vsel %vm3368_vm14, %v3304_v37, %v3432_v32  ;;  %v3434_v23 = vmul.f32 0.2, %v3306_v39  ;;  %vm3371_vm1 = vcmp.gt.f32.partialorder %v3307_v26, 0.0  ;;  %v3435_v9 = vmul.f32 0.2, %v3307_v26 }
 0x4ab   : > { %v5223_v15 = vpack.c.bf16 %v3496_v18, %v3495_v54  ;;  %v3497_v35 = vsel %vm3369_vm15, %v3305_v61, %v3433_v59  ;;  %vm3372_vm2 = vcmp.gt.f32.partialorder %v3308_v60, 0.0  ;;  %v3436_v16 = vmul.f32 0.2, %v3308_v60 }
 0x4ac   : > { %v3498_v44 = vsel %vm3370_vm0, %v3306_v39, %v3434_v23  ;;  %v3499_v57 = vsel %vm3371_vm1, %v3307_v26, %v3435_v9 }
 0x4ad   : > { %5263 = vst [vmem:[%s5949_s5 + $0xe8] sm:$0xff] %v5223_v15   ;;  %v5228_v48 = vpack.c.bf16 %v3498_v44, %v3497_v35  ;;  %v3500_v58 = vsel %vm3372_vm2, %v3308_v60, %v3436_v16 }
 0x4ae   : > { %v5233_v55 = vpack.c.bf16 %v3500_v58, %v3499_v57 }
 0x4af   : > { %5264 = vst [vmem:[%s5949_s5 + $0xf0] sm:$0xff] %v5228_v48  }
 0x4b0   : > { %5265 = vst [vmem:[%s5949_s5 + $0xf8] sm:$0xff] %v5233_v55  }
 0x4b1 PF: > { %3635 = sbr.rel (!%p5495_p9) target bundleno = 1267 (0x4f3), region = 85  ;;  %s4910_s13 = sshll.u32 (%p5495_p9), %s5398_s14, 2  ;;  %v3654_v6 = vld [vmem:[%s5949_s5] sm:$0xf] (%p5495_p9)  ;;  %v3656_v2 = vld [vmem:[%s5949_s5 + $0x4] sm:$0xf] (%p5495_p9) }
 0x4b2   : > { %s6783_s8 = scalar_lea.vmem (%p5495_p9), %s6940_s2, %s4910_s13  ;;  %v3658_v33 = vld [vmem:[%s5949_s5 + $0x8] sm:$0xf] (%p5495_p9)  ;;  %v3660_v12 = vld [vmem:[%s5949_s5 + $0xc] sm:$0xf] (%p5495_p9)  ;;  %v3662_v25 = vld [vmem:[%s5949_s5 + $0x10] sm:$0xf] (%p5495_p9) }
 0x4b3   : > { %3655 = vst [vmem:[%s6783_s8] sm:$0xf] (%p5495_p9), %v3654_v6  ;;  %v3664_v24 = vld [vmem:[%s5949_s5 + $0x14] sm:$0xf] (%p5495_p9)  ;;  %v3666_v17 = vld [vmem:[%s5949_s5 + $0x18] sm:$0xf] (%p5495_p9) }
 0x4b4   : > { %3657 = vst [vmem:[%s6783_s8 + $0x8] sm:$0xf] (%p5495_p9), %v3656_v2  ;;  %v3668_v0 = vld [vmem:[%s5949_s5 + $0x1c] sm:$0xf] (%p5495_p9)  ;;  %v3670_v10 = vld [vmem:[%s5949_s5 + $0x20] sm:$0xf] (%p5495_p9) }
 0x4b5   : > { %3659 = vst [vmem:[%s6783_s8 + $0x10] sm:$0xf] (%p5495_p9), %v3658_v33  ;;  %v3672_v49 = vld [vmem:[%s5949_s5 + $0x24] sm:$0xf] (%p5495_p9)  ;;  %v3674_v30 = vld [vmem:[%s5949_s5 + $0x28] sm:$0xf] (%p5495_p9) }
 0x4b6   : > { %3661 = vst [vmem:[%s6783_s8 + $0x18] sm:$0xf] %v3660_v12  ;;  %v3676_v31 = vld [vmem:[%s5949_s5 + $0x2c] sm:$0xf]  ;;  %v3678_v47 = vld [vmem:[%s5949_s5 + $0x30] sm:$0xf] }
 0x4b7   : > { %3663 = vst [vmem:[%s6783_s8 + $0x20] sm:$0xf] %v3662_v25  ;;  %v3680_v40 = vld [vmem:[%s5949_s5 + $0x34] sm:$0xf]  ;;  %v3682_v13 = vld [vmem:[%s5949_s5 + $0x38] sm:$0xf] }
 0x4b8   : > { %3665 = vst [vmem:[%s6783_s8 + $0x28] sm:$0xf] %v3664_v24  ;;  %v3684_v4 = vld [vmem:[%s5949_s5 + $0x3c] sm:$0xf]  ;;  %v3686_v19 = vld [vmem:[%s5949_s5 + $0x40] sm:$0xf] }
 0x4b9   : > { %3667 = vst [vmem:[%s6783_s8 + $0x30] sm:$0xf] %v3666_v17  ;;  %v3688_v27 = vld [vmem:[%s5949_s5 + $0x44] sm:$0xf]  ;;  %v3690_v62 = vld [vmem:[%s5949_s5 + $0x48] sm:$0xf] }
 0x4ba   : > { %3669 = vst [vmem:[%s6783_s8 + $0x38] sm:$0xf] %v3668_v0  ;;  %v3692_v50 = vld [vmem:[%s5949_s5 + $0x4c] sm:$0xf]  ;;  %v3694_v1 = vld [vmem:[%s5949_s5 + $0x50] sm:$0xf] }
 0x4bb   : > { %3671 = vst [vmem:[%s6783_s8 + $0x40] sm:$0xf] %v3670_v10  ;;  %v3696_v56 = vld [vmem:[%s5949_s5 + $0x54] sm:$0xf]  ;;  %v3698_v20 = vld [vmem:[%s5949_s5 + $0x58] sm:$0xf] }
 0x4bc   : > { %3673 = vst [vmem:[%s6783_s8 + $0x48] sm:$0xf] %v3672_v49  ;;  %v3700_v22 = vld [vmem:[%s5949_s5 + $0x5c] sm:$0xf]  ;;  %v3702_v21 = vld [vmem:[%s5949_s5 + $0x60] sm:$0xf] }
 0x4bd   : > { %3675 = vst [vmem:[%s6783_s8 + $0x50] sm:$0xf] %v3674_v30  ;;  %v3704_v29 = vld [vmem:[%s5949_s5 + $0x64] sm:$0xf]  ;;  %v3706_v46 = vld [vmem:[%s5949_s5 + $0x68] sm:$0xf] }
 0x4be   : > { %3677 = vst [vmem:[%s6783_s8 + $0x58] sm:$0xf] %v3676_v31  ;;  %v3708_v41 = vld [vmem:[%s5949_s5 + $0x6c] sm:$0xf]  ;;  %v3710_v43 = vld [vmem:[%s5949_s5 + $0x70] sm:$0xf] }
 0x4bf   : > { %3679 = vst [vmem:[%s6783_s8 + $0x60] sm:$0xf] %v3678_v47  ;;  %v3712_v63 = vld [vmem:[%s5949_s5 + $0x74] sm:$0xf]  ;;  %v3714_v52 = vld [vmem:[%s5949_s5 + $0x78] sm:$0xf] }
 0x4c0   : > { %3681 = vst [vmem:[%s6783_s8 + $0x68] sm:$0xf] %v3680_v40  ;;  %v3716_v11 = vld [vmem:[%s5949_s5 + $0x7c] sm:$0xf]  ;;  %v3718_v45 = vld [vmem:[%s5949_s5 + $0x80] sm:$0xf] }
 0x4c1   : > { %3683 = vst [vmem:[%s6783_s8 + $0x70] sm:$0xf] %v3682_v13  ;;  %v3720_v51 = vld [vmem:[%s5949_s5 + $0x84] sm:$0xf]  ;;  %v3722_v36 = vld [vmem:[%s5949_s5 + $0x88] sm:$0xf] }
 0x4c2   : > { %3685 = vst [vmem:[%s6783_s8 + $0x78] sm:$0xf] %v3684_v4  ;;  %v3724_v3 = vld [vmem:[%s5949_s5 + $0x8c] sm:$0xf]  ;;  %v3726_v5 = vld [vmem:[%s5949_s5 + $0x90] sm:$0xf] }
 0x4c3   : > { %3687 = vst [vmem:[%s6783_s8 + $0x80] sm:$0xf] %v3686_v19  ;;  %v3728_v53 = vld [vmem:[%s5949_s5 + $0x94] sm:$0xf]  ;;  %v3730_v7 = vld [vmem:[%s5949_s5 + $0x98] sm:$0xf] }
 0x4c4   : > { %3689 = vst [vmem:[%s6783_s8 + $0x88] sm:$0xf] %v3688_v27  ;;  %v3732_v37 = vld [vmem:[%s5949_s5 + $0x9c] sm:$0xf]  ;;  %v3734_v34 = vld [vmem:[%s5949_s5 + $0xa0] sm:$0xf] }
 0x4c5   : > { %3691 = vst [vmem:[%s6783_s8 + $0x90] sm:$0xf] %v3690_v62  ;;  %v3736_v14 = vld [vmem:[%s5949_s5 + $0xa4] sm:$0xf]  ;;  %v3738_v61 = vld [vmem:[%s5949_s5 + $0xa8] sm:$0xf] }
 0x4c6   : > { %3693 = vst [vmem:[%s6783_s8 + $0x98] sm:$0xf] %v3692_v50  ;;  %v3740_v38 = vld [vmem:[%s5949_s5 + $0xac] sm:$0xf]  ;;  %v3742_v42 = vld [vmem:[%s5949_s5 + $0xb0] sm:$0xf] }
 0x4c7   : > { %3695 = vst [vmem:[%s6783_s8 + $0xa0] sm:$0xf] %v3694_v1  ;;  %v3744_v8 = vld [vmem:[%s5949_s5 + $0xb4] sm:$0xf]  ;;  %v3746_v28 = vld [vmem:[%s5949_s5 + $0xb8] sm:$0xf] }
 0x4c8   : > { %3697 = vst [vmem:[%s6783_s8 + $0xa8] sm:$0xf] %v3696_v56  ;;  %v3748_v32 = vld [vmem:[%s5949_s5 + $0xbc] sm:$0xf]  ;;  %v3750_v54 = vld [vmem:[%s5949_s5 + $0xc0] sm:$0xf] }
 0x4c9   : > { %3699 = vst [vmem:[%s6783_s8 + $0xb0] sm:$0xf] %v3698_v20  ;;  %v3752_v39 = vld [vmem:[%s5949_s5 + $0xc4] sm:$0xf]  ;;  %v3754_v59 = vld [vmem:[%s5949_s5 + $0xc8] sm:$0xf] }
 0x4ca   : > { %3701 = vst [vmem:[%s6783_s8 + $0xb8] sm:$0xf] %v3700_v22  ;;  %v3756_v26 = vld [vmem:[%s5949_s5 + $0xcc] sm:$0xf]  ;;  %v3758_v18 = vld [vmem:[%s5949_s5 + $0xd0] sm:$0xf] }
 0x4cb   : > { %3703 = vst [vmem:[%s6783_s8 + $0xc0] sm:$0xf] %v3702_v21  ;;  %v3760_v60 = vld [vmem:[%s5949_s5 + $0xd4] sm:$0xf]  ;;  %v3762_v15 = vld [vmem:[%s5949_s5 + $0xd8] sm:$0xf] }
 0x4cc   : > { %3705 = vst [vmem:[%s6783_s8 + $0xc8] sm:$0xf] %v3704_v29  ;;  %v3764_v23 = vld [vmem:[%s5949_s5 + $0xdc] sm:$0xf]  ;;  %v3766_v35 = vld [vmem:[%s5949_s5 + $0xe0] sm:$0xf] }
 0x4cd   : > { %3707 = vst [vmem:[%s6783_s8 + $0xd0] sm:$0xf] %v3706_v46  ;;  %v3768_v9 = vld [vmem:[%s5949_s5 + $0xe4] sm:$0xf]  ;;  %v3770_v16 = vld [vmem:[%s5949_s5 + $0xe8] sm:$0xf] }
 0x4ce   : > { %3709 = vst [vmem:[%s6783_s8 + $0xd8] sm:$0xf] %v3708_v41  ;;  %v3772_v44 = vld [vmem:[%s5949_s5 + $0xec] sm:$0xf]  ;;  %v3774_v48 = vld [vmem:[%s5949_s5 + $0xf0] sm:$0xf] }
 0x4cf   : > { %3711 = vst [vmem:[%s6783_s8 + $0xe0] sm:$0xf] %v3710_v43  ;;  %v3776_v57 = vld [vmem:[%s5949_s5 + $0xf4] sm:$0xf]  ;;  %v3778_v58 = vld [vmem:[%s5949_s5 + $0xf8] sm:$0xf] }
 0x4d0   : > { %3713 = vst [vmem:[%s6783_s8 + $0xe8] sm:$0xf] %v3712_v63  ;;  %v3780_v55 = vld [vmem:[%s5949_s5 + $0xfc] sm:$0xf] }
 0x4d1   : > { %3715 = vst [vmem:[%s6783_s8 + $0xf0] sm:$0xf] %v3714_v52 }
 0x4d2   : > { %3717 = vst [vmem:[%s6783_s8 + $0xf8] sm:$0xf] %v3716_v11 }
 0x4d3   : > { %3719 = vst [vmem:[%s6783_s8 + $0x100] sm:$0xf] %v3718_v45 }
 0x4d4   : > { %3721 = vst [vmem:[%s6783_s8 + $0x108] sm:$0xf] %v3720_v51 }
 0x4d5   : > { %3723 = vst [vmem:[%s6783_s8 + $0x110] sm:$0xf] %v3722_v36 }
 0x4d6   : > { %3725 = vst [vmem:[%s6783_s8 + $0x118] sm:$0xf] %v3724_v3 }
 0x4d7   : > { %3727 = vst [vmem:[%s6783_s8 + $0x120] sm:$0xf] %v3726_v5 }
 0x4d8   : > { %3729 = vst [vmem:[%s6783_s8 + $0x128] sm:$0xf] %v3728_v53 }
 0x4d9   : > { %3731 = vst [vmem:[%s6783_s8 + $0x130] sm:$0xf] %v3730_v7 }
 0x4da   : > { %3733 = vst [vmem:[%s6783_s8 + $0x138] sm:$0xf] %v3732_v37 }
 0x4db   : > { %3735 = vst [vmem:[%s6783_s8 + $0x140] sm:$0xf] %v3734_v34 }
 0x4dc   : > { %3737 = vst [vmem:[%s6783_s8 + $0x148] sm:$0xf] %v3736_v14 }
 0x4dd   : > { %3739 = vst [vmem:[%s6783_s8 + $0x150] sm:$0xf] %v3738_v61 }
 0x4de   : > { %3741 = vst [vmem:[%s6783_s8 + $0x158] sm:$0xf] %v3740_v38 }
 0x4df   : > { %3743 = vst [vmem:[%s6783_s8 + $0x160] sm:$0xf] %v3742_v42 }
 0x4e0   : > { %3745 = vst [vmem:[%s6783_s8 + $0x168] sm:$0xf] %v3744_v8 }
 0x4e1   : > { %3747 = vst [vmem:[%s6783_s8 + $0x170] sm:$0xf] %v3746_v28 }
 0x4e2   : > { %3749 = vst [vmem:[%s6783_s8 + $0x178] sm:$0xf] %v3748_v32 }
 0x4e3   : > { %3751 = vst [vmem:[%s6783_s8 + $0x180] sm:$0xf] %v3750_v54 }
 0x4e4   : > { %3753 = vst [vmem:[%s6783_s8 + $0x188] sm:$0xf] %v3752_v39 }
 0x4e5   : > { %3755 = vst [vmem:[%s6783_s8 + $0x190] sm:$0xf] %v3754_v59 }
 0x4e6   : > { %3757 = vst [vmem:[%s6783_s8 + $0x198] sm:$0xf] %v3756_v26 }
 0x4e7   : > { %3759 = vst [vmem:[%s6783_s8 + $0x1a0] sm:$0xf] %v3758_v18 }
 0x4e8   : > { %3761 = vst [vmem:[%s6783_s8 + $0x1a8] sm:$0xf] %v3760_v60 }
 0x4e9   : > { %3763 = vst [vmem:[%s6783_s8 + $0x1b0] sm:$0xf] %v3762_v15 }
 0x4ea   : > { %3765 = vst [vmem:[%s6783_s8 + $0x1b8] sm:$0xf] %v3764_v23 }
 0x4eb   : > { %3767 = vst [vmem:[%s6783_s8 + $0x1c0] sm:$0xf] %v3766_v35 }
 0x4ec   : > { %3769 = vst [vmem:[%s6783_s8 + $0x1c8] sm:$0xf] %v3768_v9 }
 0x4ed   : > { %3771 = vst [vmem:[%s6783_s8 + $0x1d0] sm:$0xf] %v3770_v16 }
 0x4ee   : > { %3773 = vst [vmem:[%s6783_s8 + $0x1d8] sm:$0xf] %v3772_v44 }
 0x4ef   : > { %3775 = vst [vmem:[%s6783_s8 + $0x1e0] sm:$0xf] %v3774_v48 }
 0x4f0   : > { %3777 = vst [vmem:[%s6783_s8 + $0x1e8] sm:$0xf] %v3776_v57 }
 0x4f1   : > { %3779 = vst [vmem:[%s6783_s8 + $0x1f0] sm:$0xf] %v3778_v58 }
 0x4f2   : > { %3781 = vst [vmem:[%s6783_s8 + $0x1f8] sm:$0xf] %v3780_v55 }
 0x4f3 PF: > { %s12_s17 = sadd.s32 1, %s5410_s17   ;;  %s7126_s9 = smov %s5382_s10 }
 0x4f4   : > { %p9_p6 = scmp.ge.s32.totalorder %s12_s17, 10   ;;  %s7127_s10 = smov %s5500_s28 }
 0x4f5   : > { %s7128_s11 = smov %s5390_s12  ;;  %s7129_s12 = smov %s5503_s29 }
 0x4f6   : > { %s7130_s13 = smov %s5402_s15  ;;  %s7131_s14 = smov %s5406_s16 }
 0x4f7   : > { %s7132_s15 = smov %s7135_s18  ;;  %s7133_s16 = smov %s7139_s19 }
 0x4f8   :  { %11 = sbr.rel (!%p9_p6) target bundleno = 5 (0x5), region = 166 }

// kernel: discriminator_forward.5
= control target key start
LH: loop header
LB: loop body
LE: loop exit
PB: predicated region body
PF: predicated region fallthrough
CT: control target
= control target key end

     0   :  { %s4898_s12 = smov 0   ;;  %s4900_s13 = smov 0   ;;  %s6552_s0 = inlined_call_operand.vmem [shape: bf16[16,128,256], index: 0, kind: input, shape index: {}]   ;;  %s6553_s1 = inlined_call_operand.vmem [shape: bf16[16,256,512], index: 1, kind: input, shape index: {}]   ;;  %s6554_s2 = inlined_call_operand.vmem [shape: bf16[64,512], index: 2, kind: input, shape index: {}]   ;;  %s6555_s3 = inlined_call_operand.vmem [shape: f32[2,2,1], index: 3, kind: output, shape index: {}]  }
   0x1   :  { %s4902_s14 = smov 0   ;;  %s4904_s15 = smov 0  }
   0x2   :  { %s4906_s16 = smov 0   ;;  %s4908_s17 = smov 0  }
   0x3   :  { %s4910_s18 = smov 0   ;;  %s4912_s19 = smov 0  }
   0x4   :  { %s4914_s20 = smov 0  }
   0x5 LB: > { %s22_s21 = sadd.s32 1, %s4868_s18  ;;  %s25_s22 = sadd.s32 1, %s4872_s19  ;;  %s4876_s20 = sphi %s4914_s20, %s13_s20   ;;  %s4872_s19 = sphi %s4912_s19, %s6594_s19   ;;  %s4868_s18 = sphi %s4910_s18, %s6593_s18   ;;  %s4864_s17 = sphi %s4908_s17, %s6592_s17   ;;  %s4860_s16 = sphi %s4906_s16, %s6591_s16   ;;  %s4856_s15 = sphi %s4904_s15, %s6590_s15   ;;  %s4852_s14 = sphi %s4902_s14, %s6589_s14   ;;  %s4848_s13 = sphi %s4900_s13, %s6588_s13   ;;  %s4844_s12 = sphi %s4898_s12, %s6587_s12  }
   0x6   : > { %p23_p0 = scmp.ge.s32.totalorder %s22_s21, 4  ;;  %p67_p1 = scmp.ne.s32.totalorder %s4856_s15, %s4852_s14 }
   0x7   : > { %p68_p2 = scmp.eq.s32.totalorder %s4876_s20, 0  ;;  %p93_p5 = scmp.ne.s32.totalorder %s4848_s13, %s4844_s12 }
   0x8   : > { %s6596_s21 = smov (%p23_p0, %s22_s21), 0  ;;  %s6598_s22 = smov (!%p23_p0, %s25_s22), %s4872_s19 }
   0x9   : > { %p4951_p3 = por %p68_p2, %p67_p1  ;;  %p27_p4 = scmp.ge.s32.totalorder %s6598_s22, 2 }
   0xa   : > { %s55_s24 = ssub.s32 %s4868_s18, %s6596_s21  ;;  %s60_s25 = sadd.s32 1, %s4856_s15 }
   0xb   : > { %s6600_s22 = smov (%p27_p4, %s6598_s22), 0  ;;  %p4962_p6 = por %p93_p5, %p68_p2 }
   0xc   : > { %s56_s27 = ssub.s32 %s4872_s19, %s6600_s22  ;;  %s86_s28 = sadd.s32 1, %s4848_s13 }
   0xd   : > { %s57_s29 = sor.u32 %s56_s27, %s55_s24  ;;  %p84_p7 = scmp.eq.s32.totalorder %s56_s27, 0 }
   0xe   : > { %p58_p8 = scmp.eq.s32.totalorder %s57_s29, 0  ;;  %p3603_p9 = scmp.ge.s32.totalorder %s4876_s20, 8 }
   0xf   : > { %s4970_s30 = scalar_select %p84_p7, %s4848_s13, %s86_s28  }
  0x10   : > { %s4973_s4 = scalar_select %p58_p8, %s4856_s15, %s60_s25  }
  0x11   : > { %145 = sbr.rel (%p3603_p9) target bundleno = 169 (0xa9), region = 16 }
  0x16   : > { %158 = sbr.rel (!%p4951_p3) target bundleno = 157 (0x9d), region = 24  ;;  %s160_s5 = sand.u32 (%p4951_p3), 1, %s4856_s15  }
  0x17   : > { %s3606_s6 = sshll.u32 (%p4951_p3), %s4872_s19, 1  ;;  %s3604_s7 = sshll.u32 (%p4951_p3), %s160_s5, 10 }
  0x18   : > { %s4535_s8 = sshll.u32 (%p4951_p3), %s4868_s18, 9  ;;  %s4989_s23 = scalar_lea.vmem (%p4951_p3), [#allocation3], %s3604_s7 }
  0x19   : > { %s166_s9 = sadd.s32 (%p4951_p3), %s4535_s8, %s3606_s6 }
  0x1a   : > { %s3608_s10 = sshll.u32 (%p4951_p3), %s166_s9, 2 }
  0x1b   : > { %s4984_s25 = scalar_lea.vmem %s6553_s1, %s3608_s10 }
  0x1c   : > { %v451_v0 = vld [vmem:[%s4984_s25] sm:$0xff]  ;;  %v453_v1 = vld [vmem:[%s4984_s25 + $0x10] sm:$0xff] }
  0x1d   : > { %v455_v2 = vld [vmem:[%s4984_s25 + $0x20] sm:$0xff]  ;;  %452 = vst [vmem:[%s4989_s23] sm:$0xff] %v451_v0  ;;  %v457_v3 = vld [vmem:[%s4984_s25 + $0x30] sm:$0xff] }
  0x1e   : > { %454 = vst [vmem:[%s4989_s23 + $0x8] sm:$0xff] %v453_v1  ;;  %v459_v4 = vld [vmem:[%s4984_s25 + $0x40] sm:$0xff]  ;;  %v461_v5 = vld [vmem:[%s4984_s25 + $0x50] sm:$0xff] }
  0x1f   : > { %456 = vst [vmem:[%s4989_s23 + $0x10] sm:$0xff] %v455_v2  ;;  %v463_v6 = vld [vmem:[%s4984_s25 + $0x60] sm:$0xff]  ;;  %v465_v7 = vld [vmem:[%s4984_s25 + $0x70] sm:$0xff] }
  0x20   : > { %458 = vst [vmem:[%s4989_s23 + $0x18] sm:$0xff] %v457_v3  ;;  %v467_v8 = vld [vmem:[%s4984_s25 + $0x80] sm:$0xff]  ;;  %v469_v9 = vld [vmem:[%s4984_s25 + $0x90] sm:$0xff] }
  0x21   : > { %460 = vst [vmem:[%s4989_s23 + $0x20] sm:$0xff] %v459_v4  ;;  %v471_v10 = vld [vmem:[%s4984_s25 + $0xa0] sm:$0xff]  ;;  %v473_v11 = vld [vmem:[%s4984_s25 + $0xb0] sm:$0xff] }
  0x22   : > { %462 = vst [vmem:[%s4989_s23 + $0x28] sm:$0xff] %v461_v5  ;;  %v475_v12 = vld [vmem:[%s4984_s25 + $0xc0] sm:$0xff]  ;;  %v477_v13 = vld [vmem:[%s4984_s25 + $0xd0] sm:$0xff] }
  0x23   : > { %464 = vst [vmem:[%s4989_s23 + $0x30] sm:$0xff] %v463_v6  ;;  %v479_v14 = vld [vmem:[%s4984_s25 + $0xe0] sm:$0xff]  ;;  %v481_v15 = vld [vmem:[%s4984_s25 + $0xf0] sm:$0xff] }
  0x24   : > { %466 = vst [vmem:[%s4989_s23 + $0x38] sm:$0xff] %v465_v7  ;;  %v483_v16 = vld [vmem:[%s4984_s25 + $0x100] sm:$0xff]  ;;  %v485_v17 = vld [vmem:[%s4984_s25 + $0x110] sm:$0xff] }
  0x25   : > { %468 = vst [vmem:[%s4989_s23 + $0x40] sm:$0xff] %v467_v8  ;;  %v487_v18 = vld [vmem:[%s4984_s25 + $0x120] sm:$0xff]  ;;  %v489_v19 = vld [vmem:[%s4984_s25 + $0x130] sm:$0xff] }
  0x26   : > { %470 = vst [vmem:[%s4989_s23 + $0x48] sm:$0xff] %v469_v9  ;;  %v491_v20 = vld [vmem:[%s4984_s25 + $0x140] sm:$0xff]  ;;  %v493_v21 = vld [vmem:[%s4984_s25 + $0x150] sm:$0xff] }
  0x27   : > { %472 = vst [vmem:[%s4989_s23 + $0x50] sm:$0xff] %v471_v10  ;;  %v495_v22 = vld [vmem:[%s4984_s25 + $0x160] sm:$0xff]  ;;  %v497_v23 = vld [vmem:[%s4984_s25 + $0x170] sm:$0xff] }
  0x28   : > { %474 = vst [vmem:[%s4989_s23 + $0x58] sm:$0xff] %v473_v11  ;;  %v499_v24 = vld [vmem:[%s4984_s25 + $0x180] sm:$0xff]  ;;  %v501_v25 = vld [vmem:[%s4984_s25 + $0x190] sm:$0xff] }
  0x29   : > { %476 = vst [vmem:[%s4989_s23 + $0x60] sm:$0xff] %v475_v12  ;;  %v503_v26 = vld [vmem:[%s4984_s25 + $0x1a0] sm:$0xff]  ;;  %v505_v27 = vld [vmem:[%s4984_s25 + $0x1b0] sm:$0xff] }
  0x2a   : > { %478 = vst [vmem:[%s4989_s23 + $0x68] sm:$0xff] %v477_v13  ;;  %v507_v28 = vld [vmem:[%s4984_s25 + $0x1c0] sm:$0xff]  ;;  %v509_v29 = vld [vmem:[%s4984_s25 + $0x1d0] sm:$0xff] }
  0x2b   : > { %480 = vst [vmem:[%s4989_s23 + $0x70] sm:$0xff] %v479_v14  ;;  %v511_v30 = vld [vmem:[%s4984_s25 + $0x1e0] sm:$0xff]  ;;  %v513_v31 = vld [vmem:[%s4984_s25 + $0x1f0] sm:$0xff] }
  0x2c   : > { %482 = vst [vmem:[%s4989_s23 + $0x78] sm:$0xff] %v481_v15  ;;  %v515_v32 = vld [vmem:[%s4984_s25 + $0x200] sm:$0xff]  ;;  %v517_v33 = vld [vmem:[%s4984_s25 + $0x210] sm:$0xff] }
  0x2d   : > { %484 = vst [vmem:[%s4989_s23 + $0x80] sm:$0xff] %v483_v16  ;;  %v519_v34 = vld [vmem:[%s4984_s25 + $0x220] sm:$0xff]  ;;  %v521_v35 = vld [vmem:[%s4984_s25 + $0x230] sm:$0xff] }
  0x2e   : > { %486 = vst [vmem:[%s4989_s23 + $0x88] sm:$0xff] %v485_v17  ;;  %v523_v36 = vld [vmem:[%s4984_s25 + $0x240] sm:$0xff]  ;;  %v525_v37 = vld [vmem:[%s4984_s25 + $0x250] sm:$0xff] }
  0x2f   : > { %488 = vst [vmem:[%s4989_s23 + $0x90] sm:$0xff] %v487_v18  ;;  %v527_v38 = vld [vmem:[%s4984_s25 + $0x260] sm:$0xff]  ;;  %v529_v39 = vld [vmem:[%s4984_s25 + $0x270] sm:$0xff] }
  0x30   : > { %490 = vst [vmem:[%s4989_s23 + $0x98] sm:$0xff] %v489_v19  ;;  %v531_v40 = vld [vmem:[%s4984_s25 + $0x280] sm:$0xff]  ;;  %v533_v41 = vld [vmem:[%s4984_s25 + $0x290] sm:$0xff] }
  0x31   : > { %492 = vst [vmem:[%s4989_s23 + $0xa0] sm:$0xff] %v491_v20  ;;  %v535_v42 = vld [vmem:[%s4984_s25 + $0x2a0] sm:$0xff]  ;;  %v537_v43 = vld [vmem:[%s4984_s25 + $0x2b0] sm:$0xff] }
  0x32   : > { %494 = vst [vmem:[%s4989_s23 + $0xa8] sm:$0xff] %v493_v21  ;;  %v539_v44 = vld [vmem:[%s4984_s25 + $0x2c0] sm:$0xff]  ;;  %v541_v45 = vld [vmem:[%s4984_s25 + $0x2d0] sm:$0xff] }
  0x33   : > { %496 = vst [vmem:[%s4989_s23 + $0xb0] sm:$0xff] %v495_v22  ;;  %v543_v46 = vld [vmem:[%s4984_s25 + $0x2e0] sm:$0xff]  ;;  %v545_v47 = vld [vmem:[%s4984_s25 + $0x2f0] sm:$0xff] }
  0x34   : > { %498 = vst [vmem:[%s4989_s23 + $0xb8] sm:$0xff] %v497_v23  ;;  %v547_v48 = vld [vmem:[%s4984_s25 + $0x300] sm:$0xff]  ;;  %v549_v49 = vld [vmem:[%s4984_s25 + $0x310] sm:$0xff] }
  0x35   : > { %500 = vst [vmem:[%s4989_s23 + $0xc0] sm:$0xff] %v499_v24  ;;  %v551_v50 = vld [vmem:[%s4984_s25 + $0x320] sm:$0xff]  ;;  %v553_v51 = vld [vmem:[%s4984_s25 + $0x330] sm:$0xff] }
  0x36   : > { %502 = vst [vmem:[%s4989_s23 + $0xc8] sm:$0xff] %v501_v25  ;;  %v555_v52 = vld [vmem:[%s4984_s25 + $0x340] sm:$0xff]  ;;  %v557_v53 = vld [vmem:[%s4984_s25 + $0x350] sm:$0xff] }
  0x37   : > { %504 = vst [vmem:[%s4989_s23 + $0xd0] sm:$0xff] %v503_v26  ;;  %v559_v54 = vld [vmem:[%s4984_s25 + $0x360] sm:$0xff]  ;;  %v561_v55 = vld [vmem:[%s4984_s25 + $0x370] sm:$0xff] }
  0x38   : > { %506 = vst [vmem:[%s4989_s23 + $0xd8] sm:$0xff] %v505_v27  ;;  %v563_v56 = vld [vmem:[%s4984_s25 + $0x380] sm:$0xff]  ;;  %v565_v57 = vld [vmem:[%s4984_s25 + $0x390] sm:$0xff] }
  0x39   : > { %508 = vst [vmem:[%s4989_s23 + $0xe0] sm:$0xff] %v507_v28  ;;  %v567_v58 = vld [vmem:[%s4984_s25 + $0x3a0] sm:$0xff]  ;;  %v569_v59 = vld [vmem:[%s4984_s25 + $0x3b0] sm:$0xff] }
  0x3a   : > { %510 = vst [vmem:[%s4989_s23 + $0xe8] sm:$0xff] %v509_v29  ;;  %v571_v60 = vld [vmem:[%s4984_s25 + $0x3c0] sm:$0xff]  ;;  %v573_v61 = vld [vmem:[%s4984_s25 + $0x3d0] sm:$0xff] }
  0x3b   : > { %512 = vst [vmem:[%s4989_s23 + $0xf0] sm:$0xff] %v511_v30  ;;  %v575_v62 = vld [vmem:[%s4984_s25 + $0x3e0] sm:$0xff]  ;;  %v577_v63 = vld [vmem:[%s4984_s25 + $0x3f0] sm:$0xff] }
  0x3c   : > { %514 = vst [vmem:[%s4989_s23 + $0xf8] sm:$0xff] %v513_v31  ;;  %v579_v0 = vld [vmem:[%s4984_s25 + $0x400] sm:$0xff]  ;;  %v581_v1 = vld [vmem:[%s4984_s25 + $0x410] sm:$0xff] }
  0x3d   : > { %516 = vst [vmem:[%s4989_s23 + $0x100] sm:$0xff] %v515_v32  ;;  %v583_v2 = vld [vmem:[%s4984_s25 + $0x420] sm:$0xff]  ;;  %v585_v3 = vld [vmem:[%s4984_s25 + $0x430] sm:$0xff] }
  0x3e   : > { %518 = vst [vmem:[%s4989_s23 + $0x108] sm:$0xff] %v517_v33  ;;  %v587_v4 = vld [vmem:[%s4984_s25 + $0x440] sm:$0xff]  ;;  %v589_v5 = vld [vmem:[%s4984_s25 + $0x450] sm:$0xff] }
  0x3f   : > { %520 = vst [vmem:[%s4989_s23 + $0x110] sm:$0xff] %v519_v34  ;;  %v591_v6 = vld [vmem:[%s4984_s25 + $0x460] sm:$0xff]  ;;  %v593_v7 = vld [vmem:[%s4984_s25 + $0x470] sm:$0xff] }
  0x40   : > { %522 = vst [vmem:[%s4989_s23 + $0x118] sm:$0xff] %v521_v35  ;;  %v595_v8 = vld [vmem:[%s4984_s25 + $0x480] sm:$0xff]  ;;  %v597_v9 = vld [vmem:[%s4984_s25 + $0x490] sm:$0xff] }
  0x41   : > { %524 = vst [vmem:[%s4989_s23 + $0x120] sm:$0xff] %v523_v36  ;;  %v599_v10 = vld [vmem:[%s4984_s25 + $0x4a0] sm:$0xff]  ;;  %v601_v11 = vld [vmem:[%s4984_s25 + $0x4b0] sm:$0xff] }
  0x42   : > { %526 = vst [vmem:[%s4989_s23 + $0x128] sm:$0xff] %v525_v37  ;;  %v603_v12 = vld [vmem:[%s4984_s25 + $0x4c0] sm:$0xff]  ;;  %v605_v13 = vld [vmem:[%s4984_s25 + $0x4d0] sm:$0xff] }
  0x43   : > { %528 = vst [vmem:[%s4989_s23 + $0x130] sm:$0xff] %v527_v38  ;;  %v607_v14 = vld [vmem:[%s4984_s25 + $0x4e0] sm:$0xff]  ;;  %v609_v15 = vld [vmem:[%s4984_s25 + $0x4f0] sm:$0xff] }
  0x44   : > { %530 = vst [vmem:[%s4989_s23 + $0x138] sm:$0xff] %v529_v39  ;;  %v611_v16 = vld [vmem:[%s4984_s25 + $0x500] sm:$0xff]  ;;  %v613_v17 = vld [vmem:[%s4984_s25 + $0x510] sm:$0xff] }
  0x45   : > { %532 = vst [vmem:[%s4989_s23 + $0x140] sm:$0xff] %v531_v40  ;;  %v615_v18 = vld [vmem:[%s4984_s25 + $0x520] sm:$0xff]  ;;  %v617_v19 = vld [vmem:[%s4984_s25 + $0x530] sm:$0xff] }
  0x46   : > { %534 = vst [vmem:[%s4989_s23 + $0x148] sm:$0xff] %v533_v41  ;;  %v619_v20 = vld [vmem:[%s4984_s25 + $0x540] sm:$0xff]  ;;  %v621_v21 = vld [vmem:[%s4984_s25 + $0x550] sm:$0xff] }
  0x47   : > { %536 = vst [vmem:[%s4989_s23 + $0x150] sm:$0xff] %v535_v42  ;;  %v623_v22 = vld [vmem:[%s4984_s25 + $0x560] sm:$0xff]  ;;  %v625_v23 = vld [vmem:[%s4984_s25 + $0x570] sm:$0xff] }
  0x48   : > { %538 = vst [vmem:[%s4989_s23 + $0x158] sm:$0xff] %v537_v43  ;;  %v627_v24 = vld [vmem:[%s4984_s25 + $0x580] sm:$0xff]  ;;  %v629_v25 = vld [vmem:[%s4984_s25 + $0x590] sm:$0xff] }
  0x49   : > { %540 = vst [vmem:[%s4989_s23 + $0x160] sm:$0xff] %v539_v44  ;;  %v631_v26 = vld [vmem:[%s4984_s25 + $0x5a0] sm:$0xff]  ;;  %v633_v27 = vld [vmem:[%s4984_s25 + $0x5b0] sm:$0xff] }
  0x4a   : > { %542 = vst [vmem:[%s4989_s23 + $0x168] sm:$0xff] %v541_v45  ;;  %v635_v28 = vld [vmem:[%s4984_s25 + $0x5c0] sm:$0xff]  ;;  %v637_v29 = vld [vmem:[%s4984_s25 + $0x5d0] sm:$0xff] }
  0x4b   : > { %544 = vst [vmem:[%s4989_s23 + $0x170] sm:$0xff] %v543_v46  ;;  %v639_v30 = vld [vmem:[%s4984_s25 + $0x5e0] sm:$0xff]  ;;  %v641_v31 = vld [vmem:[%s4984_s25 + $0x5f0] sm:$0xff] }
  0x4c   : > { %546 = vst [vmem:[%s4989_s23 + $0x178] sm:$0xff] %v545_v47  ;;  %v643_v32 = vld [vmem:[%s4984_s25 + $0x600] sm:$0xff]  ;;  %v645_v33 = vld [vmem:[%s4984_s25 + $0x610] sm:$0xff] }
  0x4d   : > { %548 = vst [vmem:[%s4989_s23 + $0x180] sm:$0xff] %v547_v48  ;;  %v647_v34 = vld [vmem:[%s4984_s25 + $0x620] sm:$0xff]  ;;  %v649_v35 = vld [vmem:[%s4984_s25 + $0x630] sm:$0xff] }
  0x4e   : > { %550 = vst [vmem:[%s4989_s23 + $0x188] sm:$0xff] %v549_v49  ;;  %v651_v36 = vld [vmem:[%s4984_s25 + $0x640] sm:$0xff]  ;;  %v653_v37 = vld [vmem:[%s4984_s25 + $0x650] sm:$0xff] }
  0x4f   : > { %552 = vst [vmem:[%s4989_s23 + $0x190] sm:$0xff] %v551_v50  ;;  %v655_v38 = vld [vmem:[%s4984_s25 + $0x660] sm:$0xff]  ;;  %v657_v39 = vld [vmem:[%s4984_s25 + $0x670] sm:$0xff] }
  0x50   : > { %554 = vst [vmem:[%s4989_s23 + $0x198] sm:$0xff] %v553_v51  ;;  %v659_v40 = vld [vmem:[%s4984_s25 + $0x680] sm:$0xff]  ;;  %v661_v41 = vld [vmem:[%s4984_s25 + $0x690] sm:$0xff] }
  0x51   : > { %556 = vst [vmem:[%s4989_s23 + $0x1a0] sm:$0xff] %v555_v52  ;;  %v663_v42 = vld [vmem:[%s4984_s25 + $0x6a0] sm:$0xff]  ;;  %v665_v43 = vld [vmem:[%s4984_s25 + $0x6b0] sm:$0xff] }
  0x52   : > { %558 = vst [vmem:[%s4989_s23 + $0x1a8] sm:$0xff] %v557_v53  ;;  %v667_v44 = vld [vmem:[%s4984_s25 + $0x6c0] sm:$0xff]  ;;  %v669_v45 = vld [vmem:[%s4984_s25 + $0x6d0] sm:$0xff] }
  0x53   : > { %560 = vst [vmem:[%s4989_s23 + $0x1b0] sm:$0xff] %v559_v54  ;;  %v671_v46 = vld [vmem:[%s4984_s25 + $0x6e0] sm:$0xff]  ;;  %v673_v47 = vld [vmem:[%s4984_s25 + $0x6f0] sm:$0xff] }
  0x54   : > { %562 = vst [vmem:[%s4989_s23 + $0x1b8] sm:$0xff] %v561_v55  ;;  %v675_v48 = vld [vmem:[%s4984_s25 + $0x700] sm:$0xff]  ;;  %v677_v49 = vld [vmem:[%s4984_s25 + $0x710] sm:$0xff] }
  0x55   : > { %564 = vst [vmem:[%s4989_s23 + $0x1c0] sm:$0xff] %v563_v56  ;;  %v679_v50 = vld [vmem:[%s4984_s25 + $0x720] sm:$0xff]  ;;  %v681_v51 = vld [vmem:[%s4984_s25 + $0x730] sm:$0xff] }
  0x56   : > { %566 = vst [vmem:[%s4989_s23 + $0x1c8] sm:$0xff] %v565_v57  ;;  %v683_v52 = vld [vmem:[%s4984_s25 + $0x740] sm:$0xff]  ;;  %v685_v53 = vld [vmem:[%s4984_s25 + $0x750] sm:$0xff] }
  0x57   : > { %568 = vst [vmem:[%s4989_s23 + $0x1d0] sm:$0xff] %v567_v58  ;;  %v687_v54 = vld [vmem:[%s4984_s25 + $0x760] sm:$0xff]  ;;  %v689_v55 = vld [vmem:[%s4984_s25 + $0x770] sm:$0xff] }
  0x58   : > { %570 = vst [vmem:[%s4989_s23 + $0x1d8] sm:$0xff] %v569_v59  ;;  %v691_v56 = vld [vmem:[%s4984_s25 + $0x780] sm:$0xff]  ;;  %v693_v57 = vld [vmem:[%s4984_s25 + $0x790] sm:$0xff] }
  0x59   : > { %572 = vst [vmem:[%s4989_s23 + $0x1e0] sm:$0xff] %v571_v60  ;;  %v695_v58 = vld [vmem:[%s4984_s25 + $0x7a0] sm:$0xff]  ;;  %v697_v59 = vld [vmem:[%s4984_s25 + $0x7b0] sm:$0xff] }
  0x5a   : > { %574 = vst [vmem:[%s4989_s23 + $0x1e8] sm:$0xff] %v573_v61  ;;  %v699_v60 = vld [vmem:[%s4984_s25 + $0x7c0] sm:$0xff]  ;;  %v701_v61 = vld [vmem:[%s4984_s25 + $0x7d0] sm:$0xff] }
  0x5b   : > { %576 = vst [vmem:[%s4989_s23 + $0x1f0] sm:$0xff] %v575_v62  ;;  %v703_v62 = vld [vmem:[%s4984_s25 + $0x7e0] sm:$0xff] }
  0x5c   : > { %578 = vst [vmem:[%s4989_s23 + $0x1f8] sm:$0xff] %v577_v63  ;;  %v705_v63 = vld [vmem:[%s4984_s25 + $0x7f0] sm:$0xff] }
  0x5d   : > { %580 = vst [vmem:[%s4989_s23 + $0x200] sm:$0xff] %v579_v0 }
  0x5e   : > { %582 = vst [vmem:[%s4989_s23 + $0x208] sm:$0xff] %v581_v1 }
  0x5f   : > { %584 = vst [vmem:[%s4989_s23 + $0x210] sm:$0xff] %v583_v2 }
  0x60   : > { %586 = vst [vmem:[%s4989_s23 + $0x218] sm:$0xff] %v585_v3 }
  0x61   : > { %588 = vst [vmem:[%s4989_s23 + $0x220] sm:$0xff] %v587_v4 }
  0x62   : > { %590 = vst [vmem:[%s4989_s23 + $0x228] sm:$0xff] %v589_v5 }
  0x63   : > { %592 = vst [vmem:[%s4989_s23 + $0x230] sm:$0xff] %v591_v6 }
  0x64   : > { %594 = vst [vmem:[%s4989_s23 + $0x238] sm:$0xff] %v593_v7 }
  0x65   : > { %596 = vst [vmem:[%s4989_s23 + $0x240] sm:$0xff] %v595_v8 }
  0x66   : > { %598 = vst [vmem:[%s4989_s23 + $0x248] sm:$0xff] %v597_v9 }
  0x67   : > { %600 = vst [vmem:[%s4989_s23 + $0x250] sm:$0xff] %v599_v10 }
  0x68   : > { %602 = vst [vmem:[%s4989_s23 + $0x258] sm:$0xff] %v601_v11 }
  0x69   : > { %604 = vst [vmem:[%s4989_s23 + $0x260] sm:$0xff] %v603_v12 }
  0x6a   : > { %606 = vst [vmem:[%s4989_s23 + $0x268] sm:$0xff] %v605_v13 }
  0x6b   : > { %608 = vst [vmem:[%s4989_s23 + $0x270] sm:$0xff] %v607_v14 }
  0x6c   : > { %610 = vst [vmem:[%s4989_s23 + $0x278] sm:$0xff] %v609_v15 }
  0x6d   : > { %612 = vst [vmem:[%s4989_s23 + $0x280] sm:$0xff] %v611_v16 }
  0x6e   : > { %614 = vst [vmem:[%s4989_s23 + $0x288] sm:$0xff] %v613_v17 }
  0x6f   : > { %616 = vst [vmem:[%s4989_s23 + $0x290] sm:$0xff] %v615_v18 }
  0x70   : > { %618 = vst [vmem:[%s4989_s23 + $0x298] sm:$0xff] %v617_v19 }
  0x71   : > { %620 = vst [vmem:[%s4989_s23 + $0x2a0] sm:$0xff] %v619_v20 }
  0x72   : > { %622 = vst [vmem:[%s4989_s23 + $0x2a8] sm:$0xff] %v621_v21 }
  0x73   : > { %624 = vst [vmem:[%s4989_s23 + $0x2b0] sm:$0xff] %v623_v22 }
  0x74   : > { %626 = vst [vmem:[%s4989_s23 + $0x2b8] sm:$0xff] %v625_v23 }
  0x75   : > { %628 = vst [vmem:[%s4989_s23 + $0x2c0] sm:$0xff] %v627_v24 }
  0x76   : > { %630 = vst [vmem:[%s4989_s23 + $0x2c8] sm:$0xff] %v629_v25 }
  0x77   : > { %632 = vst [vmem:[%s4989_s23 + $0x2d0] sm:$0xff] %v631_v26 }
  0x78   : > { %634 = vst [vmem:[%s4989_s23 + $0x2d8] sm:$0xff] %v633_v27 }
  0x79   : > { %636 = vst [vmem:[%s4989_s23 + $0x2e0] sm:$0xff] %v635_v28 }
  0x7a   : > { %638 = vst [vmem:[%s4989_s23 + $0x2e8] sm:$0xff] %v637_v29 }
  0x7b   : > { %640 = vst [vmem:[%s4989_s23 + $0x2f0] sm:$0xff] %v639_v30 }
  0x7c   : > { %642 = vst [vmem:[%s4989_s23 + $0x2f8] sm:$0xff] %v641_v31 }
  0x7d   : > { %644 = vst [vmem:[%s4989_s23 + $0x300] sm:$0xff] %v643_v32 }
  0x7e   : > { %646 = vst [vmem:[%s4989_s23 + $0x308] sm:$0xff] %v645_v33 }
  0x7f   : > { %648 = vst [vmem:[%s4989_s23 + $0x310] sm:$0xff] %v647_v34 }
  0x80   : > { %650 = vst [vmem:[%s4989_s23 + $0x318] sm:$0xff] %v649_v35 }
  0x81   : > { %652 = vst [vmem:[%s4989_s23 + $0x320] sm:$0xff] %v651_v36 }
  0x82   : > { %654 = vst [vmem:[%s4989_s23 + $0x328] sm:$0xff] %v653_v37 }
  0x83   : > { %656 = vst [vmem:[%s4989_s23 + $0x330] sm:$0xff] %v655_v38 }
  0x84   : > { %658 = vst [vmem:[%s4989_s23 + $0x338] sm:$0xff] %v657_v39 }
  0x85   : > { %660 = vst [vmem:[%s4989_s23 + $0x340] sm:$0xff] %v659_v40 }
  0x86   : > { %662 = vst [vmem:[%s4989_s23 + $0x348] sm:$0xff] %v661_v41 }
  0x87   : > { %664 = vst [vmem:[%s4989_s23 + $0x350] sm:$0xff] %v663_v42 }
  0x88   : > { %666 = vst [vmem:[%s4989_s23 + $0x358] sm:$0xff] %v665_v43 }
  0x89   : > { %668 = vst [vmem:[%s4989_s23 + $0x360] sm:$0xff] %v667_v44 }
  0x8a   : > { %670 = vst [vmem:[%s4989_s23 + $0x368] sm:$0xff] %v669_v45 }
  0x8b   : > { %672 = vst [vmem:[%s4989_s23 + $0x370] sm:$0xff] %v671_v46 }
  0x8c   : > { %674 = vst [vmem:[%s4989_s23 + $0x378] sm:$0xff] %v673_v47 }
  0x8d   : > { %676 = vst [vmem:[%s4989_s23 + $0x380] sm:$0xff] %v675_v48 }
  0x8e   : > { %678 = vst [vmem:[%s4989_s23 + $0x388] sm:$0xff] %v677_v49 }
  0x8f   : > { %680 = vst [vmem:[%s4989_s23 + $0x390] sm:$0xff] %v679_v50 }
  0x90   : > { %682 = vst [vmem:[%s4989_s23 + $0x398] sm:$0xff] %v681_v51 }
  0x91   : > { %684 = vst [vmem:[%s4989_s23 + $0x3a0] sm:$0xff] %v683_v52 }
  0x92   : > { %686 = vst [vmem:[%s4989_s23 + $0x3a8] sm:$0xff] %v685_v53 }
  0x93   : > { %688 = vst [vmem:[%s4989_s23 + $0x3b0] sm:$0xff] %v687_v54 }
  0x94   : > { %690 = vst [vmem:[%s4989_s23 + $0x3b8] sm:$0xff] %v689_v55 }
  0x95   : > { %692 = vst [vmem:[%s4989_s23 + $0x3c0] sm:$0xff] %v691_v56 }
  0x96   : > { %694 = vst [vmem:[%s4989_s23 + $0x3c8] sm:$0xff] %v693_v57 }
  0x97   : > { %696 = vst [vmem:[%s4989_s23 + $0x3d0] sm:$0xff] %v695_v58 }
  0x98   : > { %698 = vst [vmem:[%s4989_s23 + $0x3d8] sm:$0xff] %v697_v59 }
  0x99   : > { %700 = vst [vmem:[%s4989_s23 + $0x3e0] sm:$0xff] %v699_v60 }
  0x9a   : > { %702 = vst [vmem:[%s4989_s23 + $0x3e8] sm:$0xff] %v701_v61 }
  0x9b   : > { %704 = vst [vmem:[%s4989_s23 + $0x3f0] sm:$0xff] %v703_v62 }
  0x9c   : > { %706 = vst [vmem:[%s4989_s23 + $0x3f8] sm:$0xff] %v705_v63 }
  0x9d PF: > { %712 = sbr.rel (!%p4962_p6) target bundleno = 169 (0xa9), region = 62  ;;  %s714_s27 = sand.u32 (%p4962_p6), 1, %s4848_s13  }
  0x9e   : > { %s4536_s28 = sshll.u32 (%p4962_p6), %s4872_s19, 3  ;;  %s3609_s29 = sshll.u32 (%p4962_p6), %s714_s27, 6 }
  0x9f   : > { %s719_s7 = scalar_lea.vmem (%p4962_p6), %s6554_s2, %s4536_s28  ;;  %s716_s8 = scalar_lea.vmem (%p4962_p6), [#allocation4], %s3609_s29 }
  0xa0   : > { %v762_v0 = vld [vmem:[%s719_s7] sm:$0xff] (%p4962_p6)  ;;  %v764_v1 = vld [vmem:[%s719_s7 + $0x10] sm:$0xff] (%p4962_p6) }
  0xa1   : > { %v766_v2 = vld [vmem:[%s719_s7 + $0x20] sm:$0xff] (%p4962_p6)  ;;  %763 = vst [vmem:[%s716_s8] sm:$0xff] (%p4962_p6), %v762_v0  ;;  %v768_v3 = vld [vmem:[%s719_s7 + $0x30] sm:$0xff] (%p4962_p6) }
  0xa2   : > { %765 = vst [vmem:[%s716_s8 + $0x8] sm:$0xff] %v764_v1  ;;  %v770_v4 = vld [vmem:[%s719_s7 + $0x40] sm:$0xff]  ;;  %v772_v5 = vld [vmem:[%s719_s7 + $0x50] sm:$0xff] }
  0xa3   : > { %767 = vst [vmem:[%s716_s8 + $0x10] sm:$0xff] %v766_v2  ;;  %v774_v6 = vld [vmem:[%s719_s7 + $0x60] sm:$0xff]  ;;  %v776_v7 = vld [vmem:[%s719_s7 + $0x70] sm:$0xff] }
  0xa4   : > { %769 = vst [vmem:[%s716_s8 + $0x18] sm:$0xff] %v768_v3 }
  0xa5   : > { %771 = vst [vmem:[%s716_s8 + $0x20] sm:$0xff] %v770_v4 }
  0xa6   : > { %773 = vst [vmem:[%s716_s8 + $0x28] sm:$0xff] %v772_v5 }
  0xa7   : > { %775 = vst [vmem:[%s716_s8 + $0x30] sm:$0xff] %v774_v6 }
  0xa8   : > { %777 = vst [vmem:[%s716_s8 + $0x38] sm:$0xff] %v776_v7 }
  0xa9 PF: > { %p3612_p10 = scmp.ge.s32.totalorder %s4876_s20, 1  ;;  %p782_p11 = scmp.lt.s32.totalorder %s4876_s20, 9 }
  0xab   : > { %p783_p12 = pnand %p3612_p10, %p782_p11 }
  0xac   : > { %s789_s26 = sand.u32 (!%p783_p12), 1, %s4852_s14   ;;  %s796_s9 = sand.u32 (!%p783_p12), 1, %s4844_s12  }
  0xad   : > { %786 = sbr.rel (%p783_p12) target bundleno = 1213 (0x4bd), region = 100  ;;  %s3613_s10 = sshll.u32 (!%p783_p12), %s789_s26, 10 }
  0xae   : > { %s5255_s11 = sshll.u32 (!%p783_p12), %s796_s9, 6  ;;  %p838_p13 = scmp.lt.s32.totalorder (!%p783_p12), %s4864_s17, 1 }
  0xaf   : > { %s5258_s24 = scalar_lea.vmem (!%p783_p12), [#allocation3], %s3613_s10  ;;  %s6019_s7 = scalar_lea.vmem (!%p783_p12), [#allocation4], %s5255_s11 }
  0xb0   : > { %p4531_p1 = scmp.ne.s32.totalorder (!%p783_p12), %s4860_s16, 0 }
  0xb2   : > { %v3789_v8 = vld [vmem:[%s5258_s24 + $0x170] sm:$0xf]  ;;  %v4617_v9 = vld [vmem:[%s5258_s24 + $0x174] sm:$0xf0]  ;;  %v4616_v13 = vld [vmem:[%s5258_s24 + $0x174] sm:$0xf] }
  0xb3   : > { %v3790_v10 = vor.u32 %v4617_v9, %v3789_v8  ;;  %v3853_v11 = vld [vmem:[%s5258_s24 + $0x1f0] sm:$0xf]  ;;  %v4633_v12 = vld [vmem:[%s5258_s24 + $0x1f4] sm:$0xf0]  ;;  %s6602_s17 = smov (!%p838_p13, %s4864_s17), 1 }
  0xb4   : > { %v3854_v14 = vor.u32 %v4633_v12, %v3853_v11  ;;  %v3791_v15 = vld [vmem:[%s5258_s24 + $0x178] sm:$0xf0]  ;;  %v4632_v16 = vld [vmem:[%s5258_s24 + $0x1f4] sm:$0xf]  ;;  %v3781_v19 = vld [vmem:[%s5258_s24 + $0x160] sm:$0xf] }
  0xb5   : > { %1180 = vmatpush.bf16.msra.mxu0 %v3790_v10  ;;  %v3794_v17 = vor.u32 %v4616_v13, %v3791_v15  ;;  %v3855_v18 = vld [vmem:[%s5258_s24 + $0x1f8] sm:$0xf0]  ;;  %v4615_v20 = vld [vmem:[%s5258_s24 + $0x164] sm:$0xf0]  ;;  %s3618_s12 = sshll.u32 %s6602_s17, 1  ;;  %s3615_s17 = sshll.u32 %s4860_s16, 2 }
  0xb6   : > { %1229 = vmatpush.bf16.msra.mxu1 %v3854_v14  ;;  %v3858_v21 = vor.u32 %v4632_v16, %v3855_v18  ;;  %v3782_v22 = vor.u32 %v4615_v20, %v3781_v19  ;;  %v3845_v23 = vld [vmem:[%s5258_s24 + $0x1e0] sm:$0xf]  ;;  %v4631_v24 = vld [vmem:[%s5258_s24 + $0x1e4] sm:$0xf0]  ;;  %s5276_s23 = scalar_lea.vmem %s6555_s3, %s3618_s12  ;;  %v4614_v26 = vld [vmem:[%s5258_s24 + $0x164] sm:$0xf] }
  0xb7   : > { %1278 = vmatpush.bf16.msra.mxu2 %v3794_v17  ;;  %v3846_v25 = vor.u32 %v4631_v24, %v3845_v23  ;;  %v3783_v27 = vld [vmem:[%s5258_s24 + $0x168] sm:$0xf0]  ;;  %v4630_v28 = vld [vmem:[%s5258_s24 + $0x1e4] sm:$0xf]  ;;  %v3773_v31 = vld [vmem:[%s5258_s24 + $0x150] sm:$0xf] }
  0xb8   : > { %1327 = vmatpush.bf16.msra.mxu3 %v3858_v21  ;;  %v3786_v29 = vor.u32 %v4614_v26, %v3783_v27  ;;  %v3847_v30 = vld [vmem:[%s5258_s24 + $0x1e8] sm:$0xf0]  ;;  %v4613_v32 = vld [vmem:[%s5258_s24 + $0x154] sm:$0xf0]  ;;  %v3837_v35 = vld [vmem:[%s5258_s24 + $0x1d0] sm:$0xf] }
  0xb9   : > { %1181 = vmatpush.bf16.msra.mxu0 %v3782_v22  ;;  %v3850_v33 = vor.u32 %v4630_v28, %v3847_v30  ;;  %v3774_v34 = vor.u32 %v4613_v32, %v3773_v31  ;;  %v4629_v36 = vld [vmem:[%s5258_s24 + $0x1d4] sm:$0xf0]  ;;  %v4612_v37 = vld [vmem:[%s5258_s24 + $0x154] sm:$0xf]  ;;  %v3775_v39 = vld [vmem:[%s5258_s24 + $0x158] sm:$0xf0] }
  0xba   : > { %1230 = vmatpush.bf16.msra.mxu1 %v3846_v25  ;;  %v3838_v38 = vor.u32 %v4629_v36, %v3837_v35  ;;  %v4628_v40 = vld [vmem:[%s5258_s24 + $0x1d4] sm:$0xf]  ;;  %v3839_v41 = vld [vmem:[%s5258_s24 + $0x1d8] sm:$0xf0]  ;;  %v3778_v42 = vor.u32 %v4612_v37, %v3775_v39  ;;  %v3765_v43 = vld [vmem:[%s5258_s24 + $0x140] sm:$0xf] }
  0xbb   : > { %1279 = vmatpush.bf16.msra.mxu2 %v3786_v29  ;;  %v4611_v44 = vld [vmem:[%s5258_s24 + $0x144] sm:$0xf0]  ;;  %v3829_v45 = vld [vmem:[%s5258_s24 + $0x1c0] sm:$0xf]  ;;  %v3842_v46 = vor.u32 %v4628_v40, %v3839_v41  ;;  %v4610_v48 = vld [vmem:[%s5258_s24 + $0x144] sm:$0xf] }
  0xbc   : > { %1328 = vmatpush.bf16.msra.mxu3 %v3850_v33  ;;  %v4627_v47 = vld [vmem:[%s5258_s24 + $0x1c4] sm:$0xf0]  ;;  %v3767_v49 = vld [vmem:[%s5258_s24 + $0x148] sm:$0xf0]  ;;  %v3766_v50 = vor.u32 %v4611_v44, %v3765_v43  ;;  %v4626_v51 = vld [vmem:[%s5258_s24 + $0x1c4] sm:$0xf] }
  0xbd   : > { %1182 = vmatpush.bf16.msra.mxu0 %v3774_v34  ;;  %v3831_v52 = vld [vmem:[%s5258_s24 + $0x1c8] sm:$0xf0]  ;;  %v3830_v53 = vor.u32 %v4627_v47, %v3829_v45  ;;  %v3757_v54 = vld [vmem:[%s5258_s24 + $0x130] sm:$0xf]  ;;  %v4609_v55 = vld [vmem:[%s5258_s24 + $0x134] sm:$0xf0]  ;;  %v3770_v56 = vor.u32 %v4610_v48, %v3767_v49 }
  0xbe   : > { %1231 = vmatpush.bf16.msra.mxu1 %v3838_v38  ;;  %v3821_v57 = vld [vmem:[%s5258_s24 + $0x1b0] sm:$0xf]  ;;  %v4625_v58 = vld [vmem:[%s5258_s24 + $0x1b4] sm:$0xf0]  ;;  %v3834_v59 = vor.u32 %v4626_v51, %v3831_v52  ;;  %v4608_v60 = vld [vmem:[%s5258_s24 + $0x134] sm:$0xf]  ;;  %v3758_v62 = vor.u32 %v4609_v55, %v3757_v54 }
  0xbf   : > { %1280 = vmatpush.bf16.msra.mxu2 %v3778_v42  ;;  %v3759_v61 = vld [vmem:[%s5258_s24 + $0x138] sm:$0xf0]  ;;  %v4624_v63 = vld [vmem:[%s5258_s24 + $0x1b4] sm:$0xf]  ;;  %v3822_v1 = vor.u32 %v4625_v58, %v3821_v57  ;;  %v3749_v2 = vld [vmem:[%s5258_s24 + $0x120] sm:$0xf] }
  0xc0   : > { %1329 = vmatpush.bf16.msra.mxu3 %v3842_v46  ;;  %v3823_v0 = vld [vmem:[%s5258_s24 + $0x1b8] sm:$0xf0]  ;;  %v4607_v3 = vld [vmem:[%s5258_s24 + $0x124] sm:$0xf0]  ;;  %v3762_v4 = vor.u32 %v4608_v60, %v3759_v61  ;;  %v3813_v5 = vld [vmem:[%s5258_s24 + $0x1a0] sm:$0xf] }
  0xc1   : > { %1183 = vmatpush.bf16.msra.mxu0 %v3766_v50  ;;  %v4623_v6 = vld [vmem:[%s5258_s24 + $0x1a4] sm:$0xf0]  ;;  %v3826_v7 = vor.u32 %v4624_v63, %v3823_v0  ;;  %v4606_v8 = vld [vmem:[%s5258_s24 + $0x124] sm:$0xf]  ;;  %v3751_v9 = vld [vmem:[%s5258_s24 + $0x128] sm:$0xf0]  ;;  %v3750_v10 = vor.u32 %v4607_v3, %v3749_v2 }
  0xc2   : > { %1232 = vmatpush.bf16.msra.mxu1 %v3830_v53  ;;  %p5315_p0 = scmp.lt.s32.totalorder %s3615_s17, 15  ;;  %v4622_v11 = vld [vmem:[%s5258_s24 + $0x1a4] sm:$0xf]  ;;  %v3815_v12 = vld [vmem:[%s5258_s24 + $0x1a8] sm:$0xf0]  ;;  %v3814_v14 = vor.u32 %v4623_v6, %v3813_v5  ;;  %v3754_v18 = vor.u32 %v4606_v8, %v3751_v9 }
  0xc3   : > { %1281 = vmatpush.bf16.msra.mxu2 %v3770_v56  ;;  %v3741_v13 = vld [vmem:[%s5258_s24 + $0x110] sm:$0xf]  ;;  %v4605_v15 = vld [vmem:[%s5258_s24 + $0x114] sm:$0xf0]  ;;  %v4604_v19 = vld [vmem:[%s5258_s24 + $0x114] sm:$0xf]  ;;  %v3818_v22 = vor.u32 %v4622_v11, %v3815_v12 }
  0xc4   : > { %1330 = vmatpush.bf16.msra.mxu3 %v3834_v59  ;;  %v3805_v16 = vld [vmem:[%s5258_s24 + $0x190] sm:$0xf]  ;;  %v4621_v17 = vld [vmem:[%s5258_s24 + $0x194] sm:$0xf0]  ;;  %v3743_v20 = vld [vmem:[%s5258_s24 + $0x118] sm:$0xf0]  ;;  %v3742_v25 = vor.u32 %v4605_v15, %v3741_v13 }
  0xc5   : > { %1184 = vmatpush.bf16.msra.mxu0 %v3758_v62  ;;  %v4620_v21 = vld [vmem:[%s5258_s24 + $0x194] sm:$0xf]  ;;  %v3807_v23 = vld [vmem:[%s5258_s24 + $0x198] sm:$0xf0]  ;;  %v3733_v24 = vld [vmem:[%s5258_s24 + $0x100] sm:$0xf]  ;;  %v3806_v29 = vor.u32 %v4621_v17, %v3805_v16  ;;  %v3746_v32 = vor.u32 %v4604_v19, %v3743_v20 }
  0xc6   : > { %1233 = vmatpush.bf16.msra.mxu1 %v3822_v1  ;;  %s6604_s17 = smov (!%p5315_p0, %s3615_s17), 15  ;;  %v4603_v26 = vld [vmem:[%s5258_s24 + $0x104] sm:$0xf0]  ;;  %v3797_v27 = vld [vmem:[%s5258_s24 + $0x180] sm:$0xf]  ;;  %v3810_v36 = vor.u32 %v4620_v21, %v3807_v23 }
  0xc7   : > { %1282 = vmatpush.bf16.msra.mxu2 %v3762_v4  ;;  %v4619_v28 = vld [vmem:[%s5258_s24 + $0x184] sm:$0xf0]  ;;  %v4602_v30 = vld [vmem:[%s5258_s24 + $0x104] sm:$0xf]  ;;  %v3735_v31 = vld [vmem:[%s5258_s24 + $0x108] sm:$0xf0]  ;;  %v3734_v40 = vor.u32 %v4603_v26, %v3733_v24 }
  0xc8   : > { %1331 = vmatpush.bf16.msra.mxu3 %v3826_v7  ;;  %s4537_s28 = sshll.u32 %s6604_s17, 7  ;;  %v4618_v33 = vld [vmem:[%s5258_s24 + $0x184] sm:$0xf]  ;;  %v3981_v34 = vld [vmem:[%s5258_s24 + $0x70] sm:$0xf]  ;;  %v3798_v44 = vor.u32 %v4619_v28, %v3797_v27  ;;  %v3738_v49 = vor.u32 %v4602_v30, %v3735_v31 }
  0xc9   : > { %1185 = vmatpush.bf16.msra.mxu0 %v3750_v10  ;;  %s5343_s6 = scalar_lea.vmem %s6552_s0, %s4537_s28  ;;  %v4569_v35 = vld [vmem:[%s5258_s24 + $0x74] sm:$0xf0]  ;;  %v3799_v37 = vld [vmem:[%s5258_s24 + $0x188] sm:$0xf0]  ;;  %v4045_v38 = vld [vmem:[%s5258_s24 + $0xf0] sm:$0xf] }
  0xca   : > { %1234 = vmatpush.bf16.msra.mxu1 %v3814_v14  ;;  %v4585_v39 = vld [vmem:[%s5258_s24 + $0xf4] sm:$0xf0]  ;;  %v3669_v41 = vld [vmem:[%s5343_s6 + $0x80] sm:$0xf]  ;;  %v4587_v42 = vld [vmem:[%s5343_s6 + $0x84] sm:$0xf0]  ;;  %v3982_v48 = vor.u32 %v4569_v35, %v3981_v34  ;;  %v3802_v53 = vor.u32 %v4618_v33, %v3799_v37 }
  0xcb   : > { %1283 = vmatpush.bf16.msra.mxu2 %v3754_v18  ;;  %v4568_v43 = vld [vmem:[%s5258_s24 + $0x74] sm:$0xf]  ;;  %v4586_v45 = vld [vmem:[%s5343_s6 + $0x84] sm:$0xf]  ;;  %v3671_v46 = vld [vmem:[%s5343_s6 + $0x88] sm:$0xf0]  ;;  %v4046_v52 = vor.u32 %v4585_v39, %v4045_v38  ;;  %v3670_v54 = vor.u32 %v4587_v42, %v3669_v41 }
  0xcc   : > { %1332 = vmatpush.bf16.msra.mxu3 %v3818_v22  ;;  %v3983_v47 = vld [vmem:[%s5258_s24 + $0x78] sm:$0xf0]  ;;  %v4584_v50 = vld [vmem:[%s5258_s24 + $0xf4] sm:$0xf]  ;;  %v3973_v55 = vld [vmem:[%s5258_s24 + $0x60] sm:$0xf]  ;;  %v3674_v57 = vor.u32 %v4586_v45, %v3671_v46 }
  0xcd   : > { %1186 = vmatpush.bf16.msra.mxu0 %v3742_v25  ;;  %v4047_v51 = vld [vmem:[%s5258_s24 + $0xf8] sm:$0xf0]  ;;  %v4567_v56 = vld [vmem:[%s5258_s24 + $0x64] sm:$0xf0]  ;;  %v3986_v58 = vor.u32 %v4568_v43, %v3983_v47  ;;  %v4037_v59 = vld [vmem:[%s5258_s24 + $0xe0] sm:$0xf] }
  0xce   : > { %1235 = vmatpush.bf16.msra.mxu1 %v3806_v29  ;;  %v4583_v60 = vld [vmem:[%s5258_s24 + $0xe4] sm:$0xf0]  ;;  %v4050_v61 = vor.u32 %v4584_v50, %v4047_v51  ;;  %v4566_v62 = vld [vmem:[%s5258_s24 + $0x64] sm:$0xf]  ;;  %v3975_v63 = vld [vmem:[%s5258_s24 + $0x68] sm:$0xf0]  ;;  %v3974_v2 = vor.u32 %v4567_v56, %v3973_v55 }
  0xcf   : > { %1284 = vmatpush.bf16.msra.mxu2 %v3746_v32  ;;  %v4582_v0 = vld [vmem:[%s5258_s24 + $0xe4] sm:$0xf]  ;;  %v4039_v1 = vld [vmem:[%s5258_s24 + $0xe8] sm:$0xf0]  ;;  %v4038_v3 = vor.u32 %v4583_v60, %v4037_v59  ;;  %v3978_v4 = vor.u32 %v4566_v62, %v3975_v63  ;;  %v4564_v6 = vld [vmem:[%s5258_s24 + $0x54] sm:$0xf] }
  0xd0   : > { %1333 = vmatpush.bf16.msra.mxu3 %v3810_v36  ;;  %v4042_v5 = vor.u32 %v4582_v0, %v4039_v1  ;;  %v3967_v7 = vld [vmem:[%s5258_s24 + $0x58] sm:$0xf0]  ;;  %v4580_v8 = vld [vmem:[%s5258_s24 + $0xd4] sm:$0xf]  ;;  %v3965_v10 = vld [vmem:[%s5258_s24 + $0x50] sm:$0xf] }
  0xd1   : > { %1187 = vmatpush.bf16.msra.mxu0 %v3734_v40  ;;  %v4031_v9 = vld [vmem:[%s5258_s24 + $0xd8] sm:$0xf0]  ;;  %v4565_v11 = vld [vmem:[%s5258_s24 + $0x54] sm:$0xf0]  ;;  %v3970_v12 = vor.u32 %v4564_v6, %v3967_v7  ;;  %v4029_v14 = vld [vmem:[%s5258_s24 + $0xd0] sm:$0xf] }
  0xd2   : > { %1236 = vmatpush.bf16.msra.mxu1 %v3798_v44  ;;  %v3966_v13 = vor.u32 %v4565_v11, %v3965_v10  ;;  %v4581_v15 = vld [vmem:[%s5258_s24 + $0xd4] sm:$0xf0]  ;;  %v4034_v16 = vor.u32 %v4580_v8, %v4031_v9  ;;  %v3677_v18 = vld [vmem:[%s5343_s6 + $0x90] sm:$0xf]  ;;  %v4588_v20 = vld [vmem:[%s5343_s6 + $0x94] sm:$0xf] }
  0xd3   : > { %1285 = vmatpush.bf16.msra.mxu2 %v3738_v49  ;;  %v4030_v17 = vor.u32 %v4581_v15, %v4029_v14  ;;  %v4589_v19 = vld [vmem:[%s5343_s6 + $0x94] sm:$0xf0]  ;;  %v3679_v21 = vld [vmem:[%s5343_s6 + $0x98] sm:$0xf0]  ;;  %v4562_v24 = vld [vmem:[%s5258_s24 + $0x44] sm:$0xf] }
  0xd4   : > { %1334 = vmatpush.bf16.msra.mxu3 %v3802_v53  ;;  %1188 = vmatmul.bf16.vlgmr.msra.gmra.mxu0 %v3670_v54  ;;  %v3678_v22 = vor.u32 %v4589_v19, %v3677_v18  ;;  %v3682_v23 = vor.u32 %v4588_v20, %v3679_v21  ;;  %v3959_v25 = vld [vmem:[%s5258_s24 + $0x48] sm:$0xf0]  ;;  %v4578_v26 = vld [vmem:[%s5258_s24 + $0xc4] sm:$0xf]  ;;  %v3957_v29 = vld [vmem:[%s5258_s24 + $0x40] sm:$0xf] }
  0xd5   : > { %1616 = vmatpush.bf16.msrb.mxu0 %v3982_v48  ;;  %1237 = vmatmul.bf16.vlgmr.msra.gmra.mxu1 %v3674_v57  ;;  %v3962_v27 = vor.u32 %v4562_v24, %v3959_v25  ;;  %v4023_v28 = vld [vmem:[%s5258_s24 + $0xc8] sm:$0xf0]  ;;  %v4563_v30 = vld [vmem:[%s5258_s24 + $0x44] sm:$0xf0]  ;;  %v4021_v33 = vld [vmem:[%s5258_s24 + $0xc0] sm:$0xf] }
  0xd6   : > { %1665 = vmatpush.bf16.msrb.mxu1 %v4046_v52  ;;  %1286 = vmatmul.bf16.vlgmr.msra.gmra.mxu2 %v3670_v54  ;;  %v4026_v31 = vor.u32 %v4578_v26, %v4023_v28  ;;  %v3958_v32 = vor.u32 %v4563_v30, %v3957_v29  ;;  %v4579_v34 = vld [vmem:[%s5258_s24 + $0xc4] sm:$0xf0]  ;;  %v3685_v36 = vld [vmem:[%s5343_s6 + $0xa0] sm:$0xf]  ;;  %v4590_v38 = vld [vmem:[%s5343_s6 + $0xa4] sm:$0xf] }
  0xd7   : > { %1714 = vmatpush.bf16.msrb.mxu2 %v3986_v58  ;;  %1335 = vmatmul.bf16.vlgmr.msra.gmra.mxu3 %v3674_v57  ;;  %v4022_v35 = vor.u32 %v4579_v34, %v4021_v33  ;;  %v4591_v37 = vld [vmem:[%s5343_s6 + $0xa4] sm:$0xf0]  ;;  %v3687_v39 = vld [vmem:[%s5343_s6 + $0xa8] sm:$0xf0]  ;;  %v4560_v42 = vld [vmem:[%s5258_s24 + $0x34] sm:$0xf] }
  0xd8   : > { %1763 = vmatpush.bf16.msrb.mxu3 %v4050_v61  ;;  %v3686_v40 = vor.u32 %v4591_v37, %v3685_v36  ;;  %v3690_v41 = vor.u32 %v4590_v38, %v3687_v39  ;;  %v3951_v43 = vld [vmem:[%s5258_s24 + $0x38] sm:$0xf0]  ;;  %v4576_v44 = vld [vmem:[%s5258_s24 + $0xb4] sm:$0xf]  ;;  %v3949_v47 = vld [vmem:[%s5258_s24 + $0x30] sm:$0xf] }
  0xd9   : > { %1617 = vmatpush.bf16.msrb.mxu0 %v3974_v2  ;;  %v3954_v45 = vor.u32 %v4560_v42, %v3951_v43  ;;  %v4015_v46 = vld [vmem:[%s5258_s24 + $0xb8] sm:$0xf0]  ;;  %v4561_v48 = vld [vmem:[%s5258_s24 + $0x34] sm:$0xf0]  ;;  %v4013_v51 = vld [vmem:[%s5258_s24 + $0xb0] sm:$0xf] }
  0xda   : > { %1666 = vmatpush.bf16.msrb.mxu1 %v4038_v3  ;;  %v4018_v49 = vor.u32 %v4576_v44, %v4015_v46  ;;  %v3950_v50 = vor.u32 %v4561_v48, %v3949_v47  ;;  %v4577_v52 = vld [vmem:[%s5258_s24 + $0xb4] sm:$0xf0]  ;;  %v3693_v54 = vld [vmem:[%s5343_s6 + $0xb0] sm:$0xf]  ;;  %v4592_v56 = vld [vmem:[%s5343_s6 + $0xb4] sm:$0xf] }
  0xdb   : > { %1715 = vmatpush.bf16.msrb.mxu2 %v3978_v4  ;;  %v4014_v53 = vor.u32 %v4577_v52, %v4013_v51  ;;  %v4593_v55 = vld [vmem:[%s5343_s6 + $0xb4] sm:$0xf0]  ;;  %v3695_v57 = vld [vmem:[%s5343_s6 + $0xb8] sm:$0xf0]  ;;  %v4558_v60 = vld [vmem:[%s5258_s24 + $0x24] sm:$0xf] }
  0xdc   : > { %1764 = vmatpush.bf16.msrb.mxu3 %v4042_v5  ;;  %v3694_v58 = vor.u32 %v4593_v55, %v3693_v54  ;;  %v3698_v59 = vor.u32 %v4592_v56, %v3695_v57  ;;  %v3943_v61 = vld [vmem:[%s5258_s24 + $0x28] sm:$0xf0]  ;;  %v4574_v62 = vld [vmem:[%s5258_s24 + $0xa4] sm:$0xf]  ;;  %v3941_v1 = vld [vmem:[%s5258_s24 + $0x20] sm:$0xf] }
  0xdd   : > { %1618 = vmatpush.bf16.msrb.mxu0 %v3966_v13  ;;  %v3946_v63 = vor.u32 %v4558_v60, %v3943_v61  ;;  %v4007_v0 = vld [vmem:[%s5258_s24 + $0xa8] sm:$0xf0]  ;;  %v4559_v2 = vld [vmem:[%s5258_s24 + $0x24] sm:$0xf0]  ;;  %v4005_v5 = vld [vmem:[%s5258_s24 + $0xa0] sm:$0xf] }
  0xde   : > { %1667 = vmatpush.bf16.msrb.mxu1 %v4030_v17  ;;  %v4010_v3 = vor.u32 %v4574_v62, %v4007_v0  ;;  %v3942_v4 = vor.u32 %v4559_v2, %v3941_v1  ;;  %v4575_v6 = vld [vmem:[%s5258_s24 + $0xa4] sm:$0xf0]  ;;  %v3701_v8 = vld [vmem:[%s5343_s6 + $0xc0] sm:$0xf]  ;;  %v4594_v10 = vld [vmem:[%s5343_s6 + $0xc4] sm:$0xf] }
  0xdf   : > { %1716 = vmatpush.bf16.msrb.mxu2 %v3970_v12  ;;  %v4006_v7 = vor.u32 %v4575_v6, %v4005_v5  ;;  %v4595_v9 = vld [vmem:[%s5343_s6 + $0xc4] sm:$0xf0]  ;;  %v3703_v11 = vld [vmem:[%s5343_s6 + $0xc8] sm:$0xf0]  ;;  %v4556_v14 = vld [vmem:[%s5258_s24 + $0x14] sm:$0xf] }
  0xe0   : > { %1765 = vmatpush.bf16.msrb.mxu3 %v4034_v16  ;;  %v3702_v12 = vor.u32 %v4595_v9, %v3701_v8  ;;  %v3706_v13 = vor.u32 %v4594_v10, %v3703_v11  ;;  %v3935_v15 = vld [vmem:[%s5258_s24 + $0x18] sm:$0xf0]  ;;  %v4572_v16 = vld [vmem:[%s5258_s24 + $0x94] sm:$0xf]  ;;  %v3933_v19 = vld [vmem:[%s5258_s24 + $0x10] sm:$0xf] }
  0xe1   : > { %1619 = vmatpush.bf16.msrb.mxu0 %v3958_v32  ;;  %v3938_v17 = vor.u32 %v4556_v14, %v3935_v15  ;;  %v3999_v18 = vld [vmem:[%s5258_s24 + $0x98] sm:$0xf0]  ;;  %v4557_v20 = vld [vmem:[%s5258_s24 + $0x14] sm:$0xf0]  ;;  %v3709_v26 = vld [vmem:[%s5343_s6 + $0xd0] sm:$0xf] }
  0xe2   : > { %1668 = vmatpush.bf16.msrb.mxu1 %v4022_v35  ;;  %v4002_v21 = vor.u32 %v4572_v16, %v3999_v18  ;;  %v4573_v24 = vld [vmem:[%s5258_s24 + $0x94] sm:$0xf0]  ;;  %v4596_v28 = vld [vmem:[%s5343_s6 + $0xd4] sm:$0xf]  ;;  %v3711_v29 = vld [vmem:[%s5343_s6 + $0xd8] sm:$0xf0] }
  0xe3   : > { %1717 = vmatpush.bf16.msrb.mxu2 %v3962_v27  ;;  %v4597_v27 = vld [vmem:[%s5343_s6 + $0xd4] sm:$0xf0]  ;;  %v4554_v32 = vld [vmem:[%s5258_s24 + $0x4] sm:$0xf]  ;;  %v3927_v33 = vld [vmem:[%s5258_s24 + $0x8] sm:$0xf0] }
  0xe4   : > { %1193 = vmatmul.bf16.gmra.mxu0 %v3678_v22  ;;  %1766 = vmatpush.bf16.msrb.mxu3 %v4026_v31  ;;  %v3710_v30 = vor.u32 %v4597_v27, %v3709_v26  ;;  %v3714_v31 = vor.u32 %v4596_v28, %v3711_v29  ;;  %v4570_v34 = vld [vmem:[%s5258_s24 + $0x84] sm:$0xf]  ;;  %v3930_v35 = vor.u32 %v4554_v32, %v3927_v33  ;;  %v3991_v36 = vld [vmem:[%s5258_s24 + $0x88] sm:$0xf0]  ;;  %v3925_v37 = vld [vmem:[%s5258_s24] sm:$0xf] }
  0xe5   : > { %1242 = vmatmul.bf16.gmra.mxu1 %v3682_v23  ;;  %1620 = vmatpush.bf16.msrb.mxu0 %v3950_v50  ;;  %v4555_v38 = vld [vmem:[%s5258_s24 + $0x4] sm:$0xf0]  ;;  %v3994_v39 = vor.u32 %v4570_v34, %v3991_v36  ;;  %v3717_v44 = vld [vmem:[%s5343_s6 + $0xe0] sm:$0xf]  ;;  %v4598_v46 = vld [vmem:[%s5343_s6 + $0xe4] sm:$0xf] }
  0xe6   : > { %1291 = vmatmul.bf16.gmra.mxu2 %v3678_v22  ;;  %1669 = vmatpush.bf16.msrb.mxu1 %v4014_v53  ;;  %v3934_v22 = vor.u32 %v4557_v20, %v3933_v19  ;;  %v4571_v42 = vld [vmem:[%s5258_s24 + $0x84] sm:$0xf0]  ;;  %v3719_v47 = vld [vmem:[%s5343_s6 + $0xe8] sm:$0xf0]  ;;  %v4664_v50 = vld [vmem:[%s5258_s24 + $0x274] sm:$0xf] }
  0xe7   : > { %1340 = vmatmul.bf16.gmra.mxu3 %v3682_v23  ;;  %1718 = vmatpush.bf16.msrb.mxu2 %v3954_v45  ;;  %v3997_v23 = vld [vmem:[%s5258_s24 + $0x90] sm:$0xf]  ;;  %v4599_v45 = vld [vmem:[%s5343_s6 + $0xe4] sm:$0xf0]  ;;  %v4223_v51 = vld [vmem:[%s5258_s24 + $0x278] sm:$0xf0] }
  0xe8   : > { %1767 = vmatpush.bf16.msrb.mxu3 %v4018_v49  ;;  %v3998_v25 = vor.u32 %v4573_v24, %v3997_v23  ;;  %v3718_v48 = vor.u32 %v4599_v45, %v3717_v44  ;;  %v3722_v49 = vor.u32 %v4598_v46, %v3719_v47  ;;  %v4680_v52 = vld [vmem:[%s5258_s24 + $0x2f4] sm:$0xf]  ;;  %v4226_v53 = vor.u32 %v4664_v50, %v4223_v51  ;;  %v4287_v54 = vld [vmem:[%s5258_s24 + $0x2f8] sm:$0xf0]  ;;  %v4221_v56 = vld [vmem:[%s5258_s24 + $0x270] sm:$0xf] }
  0xe9   : > { %1621 = vmatpush.bf16.msrb.mxu0 %v3942_v4  ;;  %v4290_v55 = vor.u32 %v4680_v52, %v4287_v54  ;;  %v4665_v57 = vld [vmem:[%s5258_s24 + $0x274] sm:$0xf0]  ;;  %v3725_v61 = vld [vmem:[%s5343_s6 + $0xf0] sm:$0xf]  ;;  %v4600_v0 = vld [vmem:[%s5343_s6 + $0xf4] sm:$0xf] }
  0xea   : > { %1670 = vmatpush.bf16.msrb.mxu1 %v4006_v7  ;;  %v4681_v60 = vld [vmem:[%s5258_s24 + $0x2f4] sm:$0xf0]  ;;  %v3727_v1 = vld [vmem:[%s5343_s6 + $0xf8] sm:$0xf0]  ;;  %v4662_v4 = vld [vmem:[%s5258_s24 + $0x264] sm:$0xf] }
  0xeb   : > { %1719 = vmatpush.bf16.msrb.mxu2 %v3946_v63  ;;  %v4601_v62 = vld [vmem:[%s5343_s6 + $0xf4] sm:$0xf0]  ;;  %v4215_v5 = vld [vmem:[%s5258_s24 + $0x268] sm:$0xf0]  ;;  %v4678_v6 = vld [vmem:[%s5258_s24 + $0x2e4] sm:$0xf] }
  0xec   : > { %1768 = vmatpush.bf16.msrb.mxu3 %v4010_v3  ;;  %v3726_v2 = vor.u32 %v4601_v62, %v3725_v61  ;;  %v3730_v3 = vor.u32 %v4600_v0, %v3727_v1  ;;  %v4218_v7 = vor.u32 %v4662_v4, %v4215_v5  ;;  %v4279_v8 = vld [vmem:[%s5258_s24 + $0x2e8] sm:$0xf0]  ;;  %v4213_v10 = vld [vmem:[%s5258_s24 + $0x260] sm:$0xf]  ;;  %v4663_v11 = vld [vmem:[%s5258_s24 + $0x264] sm:$0xf0] }
  0xed   : > { %1622 = vmatpush.bf16.msrb.mxu0 %v3934_v22  ;;  %v4282_v9 = vor.u32 %v4678_v6, %v4279_v8  ;;  %v4679_v14 = vld [vmem:[%s5258_s24 + $0x2e4] sm:$0xf0]  ;;  %v3861_v15 = vld [vmem:[%s5343_s6] sm:$0xf]  ;;  %v4538_v18 = vld [vmem:[%s5343_s6 + $0x4] sm:$0xf] }
  0xee   : > { %1671 = vmatpush.bf16.msrb.mxu1 %v3998_v25  ;;  %v4539_v16 = vld [vmem:[%s5343_s6 + $0x4] sm:$0xf0]  ;;  %v3863_v19 = vld [vmem:[%s5343_s6 + $0x8] sm:$0xf0]  ;;  %v4660_v25 = vld [vmem:[%s5258_s24 + $0x254] sm:$0xf] }
  0xef   : > { %1720 = vmatpush.bf16.msrb.mxu2 %v3938_v17  ;;  %v3862_v20 = vor.u32 %v4539_v16, %v3861_v15  ;;  %v3866_v22 = vor.u32 %v4538_v18, %v3863_v19  ;;  %v4207_v26 = vld [vmem:[%s5258_s24 + $0x258] sm:$0xf0]  ;;  %v4676_v27 = vld [vmem:[%s5258_s24 + $0x2d4] sm:$0xf]  ;;  %v4659_v4 = vld [vmem:[%s5258_s24 + $0x244] sm:$0xf0] }
  0xf0   : > { %1769 = vmatpush.bf16.msrb.mxu3 %v4002_v21  ;;  %v4210_v28 = vor.u32 %v4660_v25, %v4207_v26  ;;  %v4271_v29 = vld [vmem:[%s5258_s24 + $0x2d8] sm:$0xf0]  ;;  %v4540_v45 = vld [vmem:[%s5343_s6 + $0x14] sm:$0xf]  ;;  %v4261_v5 = vld [vmem:[%s5258_s24 + $0x2c0] sm:$0xf] }
  0xf1   : > { %v4274_v32 = vor.u32 %v4676_v27, %v4271_v29  ;;  %v3871_v46 = vld [vmem:[%s5343_s6 + $0x18] sm:$0xf0]  ;;  %v3877_v8 = vld [vmem:[%s5343_s6 + $0x20] sm:$0xf] }
  0xf2   : > { %v3874_v50 = vor.u32 %v4540_v45, %v3871_v46  ;;  %v4255_v26 = vld [vmem:[%s5258_s24 + $0x2b8] sm:$0xf0] }
  0xf3   : > { %1721 = vmatpush.bf16.msrb.mxu2 %v3930_v35  ;;  %v3887_v45 = vld [vmem:[%s5343_s6 + $0x38] sm:$0xf0] }
  0xf4   : > { %1198 = vmatmul.bf16.gmra.mxu0 %v3686_v40  ;;  %1770 = vmatpush.bf16.msrb.mxu3 %v3994_v39  ;;  %v4269_v39 = vld [vmem:[%s5258_s24 + $0x2d0] sm:$0xf] }
  0xf5   : > { %1247 = vmatmul.bf16.gmra.mxu1 %v3690_v41 }
  0xf6   : > { %1296 = vmatmul.bf16.gmra.mxu2 %v3686_v40  ;;  %v3926_v40 = vor.u32 %v4555_v38, %v3925_v37  ;;  %v4205_v37 = vld [vmem:[%s5258_s24 + $0x250] sm:$0xf]  ;;  %v4661_v38 = vld [vmem:[%s5258_s24 + $0x254] sm:$0xf0] }
  0xf7   : > { %1345 = vmatmul.bf16.gmra.mxu3 %v3690_v41  ;;  %v3989_v41 = vld [vmem:[%s5258_s24 + $0x80] sm:$0xf]  ;;  %2200 = vmatpush.bf16.msra.mxu2 %v4226_v53 }
  0xf8   : > { %v3990_v43 = vor.u32 %v4571_v42, %v3989_v41  ;;  %1623 = vmatpush.bf16.msrb.mxu0 %v3926_v40  ;;  %2249 = vmatpush.bf16.msra.mxu3 %v4290_v55  ;;  %v4206_v40 = vor.u32 %v4661_v38, %v4205_v37  ;;  %v4677_v41 = vld [vmem:[%s5258_s24 + $0x2d4] sm:$0xf0]  ;;  %v3869_v42 = vld [vmem:[%s5343_s6 + $0x10] sm:$0xf]  ;;  %v4658_v55 = vld [vmem:[%s5258_s24 + $0x244] sm:$0xf] }
  0xf9   : > { %v4270_v44 = vor.u32 %v4677_v41, %v4269_v39  ;;  %v4657_v37 = vld [vmem:[%s5258_s24 + $0x234] sm:$0xf0]  ;;  %v4253_v38 = vld [vmem:[%s5258_s24 + $0x2b0] sm:$0xf] }
  0xfa   : > { %1672 = vmatpush.bf16.msrb.mxu1 %v3990_v43  ;;  %v4541_v43 = vld [vmem:[%s5343_s6 + $0x14] sm:$0xf0]  ;;  %v3885_v41 = vld [vmem:[%s5343_s6 + $0x30] sm:$0xf] }
  0xfb   : > { %2201 = vmatpush.bf16.msra.mxu2 %v4218_v7  ;;  %v3870_v47 = vor.u32 %v4541_v43, %v3869_v42  ;;  %v4675_v7 = vld [vmem:[%s5258_s24 + $0x2c4] sm:$0xf0]  ;;  %v4545_v42 = vld [vmem:[%s5343_s6 + $0x34] sm:$0xf0] }
  0xfc   : > { %2250 = vmatpush.bf16.msra.mxu3 %v4282_v9  ;;  %v4543_v9 = vld [vmem:[%s5343_s6 + $0x24] sm:$0xf0]  ;;  %v3886_v46 = vor.u32 %v4545_v42, %v3885_v41 }
  0xff   : > { %2202 = vmatpush.bf16.msra.mxu2 %v4210_v28 }
 0x100   : > { %2251 = vmatpush.bf16.msra.mxu3 %v4274_v32 }
 0x104   : > { %1203 = vmatmul.bf16.gmra.mxu0 %v3694_v58 }
 0x105   : > { %1252 = vmatmul.bf16.gmra.mxu1 %v3698_v59 }
 0x106   : > { %1301 = vmatmul.bf16.gmra.mxu2 %v3694_v58  ;;  %v4285_v58 = vld [vmem:[%s5258_s24 + $0x2f0] sm:$0xf] }
 0x107   : > { %1350 = vmatmul.bf16.gmra.mxu3 %v3698_v59  ;;  %v4222_v59 = vor.u32 %v4665_v57, %v4221_v56  ;;  %v4286_v63 = vor.u32 %v4681_v60, %v4285_v58  ;;  %v4199_v56 = vld [vmem:[%s5258_s24 + $0x248] sm:$0xf0]  ;;  %v4674_v57 = vld [vmem:[%s5258_s24 + $0x2c4] sm:$0xf] }
 0x108   : > { %v4202_v58 = vor.u32 %v4658_v55, %v4199_v56  ;;  %v4654_v56 = vld [vmem:[%s5258_s24 + $0x224] sm:$0xf] }
 0x109   : > { %2102 = vmatpush.bf16.msra.mxu0 %v4222_v59  ;;  %2151 = vmatpush.bf16.msra.mxu1 %v4286_v63  ;;  %v4263_v59 = vld [vmem:[%s5258_s24 + $0x2c8] sm:$0xf0] }
 0x10a   : > { %v4266_v62 = vor.u32 %v4674_v57, %v4263_v59  ;;  %2203 = vmatpush.bf16.msra.mxu2 %v4202_v58  ;;  %v4183_v57 = vld [vmem:[%s5258_s24 + $0x228] sm:$0xf0]  ;;  %v4670_v58 = vld [vmem:[%s5258_s24 + $0x2a4] sm:$0xf] }
 0x10b   : > { %v4186_v59 = vor.u32 %v4654_v56, %v4183_v57  ;;  %v3903_v56 = vld [vmem:[%s5343_s6 + $0x58] sm:$0xf0] }
 0x10c   : > { %2252 = vmatpush.bf16.msra.mxu3 %v4266_v62 }
 0x114   : > { %1208 = vmatmul.bf16.gmra.mxu0 %v3702_v12 }
 0x115   : > { %1257 = vmatmul.bf16.gmra.mxu1 %v3706_v13 }
 0x116   : > { %1306 = vmatmul.bf16.gmra.mxu2 %v3702_v12  ;;  %v4277_v12 = vld [vmem:[%s5258_s24 + $0x2e0] sm:$0xf] }
 0x117   : > { %1355 = vmatmul.bf16.gmra.mxu3 %v3706_v13  ;;  %v4214_v13 = vor.u32 %v4663_v11, %v4213_v10  ;;  %v4278_v17 = vor.u32 %v4679_v14, %v4277_v12  ;;  %v4262_v10 = vor.u32 %v4675_v7, %v4261_v5  ;;  %v4542_v11 = vld [vmem:[%s5343_s6 + $0x24] sm:$0xf]  ;;  %v3879_v12 = vld [vmem:[%s5343_s6 + $0x28] sm:$0xf0]  ;;  %v4655_v7 = vld [vmem:[%s5258_s24 + $0x224] sm:$0xf0] }
 0x118   : > { %v3882_v16 = vor.u32 %v4542_v11, %v3879_v12  ;;  %v3893_v11 = vld [vmem:[%s5343_s6 + $0x40] sm:$0xf]  ;;  %v4547_v12 = vld [vmem:[%s5343_s6 + $0x44] sm:$0xf0] }
 0x119   : > { %2103 = vmatpush.bf16.msra.mxu0 %v4214_v13  ;;  %2152 = vmatpush.bf16.msra.mxu1 %v4278_v17  ;;  %v3878_v13 = vor.u32 %v4543_v9, %v3877_v8  ;;  %v4245_v8 = vld [vmem:[%s5258_s24 + $0x2a0] sm:$0xf] }
 0x11d   : > { %2104 = vmatpush.bf16.msra.mxu0 %v4206_v40  ;;  %2153 = vmatpush.bf16.msra.mxu1 %v4270_v44  ;;  %v4673_v40 = vld [vmem:[%s5258_s24 + $0x2b4] sm:$0xf0]  ;;  %v4544_v44 = vld [vmem:[%s5343_s6 + $0x34] sm:$0xf] }
 0x11e   : > { %v4254_v43 = vor.u32 %v4673_v40, %v4253_v38 }
 0x121   : > { %2154 = vmatpush.bf16.msra.mxu1 %v4262_v10  ;;  %v4671_v10 = vld [vmem:[%s5258_s24 + $0x2a4] sm:$0xf0] }
 0x124   : > { %1213 = vmatmul.bf16.gmra.mxu0 %v3710_v30 }
 0x125   : > { %1262 = vmatmul.bf16.gmra.mxu1 %v3714_v31 }
 0x126   : > { %1311 = vmatmul.bf16.gmra.mxu2 %v3710_v30  ;;  %2155 = vmatpush.bf16.msra.mxu1 %v4254_v43  ;;  %v4173_v43 = vld [vmem:[%s5258_s24 + $0x210] sm:$0xf] }
 0x127   : > { %1360 = vmatmul.bf16.gmra.mxu3 %v3714_v31 }
 0x134   : > { %1218 = vmatmul.bf16.gmra.mxu0 %v3718_v48 }
 0x135   : > { %1267 = vmatmul.bf16.gmra.mxu1 %v3722_v49 }
 0x136   : > { %1316 = vmatmul.bf16.gmra.mxu2 %v3718_v48 }
 0x137   : > { %1365 = vmatmul.bf16.gmra.mxu3 %v3722_v49 }
 0x144   : > { %1223 = vmatmul.bf16.gmra.mxu0 %v3726_v2 }
 0x145   : > { %1272 = vmatmul.bf16.gmra.mxu1 %v3730_v3 }
 0x146   : > { %1321 = vmatmul.bf16.gmra.mxu2 %v3726_v2 }
 0x147   : > { %1370 = vmatmul.bf16.gmra.mxu3 %v3730_v3  ;;  %v4197_v3 = vld [vmem:[%s5258_s24 + $0x240] sm:$0xf] }
 0x148   : > { %v4198_v6 = vor.u32 %v4659_v4, %v4197_v3 }
 0x14a   : > { %2105 = vmatpush.bf16.msra.mxu0 %v4198_v6  ;;  %v4181_v6 = vld [vmem:[%s5258_s24 + $0x220] sm:$0xf] }
 0x14b   : > { %v4182_v9 = vor.u32 %v4655_v7, %v4181_v6  ;;  %v4167_v6 = vld [vmem:[%s5258_s24 + $0x208] sm:$0xf0]  ;;  %v4666_v7 = vld [vmem:[%s5258_s24 + $0x284] sm:$0xf] }
 0x151   : > { %v1189_v21 = vpop.f32.mrf.mxu0 }
 0x152   : > { %v1238_v23 = vpop.f32.mrf.mxu1 }
 0x153   : > { %v5462_v24 = vadd.f32 %v1238_v23, %v1189_v21  ;;  %v4656_v21 = vld [vmem:[%s5258_s24 + $0x234] sm:$0xf] }
 0x154   : > { %1624 = vmatmul.bf16.vlgmr.msrb.gmra.mxu0 %v3862_v20  ;;  %v4672_v23 = vld [vmem:[%s5258_s24 + $0x2b4] sm:$0xf] }
 0x155   : > { %1673 = vmatmul.bf16.vlgmr.msrb.gmra.mxu1 %v3866_v22  ;;  %v4258_v29 = vor.u32 %v4672_v23, %v4255_v26 }
 0x156   : > { %1722 = vmatmul.bf16.vlgmr.msrb.gmra.mxu2 %v3862_v20 }
 0x157   : > { %1771 = vmatmul.bf16.vlgmr.msrb.gmra.mxu3 %v3866_v22  ;;  %v4191_v22 = vld [vmem:[%s5258_s24 + $0x238] sm:$0xf0] }
 0x158   : > { %v4194_v25 = vor.u32 %v4656_v21, %v4191_v22  ;;  %2253 = vmatpush.bf16.msra.mxu3 %v4258_v29  ;;  %v4668_v29 = vld [vmem:[%s5258_s24 + $0x294] sm:$0xf] }
 0x159   : > { %v1287_v30 = vpop.f32.mrf.mxu2  ;;  %v1191_v31 = vpop.f32.mrf.mxu0 }
 0x15a   : > { %v1336_v33 = vpop.f32.mrf.mxu3  ;;  %v1240_v34 = vpop.f32.mrf.mxu1  ;;  %2204 = vmatpush.bf16.msra.mxu2 %v4194_v25 }
 0x15b   : > { %v5468_v35 = vadd.f32 %v1336_v33, %v1287_v30  ;;  %v5470_v36 = vadd.f32 %v1240_v34, %v1191_v31  ;;  %v4189_v34 = vld [vmem:[%s5258_s24 + $0x230] sm:$0xf] }
 0x15c   : > { %v4190_v39 = vor.u32 %v4657_v37, %v4189_v34 }
 0x15e   : > { %2106 = vmatpush.bf16.msra.mxu0 %v4190_v39  ;;  %2205 = vmatpush.bf16.msra.mxu2 %v4186_v59 }
 0x161   : > { %v1289_v48 = vpop.f32.mrf.mxu2  ;;  %v1194_v49 = vpop.f32.mrf.mxu0 }
 0x162   : > { %v1338_v51 = vpop.f32.mrf.mxu3  ;;  %v1243_v52 = vpop.f32.mrf.mxu1  ;;  %2107 = vmatpush.bf16.msra.mxu0 %v4182_v9  ;;  %v4231_v9 = vld [vmem:[%s5258_s24 + $0x288] sm:$0xf0] }
 0x163   : > { %v5480_v53 = vadd.f32 %v1338_v51, %v1289_v48  ;;  %v5482_v54 = vadd.f32 %v1243_v52, %v1194_v49  ;;  %v3890_v49 = vor.u32 %v4544_v44, %v3887_v45  ;;  %v4653_v44 = vld [vmem:[%s5258_s24 + $0x214] sm:$0xf0]  ;;  %v4237_v45 = vld [vmem:[%s5258_s24 + $0x290] sm:$0xf] }
 0x164   : > { %1629 = vmatmul.bf16.gmra.mxu0 %v3870_v47 }
 0x165   : > { %1678 = vmatmul.bf16.gmra.mxu1 %v3874_v50 }
 0x166   : > { %1727 = vmatmul.bf16.gmra.mxu2 %v3870_v47 }
 0x167   : > { %1776 = vmatmul.bf16.gmra.mxu3 %v3874_v50 }
 0x169   : > { %v1292_v60 = vpop.f32.mrf.mxu2  ;;  %v1196_v61 = vpop.f32.mrf.mxu0 }
 0x16a   : > { %v1341_v63 = vpop.f32.mrf.mxu3  ;;  %v1245_v0 = vpop.f32.mrf.mxu1 }
 0x16b   : > { %v5488_v1 = vadd.f32 %v1341_v63, %v1292_v60  ;;  %v5490_v2 = vadd.f32 %v1245_v0, %v1196_v61  ;;  %v4247_v60 = vld [vmem:[%s5258_s24 + $0x2a8] sm:$0xf0] }
 0x16c   : > { %v4250_v63 = vor.u32 %v4670_v58, %v4247_v60 }
 0x16e   : > { %2254 = vmatpush.bf16.msra.mxu3 %v4250_v63 }
 0x171   : > { %v1294_v14 = vpop.f32.mrf.mxu2  ;;  %v1199_v15 = vpop.f32.mrf.mxu0 }
 0x172   : > { %v1343_v17 = vpop.f32.mrf.mxu3  ;;  %v1248_v18 = vpop.f32.mrf.mxu1 }
 0x173   : > { %v5500_v19 = vadd.f32 %v1343_v17, %v1294_v14  ;;  %v5502_v20 = vadd.f32 %v1248_v18, %v1199_v15  ;;  %v4546_v14 = vld [vmem:[%s5343_s6 + $0x44] sm:$0xf]  ;;  %v3895_v15 = vld [vmem:[%s5343_s6 + $0x48] sm:$0xf0] }
 0x174   : > { %1634 = vmatmul.bf16.gmra.mxu0 %v3878_v13  ;;  %v3898_v21 = vor.u32 %v4546_v14, %v3895_v15 }
 0x175   : > { %1683 = vmatmul.bf16.gmra.mxu1 %v3882_v16 }
 0x176   : > { %1732 = vmatmul.bf16.gmra.mxu2 %v3878_v13  ;;  %v4246_v13 = vor.u32 %v4671_v10, %v4245_v8 }
 0x177   : > { %1781 = vmatmul.bf16.gmra.mxu3 %v3882_v16  ;;  %v3894_v16 = vor.u32 %v4547_v12, %v3893_v11  ;;  %v4234_v12 = vor.u32 %v4666_v7, %v4231_v9  ;;  %v3917_v7 = vld [vmem:[%s5343_s6 + $0x70] sm:$0xf] }
 0x178   : > { %2156 = vmatpush.bf16.msra.mxu1 %v4246_v13 }
 0x179   : > { %v1297_v27 = vpop.f32.mrf.mxu2  ;;  %v1201_v28 = vpop.f32.mrf.mxu0 }
 0x17a   : > { %v1346_v30 = vpop.f32.mrf.mxu3  ;;  %v1250_v31 = vpop.f32.mrf.mxu1 }
 0x17b   : > { %v5508_v32 = vadd.f32 %v1346_v30, %v1297_v27  ;;  %v5510_v33 = vadd.f32 %v1250_v31, %v1201_v28  ;;  %v4652_v27 = vld [vmem:[%s5258_s24 + $0x214] sm:$0xf]  ;;  %v4175_v28 = vld [vmem:[%s5258_s24 + $0x218] sm:$0xf0] }
 0x17c   : > { %v4178_v30 = vor.u32 %v4652_v27, %v4175_v28  ;;  %v4239_v31 = vld [vmem:[%s5258_s24 + $0x298] sm:$0xf0]  ;;  %v3909_v27 = vld [vmem:[%s5343_s6 + $0x60] sm:$0xf]  ;;  %v4551_v28 = vld [vmem:[%s5343_s6 + $0x64] sm:$0xf0] }
 0x17d   : > { %v4242_v38 = vor.u32 %v4668_v29, %v4239_v31  ;;  %v3911_v31 = vld [vmem:[%s5343_s6 + $0x68] sm:$0xf0] }
 0x17e   : > { %2206 = vmatpush.bf16.msra.mxu2 %v4178_v30  ;;  %v4550_v30 = vld [vmem:[%s5343_s6 + $0x64] sm:$0xf] }
 0x17f   : > { %2255 = vmatpush.bf16.msra.mxu3 %v4242_v38 }
 0x181   : > { %v1299_v47 = vpop.f32.mrf.mxu2  ;;  %v1204_v48 = vpop.f32.mrf.mxu0 }
 0x182   : > { %v1348_v50 = vpop.f32.mrf.mxu3  ;;  %v1253_v51 = vpop.f32.mrf.mxu1 }
 0x183   : > { %v5520_v52 = vadd.f32 %v1348_v50, %v1299_v47  ;;  %v5522_v55 = vadd.f32 %v1253_v51, %v1204_v48  ;;  %v4669_v47 = vld [vmem:[%s5258_s24 + $0x294] sm:$0xf0]  ;;  %v3901_v48 = vld [vmem:[%s5343_s6 + $0x50] sm:$0xf]  ;;  %v4548_v51 = vld [vmem:[%s5343_s6 + $0x54] sm:$0xf]  ;;  %2256 = vmatpush.bf16.msra.mxu3 %v4234_v12 }
 0x184   : > { %1639 = vmatmul.bf16.gmra.mxu0 %v3886_v46  ;;  %v4238_v50 = vor.u32 %v4669_v47, %v4237_v45  ;;  %v3906_v60 = vor.u32 %v4548_v51, %v3903_v56  ;;  %v4463_v47 = vld [vmem:[%s5258_s24 + $0x378] sm:$0xf0] }
 0x185   : > { %1688 = vmatmul.bf16.gmra.mxu1 %v3890_v49  ;;  %v3919_v12 = vld [vmem:[%s5343_s6 + $0x78] sm:$0xf0] }
 0x186   : > { %1737 = vmatmul.bf16.gmra.mxu2 %v3886_v46  ;;  %v4174_v46 = vor.u32 %v4653_v44, %v4173_v43  ;;  %2157 = vmatpush.bf16.msra.mxu1 %v4238_v50  ;;  %v4527_v50 = vld [vmem:[%s5258_s24 + $0x3f8] sm:$0xf0] }
 0x187   : > { %1786 = vmatmul.bf16.gmra.mxu3 %v3890_v49  ;;  %v4549_v49 = vld [vmem:[%s5343_s6 + $0x54] sm:$0xf0] }
 0x188   : > { %2108 = vmatpush.bf16.msra.mxu0 %v4174_v46  ;;  %v3902_v57 = vor.u32 %v4549_v49, %v3901_v48  ;;  %v4712_v46 = vld [vmem:[%s5258_s24 + $0x374] sm:$0xf] }
 0x189   : > { %v1302_v61 = vpop.f32.mrf.mxu2  ;;  %v1206_v62 = vpop.f32.mrf.mxu0  ;;  %v4728_v48 = vld [vmem:[%s5258_s24 + $0x3f4] sm:$0xf]  ;;  %v4466_v49 = vor.u32 %v4712_v46, %v4463_v47 }
 0x18a   : > { %v1351_v0 = vpop.f32.mrf.mxu3  ;;  %v1255_v3 = vpop.f32.mrf.mxu1 }
 0x18b   : > { %v5528_v4 = vadd.f32 %v1351_v0, %v1302_v61  ;;  %v5530_v5 = vadd.f32 %v1255_v3, %v1206_v62  ;;  %v4650_v3 = vld [vmem:[%s5258_s24 + $0x204] sm:$0xf] }
 0x18c   : > { %v4170_v8 = vor.u32 %v4650_v3, %v4167_v6  ;;  %v4713_v3 = vld [vmem:[%s5258_s24 + $0x374] sm:$0xf0]  ;;  %v4525_v6 = vld [vmem:[%s5258_s24 + $0x3f0] sm:$0xf] }
 0x18e   : > { %2207 = vmatpush.bf16.msra.mxu2 %v4170_v8  ;;  %v4553_v8 = vld [vmem:[%s5343_s6 + $0x74] sm:$0xf0] }
 0x191   : > { %v1304_v17 = vpop.f32.mrf.mxu2  ;;  %v1209_v18 = vpop.f32.mrf.mxu0 }
 0x192   : > { %v1353_v22 = vpop.f32.mrf.mxu3  ;;  %v1258_v23 = vpop.f32.mrf.mxu1  ;;  %2718 = vmatpush.bf16.msrb.mxu2 %v4466_v49  ;;  %v4453_v49 = vld [vmem:[%s5258_s24 + $0x360] sm:$0xf] }
 0x193   : > { %v5540_v25 = vadd.f32 %v1353_v22, %v1304_v17  ;;  %v5542_v26 = vadd.f32 %v1258_v23, %v1209_v18  ;;  %v4165_v17 = vld [vmem:[%s5258_s24 + $0x200] sm:$0xf]  ;;  %v4651_v18 = vld [vmem:[%s5258_s24 + $0x204] sm:$0xf0] }
 0x194   : > { %1644 = vmatmul.bf16.gmra.mxu0 %v3894_v16  ;;  %v4166_v22 = vor.u32 %v4651_v18, %v4165_v17  ;;  %v4667_v23 = vld [vmem:[%s5258_s24 + $0x284] sm:$0xf0] }
 0x195   : > { %1693 = vmatmul.bf16.gmra.mxu1 %v3898_v21 }
 0x196   : > { %1742 = vmatmul.bf16.gmra.mxu2 %v3894_v16  ;;  %2109 = vmatpush.bf16.msra.mxu0 %v4166_v22 }
 0x197   : > { %1791 = vmatmul.bf16.gmra.mxu3 %v3898_v21  ;;  %v4229_v21 = vld [vmem:[%s5258_s24 + $0x280] sm:$0xf] }
 0x198   : > { %v4230_v29 = vor.u32 %v4667_v23, %v4229_v21 }
 0x199   : > { %v1307_v34 = vpop.f32.mrf.mxu2  ;;  %v1211_v37 = vpop.f32.mrf.mxu0 }
 0x19a   : > { %v1356_v39 = vpop.f32.mrf.mxu3  ;;  %v1260_v40 = vpop.f32.mrf.mxu1  ;;  %2158 = vmatpush.bf16.msra.mxu1 %v4230_v29  ;;  %v4710_v29 = vld [vmem:[%s5258_s24 + $0x364] sm:$0xf] }
 0x19b   : > { %v5548_v41 = vadd.f32 %v1356_v39, %v1307_v34  ;;  %v5550_v42 = vadd.f32 %v1260_v40, %v1211_v37  ;;  %v3910_v34 = vor.u32 %v4551_v28, %v3909_v27  ;;  %v3914_v39 = vor.u32 %v4550_v30, %v3911_v31  ;;  %v4455_v30 = vld [vmem:[%s5258_s24 + $0x368] sm:$0xf0]  ;;  %v4726_v31 = vld [vmem:[%s5258_s24 + $0x3e4] sm:$0xf] }
 0x1a1   : > { %v1309_v58 = vpop.f32.mrf.mxu2  ;;  %v1214_v59 = vpop.f32.mrf.mxu0 }
 0x1a2   : > { %v1358_v61 = vpop.f32.mrf.mxu3  ;;  %v1263_v62 = vpop.f32.mrf.mxu1 }
 0x1a3   : > { %v5560_v63 = vadd.f32 %v1358_v61, %v1309_v58  ;;  %v5562_v0 = vadd.f32 %v1263_v62, %v1214_v59  ;;  %v4461_v62 = vld [vmem:[%s5258_s24 + $0x370] sm:$0xf] }
 0x1a4   : > { %1649 = vmatmul.bf16.gmra.mxu0 %v3902_v57  ;;  %v4462_v9 = vor.u32 %v4713_v3, %v4461_v62  ;;  %v4634_v62 = vld [vmem:[%s5343_s6 + $0x104] sm:$0xf]  ;;  %v4103_v3 = vld [vmem:[%s5343_s6 + $0x108] sm:$0xf0] }
 0x1a5   : > { %1698 = vmatmul.bf16.gmra.mxu1 %v3906_v60 }
 0x1a6   : > { %1747 = vmatmul.bf16.gmra.mxu2 %v3902_v57  ;;  %v4530_v57 = vor.u32 %v4728_v48, %v4527_v50  ;;  %2620 = vmatpush.bf16.msrb.mxu0 %v4462_v9  ;;  %v4711_v50 = vld [vmem:[%s5258_s24 + $0x364] sm:$0xf0] }
 0x1a7   : > { %1796 = vmatmul.bf16.gmra.mxu3 %v3906_v60 }
 0x1a8   : > { %2767 = vmatpush.bf16.msrb.mxu3 %v4530_v57  ;;  %v4635_v57 = vld [vmem:[%s5343_s6 + $0x104] sm:$0xf0] }
 0x1a9   : > { %v1312_v10 = vpop.f32.mrf.mxu2  ;;  %v1216_v11 = vpop.f32.mrf.mxu0 }
 0x1aa   : > { %v1361_v13 = vpop.f32.mrf.mxu3  ;;  %v1265_v14 = vpop.f32.mrf.mxu1 }
 0x1ab   : > { %v5568_v15 = vadd.f32 %v1361_v13, %v1312_v10  ;;  %v5570_v16 = vadd.f32 %v1265_v14, %v1216_v11  ;;  %v4729_v10 = vld [vmem:[%s5258_s24 + $0x3f4] sm:$0xf0]  ;;  %v4552_v11 = vld [vmem:[%s5343_s6 + $0x74] sm:$0xf]  ;;  %v3918_v14 = vor.u32 %v4553_v8, %v3917_v7 }
 0x1ac   : > { %v4526_v13 = vor.u32 %v4729_v10, %v4525_v6  ;;  %v3922_v21 = vor.u32 %v4552_v11, %v3919_v12  ;;  %v4106_v10 = vor.u32 %v4634_v62, %v4103_v3 }
 0x1ae   : > { %2669 = vmatpush.bf16.msrb.mxu1 %v4526_v13 }
 0x1b1   : > { %v1314_v37 = vpop.f32.mrf.mxu2  ;;  %v1219_v38 = vpop.f32.mrf.mxu0 }
 0x1b2   : > { %v1363_v40 = vpop.f32.mrf.mxu3  ;;  %v1268_v43 = vpop.f32.mrf.mxu1 }
 0x1b3   : > { %v5580_v44 = vadd.f32 %v1363_v40, %v1314_v37  ;;  %v5582_v45 = vadd.f32 %v1268_v43, %v1219_v38  ;;  %v4519_v37 = vld [vmem:[%s5258_s24 + $0x3e8] sm:$0xf0] }
 0x1b4   : > { %1654 = vmatmul.bf16.gmra.mxu0 %v3910_v34  ;;  %v4522_v40 = vor.u32 %v4726_v31, %v4519_v37 }
 0x1b5   : > { %1703 = vmatmul.bf16.gmra.mxu1 %v3914_v39 }
 0x1b6   : > { %1752 = vmatmul.bf16.gmra.mxu2 %v3910_v34  ;;  %v4458_v34 = vor.u32 %v4710_v29, %v4455_v30  ;;  %2768 = vmatpush.bf16.msrb.mxu3 %v4522_v40  ;;  %v4511_v29 = vld [vmem:[%s5258_s24 + $0x3d8] sm:$0xf0] }
 0x1b7   : > { %1801 = vmatmul.bf16.gmra.mxu3 %v3914_v39 }
 0x1b8   : > { %2719 = vmatpush.bf16.msrb.mxu2 %v4458_v34 }
 0x1b9   : > { %v1317_v51 = vpop.f32.mrf.mxu2  ;;  %v1221_v56 = vpop.f32.mrf.mxu0 }
 0x1ba   : > { %v1366_v58 = vpop.f32.mrf.mxu3  ;;  %v1270_v59 = vpop.f32.mrf.mxu1 }
 0x1bb   : > { %v5588_v60 = vadd.f32 %v1366_v58, %v1317_v51  ;;  %v5590_v61 = vadd.f32 %v1270_v59, %v1221_v56  ;;  %v4517_v51 = vld [vmem:[%s5258_s24 + $0x3e0] sm:$0xf]  ;;  %v4454_v58 = vor.u32 %v4711_v50, %v4453_v49  ;;  %v4727_v59 = vld [vmem:[%s5258_s24 + $0x3e4] sm:$0xf0]  ;;  %v4709_v49 = vld [vmem:[%s5258_s24 + $0x354] sm:$0xf0] }
 0x1bc   : > { %v4101_v56 = vld [vmem:[%s5343_s6 + $0x100] sm:$0xf]  ;;  %v4518_v6 = vor.u32 %v4727_v59, %v4517_v51  ;;  %v4509_v50 = vld [vmem:[%s5258_s24 + $0x3d0] sm:$0xf]  ;;  %v4636_v59 = vld [vmem:[%s5343_s6 + $0x114] sm:$0xf] }
 0x1bd   : > { %2621 = vmatpush.bf16.msrb.mxu0 %v4454_v58  ;;  %v4102_v7 = vor.u32 %v4635_v57, %v4101_v56  ;;  %v4109_v51 = vld [vmem:[%s5343_s6 + $0x110] sm:$0xf]  ;;  %v4637_v56 = vld [vmem:[%s5343_s6 + $0x114] sm:$0xf0] }
 0x1be   : > { %2670 = vmatpush.bf16.msrb.mxu1 %v4518_v6  ;;  %v4725_v58 = vld [vmem:[%s5258_s24 + $0x3d4] sm:$0xf0] }
 0x1bf   : > { %v4510_v62 = vor.u32 %v4725_v58, %v4509_v50  ;;  %v4501_v50 = vld [vmem:[%s5258_s24 + $0x3c0] sm:$0xf]  ;;  %v4723_v58 = vld [vmem:[%s5258_s24 + $0x3c4] sm:$0xf0] }
 0x1c1   : > { %v1319_v17 = vpop.f32.mrf.mxu2  ;;  %v1224_v18 = vpop.f32.mrf.mxu0 }
 0x1c2   : > { %v1368_v22 = vpop.f32.mrf.mxu3  ;;  %v1273_v23 = vpop.f32.mrf.mxu1  ;;  %2671 = vmatpush.bf16.msrb.mxu1 %v4510_v62 }
 0x1c3   : > { %v5600_v27 = vadd.f32 %v1368_v22, %v1319_v17  ;;  %v5602_v28 = vadd.f32 %v1273_v23, %v1224_v18  ;;  %v4708_v18 = vld [vmem:[%s5258_s24 + $0x354] sm:$0xf] }
 0x1c4   : > { %1659 = vmatmul.bf16.gmra.mxu0 %v3918_v14  ;;  %v4724_v22 = vld [vmem:[%s5258_s24 + $0x3d4] sm:$0xf] }
 0x1c5   : > { %1708 = vmatmul.bf16.gmra.mxu1 %v3922_v21  ;;  %v4514_v31 = vor.u32 %v4724_v22, %v4511_v29  ;;  %v4722_v22 = vld [vmem:[%s5258_s24 + $0x3c4] sm:$0xf] }
 0x1c6   : > { %1757 = vmatmul.bf16.gmra.mxu2 %v3918_v14 }
 0x1c7   : > { %1806 = vmatmul.bf16.gmra.mxu3 %v3922_v21  ;;  %v4447_v21 = vld [vmem:[%s5258_s24 + $0x358] sm:$0xf0] }
 0x1c8   : > { %v4450_v23 = vor.u32 %v4708_v18, %v4447_v21  ;;  %2769 = vmatpush.bf16.msrb.mxu3 %v4514_v31  ;;  %v4706_v18 = vld [vmem:[%s5258_s24 + $0x344] sm:$0xf]  ;;  %v4439_v21 = vld [vmem:[%s5258_s24 + $0x348] sm:$0xf0] }
 0x1c9   : > { %v1322_v38 = vpop.f32.mrf.mxu2  ;;  %v1226_v39 = vpop.f32.mrf.mxu0 }
 0x1ca   : > { %v1371_v43 = vpop.f32.mrf.mxu3  ;;  %v1275_v46 = vpop.f32.mrf.mxu1  ;;  %2720 = vmatpush.bf16.msrb.mxu2 %v4450_v23  ;;  %v4442_v23 = vor.u32 %v4706_v18, %v4439_v21  ;;  %v4704_v18 = vld [vmem:[%s5258_s24 + $0x334] sm:$0xf]  ;;  %v4431_v21 = vld [vmem:[%s5258_s24 + $0x338] sm:$0xf0] }
 0x1cb   : > { %v5608_v47 = vadd.f32 %v1371_v43, %v1322_v38  ;;  %v5610_v48 = vadd.f32 %v1275_v46, %v1226_v39  ;;  %v4445_v46 = vld [vmem:[%s5258_s24 + $0x350] sm:$0xf] }
 0x1cc   : > { %v4446_v57 = vor.u32 %v4709_v49, %v4445_v46  ;;  %v4437_v46 = vld [vmem:[%s5258_s24 + $0x340] sm:$0xf]  ;;  %v4707_v49 = vld [vmem:[%s5258_s24 + $0x344] sm:$0xf0] }
 0x1ce   : > { %2622 = vmatpush.bf16.msrb.mxu0 %v4446_v57  ;;  %2721 = vmatpush.bf16.msrb.mxu2 %v4442_v23  ;;  %v4438_v57 = vor.u32 %v4707_v49, %v4437_v46  ;;  %v4434_v23 = vor.u32 %v4704_v18, %v4431_v21  ;;  %v4429_v46 = vld [vmem:[%s5258_s24 + $0x330] sm:$0xf]  ;;  %v4705_v49 = vld [vmem:[%s5258_s24 + $0x334] sm:$0xf0]  ;;  %v4702_v18 = vld [vmem:[%s5258_s24 + $0x324] sm:$0xf] }
 0x1cf   : > { %v4423_v21 = vld [vmem:[%s5258_s24 + $0x328] sm:$0xf0] }
 0x1d1   : > { %v1324_v8 = vpop.f32.mrf.mxu2  ;;  %v1625_v9 = vpop.f32.mrf.mxu0 }
 0x1d2   : > { %v1373_v11 = vpop.f32.mrf.mxu3  ;;  %v1626_v12 = vadd.f32 %v1625_v9, %v5462_v24  ;;  %v1674_v13 = vpop.f32.mrf.mxu1  ;;  %2623 = vmatpush.bf16.msrb.mxu0 %v4438_v57  ;;  %2722 = vmatpush.bf16.msrb.mxu2 %v4434_v23  ;;  %v4430_v57 = vor.u32 %v4705_v49, %v4429_v46  ;;  %v4426_v23 = vor.u32 %v4702_v18, %v4423_v21  ;;  %v4421_v46 = vld [vmem:[%s5258_s24 + $0x320] sm:$0xf]  ;;  %v4703_v49 = vld [vmem:[%s5258_s24 + $0x324] sm:$0xf0]  ;;  %v4700_v18 = vld [vmem:[%s5258_s24 + $0x314] sm:$0xf] }
 0x1d3   : > { %v5621_v14 = vadd.f32 %v1373_v11, %v1324_v8  ;;  %v4415_v21 = vld [vmem:[%s5258_s24 + $0x318] sm:$0xf0] }
 0x1d4   : > { %v5623_v17 = vadd.f32 %v1674_v13, %v1626_v12  ;;  %2110 = vmatmul.bf16.vlgmr.msra.gmra.mxu0 %v4102_v7 }
 0x1d5   : > { %2159 = vmatmul.bf16.vlgmr.msra.gmra.mxu1 %v4106_v10 }
 0x1d6   : > { %2208 = vmatmul.bf16.vlgmr.msra.gmra.mxu2 %v4102_v7  ;;  %2624 = vmatpush.bf16.msrb.mxu0 %v4430_v57  ;;  %v4422_v57 = vor.u32 %v4703_v49, %v4421_v46  ;;  %v4413_v46 = vld [vmem:[%s5258_s24 + $0x310] sm:$0xf]  ;;  %v4701_v49 = vld [vmem:[%s5258_s24 + $0x314] sm:$0xf0] }
 0x1d7   : > { %2257 = vmatmul.bf16.vlgmr.msra.gmra.mxu3 %v4106_v10  ;;  %2723 = vmatpush.bf16.msrb.mxu2 %v4426_v23  ;;  %v4418_v23 = vor.u32 %v4700_v18, %v4415_v21  ;;  %v4698_v18 = vld [vmem:[%s5258_s24 + $0x304] sm:$0xf]  ;;  %v4407_v21 = vld [vmem:[%s5258_s24 + $0x308] sm:$0xf0] }
 0x1d9   : > { %v1723_v24 = vpop.f32.mrf.mxu2  ;;  %v1627_v30 = vpop.f32.mrf.mxu0 }
 0x1da   : > { %v1724_v34 = vadd.f32 %v1723_v24, %v5468_v35  ;;  %v1772_v37 = vpop.f32.mrf.mxu3  ;;  %v1628_v38 = vadd.f32 %v1627_v30, %v5470_v36  ;;  %v1676_v39 = vpop.f32.mrf.mxu1  ;;  %v4111_v35 = vld [vmem:[%s5343_s6 + $0x118] sm:$0xf0]  ;;  %v4110_v36 = vor.u32 %v4637_v56, %v4109_v51  ;;  %v4117_v51 = vld [vmem:[%s5343_s6 + $0x120] sm:$0xf]  ;;  %v4639_v56 = vld [vmem:[%s5343_s6 + $0x124] sm:$0xf0]  ;;  %2625 = vmatpush.bf16.msrb.mxu0 %v4422_v57  ;;  %v4414_v57 = vor.u32 %v4701_v49, %v4413_v46 }
 0x1db   : > { %v4114_v7 = vor.u32 %v4636_v59, %v4111_v35  ;;  %v4638_v59 = vld [vmem:[%s5343_s6 + $0x124] sm:$0xf]  ;;  %v4502_v35 = vor.u32 %v4723_v58, %v4501_v50  ;;  %v4493_v50 = vld [vmem:[%s5258_s24 + $0x3b0] sm:$0xf]  ;;  %v4721_v58 = vld [vmem:[%s5258_s24 + $0x3b4] sm:$0xf0]  ;;  %2724 = vmatpush.bf16.msrb.mxu2 %v4418_v23  ;;  %v4410_v23 = vor.u32 %v4698_v18, %v4407_v21 }
 0x1dc   : > { %v5631_v40 = vadd.f32 %v1772_v37, %v1724_v34  ;;  %v5633_v43 = vadd.f32 %v1676_v39, %v1628_v38  ;;  %v4405_v46 = vld [vmem:[%s5258_s24 + $0x300] sm:$0xf]  ;;  %v4699_v49 = vld [vmem:[%s5258_s24 + $0x304] sm:$0xf0] }
 0x1dd   : > { %2672 = vmatpush.bf16.msrb.mxu1 %v4502_v35 }
 0x1de   : > { %2626 = vmatpush.bf16.msrb.mxu0 %v4414_v57  ;;  %v4406_v57 = vor.u32 %v4699_v49, %v4405_v46 }
 0x1df   : > { %2725 = vmatpush.bf16.msrb.mxu2 %v4410_v23 }
 0x1e1   : > { %v1725_v3 = vpop.f32.mrf.mxu2  ;;  %v1630_v6 = vpop.f32.mrf.mxu0 }
 0x1e2   : > { %v1726_v8 = vadd.f32 %v1725_v3, %v5480_v53  ;;  %v1774_v9 = vpop.f32.mrf.mxu3  ;;  %v1631_v10 = vadd.f32 %v1630_v6, %v5482_v54  ;;  %v1679_v11 = vpop.f32.mrf.mxu1  ;;  %v4503_v53 = vld [vmem:[%s5258_s24 + $0x3c8] sm:$0xf0]  ;;  %2627 = vmatpush.bf16.msrb.mxu0 %v4406_v57 }
 0x1e3   : > { %v4506_v24 = vor.u32 %v4722_v22, %v4503_v53  ;;  %v4720_v22 = vld [vmem:[%s5258_s24 + $0x3b4] sm:$0xf] }
 0x1e4   : > { %v5645_v12 = vadd.f32 %v1774_v9, %v1726_v8  ;;  %v5647_v13 = vadd.f32 %v1679_v11, %v1631_v10  ;;  %2115 = vmatmul.bf16.gmra.mxu0 %v4110_v36 }
 0x1e5   : > { %2164 = vmatmul.bf16.gmra.mxu1 %v4114_v7  ;;  %2770 = vmatpush.bf16.msrb.mxu3 %v4506_v24 }
 0x1e6   : > { %2213 = vmatmul.bf16.gmra.mxu2 %v4110_v36 }
 0x1e7   : > { %2262 = vmatmul.bf16.gmra.mxu3 %v4114_v7 }
 0x1e9   : > { %v1728_v54 = vpop.f32.mrf.mxu2  ;;  %v1632_v29 = vpop.f32.mrf.mxu0 }
 0x1ea   : > { %v1729_v30 = vadd.f32 %v1728_v54, %v5488_v1  ;;  %v1777_v31 = vpop.f32.mrf.mxu3  ;;  %v1633_v34 = vadd.f32 %v1632_v29, %v5490_v2  ;;  %v1681_v37 = vpop.f32.mrf.mxu1  ;;  %v4119_v1 = vld [vmem:[%s5343_s6 + $0x128] sm:$0xf0]  ;;  %v4118_v2 = vor.u32 %v4639_v56, %v4117_v51  ;;  %v4125_v51 = vld [vmem:[%s5343_s6 + $0x130] sm:$0xf]  ;;  %v4641_v56 = vld [vmem:[%s5343_s6 + $0x134] sm:$0xf0] }
 0x1eb   : > { %v4122_v3 = vor.u32 %v4638_v59, %v4119_v1  ;;  %v4640_v59 = vld [vmem:[%s5343_s6 + $0x134] sm:$0xf]  ;;  %v4494_v1 = vor.u32 %v4721_v58, %v4493_v50  ;;  %v4485_v50 = vld [vmem:[%s5258_s24 + $0x3a0] sm:$0xf]  ;;  %v4719_v58 = vld [vmem:[%s5258_s24 + $0x3a4] sm:$0xf0] }
 0x1ec   : > { %v5655_v38 = vadd.f32 %v1777_v31, %v1729_v30  ;;  %v5657_v39 = vadd.f32 %v1681_v37, %v1633_v34 }
 0x1ed   : > { %2673 = vmatpush.bf16.msrb.mxu1 %v4494_v1 }
 0x1f1   : > { %v1730_v62 = vpop.f32.mrf.mxu2  ;;  %v1635_v36 = vpop.f32.mrf.mxu0 }
 0x1f2   : > { %v1731_v6 = vadd.f32 %v1730_v62, %v5500_v19  ;;  %v1779_v7 = vpop.f32.mrf.mxu3  ;;  %v1636_v8 = vadd.f32 %v1635_v36, %v5502_v20  ;;  %v1684_v9 = vpop.f32.mrf.mxu1  ;;  %v4495_v19 = vld [vmem:[%s5258_s24 + $0x3b8] sm:$0xf0] }
 0x1f3   : > { %v4498_v54 = vor.u32 %v4720_v22, %v4495_v19  ;;  %v4718_v22 = vld [vmem:[%s5258_s24 + $0x3a4] sm:$0xf] }
 0x1f4   : > { %v5669_v10 = vadd.f32 %v1779_v7, %v1731_v6  ;;  %v5671_v11 = vadd.f32 %v1684_v9, %v1636_v8  ;;  %2120 = vmatmul.bf16.gmra.mxu0 %v4118_v2 }
 0x1f5   : > { %2169 = vmatmul.bf16.gmra.mxu1 %v4122_v3  ;;  %2771 = vmatpush.bf16.msrb.mxu3 %v4498_v54 }
 0x1f6   : > { %2218 = vmatmul.bf16.gmra.mxu2 %v4118_v2 }
 0x1f7   : > { %2267 = vmatmul.bf16.gmra.mxu3 %v4122_v3 }
 0x1f9   : > { %v1733_v20 = vpop.f32.mrf.mxu2  ;;  %v1637_v53 = vpop.f32.mrf.mxu0 }
 0x1fa   : > { %v1734_v29 = vadd.f32 %v1733_v20, %v5508_v32  ;;  %v1782_v24 = vpop.f32.mrf.mxu3  ;;  %v1638_v30 = vadd.f32 %v1637_v53, %v5510_v33  ;;  %v1686_v31 = vpop.f32.mrf.mxu1  ;;  %v4127_v32 = vld [vmem:[%s5343_s6 + $0x138] sm:$0xf0]  ;;  %v4126_v33 = vor.u32 %v4641_v56, %v4125_v51  ;;  %v4133_v51 = vld [vmem:[%s5343_s6 + $0x140] sm:$0xf]  ;;  %v4643_v56 = vld [vmem:[%s5343_s6 + $0x144] sm:$0xf0] }
 0x1fb   : > { %v4130_v62 = vor.u32 %v4640_v59, %v4127_v32  ;;  %v4642_v59 = vld [vmem:[%s5343_s6 + $0x144] sm:$0xf]  ;;  %v4486_v32 = vor.u32 %v4719_v58, %v4485_v50  ;;  %v4477_v50 = vld [vmem:[%s5258_s24 + $0x390] sm:$0xf]  ;;  %v4717_v58 = vld [vmem:[%s5258_s24 + $0x394] sm:$0xf0] }
 0x1fc   : > { %v5679_v34 = vadd.f32 %v1782_v24, %v1734_v29  ;;  %v5681_v37 = vadd.f32 %v1686_v31, %v1638_v30 }
 0x1fd   : > { %2674 = vmatpush.bf16.msrb.mxu1 %v4486_v32 }
 0x201   : > { %v1735_v35 = vpop.f32.mrf.mxu2  ;;  %v1640_v2 = vpop.f32.mrf.mxu0 }
 0x202   : > { %v1736_v36 = vadd.f32 %v1735_v35, %v5520_v52  ;;  %v1784_v3 = vpop.f32.mrf.mxu3  ;;  %v1641_v6 = vadd.f32 %v1640_v2, %v5522_v55  ;;  %v1689_v7 = vpop.f32.mrf.mxu1  ;;  %v4487_v52 = vld [vmem:[%s5258_s24 + $0x3a8] sm:$0xf0] }
 0x203   : > { %v4490_v20 = vor.u32 %v4718_v22, %v4487_v52  ;;  %v4716_v22 = vld [vmem:[%s5258_s24 + $0x394] sm:$0xf] }
 0x204   : > { %v5693_v8 = vadd.f32 %v1784_v3, %v1736_v36  ;;  %v5695_v9 = vadd.f32 %v1689_v7, %v1641_v6  ;;  %2125 = vmatmul.bf16.gmra.mxu0 %v4126_v33 }
 0x205   : > { %2174 = vmatmul.bf16.gmra.mxu1 %v4130_v62  ;;  %2772 = vmatpush.bf16.msrb.mxu3 %v4490_v20 }
 0x206   : > { %2223 = vmatmul.bf16.gmra.mxu2 %v4126_v33 }
 0x207   : > { %2272 = vmatmul.bf16.gmra.mxu3 %v4130_v62 }
 0x209   : > { %v1738_v55 = vpop.f32.mrf.mxu2  ;;  %v1642_v19 = vpop.f32.mrf.mxu0 }
 0x20a   : > { %v1739_v53 = vadd.f32 %v1738_v55, %v5528_v4  ;;  %v1787_v54 = vpop.f32.mrf.mxu3  ;;  %v1643_v29 = vadd.f32 %v1642_v19, %v5530_v5  ;;  %v1691_v24 = vpop.f32.mrf.mxu1  ;;  %v4135_v4 = vld [vmem:[%s5343_s6 + $0x148] sm:$0xf0]  ;;  %v4134_v5 = vor.u32 %v4643_v56, %v4133_v51  ;;  %v4141_v51 = vld [vmem:[%s5343_s6 + $0x150] sm:$0xf]  ;;  %v4645_v56 = vld [vmem:[%s5343_s6 + $0x154] sm:$0xf0] }
 0x20b   : > { %v4138_v35 = vor.u32 %v4642_v59, %v4135_v4  ;;  %v4644_v59 = vld [vmem:[%s5343_s6 + $0x154] sm:$0xf]  ;;  %v4478_v4 = vor.u32 %v4717_v58, %v4477_v50  ;;  %v4469_v50 = vld [vmem:[%s5258_s24 + $0x380] sm:$0xf]  ;;  %v4715_v58 = vld [vmem:[%s5258_s24 + $0x384] sm:$0xf0] }
 0x20c   : > { %v5703_v30 = vadd.f32 %v1787_v54, %v1739_v53  ;;  %v5705_v31 = vadd.f32 %v1691_v24, %v1643_v29 }
 0x20d   : > { %2675 = vmatpush.bf16.msrb.mxu1 %v4478_v4 }
 0x211   : > { %v1740_v1 = vpop.f32.mrf.mxu2  ;;  %v1645_v33 = vpop.f32.mrf.mxu0 }
 0x212   : > { %v1741_v2 = vadd.f32 %v1740_v1, %v5540_v25  ;;  %v1789_v62 = vpop.f32.mrf.mxu3  ;;  %v1646_v36 = vadd.f32 %v1645_v33, %v5542_v26  ;;  %v1694_v3 = vpop.f32.mrf.mxu1  ;;  %v4479_v25 = vld [vmem:[%s5258_s24 + $0x398] sm:$0xf0] }
 0x213   : > { %v4482_v55 = vor.u32 %v4716_v22, %v4479_v25  ;;  %v4714_v22 = vld [vmem:[%s5258_s24 + $0x384] sm:$0xf] }
 0x214   : > { %v5717_v6 = vadd.f32 %v1789_v62, %v1741_v2  ;;  %v5719_v7 = vadd.f32 %v1694_v3, %v1646_v36  ;;  %2130 = vmatmul.bf16.gmra.mxu0 %v4134_v5 }
 0x215   : > { %2179 = vmatmul.bf16.gmra.mxu1 %v4138_v35  ;;  %2773 = vmatpush.bf16.msrb.mxu3 %v4482_v55 }
 0x216   : > { %2228 = vmatmul.bf16.gmra.mxu2 %v4134_v5 }
 0x217   : > { %2277 = vmatmul.bf16.gmra.mxu3 %v4138_v35 }
 0x219   : > { %v1743_v26 = vpop.f32.mrf.mxu2  ;;  %v1647_v52 = vpop.f32.mrf.mxu0 }
 0x21a   : > { %v1744_v19 = vadd.f32 %v1743_v26, %v5548_v41  ;;  %v1792_v20 = vpop.f32.mrf.mxu3  ;;  %v1648_v53 = vadd.f32 %v1647_v52, %v5550_v42  ;;  %v1696_v54 = vpop.f32.mrf.mxu1  ;;  %v4143_v41 = vld [vmem:[%s5343_s6 + $0x158] sm:$0xf0]  ;;  %v4142_v42 = vor.u32 %v4645_v56, %v4141_v51  ;;  %v4149_v51 = vld [vmem:[%s5343_s6 + $0x160] sm:$0xf]  ;;  %v4647_v56 = vld [vmem:[%s5343_s6 + $0x164] sm:$0xf0] }
 0x21b   : > { %v4146_v1 = vor.u32 %v4644_v59, %v4143_v41  ;;  %v4646_v59 = vld [vmem:[%s5343_s6 + $0x164] sm:$0xf]  ;;  %v4470_v41 = vor.u32 %v4715_v58, %v4469_v50  ;;  %v4150_v4 = vor.u32 %v4647_v56, %v4149_v51 }
 0x21c   : > { %v5727_v29 = vadd.f32 %v1792_v20, %v1744_v19  ;;  %v5729_v24 = vadd.f32 %v1696_v54, %v1648_v53 }
 0x21d   : > { %2676 = vmatpush.bf16.msrb.mxu1 %v4470_v41 }
 0x221   : > { %v1745_v32 = vpop.f32.mrf.mxu2  ;;  %v1650_v5 = vpop.f32.mrf.mxu0 }
 0x222   : > { %v1746_v33 = vadd.f32 %v1745_v32, %v5560_v63  ;;  %v1794_v35 = vpop.f32.mrf.mxu3  ;;  %v1651_v2 = vadd.f32 %v1650_v5, %v5562_v0  ;;  %v1699_v62 = vpop.f32.mrf.mxu1  ;;  %v4471_v63 = vld [vmem:[%s5258_s24 + $0x388] sm:$0xf0] }
 0x223   : > { %v4474_v26 = vor.u32 %v4714_v22, %v4471_v63 }
 0x224   : > { %v5741_v36 = vadd.f32 %v1794_v35, %v1746_v33  ;;  %v5743_v3 = vadd.f32 %v1699_v62, %v1651_v2  ;;  %2135 = vmatmul.bf16.gmra.mxu0 %v4142_v42 }
 0x225   : > { %2184 = vmatmul.bf16.gmra.mxu1 %v4146_v1  ;;  %2774 = vmatpush.bf16.msrb.mxu3 %v4474_v26  ;;  %v4649_v26 = vld [vmem:[%s5343_s6 + $0x174] sm:$0xf0] }
 0x226   : > { %2233 = vmatmul.bf16.gmra.mxu2 %v4142_v42 }
 0x227   : > { %2282 = vmatmul.bf16.gmra.mxu3 %v4146_v1 }
 0x229   : > { %v1748_v0 = vpop.f32.mrf.mxu2  ;;  %v1652_v25 = vpop.f32.mrf.mxu0 }
 0x22a   : > { %v1749_v52 = vadd.f32 %v1748_v0, %v5568_v15  ;;  %v1797_v55 = vpop.f32.mrf.mxu3  ;;  %v1653_v19 = vadd.f32 %v1652_v25, %v5570_v16  ;;  %v1701_v20 = vpop.f32.mrf.mxu1  ;;  %v4151_v15 = vld [vmem:[%s5343_s6 + $0x168] sm:$0xf0]  ;;  %v4157_v25 = vld [vmem:[%s5343_s6 + $0x170] sm:$0xf] }
 0x22b   : > { %v4154_v32 = vor.u32 %v4646_v59, %v4151_v15 }
 0x22c   : > { %v5751_v53 = vadd.f32 %v1797_v55, %v1749_v52  ;;  %v5753_v54 = vadd.f32 %v1701_v20, %v1653_v19  ;;  %v4648_v52 = vld [vmem:[%s5343_s6 + $0x174] sm:$0xf]  ;;  %v4159_v55 = vld [vmem:[%s5343_s6 + $0x178] sm:$0xf0]  ;;  %v4158_v19 = vor.u32 %v4649_v26, %v4157_v25 }
 0x22d   : > { %v4162_v49 = vor.u32 %v4648_v52, %v4159_v55 }
 0x231   : > { %v1750_v16 = vpop.f32.mrf.mxu2  ;;  %v1655_v42 = vpop.f32.mrf.mxu0 }
 0x232   : > { %v1751_v5 = vadd.f32 %v1750_v16, %v5580_v44  ;;  %v1799_v1 = vpop.f32.mrf.mxu3  ;;  %v1656_v33 = vadd.f32 %v1655_v42, %v5582_v45  ;;  %v1704_v35 = vpop.f32.mrf.mxu1  ;;  %v4341_v42 = vld [vmem:[%s5343_s6 + $0x180] sm:$0xf] }
 0x234   : > { %v5765_v2 = vadd.f32 %v1799_v1, %v1751_v5  ;;  %v5767_v62 = vadd.f32 %v1704_v35, %v1656_v33  ;;  %2140 = vmatmul.bf16.gmra.mxu0 %v4150_v4  ;;  %v4682_v5 = vld [vmem:[%s5343_s6 + $0x184] sm:$0xf]  ;;  %v4343_v1 = vld [vmem:[%s5343_s6 + $0x188] sm:$0xf0] }
 0x235   : > { %2189 = vmatmul.bf16.gmra.mxu1 %v4154_v32 }
 0x236   : > { %2238 = vmatmul.bf16.gmra.mxu2 %v4150_v4 }
 0x237   : > { %2287 = vmatmul.bf16.gmra.mxu3 %v4154_v32  ;;  %v4683_v32 = vld [vmem:[%s5343_s6 + $0x184] sm:$0xf0] }
 0x238   : > { %v4342_v33 = vor.u32 %v4683_v32, %v4341_v42 }
 0x239   : > { %v1753_v18 = vpop.f32.mrf.mxu2  ;;  %v1657_v21 = vpop.f32.mrf.mxu0 }
 0x23a   : > { %v1754_v44 = vadd.f32 %v1753_v18, %v5588_v60  ;;  %v1802_v22 = vpop.f32.mrf.mxu3  ;;  %v1658_v45 = vadd.f32 %v1657_v21, %v5590_v61  ;;  %v1706_v23 = vpop.f32.mrf.mxu1  ;;  %v4346_v21 = vor.u32 %v4682_v5, %v4343_v1 }
 0x23c   : > { %v5771_v63 = vadd.f32 %v1802_v22, %v1754_v44  ;;  %v5773_v0 = vadd.f32 %v1706_v23, %v1658_v45 }
 0x241   : > { %v1755_v20 = vpop.f32.mrf.mxu2  ;;  %v1660_v46 = vpop.f32.mrf.mxu0 }
 0x242   : > { %v1756_v50 = vadd.f32 %v1755_v20, %v5600_v27  ;;  %v1804_v51 = vpop.f32.mrf.mxu3  ;;  %v1661_v60 = vadd.f32 %v1660_v46, %v5602_v28  ;;  %v1709_v61 = vpop.f32.mrf.mxu1 }
 0x244   : > { %v5781_v56 = vadd.f32 %v1804_v51, %v1756_v50  ;;  %v5783_v57 = vadd.f32 %v1709_v61, %v1661_v60  ;;  %2145 = vmatmul.bf16.gmra.mxu0 %v4158_v19  ;;  %v4685_v50 = vld [vmem:[%s5343_s6 + $0x194] sm:$0xf0]  ;;  %v4684_v51 = vld [vmem:[%s5343_s6 + $0x194] sm:$0xf] }
 0x245   : > { %2194 = vmatmul.bf16.gmra.mxu1 %v4162_v49 }
 0x246   : > { %2243 = vmatmul.bf16.gmra.mxu2 %v4158_v19 }
 0x247   : > { %2292 = vmatmul.bf16.gmra.mxu3 %v4162_v49  ;;  %v4349_v49 = vld [vmem:[%s5343_s6 + $0x190] sm:$0xf] }
 0x248   : > { %v4350_v60 = vor.u32 %v4685_v50, %v4349_v49 }
 0x249   : > { %v1758_v58 = vpop.f32.mrf.mxu2  ;;  %v1662_v59 = vpop.f32.mrf.mxu0 }
 0x24a   : > { %v1759_v27 = vadd.f32 %v1758_v58, %v5608_v47  ;;  %v1807_v15 = vpop.f32.mrf.mxu3  ;;  %v1663_v28 = vadd.f32 %v1662_v59, %v5610_v48  ;;  %v1711_v41 = vpop.f32.mrf.mxu1 }
 0x24c   : > { %v5787_v4 = vadd.f32 %v1807_v15, %v1759_v27  ;;  %v5789_v16 = vadd.f32 %v1711_v41, %v1663_v28 }
 0x251   : > { %v1760_v35 = vpop.f32.mrf.mxu2  ;;  %v2111_v18 = vpop.f32.mrf.mxu0 }
 0x252   : > { %v1761_v44 = vadd.f32 %v1760_v35, %v5621_v14  ;;  %v1809_v22 = vpop.f32.mrf.mxu3  ;;  %v2160_v47 = vpop.f32.mrf.mxu1 }
 0x253   : > { %v2161_v45 = vadd.f32 %v2160_v47, %v2111_v18 }
 0x254   : > { %v5796_v48 = vadd.f32 %v1809_v22, %v1761_v44  ;;  %2628 = vmatmul.bf16.vlgmr.msrb.gmra.mxu0 %v4342_v33  ;;  %v4687_v44 = vld [vmem:[%s5343_s6 + $0x1a4] sm:$0xf0]  ;;  %v4686_v22 = vld [vmem:[%s5343_s6 + $0x1a4] sm:$0xf] }
 0x255   : > { %v5799_v23 = vadd.f32 %v2161_v45, %v5623_v17  ;;  %2677 = vmatmul.bf16.vlgmr.msrb.gmra.mxu1 %v4346_v21  ;;  %v4351_v17 = vld [vmem:[%s5343_s6 + $0x198] sm:$0xf0] }
 0x256   : > { %2726 = vmatmul.bf16.vlgmr.msrb.gmra.mxu2 %v4342_v33  ;;  %v4354_v59 = vor.u32 %v4684_v51, %v4351_v17 }
 0x257   : > { %2775 = vmatmul.bf16.vlgmr.msrb.gmra.mxu3 %v4346_v21 }
 0x259   : > { %v2209_v25 = vpop.f32.mrf.mxu2  ;;  %v2113_v26 = vpop.f32.mrf.mxu0 }
 0x25a   : > { %v2258_v52 = vpop.f32.mrf.mxu3  ;;  %v2162_v14 = vpop.f32.mrf.mxu1 }
 0x25b   : > { %v2259_v55 = vadd.f32 %v2258_v52, %v2209_v25  ;;  %v2163_v19 = vadd.f32 %v2162_v14, %v2113_v26 }
 0x25d   : > { %v5802_v20 = vadd.f32 %v2259_v55, %v5631_v40  ;;  %v5805_v46 = vadd.f32 %v2163_v19, %v5633_v43 }
 0x261   : > { %v2211_v61 = vpop.f32.mrf.mxu2  ;;  %v2116_v58 = vpop.f32.mrf.mxu0 }
 0x262   : > { %v2260_v27 = vpop.f32.mrf.mxu3  ;;  %v2165_v15 = vpop.f32.mrf.mxu1 }
 0x263   : > { %v2261_v28 = vadd.f32 %v2260_v27, %v2211_v61  ;;  %v2166_v41 = vadd.f32 %v2165_v15, %v2116_v58  ;;  %v4689_v27 = vld [vmem:[%s5343_s6 + $0x1b4] sm:$0xf0]  ;;  %v4688_v15 = vld [vmem:[%s5343_s6 + $0x1b4] sm:$0xf] }
 0x264   : > { %2633 = vmatmul.bf16.gmra.mxu0 %v4350_v60 }
 0x265   : > { %v5812_v40 = vadd.f32 %v2261_v28, %v5645_v12  ;;  %v5815_v43 = vadd.f32 %v2166_v41, %v5647_v13  ;;  %2682 = vmatmul.bf16.gmra.mxu1 %v4354_v59  ;;  %v4357_v12 = vld [vmem:[%s5343_s6 + $0x1a0] sm:$0xf]  ;;  %v4359_v13 = vld [vmem:[%s5343_s6 + $0x1a8] sm:$0xf0] }
 0x266   : > { %2731 = vmatmul.bf16.gmra.mxu2 %v4350_v60  ;;  %v4358_v47 = vor.u32 %v4687_v44, %v4357_v12  ;;  %v4362_v26 = vor.u32 %v4686_v22, %v4359_v13 }
 0x267   : > { %2780 = vmatmul.bf16.gmra.mxu3 %v4354_v59 }
 0x269   : > { %v2214_v42 = vpop.f32.mrf.mxu2  ;;  %v2118_v32 = vpop.f32.mrf.mxu0 }
 0x26a   : > { %v2263_v5 = vpop.f32.mrf.mxu3  ;;  %v2167_v1 = vpop.f32.mrf.mxu1 }
 0x26b   : > { %v2264_v33 = vadd.f32 %v2263_v5, %v2214_v42  ;;  %v2168_v35 = vadd.f32 %v2167_v1, %v2118_v32 }
 0x26d   : > { %v5818_v18 = vadd.f32 %v2264_v33, %v5655_v38  ;;  %v5821_v21 = vadd.f32 %v2168_v35, %v5657_v39 }
 0x271   : > { %v2216_v45 = vpop.f32.mrf.mxu2  ;;  %v2121_v25 = vpop.f32.mrf.mxu0 }
 0x272   : > { %v2265_v52 = vpop.f32.mrf.mxu3  ;;  %v2170_v14 = vpop.f32.mrf.mxu1 }
 0x273   : > { %v2266_v55 = vadd.f32 %v2265_v52, %v2216_v45  ;;  %v2171_v19 = vadd.f32 %v2170_v14, %v2121_v25  ;;  %v4691_v52 = vld [vmem:[%s5343_s6 + $0x1c4] sm:$0xf0]  ;;  %v4690_v14 = vld [vmem:[%s5343_s6 + $0x1c4] sm:$0xf] }
 0x274   : > { %2638 = vmatmul.bf16.gmra.mxu0 %v4358_v47 }
 0x275   : > { %v5828_v38 = vadd.f32 %v2266_v55, %v5669_v10  ;;  %v5831_v39 = vadd.f32 %v2171_v19, %v5671_v11  ;;  %2687 = vmatmul.bf16.gmra.mxu1 %v4362_v26  ;;  %v4365_v10 = vld [vmem:[%s5343_s6 + $0x1b0] sm:$0xf]  ;;  %v4367_v11 = vld [vmem:[%s5343_s6 + $0x1b8] sm:$0xf0] }
 0x276   : > { %2736 = vmatmul.bf16.gmra.mxu2 %v4358_v47  ;;  %v4366_v28 = vor.u32 %v4689_v27, %v4365_v10  ;;  %v4370_v32 = vor.u32 %v4688_v15, %v4367_v11 }
 0x277   : > { %2785 = vmatmul.bf16.gmra.mxu3 %v4362_v26 }
 0x279   : > { %v2219_v49 = vpop.f32.mrf.mxu2  ;;  %v2123_v50 = vpop.f32.mrf.mxu0 }
 0x27a   : > { %v2268_v51 = vpop.f32.mrf.mxu3  ;;  %v2172_v17 = vpop.f32.mrf.mxu1 }
 0x27b   : > { %v2269_v60 = vadd.f32 %v2268_v51, %v2219_v49  ;;  %v2173_v61 = vadd.f32 %v2172_v17, %v2123_v50 }
 0x27d   : > { %v5834_v58 = vadd.f32 %v2269_v60, %v5679_v34  ;;  %v5837_v59 = vadd.f32 %v2173_v61, %v5681_v37 }
 0x281   : > { %v2221_v41 = vpop.f32.mrf.mxu2  ;;  %v2126_v42 = vpop.f32.mrf.mxu0 }
 0x282   : > { %v2270_v5 = vpop.f32.mrf.mxu3  ;;  %v2175_v1 = vpop.f32.mrf.mxu1 }
 0x283   : > { %v2271_v33 = vadd.f32 %v2270_v5, %v2221_v41  ;;  %v2176_v35 = vadd.f32 %v2175_v1, %v2126_v42  ;;  %v4693_v5 = vld [vmem:[%s5343_s6 + $0x1d4] sm:$0xf0]  ;;  %v4692_v1 = vld [vmem:[%s5343_s6 + $0x1d4] sm:$0xf] }
 0x284   : > { %2643 = vmatmul.bf16.gmra.mxu0 %v4366_v28 }
 0x285   : > { %v5844_v34 = vadd.f32 %v2271_v33, %v5693_v8  ;;  %v5847_v37 = vadd.f32 %v2176_v35, %v5695_v9  ;;  %2692 = vmatmul.bf16.gmra.mxu1 %v4370_v32  ;;  %v4373_v8 = vld [vmem:[%s5343_s6 + $0x1c0] sm:$0xf]  ;;  %v4375_v9 = vld [vmem:[%s5343_s6 + $0x1c8] sm:$0xf0] }
 0x286   : > { %2741 = vmatmul.bf16.gmra.mxu2 %v4366_v28  ;;  %v4374_v55 = vor.u32 %v4691_v52, %v4373_v8  ;;  %v4378_v50 = vor.u32 %v4690_v14, %v4375_v9 }
 0x287   : > { %2790 = vmatmul.bf16.gmra.mxu3 %v4370_v32 }
 0x289   : > { %v2224_v12 = vpop.f32.mrf.mxu2  ;;  %v2128_v44 = vpop.f32.mrf.mxu0 }
 0x28a   : > { %v2273_v22 = vpop.f32.mrf.mxu3  ;;  %v2177_v13 = vpop.f32.mrf.mxu1 }
 0x28b   : > { %v2274_v47 = vadd.f32 %v2273_v22, %v2224_v12  ;;  %v2178_v45 = vadd.f32 %v2177_v13, %v2128_v44 }
 0x28d   : > { %v5850_v25 = vadd.f32 %v2274_v47, %v5703_v30  ;;  %v5853_v26 = vadd.f32 %v2178_v45, %v5705_v31 }
 0x291   : > { %v2226_v19 = vpop.f32.mrf.mxu2  ;;  %v2131_v49 = vpop.f32.mrf.mxu0 }
 0x292   : > { %v2275_v51 = vpop.f32.mrf.mxu3  ;;  %v2180_v17 = vpop.f32.mrf.mxu1 }
 0x293   : > { %v2276_v60 = vadd.f32 %v2275_v51, %v2226_v19  ;;  %v2181_v61 = vadd.f32 %v2180_v17, %v2131_v49  ;;  %v4695_v51 = vld [vmem:[%s5343_s6 + $0x1e4] sm:$0xf0]  ;;  %v4694_v17 = vld [vmem:[%s5343_s6 + $0x1e4] sm:$0xf] }
 0x294   : > { %2648 = vmatmul.bf16.gmra.mxu0 %v4374_v55 }
 0x295   : > { %v5860_v30 = vadd.f32 %v2276_v60, %v5717_v6  ;;  %v5863_v31 = vadd.f32 %v2181_v61, %v5719_v7  ;;  %2697 = vmatmul.bf16.gmra.mxu1 %v4378_v50  ;;  %v4381_v6 = vld [vmem:[%s5343_s6 + $0x1d0] sm:$0xf]  ;;  %v4383_v7 = vld [vmem:[%s5343_s6 + $0x1d8] sm:$0xf0] }
 0x296   : > { %2746 = vmatmul.bf16.gmra.mxu2 %v4374_v55  ;;  %v4382_v33 = vor.u32 %v4693_v5, %v4381_v6  ;;  %v4386_v44 = vor.u32 %v4692_v1, %v4383_v7 }
 0x297   : > { %2795 = vmatmul.bf16.gmra.mxu3 %v4378_v50 }
 0x299   : > { %v2229_v10 = vpop.f32.mrf.mxu2  ;;  %v2133_v27 = vpop.f32.mrf.mxu0 }
 0x29a   : > { %v2278_v15 = vpop.f32.mrf.mxu3  ;;  %v2182_v11 = vpop.f32.mrf.mxu1 }
 0x29b   : > { %v2279_v28 = vadd.f32 %v2278_v15, %v2229_v10  ;;  %v2183_v41 = vadd.f32 %v2182_v11, %v2133_v27 }
 0x29d   : > { %v5866_v42 = vadd.f32 %v2279_v28, %v5727_v29  ;;  %v5869_v32 = vadd.f32 %v2183_v41, %v5729_v24 }
 0x2a1   : > { %v2231_v35 = vpop.f32.mrf.mxu2  ;;  %v2136_v12 = vpop.f32.mrf.mxu0 }
 0x2a2   : > { %v2280_v22 = vpop.f32.mrf.mxu3  ;;  %v2185_v13 = vpop.f32.mrf.mxu1 }
 0x2a3   : > { %v2281_v47 = vadd.f32 %v2280_v22, %v2231_v35  ;;  %v2186_v45 = vadd.f32 %v2185_v13, %v2136_v12  ;;  %v4697_v22 = vld [vmem:[%s5343_s6 + $0x1f4] sm:$0xf0]  ;;  %v4696_v13 = vld [vmem:[%s5343_s6 + $0x1f4] sm:$0xf] }
 0x2a4   : > { %2653 = vmatmul.bf16.gmra.mxu0 %v4382_v33 }
 0x2a5   : > { %v5876_v29 = vadd.f32 %v2281_v47, %v5741_v36  ;;  %v5879_v24 = vadd.f32 %v2186_v45, %v5743_v3  ;;  %2702 = vmatmul.bf16.gmra.mxu1 %v4386_v44  ;;  %v4389_v36 = vld [vmem:[%s5343_s6 + $0x1e0] sm:$0xf]  ;;  %v4391_v3 = vld [vmem:[%s5343_s6 + $0x1e8] sm:$0xf0] }
 0x2a6   : > { %2751 = vmatmul.bf16.gmra.mxu2 %v4382_v33  ;;  %v4390_v60 = vor.u32 %v4695_v51, %v4389_v36  ;;  %v4394_v27 = vor.u32 %v4694_v17, %v4391_v3 }
 0x2a7   : > { %2800 = vmatmul.bf16.gmra.mxu3 %v4386_v44 }
 0x2a9   : > { %v2234_v8 = vpop.f32.mrf.mxu2  ;;  %v2138_v52 = vpop.f32.mrf.mxu0 }
 0x2aa   : > { %v2283_v14 = vpop.f32.mrf.mxu3  ;;  %v2187_v9 = vpop.f32.mrf.mxu1 }
 0x2ab   : > { %v2284_v55 = vadd.f32 %v2283_v14, %v2234_v8  ;;  %v2188_v19 = vadd.f32 %v2187_v9, %v2138_v52 }
 0x2ad   : > { %v5882_v49 = vadd.f32 %v2284_v55, %v5751_v53  ;;  %v5885_v50 = vadd.f32 %v2188_v19, %v5753_v54 }
 0x2b1   : > { %v2236_v61 = vpop.f32.mrf.mxu2  ;;  %v2141_v10 = vpop.f32.mrf.mxu0 }
 0x2b2   : > { %v2285_v15 = vpop.f32.mrf.mxu3  ;;  %v2190_v11 = vpop.f32.mrf.mxu1 }
 0x2b3   : > { %v2286_v28 = vadd.f32 %v2285_v15, %v2236_v61  ;;  %v2191_v41 = vadd.f32 %v2190_v11, %v2141_v10 }
 0x2b4   : > { %2658 = vmatmul.bf16.gmra.mxu0 %v4390_v60 }
 0x2b5   : > { %v5892_v53 = vadd.f32 %v2286_v28, %v5765_v2  ;;  %v5895_v54 = vadd.f32 %v2191_v41, %v5767_v62  ;;  %2707 = vmatmul.bf16.gmra.mxu1 %v4394_v27  ;;  %v4397_v2 = vld [vmem:[%s5343_s6 + $0x1f0] sm:$0xf]  ;;  %v4399_v62 = vld [vmem:[%s5343_s6 + $0x1f8] sm:$0xf0] }
 0x2b6   : > { %2756 = vmatmul.bf16.gmra.mxu2 %v4390_v60  ;;  %v4398_v47 = vor.u32 %v4697_v22, %v4397_v2  ;;  %v4402_v52 = vor.u32 %v4696_v13, %v4399_v62 }
 0x2b7   : > { %2805 = vmatmul.bf16.gmra.mxu3 %v4394_v27 }
 0x2b9   : > { %v2239_v6 = vpop.f32.mrf.mxu2  ;;  %v2143_v5 = vpop.f32.mrf.mxu0 }
 0x2ba   : > { %v2288_v1 = vpop.f32.mrf.mxu3  ;;  %v2192_v7 = vpop.f32.mrf.mxu1 }
 0x2bb   : > { %v2289_v33 = vadd.f32 %v2288_v1, %v2239_v6  ;;  %v2193_v35 = vadd.f32 %v2192_v7, %v2143_v5 }
 0x2bd   : > { %v5898_v12 = vadd.f32 %v2289_v33, %v5771_v63  ;;  %v5901_v44 = vadd.f32 %v2193_v35, %v5773_v0 }
 0x2c1   : > { %v2241_v45 = vpop.f32.mrf.mxu2  ;;  %v2146_v8 = vpop.f32.mrf.mxu0 }
 0x2c2   : > { %v2290_v14 = vpop.f32.mrf.mxu3  ;;  %v2195_v9 = vpop.f32.mrf.mxu1 }
 0x2c3   : > { %v2291_v55 = vadd.f32 %v2290_v14, %v2241_v45  ;;  %v2196_v19 = vadd.f32 %v2195_v9, %v2146_v8 }
 0x2c4   : > { %2663 = vmatmul.bf16.gmra.mxu0 %v4398_v47 }
 0x2c5   : > { %v5908_v36 = vadd.f32 %v2291_v55, %v5781_v56  ;;  %v5911_v63 = vadd.f32 %v2196_v19, %v5783_v57  ;;  %2712 = vmatmul.bf16.gmra.mxu1 %v4402_v52 }
 0x2c6   : > { %2761 = vmatmul.bf16.gmra.mxu2 %v4398_v47 }
 0x2c7   : > { %2810 = vmatmul.bf16.gmra.mxu3 %v4402_v52 }
 0x2c9   : > { %v2244_v0 = vpop.f32.mrf.mxu2  ;;  %v2148_v51 = vpop.f32.mrf.mxu0 }
 0x2ca   : > { %v2293_v17 = vpop.f32.mrf.mxu3  ;;  %v2197_v3 = vpop.f32.mrf.mxu1 }
 0x2cb   : > { %v2294_v60 = vadd.f32 %v2293_v17, %v2244_v0  ;;  %v2198_v61 = vadd.f32 %v2197_v3, %v2148_v51 }
 0x2cd   : > { %v5914_v10 = vadd.f32 %v2294_v60, %v5787_v4  ;;  %v5917_v27 = vadd.f32 %v2198_v61, %v5789_v16 }
 0x2d1   : > { %v2246_v56 = vpop.f32.mrf.mxu2  ;;  %v2629_v15 = vpop.f32.mrf.mxu0 }
 0x2d2   : > { %v2295_v11 = vpop.f32.mrf.mxu3  ;;  %v2678_v57 = vpop.f32.mrf.mxu1 }
 0x2d3   : > { %v2296_v28 = vadd.f32 %v2295_v11, %v2246_v56  ;;  %v2679_v41 = vadd.f32 %v2678_v57, %v2629_v15 }
 0x2d5   : > { %v5920_v6 = vadd.f32 %v2296_v28, %v5796_v48  ;;  %v5923_v5 = vadd.f32 %v2679_v41, %v5799_v23 }
 0x2d9   : > { %v2727_v1 = vpop.f32.mrf.mxu2  ;;  %v2631_v7 = vpop.f32.mrf.mxu0 }
 0x2da   : > { %v2776_v33 = vpop.f32.mrf.mxu3  ;;  %v2680_v4 = vpop.f32.mrf.mxu1 }
 0x2db   : > { %v2777_v35 = vadd.f32 %v2776_v33, %v2727_v1  ;;  %v2681_v2 = vadd.f32 %v2680_v4, %v2631_v7 }
 0x2dd   : > { %v5926_v16 = vadd.f32 %v2777_v35, %v5802_v20  ;;  %v5929_v22 = vadd.f32 %v2681_v2, %v5805_v46 }
 0x2e1   : > { %v2729_v13 = vpop.f32.mrf.mxu2  ;;  %v2634_v62 = vpop.f32.mrf.mxu0 }
 0x2e2   : > { %v2778_v47 = vpop.f32.mrf.mxu3  ;;  %v2683_v48 = vpop.f32.mrf.mxu1 }
 0x2e3   : > { %v2779_v45 = vadd.f32 %v2778_v47, %v2729_v13  ;;  %v2684_v8 = vadd.f32 %v2683_v48, %v2634_v62 }
 0x2e5   : > { %v5932_v23 = vadd.f32 %v2779_v45, %v5812_v40  ;;  %v5935_v52 = vadd.f32 %v2684_v8, %v5815_v43 }
 0x2e9   : > { %v2732_v14 = vpop.f32.mrf.mxu2  ;;  %v2636_v9 = vpop.f32.mrf.mxu0 }
 0x2ea   : > { %v2781_v55 = vpop.f32.mrf.mxu3  ;;  %v2685_v20 = vpop.f32.mrf.mxu1 }
 0x2eb   : > { %v2782_v19 = vadd.f32 %v2781_v55, %v2732_v14  ;;  %v2686_v0 = vadd.f32 %v2685_v20, %v2636_v9 }
 0x2ed   : > { %v5938_v46 = vadd.f32 %v2782_v19, %v5818_v18  ;;  %v5941_v51 = vadd.f32 %v2686_v0, %v5821_v21 }
 0x2f1   : > { %v2734_v17 = vpop.f32.mrf.mxu2  ;;  %v2639_v3 = vpop.f32.mrf.mxu0 }
 0x2f2   : > { %v2783_v60 = vpop.f32.mrf.mxu3  ;;  %v2688_v40 = vpop.f32.mrf.mxu1 }
 0x2f3   : > { %v2784_v61 = vadd.f32 %v2783_v60, %v2734_v17  ;;  %v2689_v56 = vadd.f32 %v2688_v40, %v2639_v3 }
 0x2f5   : > { %v5944_v43 = vadd.f32 %v2784_v61, %v5828_v38  ;;  %v5947_v15 = vadd.f32 %v2689_v56, %v5831_v39 }
 0x2f9   : > { %v2737_v11 = vpop.f32.mrf.mxu2  ;;  %v2641_v57 = vpop.f32.mrf.mxu0 }
 0x2fa   : > { %v2786_v28 = vpop.f32.mrf.mxu3  ;;  %v2690_v18 = vpop.f32.mrf.mxu1 }
 0x2fb   : > { %v2787_v41 = vadd.f32 %v2786_v28, %v2737_v11  ;;  %v2691_v1 = vadd.f32 %v2690_v18, %v2641_v57 }
 0x2fd   : > { %v5950_v21 = vadd.f32 %v2787_v41, %v5834_v58  ;;  %v5953_v7 = vadd.f32 %v2691_v1, %v5837_v59 }
 0x301   : > { %v2739_v33 = vpop.f32.mrf.mxu2  ;;  %v2644_v4 = vpop.f32.mrf.mxu0 }
 0x302   : > { %v2788_v35 = vpop.f32.mrf.mxu3  ;;  %v2693_v38 = vpop.f32.mrf.mxu1 }
 0x303   : > { %v2789_v2 = vadd.f32 %v2788_v35, %v2739_v33  ;;  %v2694_v13 = vadd.f32 %v2693_v38, %v2644_v4 }
 0x305   : > { %v5956_v39 = vadd.f32 %v2789_v2, %v5844_v34  ;;  %v5959_v62 = vadd.f32 %v2694_v13, %v5847_v37 }
 0x309   : > { %v2742_v47 = vpop.f32.mrf.mxu2  ;;  %v2646_v48 = vpop.f32.mrf.mxu0 }
 0x30a   : > { %v2791_v45 = vpop.f32.mrf.mxu3  ;;  %v2695_v58 = vpop.f32.mrf.mxu1 }
 0x30b   : > { %v2792_v8 = vadd.f32 %v2791_v45, %v2742_v47  ;;  %v2696_v14 = vadd.f32 %v2695_v58, %v2646_v48 }
 0x30d   : > { %v5962_v59 = vadd.f32 %v2792_v8, %v5850_v25  ;;  %v5965_v9 = vadd.f32 %v2696_v14, %v5853_v26 }
 0x311   : > { %v2744_v55 = vpop.f32.mrf.mxu2  ;;  %v2649_v20 = vpop.f32.mrf.mxu0 }
 0x312   : > { %v2793_v19 = vpop.f32.mrf.mxu3  ;;  %v2698_v34 = vpop.f32.mrf.mxu1 }
 0x313   : > { %v2794_v0 = vadd.f32 %v2793_v19, %v2744_v55  ;;  %v2699_v17 = vadd.f32 %v2698_v34, %v2649_v20 }
 0x315   : > { %v5968_v37 = vadd.f32 %v2794_v0, %v5860_v30  ;;  %v5971_v3 = vadd.f32 %v2699_v17, %v5863_v31 }
 0x319   : > { %v2747_v60 = vpop.f32.mrf.mxu2  ;;  %v2651_v40 = vpop.f32.mrf.mxu0 }
 0x31a   : > { %v2796_v61 = vpop.f32.mrf.mxu3  ;;  %v2700_v25 = vpop.f32.mrf.mxu1 }
 0x31b   : > { %v2797_v56 = vadd.f32 %v2796_v61, %v2747_v60  ;;  %v2701_v11 = vadd.f32 %v2700_v25, %v2651_v40 }
 0x31d   : > { %v5974_v26 = vadd.f32 %v2797_v56, %v5866_v42  ;;  %v5977_v57 = vadd.f32 %v2701_v11, %v5869_v32 }
 0x321   : > { %v2749_v28 = vpop.f32.mrf.mxu2  ;;  %v2654_v18 = vpop.f32.mrf.mxu0 }
 0x322   : > { %v2798_v41 = vpop.f32.mrf.mxu3  ;;  %v2703_v30 = vpop.f32.mrf.mxu1 }
 0x323   : > { %v2799_v1 = vadd.f32 %v2798_v41, %v2749_v28  ;;  %v2704_v33 = vadd.f32 %v2703_v30, %v2654_v18 }
 0x325   : > { %v5980_v31 = vadd.f32 %v2799_v1, %v5876_v29  ;;  %v5983_v4 = vadd.f32 %v2704_v33, %v5879_v24 }
 0x329   : > { %v2752_v35 = vpop.f32.mrf.mxu2  ;;  %v2656_v38 = vpop.f32.mrf.mxu0 }
 0x32a   : > { %v2801_v2 = vpop.f32.mrf.mxu3  ;;  %v2705_v42 = vpop.f32.mrf.mxu1 }
 0x32b   : > { %v2802_v13 = vadd.f32 %v2801_v2, %v2752_v35  ;;  %v2706_v47 = vadd.f32 %v2705_v42, %v2656_v38 }
 0x32d   : > { %v5986_v32 = vadd.f32 %v2802_v13, %v5882_v49  ;;  %v5989_v48 = vadd.f32 %v2706_v47, %v5885_v50 }
 0x331   : > { %v2754_v45 = vpop.f32.mrf.mxu2  ;;  %v2659_v58 = vpop.f32.mrf.mxu0 }
 0x332   : > { %v2803_v8 = vpop.f32.mrf.mxu3  ;;  %v2708_v29 = vpop.f32.mrf.mxu1 }
 0x333   : > { %v2804_v14 = vadd.f32 %v2803_v8, %v2754_v45  ;;  %v2709_v55 = vadd.f32 %v2708_v29, %v2659_v58 }
 0x335   : > { %v5992_v24 = vadd.f32 %v2804_v14, %v5892_v53  ;;  %v5995_v20 = vadd.f32 %v2709_v55, %v5895_v54 }
 0x339   : > { %v2757_v19 = vpop.f32.mrf.mxu2  ;;  %v2661_v34 = vpop.f32.mrf.mxu0 }
 0x33a   : > { %v2806_v0 = vpop.f32.mrf.mxu3  ;;  %v2710_v49 = vpop.f32.mrf.mxu1 }
 0x33b   : > { %v2807_v17 = vadd.f32 %v2806_v0, %v2757_v19  ;;  %v2711_v60 = vadd.f32 %v2710_v49, %v2661_v34 }
 0x33d   : > { %v5998_v50 = vadd.f32 %v2807_v17, %v5898_v12  ;;  %v6001_v40 = vadd.f32 %v2711_v60, %v5901_v44 }
 0x341   : > { %v2759_v61 = vpop.f32.mrf.mxu2  ;;  %v2664_v25 = vpop.f32.mrf.mxu0 }
 0x342   : > { %v2808_v56 = vpop.f32.mrf.mxu3  ;;  %v2713_v53 = vpop.f32.mrf.mxu1 }
 0x343   : > { %v2809_v11 = vadd.f32 %v2808_v56, %v2759_v61  ;;  %v2714_v54 = vadd.f32 %v2713_v53, %v2664_v25 }
 0x345   : > { %v6004_v28 = vadd.f32 %v2809_v11, %v5908_v36  ;;  %v6007_v18 = vadd.f32 %v2714_v54, %v5911_v63 }
 0x349   : > { %v2762_v41 = vpop.f32.mrf.mxu2  ;;  %v2666_v30 = vpop.f32.mrf.mxu0 }
 0x34a   : > { %v2811_v12 = vpop.f32.mrf.mxu3  ;;  %v2715_v1 = vpop.f32.mrf.mxu1 }
 0x34b   : > { %v2812_v33 = vadd.f32 %v2811_v12, %v2762_v41  ;;  %v2716_v44 = vadd.f32 %v2715_v1, %v2666_v30 }
 0x34d   : > { %v6010_v35 = vadd.f32 %v2812_v33, %v5914_v10  ;;  %v6013_v38 = vadd.f32 %v2716_v44, %v5917_v27 }
 0x351   : > { %v2764_v2 = vpop.f32.mrf.mxu2  ;;  %2851 = sbr.rel (%p4531_p1) target bundleno = 886 (0x376), region = 112 }
 0x352   : > { %v2813_v42 = vpop.f32.mrf.mxu3 }
 0x353   : > { %v2814_v13 = vadd.f32 %v2813_v42, %v2764_v2 }
 0x355   : > { %v6016_v36 = vadd.f32 %v2814_v13, %v5920_v6 }
 0x356   : > { %2852 = vst [vmem:[#allocation2 + $0xb0] sm:$0xff] %v5923_v5 }
 0x357   : > { %2853 = vst [vmem:[#allocation2] sm:$0xff] %v5926_v16 }
 0x358   : > { %2854 = vst [vmem:[#allocation2 + $0xd8] sm:$0xff] %v5929_v22 }
 0x359   : > { %2855 = vst [vmem:[#allocation2 + $0x18] sm:$0xff] %v5932_v23 }
 0x35a   : > { %2856 = vst [vmem:[#allocation2 + $0x50] sm:$0xff] %v5935_v52 }
 0x35b   : > { %2857 = vst [vmem:[#allocation2 + $0x68] sm:$0xff] %v5938_v46 }
 0x35c   : > { %2858 = vst [vmem:[#allocation2 + $0x30] sm:$0xff] %v5941_v51 }
 0x35d   : > { %2859 = vst [vmem:[#allocation2 + $0x48] sm:$0xff] %v5944_v43 }
 0x35e   : > { %2860 = vst [vmem:[#allocation2 + $0x80] sm:$0xff] %v5947_v15 }
 0x35f   : > { %2861 = vst [vmem:[#allocation2 + $0x88] sm:$0xff] %v5950_v21 }
 0x360   : > { %2862 = vst [vmem:[#allocation2 + $0xe8] sm:$0xff] %v5953_v7 }
 0x361   : > { %2863 = vst [vmem:[#allocation2 + $0xb8] sm:$0xff] %v5956_v39 }
 0x362   : > { %2864 = vst [vmem:[#allocation2 + $0x60] sm:$0xff] %v5959_v62 }
 0x363   : > { %2865 = vst [vmem:[#allocation2 + $0xf0] sm:$0xff] %v5962_v59 }
 0x364   : > { %2866 = vst [vmem:[#allocation2 + $0x8] sm:$0xff] %v5965_v9 }
 0x365   : > { %2867 = vst [vmem:[#allocation2 + $0x78] sm:$0xff] %v5968_v37 }
 0x366   : > { %2868 = vst [vmem:[#allocation2 + $0x38] sm:$0xff] %v5971_v3 }
 0x367   : > { %2869 = vst [vmem:[#allocation2 + $0x58] sm:$0xff] %v5974_v26 }
 0x368   : > { %2870 = vst [vmem:[#allocation2 + $0x40] sm:$0xff] %v5977_v57 }
 0x369   : > { %2871 = vst [vmem:[#allocation2 + $0xc8] sm:$0xff] %v5980_v31 }
 0x36a   : > { %2872 = vst [vmem:[#allocation2 + $0xe0] sm:$0xff] %v5983_v4 }
 0x36b   : > { %2873 = vst [vmem:[#allocation2 + $0x90] sm:$0xff] %v5986_v32 }
 0x36c   : > { %2874 = vst [vmem:[#allocation2 + $0x70] sm:$0xff] %v5989_v48 }
 0x36d   : > { %2875 = vst [vmem:[#allocation2 + $0xc0] sm:$0xff] %v5992_v24 }
 0x36e   : > { %2876 = vst [vmem:[#allocation2 + $0xa8] sm:$0xff] %v5995_v20 }
 0x36f   : > { %2877 = vst [vmem:[#allocation2 + $0xd0] sm:$0xff] %v5998_v50 }
 0x370   : > { %2878 = vst [vmem:[#allocation2 + $0x10] sm:$0xff] %v6001_v40 }
 0x371   : > { %2879 = vst [vmem:[#allocation2 + $0x28] sm:$0xff] %v6004_v28 }
 0x372   : > { %2880 = vst [vmem:[#allocation2 + $0xa0] sm:$0xff] %v6007_v18 }
 0x373   : > { %2881 = vst [vmem:[#allocation2 + $0xf8] sm:$0xff] %v6010_v35 }
 0x374   : > { %2882 = vst [vmem:[#allocation2 + $0x20] sm:$0xff] %v6013_v38 }
 0x375   : > { %2883 = vst [vmem:[#allocation2 + $0x98] sm:$0xff] %v6016_v36 }
 0x376 PF: > { %p2884_p2 = scmp.gt.s32.totalorder %s4860_s16, 0  ;;  %p2885_p3 = scmp.lt.s32.totalorder %s4860_s16, 3 }
 0x378   : > { %p2886_p4 = pnand %p2885_p3, %p2884_p2 }
 0x37a   : > { %2889 = sbr.rel (%p2886_p4) target bundleno = 930 (0x3a2), region = 116 }
 0x37f   : > { %v2890_v63 = vld [vmem:[#allocation2 + $0xb0] sm:$0xff]  ;;  %v2891_v10 = vld [vmem:[#allocation2] sm:$0xff]  ;;  %v2892_v27 = vld [vmem:[#allocation2 + $0xd8] sm:$0xff] }
 0x380   : > { %v2922_v6 = vadd.f32 %v2890_v63, %v5923_v5  ;;  %v2923_v47 = vadd.f32 %v2891_v10, %v5926_v16  ;;  %v2924_v45 = vadd.f32 %v2892_v27, %v5929_v22  ;;  %v2893_v58 = vld [vmem:[#allocation2 + $0x18] sm:$0xff]  ;;  %v2894_v8 = vld [vmem:[#allocation2 + $0x50] sm:$0xff]  ;;  %v2895_v29 = vld [vmem:[#allocation2 + $0x68] sm:$0xff] }
 0x381   : > { %v2925_v14 = vadd.f32 %v2893_v58, %v5932_v23  ;;  %v2896_v55 = vld [vmem:[#allocation2 + $0x30] sm:$0xff]  ;;  %v2926_v19 = vadd.f32 %v2894_v8, %v5935_v52  ;;  %v2897_v34 = vld [vmem:[#allocation2 + $0x48] sm:$0xff]  ;;  %v2927_v0 = vadd.f32 %v2895_v29, %v5938_v46  ;;  %v2898_v49 = vld [vmem:[#allocation2 + $0x80] sm:$0xff] }
 0x382   : > { %2954 = vst [vmem:[#allocation2 + $0xb0] sm:$0xff] %v2922_v6  ;;  %v2928_v17 = vadd.f32 %v2896_v55, %v5941_v51  ;;  %v2899_v60 = vld [vmem:[#allocation2 + $0x88] sm:$0xff]  ;;  %v2929_v61 = vadd.f32 %v2897_v34, %v5944_v43  ;;  %v2930_v56 = vadd.f32 %v2898_v49, %v5947_v15  ;;  %v2901_v53 = vld [vmem:[#allocation2 + $0xb8] sm:$0xff]  ;;  %v2902_v54 = vld [vmem:[#allocation2 + $0x60] sm:$0xff] }
 0x383   : > { %2955 = vst [vmem:[#allocation2] sm:$0xff] %v2923_v47  ;;  %v2900_v25 = vld [vmem:[#allocation2 + $0xe8] sm:$0xff]  ;;  %v2931_v11 = vadd.f32 %v2899_v60, %v5950_v21  ;;  %v2903_v30 = vld [vmem:[#allocation2 + $0xf0] sm:$0xff]  ;;  %v2933_v12 = vadd.f32 %v2901_v53, %v5956_v39  ;;  %v2934_v33 = vadd.f32 %v2902_v54, %v5959_v62  ;;  %v2905_v44 = vld [vmem:[#allocation2 + $0x78] sm:$0xff] }
 0x384   : > { %2956 = vst [vmem:[#allocation2 + $0xd8] sm:$0xff] %v2924_v45  ;;  %v2932_v41 = vadd.f32 %v2900_v25, %v5953_v7  ;;  %v2904_v1 = vld [vmem:[#allocation2 + $0x8] sm:$0xff]  ;;  %v2935_v2 = vadd.f32 %v2903_v30, %v5962_v59  ;;  %v2906_v42 = vld [vmem:[#allocation2 + $0x38] sm:$0xff]  ;;  %v2937_v10 = vadd.f32 %v2905_v44, %v5968_v37  ;;  %v2908_v27 = vld [vmem:[#allocation2 + $0x40] sm:$0xff] }
 0x385   : > { %2957 = vst [vmem:[#allocation2 + $0x18] sm:$0xff] %v2925_v14  ;;  %v2936_v13 = vadd.f32 %v2904_v1, %v5965_v9  ;;  %v2907_v63 = vld [vmem:[#allocation2 + $0x58] sm:$0xff]  ;;  %v2938_v6 = vadd.f32 %v2906_v42, %v5971_v3  ;;  %v2909_v47 = vld [vmem:[#allocation2 + $0xc8] sm:$0xff]  ;;  %v2910_v58 = vld [vmem:[#allocation2 + $0xe0] sm:$0xff]  ;;  %v2940_v8 = vadd.f32 %v2908_v27, %v5977_v57 }
 0x386   : > { %2958 = vst [vmem:[#allocation2 + $0x50] sm:$0xff] %v2926_v19  ;;  %v2939_v45 = vadd.f32 %v2907_v63, %v5974_v26  ;;  %v2911_v29 = vld [vmem:[#allocation2 + $0x90] sm:$0xff]  ;;  %v2941_v14 = vadd.f32 %v2909_v47, %v5980_v31  ;;  %v2942_v19 = vadd.f32 %v2910_v58, %v5983_v4  ;;  %v2913_v34 = vld [vmem:[#allocation2 + $0xc0] sm:$0xff]  ;;  %v2914_v49 = vld [vmem:[#allocation2 + $0xa8] sm:$0xff] }
 0x387   : > { %2959 = vst [vmem:[#allocation2 + $0x68] sm:$0xff] %v2927_v0  ;;  %v2912_v55 = vld [vmem:[#allocation2 + $0x70] sm:$0xff]  ;;  %v2943_v0 = vadd.f32 %v2911_v29, %v5986_v32  ;;  %v2917_v53 = vld [vmem:[#allocation2 + $0x28] sm:$0xff]  ;;  %v2918_v54 = vld [vmem:[#allocation2 + $0xa0] sm:$0xff] }
 0x388   : > { %2960 = vst [vmem:[#allocation2 + $0x30] sm:$0xff] %v2928_v17  ;;  %v2944_v17 = vadd.f32 %v2912_v55, %v5989_v48  ;;  %v2915_v60 = vld [vmem:[#allocation2 + $0xd0] sm:$0xff]  ;;  %v2919_v30 = vld [vmem:[#allocation2 + $0xf8] sm:$0xff]  ;;  %v2920_v1 = vld [vmem:[#allocation2 + $0x20] sm:$0xff] }
 0x389   : > { %2961 = vst [vmem:[#allocation2 + $0x48] sm:$0xff] %v2929_v61  ;;  %v2945_v61 = vadd.f32 %v2913_v34, %v5992_v24  ;;  %v2916_v25 = vld [vmem:[#allocation2 + $0x10] sm:$0xff]  ;;  %v2921_v44 = vld [vmem:[#allocation2 + $0x98] sm:$0xff]  ;;  %v2952_v42 = vadd.f32 %v2920_v1, %v6013_v38 }
 0x38a   : > { %2962 = vst [vmem:[#allocation2 + $0x80] sm:$0xff] %v2930_v56  ;;  %v2946_v56 = vadd.f32 %v2914_v49, %v5995_v20 }
 0x38b   : > { %2963 = vst [vmem:[#allocation2 + $0x88] sm:$0xff] %v2931_v11  ;;  %v2947_v11 = vadd.f32 %v2915_v60, %v5998_v50 }
 0x38c   : > { %2964 = vst [vmem:[#allocation2 + $0xe8] sm:$0xff] %v2932_v41  ;;  %v2948_v41 = vadd.f32 %v2916_v25, %v6001_v40 }
 0x38d   : > { %2965 = vst [vmem:[#allocation2 + $0xb8] sm:$0xff] %v2933_v12  ;;  %v2949_v12 = vadd.f32 %v2917_v53, %v6004_v28 }
 0x38e   : > { %2966 = vst [vmem:[#allocation2 + $0x60] sm:$0xff] %v2934_v33  ;;  %v2950_v33 = vadd.f32 %v2918_v54, %v6007_v18 }
 0x38f   : > { %2967 = vst [vmem:[#allocation2 + $0xf0] sm:$0xff] %v2935_v2  ;;  %v2951_v2 = vadd.f32 %v2919_v30, %v6010_v35 }
 0x390   : > { %2968 = vst [vmem:[#allocation2 + $0x8] sm:$0xff] %v2936_v13  ;;  %v2953_v13 = vadd.f32 %v2921_v44, %v6016_v36 }
 0x391   : > { %2969 = vst [vmem:[#allocation2 + $0x78] sm:$0xff] %v2937_v10 }
 0x392   : > { %2970 = vst [vmem:[#allocation2 + $0x38] sm:$0xff] %v2938_v6 }
 0x393   : > { %2971 = vst [vmem:[#allocation2 + $0x58] sm:$0xff] %v2939_v45 }
 0x394   : > { %2972 = vst [vmem:[#allocation2 + $0x40] sm:$0xff] %v2940_v8 }
 0x395   : > { %2973 = vst [vmem:[#allocation2 + $0xc8] sm:$0xff] %v2941_v14 }
 0x396   : > { %2974 = vst [vmem:[#allocation2 + $0xe0] sm:$0xff] %v2942_v19 }
 0x397   : > { %2975 = vst [vmem:[#allocation2 + $0x90] sm:$0xff] %v2943_v0 }
 0x398   : > { %2976 = vst [vmem:[#allocation2 + $0x70] sm:$0xff] %v2944_v17 }
 0x399   : > { %2977 = vst [vmem:[#allocation2 + $0xc0] sm:$0xff] %v2945_v61 }
 0x39a   : > { %2978 = vst [vmem:[#allocation2 + $0xa8] sm:$0xff] %v2946_v56 }
 0x39b   : > { %2979 = vst [vmem:[#allocation2 + $0xd0] sm:$0xff] %v2947_v11 }
 0x39c   : > { %2980 = vst [vmem:[#allocation2 + $0x10] sm:$0xff] %v2948_v41 }
 0x39d   : > { %2981 = vst [vmem:[#allocation2 + $0x28] sm:$0xff] %v2949_v12 }
 0x39e   : > { %2982 = vst [vmem:[#allocation2 + $0xa0] sm:$0xff] %v2950_v33 }
 0x39f   : > { %2983 = vst [vmem:[#allocation2 + $0xf8] sm:$0xff] %v2951_v2 }
 0x3a0   : > { %2984 = vst [vmem:[#allocation2 + $0x20] sm:$0xff] %v2952_v42 }
 0x3a1   : > { %2985 = vst [vmem:[#allocation2 + $0x98] sm:$0xff] %v2953_v13 }
 0x3a2 PF: > { %p4532_p5 = scmp.ne.s32.totalorder %s4860_s16, 3 }
 0x3a4   : > { %2989 = sbr.rel (%p4532_p5) target bundleno = 1213 (0x4bd), region = 120 }
 0x3a9   : > { %v2990_v63 = vld [vmem:[#allocation2 + $0xb0] sm:$0xff]  ;;  %v2991_v10 = vld [vmem:[#allocation2] sm:$0xff]  ;;  %v2992_v27 = vld [vmem:[#allocation2 + $0xd8] sm:$0xff] }
 0x3aa   : > { %v2993_v6 = vld [vmem:[#allocation2 + $0x18] sm:$0xff]  ;;  %v2994_v47 = vld [vmem:[#allocation2 + $0x50] sm:$0xff]  ;;  %v2995_v45 = vld [vmem:[#allocation2 + $0x68] sm:$0xff]  ;;  %v6090_v58 = vadd.f32 %v2990_v63, %v5923_v5  ;;  %v6093_v8 = vadd.f32 %v2991_v10, %v5926_v16  ;;  %v6096_v29 = vadd.f32 %v2992_v27, %v5929_v22 }
 0x3ab   : > { %v2996_v14 = vld [vmem:[#allocation2 + $0x30] sm:$0xff]  ;;  %v2997_v55 = vld [vmem:[#allocation2 + $0x48] sm:$0xff]  ;;  %v2998_v19 = vld [vmem:[#allocation2 + $0x80] sm:$0xff]  ;;  %v6099_v34 = vadd.f32 %v2993_v6, %v5932_v23  ;;  %v6102_v0 = vadd.f32 %v2994_v47, %v5935_v52  ;;  %v6105_v49 = vadd.f32 %v2995_v45, %v5938_v46 }
 0x3ac   : > { %v2999_v5 = vld [vmem:[#allocation2 + $0x88] sm:$0xff]  ;;  %v6108_v17 = vadd.f32 %v2996_v14, %v5941_v51  ;;  %v3054_v16 = vadd.f32 %v6096_v29, %v6090_v58  ;;  %v6113_v60 = vadd.f32 %v2997_v55, %v5944_v43  ;;  %v3001_v61 = vld [vmem:[#allocation2 + $0xb8] sm:$0xff]  ;;  %v6118_v52 = vadd.f32 %v2998_v19, %v5947_v15  ;;  %v3002_v25 = vld [vmem:[#allocation2 + $0x60] sm:$0xff] }
 0x3ad   : > { %v3000_v22 = vld [vmem:[#allocation2 + $0xe8] sm:$0xff]  ;;  %v3075_v23 = vadd.f32 %v6099_v34, %v6093_v8  ;;  %v6122_v51 = vadd.f32 %v2999_v5, %v5950_v21  ;;  %v3003_v53 = vld [vmem:[#allocation2 + $0xf0] sm:$0xff]  ;;  %v6130_v41 = vadd.f32 %v3001_v61, %v5956_v39  ;;  %v3005_v30 = vld [vmem:[#allocation2 + $0x78] sm:$0xff]  ;;  %v6134_v12 = vadd.f32 %v3002_v25, %v5959_v62 }
 0x3ae   : > { %v3055_v46 = vadd.f32 %v3054_v16, %v6102_v0  ;;  %v6126_v11 = vadd.f32 %v3000_v22, %v5953_v7  ;;  %v3004_v54 = vld [vmem:[#allocation2 + $0x8] sm:$0xff]  ;;  %v3006_v1 = vld [vmem:[#allocation2 + $0x38] sm:$0xff]  ;;  %v6138_v33 = vadd.f32 %v3003_v53, %v5962_v59  ;;  %v3008_v42 = vld [vmem:[#allocation2 + $0x40] sm:$0xff]  ;;  %v6146_v13 = vadd.f32 %v3005_v30, %v5968_v37 }
 0x3af   : > { %v3076_v56 = vadd.f32 %v3075_v23, %v6105_v49  ;;  %v3007_v44 = vld [vmem:[#allocation2 + $0x58] sm:$0xff]  ;;  %v6142_v2 = vadd.f32 %v3004_v54, %v5965_v9  ;;  %v3009_v63 = vld [vmem:[#allocation2 + $0xc8] sm:$0xff]  ;;  %v6150_v10 = vadd.f32 %v3006_v1, %v5971_v3  ;;  %v3010_v27 = vld [vmem:[#allocation2 + $0xe0] sm:$0xff]  ;;  %v6158_v45 = vadd.f32 %v3008_v42, %v5977_v57 }
 0x3b0   : > { %v3056_v43 = vadd.f32 %v3055_v46, %v6108_v17  ;;  %v3011_v6 = vld [vmem:[#allocation2 + $0x90] sm:$0xff]  ;;  %v6154_v47 = vadd.f32 %v3007_v44, %v5974_v26  ;;  %v6162_v55 = vadd.f32 %v3009_v63, %v5980_v31  ;;  %v3013_v19 = vld [vmem:[#allocation2 + $0xc0] sm:$0xff]  ;;  %v6166_v5 = vadd.f32 %v3010_v27, %v5983_v4  ;;  %v3014_v22 = vld [vmem:[#allocation2 + $0xa8] sm:$0xff] }
 0x3b1   : > { %v3077_v15 = vadd.f32 %v3076_v56, %v6113_v60  ;;  %v3012_v14 = vld [vmem:[#allocation2 + $0x70] sm:$0xff]  ;;  %v6169_v26 = vadd.f32 %v3011_v6, %v5986_v32  ;;  %v3096_v57 = vmul.f32 %v6090_v58, %v6090_v58  ;;  %v3097_v31 = vmul.f32 %v6093_v8, %v6093_v8  ;;  %v3017_v53 = vld [vmem:[#allocation2 + $0x28] sm:$0xff]  ;;  %v3019_v44 = vld [vmem:[#allocation2 + $0xf8] sm:$0xff] }
 0x3b2   : > { %v3057_v21 = vadd.f32 %v3056_v43, %v6118_v52  ;;  %v3015_v23 = vld [vmem:[#allocation2 + $0xd0] sm:$0xff]  ;;  %v3098_v46 = vmul.f32 %v6096_v29, %v6096_v29  ;;  %v3099_v4 = vmul.f32 %v6099_v34, %v6099_v34  ;;  %v6182_v32 = vadd.f32 %v3012_v14, %v5989_v48  ;;  %v3020_v6 = vld [vmem:[#allocation2 + $0x20] sm:$0xff] }
 0x3b3   : > { %v3078_v7 = vadd.f32 %v3077_v15, %v6122_v51  ;;  %v3016_v56 = vld [vmem:[#allocation2 + $0x10] sm:$0xff]  ;;  %v6186_v43 = vadd.f32 %v3013_v19, %v5992_v24  ;;  %v3100_v15 = vmul.f32 %v6102_v0, %v6102_v0  ;;  %v3101_v30 = vmul.f32 %v6105_v49, %v6105_v49 }
 0x3b4   : > { %v3058_v39 = vadd.f32 %v3057_v21, %v6126_v11  ;;  %v6194_v21 = vadd.f32 %v3014_v22, %v5995_v20  ;;  %v6197_v48 = vadd.f32 %v3015_v23, %v5998_v50  ;;  %v3102_v24 = vmul.f32 %v6108_v17, %v6108_v17 }
 0x3b5   : > { %v3079_v62 = vadd.f32 %v3078_v7, %v6130_v41  ;;  %v3018_v7 = vld [vmem:[#allocation2 + $0xa0] sm:$0xff]  ;;  %v3103_v42 = vmul.f32 %v6113_v60, %v6113_v60  ;;  %v3149_v63 = vadd.f32 %v3099_v4, %v3097_v31  ;;  %v6206_v20 = vadd.f32 %v3016_v56, %v6001_v40 }
 0x3b6   : > { %v3059_v59 = vadd.f32 %v3058_v39, %v6134_v12  ;;  %v6209_v50 = vadd.f32 %v3017_v53, %v6004_v28  ;;  %v3104_v27 = vmul.f32 %v6118_v52, %v6118_v52  ;;  %v3105_v14 = vmul.f32 %v6122_v51, %v6122_v51 }
 0x3b7   : > { %v3080_v9 = vadd.f32 %v3079_v62, %v6138_v33  ;;  %v3128_v62 = vadd.f32 %v3098_v46, %v3096_v57  ;;  %v3150_v19 = vadd.f32 %v3149_v63, %v3101_v30  ;;  %v6218_v40 = vadd.f32 %v3018_v7, %v6007_v18 }
 0x3b8   : > { %v3060_v37 = vadd.f32 %v3059_v59, %v6142_v2  ;;  %v6221_v28 = vadd.f32 %v3019_v44, %v6010_v35  ;;  %v3106_v57 = vmul.f32 %v6126_v11, %v6126_v11  ;;  %v3107_v23 = vmul.f32 %v6130_v41, %v6130_v41 }
 0x3b9   : > { %v3081_v3 = vadd.f32 %v3080_v9, %v6146_v13  ;;  %v3021_v9 = vld [vmem:[#allocation2 + $0x98] sm:$0xff]  ;;  %v3151_v31 = vadd.f32 %v3150_v19, %v3103_v42  ;;  %v6230_v46 = vadd.f32 %v3020_v6, %v6013_v38  ;;  %v3108_v4 = vmul.f32 %v6134_v12, %v6134_v12 }
 0x3ba   : > { %v3061_v16 = vadd.f32 %v3060_v37, %v6150_v10  ;;  %v6233_v18 = vadd.f32 %v3021_v9, %v6016_v36  ;;  %v3109_v56 = vmul.f32 %v6138_v33, %v6138_v33  ;;  %v3110_v38 = vmul.f32 %v6142_v2, %v6142_v2 }
 0x3bb   : > { %v3082_v61 = vadd.f32 %v3081_v3, %v6154_v47  ;;  %v3129_v3 = vadd.f32 %v3128_v62, %v3100_v15  ;;  %v3111_v30 = vmul.f32 %v6146_v13, %v6146_v13  ;;  %v3112_v44 = vmul.f32 %v6150_v10, %v6150_v10 }
 0x3bc   : > { %v3062_v25 = vadd.f32 %v3061_v16, %v6158_v45  ;;  %v3113_v42 = vmul.f32 %v6154_v47, %v6154_v47  ;;  %v3117_v19 = vmul.f32 %v6169_v26, %v6169_v26 }
 0x3bd   : > { %v3083_v54 = vadd.f32 %v3082_v61, %v6162_v55  ;;  %v3130_v61 = vadd.f32 %v3129_v3, %v3102_v24  ;;  %v3116_v3 = vmul.f32 %v6166_v5, %v6166_v5 }
 0x3be   : > { %v3063_v1 = vadd.f32 %v3062_v25, %v6166_v5 }
 0x3bf   : > { %v3084_v39 = vadd.f32 %v3083_v54, %v6169_v26  ;;  %v3131_v53 = vadd.f32 %v3130_v61, %v3104_v27  ;;  %v3152_v54 = vadd.f32 %v3151_v31, %v3105_v14  ;;  %v3115_v27 = vmul.f32 %v6162_v55, %v6162_v55 }
 0x3c0   : > { %v3064_v59 = vadd.f32 %v3063_v1, %v6182_v32 }
 0x3c1   : > { %v3085_v37 = vadd.f32 %v3084_v39, %v6186_v43  ;;  %v3132_v1 = vadd.f32 %v3131_v53, %v3106_v57  ;;  %v3153_v24 = vadd.f32 %v3152_v54, %v3107_v23  ;;  %v3119_v23 = vmul.f32 %v6186_v43, %v6186_v43 }
 0x3c2   : > { %v3065_v16 = vadd.f32 %v3064_v59, %v6194_v21  ;;  %v3114_v59 = vmul.f32 %v6158_v45, %v6158_v45 }
 0x3c3   : > { %v3086_v22 = vadd.f32 %v3085_v37, %v6197_v48  ;;  %v3133_v62 = vadd.f32 %v3132_v1, %v3108_v4  ;;  %v3154_v63 = vadd.f32 %v3153_v24, %v3109_v56  ;;  %v3121_v56 = vmul.f32 %v6197_v48, %v6197_v48 }
 0x3c4   : > { %v3066_v35 = vadd.f32 %v3065_v16, %v6206_v20 }
 0x3c5   : > { %v3087_v25 = vadd.f32 %v3086_v22, %v6209_v50  ;;  %v3134_v37 = vadd.f32 %v3133_v62, %v3110_v38  ;;  %v3155_v14 = vadd.f32 %v3154_v63, %v3111_v30  ;;  %v3118_v22 = vmul.f32 %v6182_v32, %v6182_v32 }
 0x3c6   : > { %v3067_v15 = vadd.f32 %v3066_v35, %v6218_v40  ;;  %v3123_v38 = vmul.f32 %v6209_v50, %v6209_v50  ;;  %v3126_v62 = vmul.f32 %v6230_v46, %v6230_v46  ;;  %v3127_v63 = vmul.f32 %v6233_v18, %v6233_v18 }
 0x3c7   : > { %v3088_v36 = vadd.f32 %v3087_v25, %v6221_v28  ;;  %v3135_v16 = vadd.f32 %v3134_v37, %v3112_v44  ;;  %v3156_v57 = vadd.f32 %v3155_v14, %v3113_v42  ;;  %v3120_v25 = vmul.f32 %v6194_v21, %v6194_v21 }
 0x3c8   : > { %v3068_v7 = vadd.f32 %v3067_v15, %v6230_v46  ;;  %v3122_v15 = vmul.f32 %v6206_v20, %v6206_v20  ;;  %v3125_v44 = vmul.f32 %v6221_v28, %v6221_v28 }
 0x3c9   : > { %v3089_v39 = vadd.f32 %v3088_v36, %v6233_v18  ;;  %v3136_v35 = vadd.f32 %v3135_v16, %v3114_v59  ;;  %v3157_v4 = vadd.f32 %v3156_v57, %v3115_v27 }
 0x3ca   : > { %v3069_v6 = vrot.slane %v3068_v7, 4 }
 0x3cb   : > { %v3090_v9 = vrot.slane %v3089_v39, 4  ;;  %v3137_v53 = vadd.f32 %v3136_v35, %v3116_v3  ;;  %v3158_v54 = vadd.f32 %v3157_v4, %v3117_v19 }
 0x3cc   : > { %v3070_v61 = vadd.f32 %v3069_v6, %v3068_v7  ;;  %v3124_v7 = vmul.f32 %v6218_v40, %v6218_v40 }
 0x3cd   : > { %v3091_v31 = vadd.f32 %v3090_v9, %v3089_v39  ;;  %v3138_v1 = vadd.f32 %v3137_v53, %v3118_v22  ;;  %v3159_v24 = vadd.f32 %v3158_v54, %v3119_v23 }
 0x3ce   : > { %v3071_v36 = vrot.slane %v3070_v61, 2 }
 0x3cf   : > { %v3092_v30 = vrot.slane %v3091_v31, 2  ;;  %v3139_v39 = vadd.f32 %v3138_v1, %v3120_v25  ;;  %v3160_v42 = vadd.f32 %v3159_v24, %v3121_v56 }
 0x3d0   : > { %v3072_v59 = vadd.f32 %v3071_v36, %v3070_v61 }
 0x3d1   : > { %v3093_v27 = vadd.f32 %v3092_v30, %v3091_v31  ;;  %v3140_v6 = vadd.f32 %v3139_v39, %v3122_v15  ;;  %v3161_v9 = vadd.f32 %v3160_v42, %v3123_v38 }
 0x3d2   : > { %v3073_v3 = vrot.slane %v3072_v59, 1 }
 0x3d3   : > { %v3141_v37 = vadd.f32 %v3140_v6, %v3124_v7  ;;  %v3162_v14 = vadd.f32 %v3161_v9, %v3125_v44  ;;  %v3094_v19 = vrot.slane %v3093_v27, 1  ;;  %v6290_v6 = vld [vmem:[%s6019_s7] sm:$0xff]  ;;  %v6293_v9 = vld [vmem:[%s6019_s7 + $0x10] sm:$0xff] }
 0x3d4   : > { %v3074_v35 = vadd.f32 %v3073_v3, %v3072_v59 }
 0x3d5   : > { %v3142_v16 = vadd.f32 %v3141_v37, %v3126_v62  ;;  %v3163_v57 = vadd.f32 %v3162_v14, %v3127_v63  ;;  %v3095_v4 = vadd.f32 %v3094_v19, %v3093_v27 }
 0x3d6   : > { %v6281_v61 = vmul.f32 0.0078125, %v3074_v35 }
 0x3d7   : > { %v3143_v22 = vrot.slane %v3142_v16, 4  ;;  %v3164_v23 = vrot.slane %v3163_v57, 4  ;;  %v6283_v31 = vmul.f32 0.0078125, %v3095_v4  ;;  %v3369_v4 = vunpack.c.h.bf16 %v6290_v6 }
 0x3d8   : > { %v3174_v7 = vmul.f32 %v6281_v61, %v6281_v61  ;;  %v3194_v37 = vsub.f32 %v6150_v10, %v6281_v61  ;;  %v3178_v3 = vsub.f32 %v6090_v58, %v6281_v61  ;;  %v3373_v58 = vunpack.c.h.bf16 %v6293_v9 }
 0x3d9   : > { %v3144_v25 = vadd.f32 %v3143_v22, %v3142_v16  ;;  %v3165_v56 = vadd.f32 %v3164_v23, %v3163_v57  ;;  %v3175_v44 = vmul.f32 %v6283_v31, %v6283_v31  ;;  %v3195_v14 = vsub.f32 %v6154_v47, %v6283_v31 }
 0x3da   : > { %v3368_v16 = vunpack.c.l.bf16 %v6290_v6  ;;  %v3179_v57 = vsub.f32 %v6093_v8, %v6283_v31  ;;  %v3182_v22 = vsub.f32 %v6102_v0, %v6281_v61  ;;  %v3183_v23 = vsub.f32 %v6105_v49, %v6283_v31 }
 0x3db   : > { %v3145_v53 = vrot.slane %v3144_v25, 2  ;;  %v3166_v54 = vrot.slane %v3165_v56, 2  ;;  %v3372_v47 = vunpack.c.l.bf16 %v6293_v9  ;;  %v3196_v8 = vsub.f32 %v6158_v45, %v6281_v61 }
 0x3dc   : > { %v3197_v0 = vsub.f32 %v6162_v55, %v6283_v31  ;;  %v3180_v49 = vsub.f32 %v6096_v29, %v6281_v61 }
 0x3dd   : > { %v3146_v1 = vadd.f32 %v3145_v53, %v3144_v25  ;;  %v3167_v24 = vadd.f32 %v3166_v54, %v3165_v56  ;;  %v6312_v25 = vld [vmem:[%s6019_s7 + $0x8] sm:$0xff]  ;;  %v3181_v54 = vsub.f32 %v6099_v34, %v6283_v31 }
 0x3de   : > { %v3370_v45 = vunpack.c.l.bf16 %v6312_v25 }
 0x3df   : > { %v3147_v15 = vrot.slane %v3146_v1, 1  ;;  %v3168_v38 = vrot.slane %v3167_v24, 1 }
 0x3e1   : > { %v3148_v36 = vadd.f32 %v3147_v15, %v3146_v1  ;;  %v3169_v30 = vadd.f32 %v3168_v38, %v3167_v24 }
 0x3e3   : > { %v3172_v39 = vmul.f32 0.0078125, %v3148_v36  ;;  %v3173_v42 = vmul.f32 0.0078125, %v3169_v30 }
 0x3e5   : > { %v3176_v62 = vsub.f32 %v3172_v39, %v3174_v7  ;;  %v3177_v63 = vsub.f32 %v3173_v42, %v3175_v44  ;;  %v6331_v7 = vld [vmem:[%s6019_s7 + $0x18] sm:$0xff]  ;;  %v6334_v44 = vld [vmem:[%s6019_s7 + $0x20] sm:$0xff] }
 0x3e7   : > { %v3210_v59 = vadd.f32 1e-05, %v3176_v62  ;;  %v3211_v27 = vadd.f32 1e-05, %v3177_v63 }
 0x3e9   : > { %4802 = vrsqrt.f32 %v3210_v59  ;;  %vm3218_vm0 = vweird.f32 %v3210_v59  ;;  %vm3228_vm2 = vweird.f32 %v3211_v27 }
 0x3ea   : > { %4804 = vrsqrt.f32 %v3211_v27 }
 0x3ef   : > { %v4803_v19 = vpop.eup %4802 }
 0x3f0   : > { %v4805_v35 = vpop.eup %4804  ;;  %v3213_v10 = vmul.f32 %v4803_v19, %v3210_v59  ;;  %vm3219_vm1 = vweird.f32 %v4803_v19  ;;  %v6357_v59 = vld [vmem:[%s6019_s7 + $0x28] sm:$0xff] }
 0x3f1   : > { %v3223_v56 = vmul.f32 %v4805_v35, %v3211_v27  ;;  %vm3229_vm3 = vweird.f32 %v4805_v35  ;;  %vm3220_vm4 = vmor %vm3218_vm0, %vm3219_vm1 }
 0x3f2   : > { %v3214_v53 = vmul.f32 %v4803_v19, %v3213_v10  ;;  %vm3230_vm5 = vmor %vm3228_vm2, %vm3229_vm3 }
 0x3f3   : > { %v3224_v15 = vmul.f32 %v4805_v35, %v3223_v56 }
 0x3f4   : > { %v3215_v36 = vmul.f32 0.5, %v3214_v53 }
 0x3f5   : > { %v3225_v39 = vmul.f32 0.5, %v3224_v15 }
 0x3f6   : > { %v3216_v63 = vsub.f32 1.5, %v3215_v36 }
 0x3f7   : > { %v3226_v15 = vsub.f32 1.5, %v3225_v39 }
 0x3f8   : > { %v3217_v62 = vmul.f32 %v4803_v19, %v3216_v63 }
 0x3f9   : > { %v3227_v39 = vmul.f32 %v4805_v35, %v3226_v15 }
 0x3fa   : > { %v6365_v63 = vsel %vm3220_vm4, %v4803_v19, %v3217_v62 }
 0x3fb   : > { %v6371_v42 = vsel %vm3230_vm5, %v4805_v35, %v3227_v39  ;;  %v3248_v15 = vmul.f32 %v6365_v63, %v3194_v37  ;;  %v3232_v30 = vmul.f32 %v6365_v63, %v3178_v3  ;;  %v3236_v24 = vmul.f32 %v6365_v63, %v3182_v22 }
 0x3fc   : > { %v3249_v10 = vmul.f32 %v6371_v42, %v3195_v14  ;;  %v3233_v19 = vmul.f32 %v6371_v42, %v3179_v57  ;;  %v3237_v62 = vmul.f32 %v6371_v42, %v3183_v23  ;;  %v3250_v27 = vmul.f32 %v6365_v63, %v3196_v8 }
 0x3fd   : > { %vm3280_vm6 = vcmp.gt.f32.partialorder %v3248_v15, 0.0  ;;  %v3312_v56 = vmul.f32 0.2, %v3248_v15  ;;  %vm3264_vm7 = vcmp.gt.f32.partialorder %v3232_v30, 0.0  ;;  %v3296_v53 = vmul.f32 0.2, %v3232_v30 }
 0x3fe   : > { %vm3281_vm8 = vcmp.gt.f32.partialorder %v3249_v10, 0.0  ;;  %v3313_v35 = vmul.f32 0.2, %v3249_v10  ;;  %vm3265_vm9 = vcmp.gt.f32.partialorder %v3233_v19, 0.0  ;;  %v3297_v37 = vmul.f32 0.2, %v3233_v19 }
 0x3ff   : > { %v3344_v39 = vsel %vm3280_vm6, %v3248_v15, %v3312_v56  ;;  %v3328_v3 = vsel %vm3264_vm7, %v3232_v30, %v3296_v53  ;;  %vm3268_vm10 = vcmp.gt.f32.partialorder %v3236_v24, 0.0  ;;  %vm3269_vm11 = vcmp.gt.f32.partialorder %v3237_v62, 0.0 }
 0x400   : > { %v3345_v22 = vsel %vm3281_vm8, %v3249_v10, %v3313_v35  ;;  %v3400_v14 = vmul.f32 %v3368_v16, %v3344_v39  ;;  %v3329_v57 = vsel %vm3265_vm9, %v3233_v19, %v3297_v37  ;;  %v3384_v23 = vmul.f32 %v3368_v16, %v3328_v3 }
 0x401   : > { %v3401_v8 = vmul.f32 %v3369_v4, %v3345_v22  ;;  %v3385_v36 = vmul.f32 %v3369_v4, %v3329_v57  ;;  %v3300_v38 = vmul.f32 0.2, %v3236_v24  ;;  %v3301_v1 = vmul.f32 0.2, %v3237_v62 }
 0x402   : > { %v3251_v30 = vmul.f32 %v6371_v42, %v3197_v0  ;;  %vm3282_vm12 = vcmp.gt.f32.partialorder %v3250_v27, 0.0  ;;  %v3314_v10 = vmul.f32 0.2, %v3250_v27  ;;  %v3234_v16 = vmul.f32 %v6365_v63, %v3180_v49 }
 0x403   : > { %v3440_v56 = vadd.f32 %v3401_v8, %v3400_v14  ;;  %v3416_v53 = vadd.f32 %v3385_v36, %v3384_v23  ;;  %v3332_v15 = vsel %vm3268_vm10, %v3236_v24, %v3300_v38  ;;  %v3333_v6 = vsel %vm3269_vm11, %v3237_v62, %v3301_v1 }
 0x404   : > { %v3388_v4 = vmul.f32 %v3372_v47, %v3332_v15  ;;  %v3389_v55 = vmul.f32 %v3373_v58, %v3333_v6  ;;  %vm3283_vm13 = vcmp.gt.f32.partialorder %v3251_v30, 0.0  ;;  %v3315_v0 = vmul.f32 0.2, %v3251_v30 }
 0x405   : > { %3441 = vadd.xlane.f32.xlu1 %v3440_v56  ;;  %3417 = vadd.xlane.f32.xlu0 %v3416_v53  ;;  %v3346_v19 = vsel %vm3282_vm12, %v3250_v27, %v3314_v10  ;;  %v3235_v29 = vmul.f32 %v6371_v42, %v3181_v54  ;;  %vm3266_vm14 = vcmp.gt.f32.partialorder %v3234_v16, 0.0  ;;  %v3298_v49 = vmul.f32 0.2, %v3234_v16 }
 0x406   : > { %v3422_v24 = vadd.f32 %v3389_v55, %v3388_v4  ;;  %v3347_v1 = vsel %vm3283_vm13, %v3251_v30, %v3315_v0  ;;  %v3402_v38 = vmul.f32 %v3370_v45, %v3346_v19  ;;  %v6559_v36 = vsub.f32 %v6166_v5, %v6281_v61 }
 0x407   : > { %v6560_v35 = vunpack.c.h.bf16 %v6312_v25  ;;  %vm3267_vm15 = vcmp.gt.f32.partialorder %v3235_v29, 0.0  ;;  %v3299_v37 = vmul.f32 0.2, %v3235_v29  ;;  %v3330_v34 = vsel %vm3266_vm14, %v3234_v16, %v3298_v49 }
 0x408   : > { %v3252_v62 = vmul.f32 %v6365_v63, %v6559_v36  ;;  %3423 = vadd.xlane.f32.xlu2 %v3422_v24  ;;  %v3386_v54 = vmul.f32 %v3370_v45, %v3330_v34  ;;  %v6561_v39 = vsub.f32 %v6169_v26, %v6283_v31  ;;  %v6562_v57 = vsub.f32 %v6182_v32, %v6281_v61 }
 0x409   : > { %v3403_v27 = vmul.f32 %v6560_v35, %v3347_v1  ;;  %v3331_v14 = vsel %vm3267_vm15, %v3235_v29, %v3299_v37  ;;  %v6563_v8 = vsub.f32 %v6186_v43, %v6283_v31  ;;  %v6564_v45 = vmov %v6560_v35 }
 0x40a   : > { %v3253_v3 = vmul.f32 %v6371_v42, %v6561_v39  ;;  %vm3284_vm0 = vcmp.gt.f32.partialorder %v3252_v62, 0.0  ;;  %v3316_v22 = vmul.f32 0.2, %v3252_v62  ;;  %v3254_v23 = vmul.f32 %v6365_v63, %v6562_v57 }
 0x40b   : > { %v3443_v5 = vadd.f32 %v3403_v27, %v3402_v38  ;;  %v3255_v30 = vmul.f32 %v6371_v42, %v6563_v8  ;;  %v3387_v10 = vmul.f32 %v6564_v45, %v3331_v14  ;;  %v6565_v43 = vsub.f32 %v6108_v17, %v6281_v61 }
 0x40c   : > { %vm3285_vm1 = vcmp.gt.f32.partialorder %v3253_v3, 0.0  ;;  %v3317_v26 = vmul.f32 0.2, %v3253_v3  ;;  %v3348_v16 = vsel %vm3284_vm0, %v3252_v62, %v3316_v22  ;;  %vm3286_vm2 = vcmp.gt.f32.partialorder %v3254_v23, 0.0 }
 0x40d   : > { %v3404_v56 = vmul.f32 %v3372_v47, %v3348_v16  ;;  %vm3287_vm3 = vcmp.gt.f32.partialorder %v3255_v30, 0.0  ;;  %v3318_v53 = vmul.f32 0.2, %v3254_v23  ;;  %v3419_v32 = vadd.f32 %v3387_v10, %v3386_v54  ;;  %3444 = vadd.xlane.f32.xlu1 %v3443_v5 }
 0x40e   : > { %v3349_v15 = vsel %vm3285_vm1, %v3253_v3, %v3317_v26  ;;  %v3319_v6 = vmul.f32 0.2, %v3255_v30  ;;  %v3238_v4 = vmul.f32 %v6365_v63, %v6565_v43  ;;  %v6566_v0 = vsub.f32 %v6113_v60, %v6283_v31 }
 0x40f   : > { %v3405_v25 = vmul.f32 %v3373_v58, %v3349_v15  ;;  %v3350_v55 = vsel %vm3286_vm2, %v3254_v23, %v3318_v53  ;;  %v6567_v19 = vsub.f32 %v6118_v52, %v6281_v61  ;;  %3420 = vadd.xlane.f32.xlu0 %v3419_v32  ;;  %v6568_v17 = vunpack.c.l.bf16 %v6331_v7 }
 0x410   : > { %v3239_v47 = vmul.f32 %v6371_v42, %v6566_v0  ;;  %v3351_v49 = vsel %vm3287_vm3, %v3255_v30, %v3319_v6  ;;  %vm3270_vm4 = vcmp.gt.f32.partialorder %v3238_v4, 0.0  ;;  %v3302_v1 = vmul.f32 0.2, %v3238_v4 }
 0x411   : > { %v3240_v29 = vmul.f32 %v6365_v63, %v6567_v19  ;;  %v3406_v24 = vmul.f32 %v6568_v17, %v3350_v55  ;;  %v3446_v9 = vadd.f32 %v3405_v25, %v3404_v56  ;;  %v6569_v58 = vunpack.c.h.bf16 %v6331_v7 }
 0x412   : > { %vm3271_vm5 = vcmp.gt.f32.partialorder %v3239_v47, 0.0  ;;  %v3303_v60 = vmul.f32 0.2, %v3239_v47  ;;  %v3334_v36 = vsel %vm3270_vm4, %v3238_v4, %v3302_v1  ;;  %v6570_v62 = vsub.f32 %v6122_v51, %v6283_v31  ;;  %v3366_v1 = vld [vmem:[%s6019_s7 + $0x30] sm:$0xff] }
 0x413   : > { %v3407_v38 = vmul.f32 %v6569_v58, %v3351_v49  ;;  %vm3272_vm6 = vcmp.gt.f32.partialorder %v3240_v29, 0.0  ;;  %v3304_v35 = vmul.f32 0.2, %v3240_v29  ;;  %3447 = vadd.xlane.f32.xlu2 %v3446_v9  ;;  %v6571_v34 = vmov %v6568_v17 }
 0x414   : > { %v3241_v52 = vmul.f32 %v6371_v42, %v6570_v62  ;;  %v3335_v37 = vsel %vm3271_vm5, %v3239_v47, %v3303_v60  ;;  %v3390_v54 = vmul.f32 %v6571_v34, %v3334_v36  ;;  %v6572_v39 = vsub.f32 %v6126_v11, %v6281_v61 }
 0x415   : > { %v3449_v27 = vadd.f32 %v3407_v38, %v3406_v24  ;;  %v6573_v22 = vmov %v6569_v58  ;;  %v3336_v14 = vsel %vm3272_vm6, %v3240_v29, %v3304_v35  ;;  %v6574_v57 = vunpack.c.l.bf16 %v6334_v44 }
 0x416   : > { %v3242_v3 = vmul.f32 %v6365_v63, %v6572_v39  ;;  %v3391_v5 = vmul.f32 %v6573_v22, %v3335_v37  ;;  %vm3273_vm7 = vcmp.gt.f32.partialorder %v3241_v52, 0.0  ;;  %v3305_v51 = vmul.f32 0.2, %v3241_v52 }
 0x417   : > { %v3392_v23 = vmul.f32 %v6574_v57, %v3336_v14  ;;  %v6575_v8 = vsub.f32 %v6130_v41, %v6283_v31  ;;  %v6576_v26 = vsub.f32 %v6194_v21, %v6281_v61  ;;  %v6577_v16 = vsub.f32 %v6197_v48, %v6283_v31  ;;  %3450 = vadd.xlane.f32.xlu1 %v3449_v27 }
 0x418   : > { %vm3274_vm8 = vcmp.gt.f32.partialorder %v3242_v3, 0.0  ;;  %v3306_v45 = vmul.f32 0.2, %v3242_v3  ;;  %v3425_v10 = vadd.f32 %v3391_v5, %v3390_v54  ;;  %v3337_v11 = vsel %vm3273_vm7, %v3241_v52, %v3305_v51 }
 0x419   : > { %v3243_v30 = vmul.f32 %v6371_v42, %v6575_v8  ;;  %v3256_v7 = vmul.f32 %v6365_v63, %v6576_v26  ;;  %v3257_v56 = vmul.f32 %v6371_v42, %v6577_v16  ;;  %v6578_v53 = vunpack.c.h.bf16 %v6334_v44  ;;  %v3367_v8 = vld [vmem:[%s6019_s7 + $0x38] sm:$0xff] }
 0x41a   : > { %v3338_v15 = vsel %vm3274_vm8, %v3242_v3, %v3306_v45  ;;  %3426 = vadd.xlane.f32.xlu0 %v3425_v10  ;;  %v6579_v6 = vunpack.c.l.bf16 %v6357_v59  ;;  %v6580_v55 = vsub.f32 %v6206_v20, %v6281_v61  ;;  %v6581_v47 = vunpack.c.h.bf16 %v6357_v59 }
 0x41b   : > { %v3393_v41 = vmul.f32 %v6578_v53, %v3337_v11  ;;  %vm3275_vm9 = vcmp.gt.f32.partialorder %v3243_v30, 0.0  ;;  %v3307_v32 = vmul.f32 0.2, %v3243_v30  ;;  %vm3288_vm10 = vcmp.gt.f32.partialorder %v3256_v7, 0.0 }
 0x41c   : > { %v3394_v43 = vmul.f32 %v6579_v6, %v3338_v15  ;;  %vm3289_vm11 = vcmp.gt.f32.partialorder %v3257_v56, 0.0  ;;  %v3320_v21 = vmul.f32 0.2, %v3256_v7  ;;  %v3321_v48 = vmul.f32 0.2, %v3257_v56 }
 0x41d   : > { %v3428_v4 = vadd.f32 %v3393_v41, %v3392_v23  ;;  %v3339_v25 = vsel %vm3275_vm9, %v3243_v30, %v3307_v32  ;;  %v3258_v0 = vmul.f32 %v6365_v63, %v6580_v55  ;;  %v6582_v49 = vsub.f32 %v6209_v50, %v6283_v31 }
 0x41e   : > { %v3395_v19 = vmul.f32 %v6581_v47, %v3339_v25  ;;  %v3352_v29 = vsel %vm3288_vm10, %v3256_v7, %v3320_v21  ;;  %v3206_v24 = vsub.f32 %v6218_v40, %v6281_v61  ;;  %v3353_v9 = vsel %vm3289_vm11, %v3257_v56, %v3321_v48 }
 0x41f   : > { %v3259_v17 = vmul.f32 %v6371_v42, %v6582_v49  ;;  %3429 = vadd.xlane.f32.xlu2 %v3428_v4  ;;  %v6583_v58 = vmov %v6574_v57  ;;  %vm3290_vm12 = vcmp.gt.f32.partialorder %v3258_v0, 0.0  ;;  %v3322_v38 = vmul.f32 0.2, %v3258_v0 }
 0x420   : > { %v3408_v20 = vmul.f32 %v6583_v58, %v3352_v29  ;;  %v3431_v60 = vadd.f32 %v3395_v19, %v3394_v43  ;;  %v6584_v36 = vmov %v6578_v53  ;;  %v3207_v35 = vsub.f32 %v6221_v28, %v6283_v31 }
 0x421   : > { %v3409_v62 = vmul.f32 %v6584_v36, %v3353_v9  ;;  %vm3291_vm13 = vcmp.gt.f32.partialorder %v3259_v17, 0.0  ;;  %v3323_v52 = vmul.f32 0.2, %v3259_v17  ;;  %v3354_v50 = vsel %vm3290_vm12, %v3258_v0, %v3322_v38 }
 0x422   : > { %v3260_v40 = vmul.f32 %v6365_v63, %v3206_v24  ;;  %v3380_v27 = vunpack.c.l.bf16 %v3366_v1  ;;  %v6585_v54 = vmov %v6579_v6  ;;  %v3381_v3 = vunpack.c.h.bf16 %v3366_v1  ;;  %3432 = vadd.xlane.f32.xlu1 %v3431_v60 }
 0x423   : > { %v3452_v37 = vadd.f32 %v3409_v62, %v3408_v20  ;;  %v3355_v34 = vsel %vm3291_vm13, %v3259_v17, %v3323_v52  ;;  %v3410_v39 = vmul.f32 %v6585_v54, %v3354_v50  ;;  %v6586_v44 = vmov %v6581_v47 }
 0x424   : > { %v3411_v22 = vmul.f32 %v6586_v44, %v3355_v34  ;;  %v3261_v5 = vmul.f32 %v6371_v42, %v3207_v35  ;;  %vm3292_vm14 = vcmp.gt.f32.partialorder %v3260_v40, 0.0  ;;  %v3324_v51 = vmul.f32 0.2, %v3260_v40 }
 0x425   : > { %3453 = vadd.xlane.f32.xlu0 %v3452_v37  ;;  %v3190_v28 = vsub.f32 %v6134_v12, %v6281_v61  ;;  %v3191_v14 = vsub.f32 %v6138_v33, %v6283_v31  ;;  %v3192_v57 = vsub.f32 %v6142_v2, %v6281_v61  ;;  %v3193_v23 = vsub.f32 %v6146_v13, %v6283_v31 }
 0x426   : > { %v3455_v59 = vadd.f32 %v3411_v22, %v3410_v39  ;;  %vm3293_vm15 = vcmp.gt.f32.partialorder %v3261_v5, 0.0  ;;  %v3325_v30 = vmul.f32 0.2, %v3261_v5  ;;  %v3356_v45 = vsel %vm3292_vm14, %v3260_v40, %v3324_v51 }
 0x427   : > { %v3412_v10 = vmul.f32 %v3380_v27, %v3356_v45  ;;  %v3244_v11 = vmul.f32 %v6365_v63, %v3190_v28  ;;  %v3245_v26 = vmul.f32 %v6371_v42, %v3191_v14  ;;  %v3246_v12 = vmul.f32 %v6365_v63, %v3192_v57 }
 0x428   : > { %3456 = vadd.xlane.f32.xlu2 %v3455_v59  ;;  %v3357_v33 = vsel %vm3293_vm15, %v3261_v5, %v3325_v30  ;;  %v3247_v7 = vmul.f32 %v6371_v42, %v3193_v23  ;;  %v3382_v2 = vunpack.c.l.bf16 %v3367_v8  ;;  %v3383_v16 = vunpack.c.h.bf16 %v3367_v8 }
 0x429   : > { %v3413_v56 = vmul.f32 %v3381_v3, %v3357_v33  ;;  %vm3276_vm0 = vcmp.gt.f32.partialorder %v3244_v11, 0.0  ;;  %vm3277_vm1 = vcmp.gt.f32.partialorder %v3245_v26, 0.0  ;;  %v3308_v13 = vmul.f32 0.2, %v3244_v11 }
 0x42a   : > { %v3309_v53 = vmul.f32 0.2, %v3245_v26  ;;  %vm3278_vm2 = vcmp.gt.f32.partialorder %v3246_v12, 0.0  ;;  %vm3279_vm3 = vcmp.gt.f32.partialorder %v3247_v7, 0.0  ;;  %v3310_v41 = vmul.f32 0.2, %v3246_v12 }
 0x42b   : > { %v3458_v32 = vadd.f32 %v3413_v56, %v3412_v10  ;;  %v3340_v15 = vsel %vm3276_vm0, %v3244_v11, %v3308_v13  ;;  %v3311_v6 = vmul.f32 0.2, %v3247_v7  ;;  %v3208_v43 = vsub.f32 %v6230_v46, %v6281_v61 }
 0x42c   : > { %v3341_v21 = vsel %vm3277_vm1, %v3245_v26, %v3309_v53  ;;  %v3396_v4 = vmul.f32 %v3380_v27, %v3340_v15  ;;  %v3342_v25 = vsel %vm3278_vm2, %v3246_v12, %v3310_v41  ;;  %v3209_v48 = vsub.f32 %v6233_v18, %v6283_v31 }
 0x42d   : > { %3459 = vadd.xlane.f32.xlu1 %v3458_v32  ;;  %v3397_v55 = vmul.f32 %v3381_v3, %v3341_v21  ;;  %v3343_v0 = vsel %vm3279_vm3, %v3247_v7, %v3311_v6  ;;  %v3398_v47 = vmul.f32 %v3382_v2, %v3342_v25  ;;  %v3262_v19 = vmul.f32 %v6365_v63, %v3208_v43 }
 0x42e   : > { %v3399_v29 = vmul.f32 %v3383_v16, %v3343_v0  ;;  %v3263_v49 = vmul.f32 %v6371_v42, %v3209_v48  ;;  %vm3492_vm6 = vcmask 1041409   ;;  %vm3495_vm7 = vcmask 1024  }
 0x42f   : > { %v3434_v17 = vadd.f32 %v3397_v55, %v3396_v4  ;;  %vm3294_vm4 = vcmp.gt.f32.partialorder %v3262_v19, 0.0  ;;  %v3326_v24 = vmul.f32 0.2, %v3262_v19 }
 0x430   : > { %v3437_v1 = vadd.f32 %v3399_v29, %v3398_v47  ;;  %vm3295_vm5 = vcmp.gt.f32.partialorder %v3263_v49, 0.0  ;;  %v3327_v46 = vmul.f32 0.2, %v3263_v49 }
 0x431   : > { %3435 = vadd.xlane.f32.xlu0 %v3434_v17  ;;  %v3358_v61 = vsel %vm3294_vm4, %v3262_v19, %v3326_v24 }
 0x432   : > { %3438 = vadd.xlane.f32.xlu2 %v3437_v1  ;;  %v3359_v9 = vsel %vm3295_vm5, %v3263_v49, %v3327_v46  ;;  %v3414_v18 = vmul.f32 %v3382_v2, %v3358_v61 }
 0x433   : > { %v3415_v31 = vmul.f32 %v3383_v16, %v3359_v9 }
 0x435   : > { %v3461_v58 = vadd.f32 %v3415_v31, %v3414_v18 }
 0x439   : > { %3462 = vadd.xlane.f32.xlu0 %v3461_v58 }
 0x478   : > { %v3418_v20 = vpop.xlane.xlu0 %3417  ;;  %v3442_v38 = vpop.xlane.xlu1 %3441 }
 0x47b   : > { %v3424_v63 = vpop.xlane.xlu2 %3423 }
 0x480   : > { %v3445_v36 = vpop.xlane.xlu1 %3444 }
 0x481   : > { %v3477_v34 = vadd.f32 %v3445_v36, %v3442_v38 }
 0x482   : > { %v3421_v60 = vpop.xlane.xlu0 %3420 }
 0x483   : > { %v3464_v35 = vadd.f32 %v3421_v60, %v3418_v20 }
 0x485   : > { %v3465_v27 = vadd.f32 %v3464_v35, %v3424_v63 }
 0x486   : > { %v3448_v42 = vpop.xlane.xlu2 %3447 }
 0x487   : > { %v3478_v3 = vadd.f32 %v3477_v34, %v3448_v42 }
 0x48a   : > { %v3451_v50 = vpop.xlane.xlu1 %3450 }
 0x48b   : > { %v3479_v22 = vadd.f32 %v3478_v3, %v3451_v50 }
 0x48d   : > { %v3427_v62 = vpop.xlane.xlu0 %3426 }
 0x48e   : > { %v3466_v54 = vadd.f32 %v3465_v27, %v3427_v62 }
 0x492   : > { %v3430_v52 = vpop.xlane.xlu2 %3429 }
 0x493   : > { %v3467_v44 = vadd.f32 %v3466_v54, %v3430_v52 }
 0x495   : > { %v3433_v39 = vpop.xlane.xlu1 %3432 }
 0x496   : > { %v3468_v5 = vadd.f32 %v3467_v44, %v3433_v39 }
 0x498   : > { %v3454_v40 = vpop.xlane.xlu0 %3453 }
 0x499   : > { %v3480_v28 = vadd.f32 %v3479_v22, %v3454_v40 }
 0x49b   : > { %v3457_v37 = vpop.xlane.xlu2 %3456 }
 0x49c   : > { %v3481_v59 = vadd.f32 %v3480_v28, %v3457_v37 }
 0x4a0   : > { %v3460_v8 = vpop.xlane.xlu1 %3459 }
 0x4a1   : > { %v3482_v45 = vadd.f32 %v3481_v59, %v3460_v8 }
 0x4a4   : > { %v3436_v51 = vpop.xlane.xlu0 %3435 }
 0x4a5   : > { %v3469_v14 = vadd.f32 %v3468_v5, %v3436_v51  ;;  %v3439_v57 = vpop.xlane.xlu2 %3438 }
 0x4a7   : > { %v3470_v23 = vadd.f32 %v3469_v14, %v3439_v57 }
 0x4a9   : > { %v3471_v30 = vrot.slane %v3470_v23, 4 }
 0x4ab   : > { %v3472_v10 = vadd.f32 %v3471_v30, %v3470_v23 }
 0x4ac   : > { %v3463_v11 = vpop.xlane.xlu0 %3462 }
 0x4ad   : > { %v3473_v26 = vrot.slane %v3472_v10, 2  ;;  %v3483_v12 = vadd.f32 %v3482_v45, %v3463_v11 }
 0x4af   : > { %v3484_v33 = vrot.slane %v3483_v12, 4  ;;  %v3474_v7 = vadd.f32 %v3473_v26, %v3472_v10 }
 0x4b1   : > { %v3485_v2 = vadd.f32 %v3484_v33, %v3483_v12  ;;  %v3475_v56 = vrot.slane %v3474_v7, 1 }
 0x4b3   : > { %v3486_v16 = vrot.slane %v3485_v2, 2  ;;  %v3476_v41 = vadd.f32 %v3475_v56, %v3474_v7 }
 0x4b5   : > { %v3487_v13 = vadd.f32 %v3486_v16, %v3485_v2 }
 0x4b7   : > { %v3488_v53 = vrot.slane %v3487_v13, 1 }
 0x4b9   : > { %v3489_v32 = vadd.f32 %v3488_v53, %v3487_v13 }
 0x4bb   : > { %v3493_v15 = vsel %vm3492_vm6, %v3489_v32, %v3476_v41 }
 0x4bc   : > { %3496 = vst.msk [vmem:[%s5276_s23] sm:$0x3] %vm3495_vm7, %v3493_v15 }
 0x4bd PF: > { %s13_s20 = sadd.s32 1, %s4876_s20   ;;  %s6587_s12 = smov %s4848_s13 }
 0x4be   : > { %p10_p6 = scmp.ge.s32.totalorder %s13_s20, 10   ;;  %s6588_s13 = smov %s4970_s30 }
 0x4bf   : > { %s6589_s14 = smov %s4856_s15  ;;  %s6590_s15 = smov %s4973_s4 }
 0x4c0   : > { %s6591_s16 = smov %s4868_s18  ;;  %s6592_s17 = smov %s4872_s19 }
 0x4c1   : > { %s6593_s18 = smov %s6596_s21  ;;  %s6594_s19 = smov %s6600_s22 }
 0x4c2   :  { %12 = sbr.rel (!%p10_p6) target bundleno = 5 (0x5), region = 172 }

</bundles_post_ra>
